<compile_context>
chip_gen: v7x
topology: tpu7x:2x2x1
jax: 0.10.0
libtpu: 0.0.40
codegen_flags: <defaults>
</compile_context>

<pallas_src>
import functools
import math

import jax
import jax.numpy as jnp
from jax.experimental import pallas as pl
from jax.experimental.pallas import tpu as pltpu


# --------------------------------------------------------------------------
# Pallas kernel 1: tiled Linear (+ optional train-mode BatchNorm1d + ReLU)
# --------------------------------------------------------------------------
def _linear_kernel(x_ref, w_ref, b_ref, *rest, nk, relu, bn, eps):
    if bn:
        g_ref, beta_ref, o_ref, acc_ref = rest
    else:
        o_ref, acc_ref = rest
    k = pl.program_id(2)

    @pl.when(k == 0)
    def _():
        acc_ref[...] = jnp.zeros_like(acc_ref)

    x = x_ref[...]
    if x.dtype != jnp.bfloat16:
        x = x.astype(jnp.bfloat16)
    w = w_ref[...]
    if w.dtype != jnp.bfloat16:
        w = w.astype(jnp.bfloat16)
    acc_ref[...] += jnp.dot(x, w, preferred_element_type=jnp.float32)

    @pl.when(k == nk - 1)
    def _():
        y = acc_ref[...] + b_ref[...].astype(jnp.float32)
        if bn:
            # PyTorch BatchNorm1d, training mode: biased batch statistics.
            # Whole batch lives in a single M block, each N tile owns a
            # disjoint set of feature columns -> per-column stats are exact.
            mu = jnp.mean(y, axis=0, keepdims=True)
            var = jnp.mean((y - mu) ** 2, axis=0, keepdims=True)
            y = (y - mu) * jax.lax.rsqrt(var + eps) * g_ref[...] + beta_ref[...]
        if relu:
            y = jnp.maximum(y, 0.0)
        o_ref[...] = y.astype(o_ref.dtype)


def _tile_m(M, bn):
    if bn or M <= 512:
        # BN needs the whole batch resident for batch statistics; fine for
        # batches up to a few thousand rows before VMEM pressure.
        return M
    for cand in (512, 256, 128):
        if M % cand == 0:
            return cand
    return M


def _tile_n(N):
    # lane-dense tiles; keep >=2 N blocks when possible (v7x megacore).
    for cand in (512, 256, 128):
        if N % cand == 0 and N // cand >= 2:
            return cand
    return N


def _tile_k(K):
    if K <= 2048:
        return K
    for cand in (2048, 1024, 512, 256, 128):
        if K % cand == 0:
            return cand
    return K


def linear_op(x, w, b, gamma=None, beta=None, *, relu=False, bn=False,
              eps=1e-5, out_dtype=jnp.float32):
    """y = x @ w + b  (optionally fused BatchNorm1d(train) and ReLU)."""
    M, K = x.shape
    K2, N = w.shape
    assert K == K2
    tm = _tile_m(M, bn)
    tn = _tile_n(N)
    tk = _tile_k(K)
    assert M % tm == 0 and N % tn == 0 and K % tk == 0
    if bn:
        assert M == tm, "fused BN needs the whole batch in a single M block"
    nk = K // tk

    vec_spec = pl.BlockSpec((1, tn), lambda i, j, k: (0, j))
    in_specs = [
        pl.BlockSpec((tm, tk), lambda i, j, k: (i, k)),
        pl.BlockSpec((tk, tn), lambda i, j, k: (k, j)),
        vec_spec,
    ]
    args = [x, w, b]
    if bn:
        in_specs += [vec_spec, vec_spec]
        args += [gamma, beta]

    kernel = functools.partial(_linear_kernel, nk=nk, relu=relu, bn=bn,
                               eps=eps)
    return pl.pallas_call(
        kernel,
        out_shape=jax.ShapeDtypeStruct((M, N), out_dtype),
        grid_spec=pltpu.PrefetchScalarGridSpec(
            num_scalar_prefetch=0,
            grid=(M // tm, N // tn, nk),
            in_specs=in_specs,
            out_specs=pl.BlockSpec((tm, tn), lambda i, j, k: (i, j)),
            scratch_shapes=[pltpu.VMEM((tm, tn), jnp.float32)],
        ),
        compiler_params=pltpu.CompilerParams(
            dimension_semantics=("parallel", "parallel", "arbitrary"),
            vmem_limit_bytes=32 * 1024 * 1024),
    )(*args)


# --------------------------------------------------------------------------
# Pallas kernel 2: SupCluLoss (L2-normalize + similarity matmul + masked
# log-softmax supervised-contrastive loss), whole batch in one block.
# Masks are built in-kernel from O(N) label vectors (no NxN HBM traffic).
# --------------------------------------------------------------------------
def _supclu_kernel(lab_row_ref, lab_col_ref, q_ref, loss_ref, *, temperature,
                   base_temperature):
    q = q_ref[...].astype(jnp.float32)
    n = q.shape[0]
    sumsq = jnp.sum(q * q, axis=1, keepdims=True)
    qn = q * jax.lax.rsqrt(sumsq + 1e-24)                 # F.normalize(dim=1)
    logits = jax.lax.dot_general(                         # qn @ qn.T
        qn, qn, (((1,), (1,)), ((), ())),
        preferred_element_type=jnp.float32) * (1.0 / temperature)
    logits = logits - jnp.max(logits, axis=1, keepdims=True)

    row = jax.lax.broadcasted_iota(jnp.int32, (n, n), 0)
    col = jax.lax.broadcasted_iota(jnp.int32, (n, n), 1)
    lmask = (row != col).astype(jnp.float32)              # mask out self
    pmask = (lab_col_ref[...] == lab_row_ref[...]).astype(jnp.float32) * lmask

    exp_logits = jnp.exp(logits) * lmask
    log_prob = logits - jnp.log(jnp.sum(exp_logits, axis=1, keepdims=True))
    pos_cnt = jnp.maximum(jnp.sum(pmask, axis=1, keepdims=True), 1.0)
    mean_log_prob_pos = (jnp.sum(pmask * log_prob, axis=1, keepdims=True)
                         * pl.reciprocal(pos_cnt, approx=True))
    loss = -(temperature / base_temperature) * jnp.mean(mean_log_prob_pos)
    loss_ref[0] = loss


def supclu_loss(q, labels, *, temperature=0.07, base_temperature=0.07):
    n = q.shape[0]
    lab = labels.astype(jnp.int32)
    lab_row = lab.reshape(1, n)
    lab_col = lab.reshape(n, 1)
    kernel = functools.partial(_supclu_kernel, temperature=temperature,
                               base_temperature=base_temperature)
    out = pl.pallas_call(
        kernel,
        out_shape=jax.ShapeDtypeStruct((1,), jnp.float32),
        in_specs=[pl.BlockSpec(memory_space=pltpu.MemorySpace.VMEM)] * 3,
        out_specs=pl.BlockSpec(memory_space=pltpu.MemorySpace.SMEM),
    )(lab_row, lab_col, q)
    return out[0]


# --------------------------------------------------------------------------
# Pallas kernel 3: cross-entropy (mean reduction) for the location head.
# Padded classes carry a -1e9 logit (via the bias), so they contribute
# exactly zero to the softmax and the loss equals CE over 4 classes.
# --------------------------------------------------------------------------
def _ce_kernel(logits_ref, onehot_ref, loss_ref):
    z = logits_ref[...].astype(jnp.float32)
    zmax = jnp.max(z, axis=1, keepdims=True)
    lse = zmax + jnp.log(jnp.sum(jnp.exp(z - zmax), axis=1, keepdims=True))
    tgt = jnp.sum(z * onehot_ref[...], axis=1, keepdims=True)
    loss_ref[0] = jnp.mean(lse - tgt)


def ce_loss(logits, onehot):
    out = pl.pallas_call(
        _ce_kernel,
        out_shape=jax.ShapeDtypeStruct((1,), jnp.float32),
        in_specs=[pl.BlockSpec(memory_space=pltpu.MemorySpace.VMEM)] * 2,
        out_specs=pl.BlockSpec(memory_space=pltpu.MemorySpace.SMEM),
    )(logits, onehot)
    return out[0]


# --------------------------------------------------------------------------
# Glue: NHWC im2col conv (matmul runs in the Pallas linear kernel), encoder,
# projection heads.
# --------------------------------------------------------------------------
def _im2col_nhwc(x, ksize, stride, pad):
    n, h, w, c = x.shape
    xp = jnp.pad(x, ((0, 0), (pad, pad), (pad, pad), (0, 0)))
    oh = (h + 2 * pad - ksize) // stride + 1
    ow = (w + 2 * pad - ksize) // stride + 1
    cols = []
    for ky in range(ksize):
        for kx in range(ksize):
            cols.append(xp[:, ky:ky + stride * oh:stride,
                           kx:kx + stride * ow:stride, :])
    patches = jnp.concatenate(cols, axis=-1)               # [n, oh, ow, k*k*c]
    return patches.reshape(n * oh * ow, ksize * ksize * c), oh, ow


def conv2d_nhwc(x, w_col, b, *, ksize, stride, pad, relu):
    n = x.shape[0]
    cout = w_col.shape[1]
    patches, oh, ow = _im2col_nhwc(x, ksize, stride, pad)
    y = linear_op(patches, w_col, b, relu=relu, out_dtype=jnp.bfloat16)
    return y.reshape(n, oh, ow, cout)                      # stays NHWC


# TODO(synk): base_encoder is an external argument in the PyTorch module
# (e.g. a ResNet-50 returning a pooled [n, 2048, 2, 2] feature map); this
# small synthetic NHWC conv stack stands in with the same output contract.
def encoder_features(p, x_nhwc):
    x = conv2d_nhwc(x_nhwc, p["conv1_w"], p["conv1_b"], ksize=3, stride=2,
                    pad=1, relu=True)                      # [n, 16, 16, 128]
    x = conv2d_nhwc(x, p["conv2_w"], p["conv2_b"], ksize=3, stride=2,
                    pad=1, relu=True)                      # [n, 8, 8, 2048]
    n, h, w, c = x.shape
    # AdaptiveAvgPool2d((2, 2)) on NHWC, f32 accumulation.
    pooled = x.reshape(n, 2, h // 2, 2, w // 2, c).astype(jnp.float32)
    return pooled.mean(axis=(2, 4))                        # [n, 2, 2, 2048]


def fc_clu(p, x):
    # Sequential(Linear(2048,4096), BN, ReLU, Linear(4096,256), BN,
    #            Linear(256,4096), BN, ReLU, Linear(4096, dim))
    x = linear_op(x, p["l1_w"], p["l1_b"], p["bn1_g"], p["bn1_b"],
                  relu=True, bn=True, out_dtype=jnp.bfloat16)
    x = linear_op(x, p["l2_w"], p["l2_b"], p["bn2_g"], p["bn2_b"],
                  relu=False, bn=True, out_dtype=jnp.bfloat16)
    x = linear_op(x, p["l3_w"], p["l3_b"], p["bn3_g"], p["bn3_b"],
                  relu=True, bn=True, out_dtype=jnp.bfloat16)
    return linear_op(x, p["l4_w"], p["l4_b"], out_dtype=jnp.float32)


def apnet_forward(params, images, permute, *, T=0.07):
    # TODO(synk): all_gather / broadcast / randperm sync are identities at
    # world_size == 1 (single device); `permute` is supplied deterministically.
    n = images[0].shape[0]
    ig = jnp.concatenate(images, axis=0)[permute]           # [4n, c, h, w]
    col1 = jnp.concatenate([ig[0:n], ig[n:2 * n]], axis=3)
    col2 = jnp.concatenate([ig[2 * n:3 * n], ig[3 * n:]], axis=3)
    montage = jnp.concatenate([col1, col2], axis=2)          # [n, c, 2h, 2w]
    montage = jnp.transpose(montage, (0, 2, 3, 1))           # NHWC, once
    bs_all = n

    q = encoder_features(params, montage)                    # [n, 2, 2, 2048]
    # split into the four quadrant features and stack along batch
    f1 = q[:, 0, 0, :]; f2 = q[:, 0, 1, :]
    f3 = q[:, 1, 0, :]; f4 = q[:, 1, 1, :]
    q_gather = jnp.concatenate([f1, f2, f3, f4],
                               axis=0).astype(jnp.bfloat16)  # [4n, 2048]

    label_clu = permute % bs_all
    q_clu = fc_clu(params, q_gather)                         # [4n, 128] f32
    loss_clu = supclu_loss(q_clu, label_clu, temperature=T)

    label_loc_base = jnp.concatenate(
        [jnp.full((bs_all,), i, jnp.int32) for i in range(4)])
    label_loc = label_loc_base[permute]
    q_loc = linear_op(q_gather, params["loc_w"], params["loc_b"],
                      out_dtype=jnp.float32)                 # [4n, 128] padded
    loss_loc = ce_loss(q_loc, jax.nn.one_hot(label_loc, q_loc.shape[1],
                                             dtype=jnp.float32))
    return loss_clu, loss_loc


# --------------------------------------------------------------------------
# Deterministic parameter initialization (shapes follow APNet.__init__).
# Weights in bf16 (halves HBM weight streaming); biases / BN params in f32.
# --------------------------------------------------------------------------
def init_params(key):
    ks = jax.random.split(key, 8)

    def lin(k, fin, fout, w_dtype=jnp.bfloat16):
        kw, kb = jax.random.split(k)
        bound = 1.0 / math.sqrt(fin)
        w = jax.random.uniform(kw, (fin, fout), jnp.float32,
                               -bound, bound).astype(w_dtype)
        b = jax.random.uniform(kb, (1, fout), jnp.float32, -bound, bound)
        return w, b

    p = {}
    p["conv1_w"], p["conv1_b"] = lin(ks[0], 3 * 9, 128)      # NHWC im2col
    p["conv2_w"], p["conv2_b"] = lin(ks[1], 128 * 9, 2048)
    p["l1_w"], p["l1_b"] = lin(ks[2], 2048, 4096)
    p["l2_w"], p["l2_b"] = lin(ks[3], 4096, 256)
    p["l3_w"], p["l3_b"] = lin(ks[4], 256, 4096)
    # original encoder.fc_clu appended at the end of the Sequential; input
    # dim taken as 4096 so the composition type-checks, output dim = 128.
    p["l4_w"], p["l4_b"] = lin(ks[5], 4096, 128)
    # encoder.fc_loc: Linear(2048, 4) padded to 128 lanes for lane-dense
    # stores; padded classes get a -1e9 bias so CE over 128 == CE over 4.
    w_loc, b_loc = lin(ks[6], 2048, 4, w_dtype=jnp.float32)
    loc_w = jnp.zeros((2048, 128), jnp.float32).at[:, :4].set(w_loc)
    p["loc_w"] = loc_w.astype(jnp.bfloat16)
    p["loc_b"] = jnp.full((1, 128), -1e9, jnp.float32).at[:, :4].set(b_loc)
    for i, f in [(1, 4096), (2, 256), (3, 4096)]:
        p[f"bn{i}_g"] = jnp.ones((1, f), jnp.float32)
        p[f"bn{i}_b"] = jnp.zeros((1, f), jnp.float32)
    return p


if __name__ == "__main__":
    key = jax.random.PRNGKey(0)
    kp, kimg, kperm = jax.random.split(key, 3)
    params = init_params(kp)

    n, c, h, w = 2, 3, 16, 16                                # 4 crops / image
    img_keys = jax.random.split(kimg, 4)
    images = [jax.random.normal(k, (n, c, h, w), jnp.float32)
              for k in img_keys]
    permute = jax.random.permutation(kperm, 4 * n)

    fwd = jax.jit(functools.partial(apnet_forward, T=0.07))
    loss_clu, loss_loc = fwd(params, images, permute)
    jax.block_until_ready((loss_clu, loss_loc))
    print("KERNEL_OK")
</pallas_src>

<mosaic_0001>
module attributes {stable_mosaic.version = 11 : i64} {
  func.func @_linear_kernel(%arg0: i32, %arg1: i32, %arg2: i32, %arg3: memref<512x27xf32, #tpu.memory_space<vmem>>, %arg4: memref<27x128xbf16, #tpu.memory_space<vmem>>, %arg5: memref<1x128xf32, #tpu.memory_space<vmem>>, %arg6: memref<512x128xbf16, #tpu.memory_space<vmem>>, %arg7: memref<512x128xf32, #tpu.memory_space<vmem>>) attributes {dimension_semantics = [#tpu.dimension_semantics<parallel>, #tpu.dimension_semantics<parallel>, #tpu.dimension_semantics<arbitrary>], iteration_bounds = array<i64: 1, 1, 1>, scalar_prefetch = 0 : i64, scratch_operands = 1 : i64, tpu.core_type = #tpu.core_type<tc>, window_params = [{transform_indices = @transform_0, window_bounds = array<i64: 512, 27>}, {transform_indices = @transform_1, window_bounds = array<i64: 27, 128>}, {transform_indices = @transform_2, window_bounds = array<i64: 1, 128>}, {transform_indices = @transform_3, window_bounds = array<i64: 512, 128>}]} {
    %c0_i32 = arith.constant 0 : i32
    %0 = arith.cmpi eq, %arg2, %c0_i32 : i32
    %1 = arith.extui %0 : i1 to i32
    %c0_i32_0 = arith.constant 0 : i32
    %2 = arith.cmpi ne, %1, %c0_i32_0 : i32
    scf.if %2 {
      %cst_10 = arith.constant 0.000000e+00 : f32
      %13 = vector.broadcast %cst_10 : f32 to vector<512x128xf32>
      %c0_11 = arith.constant 0 : index
      %c0_12 = arith.constant 0 : index
      %14 = vector.load %arg7[%c0_11, %c0_12] : memref<512x128xf32, #tpu.memory_space<vmem>>, vector<512x128xf32>
      tpu.vector_store %arg7[%c0_11, %c0_12], %13 {strides = array<i32>} : memref<512x128xf32, #tpu.memory_space<vmem>>, vector<512x128xf32>,
    } else {
    }
    %c0 = arith.constant 0 : index
    %c0_1 = arith.constant 0 : index
    %3 = vector.load %arg3[%c0, %c0_1] : memref<512x27xf32, #tpu.memory_space<vmem>>, vector<512x27xf32>
    %4 = arith.truncf %3 : vector<512x27xf32> to vector<512x27xbf16>
    %c0_2 = arith.constant 0 : index
    %c0_3 = arith.constant 0 : index
    %5 = vector.load %arg4[%c0_2, %c0_3] : memref<27x128xbf16, #tpu.memory_space<vmem>>, vector<27x128xbf16>
    %c0_4 = arith.constant 0 : index
    %c0_5 = arith.constant 0 : index
    %6 = vector.load %arg7[%c0_4, %c0_5] : memref<512x128xf32, #tpu.memory_space<vmem>>, vector<512x128xf32>
    %cst = arith.constant dense<0.000000e+00> : vector<512x128xf32>
    %7 = tpu.matmul %4, %5, %cst {dimension_numbers = #tpu.dot_dimension_numbers<[1], [0], [0], [1], [0, 0, 1, 1], [], []>} : vector<512x27xbf16>, vector<27x128xbf16>, vector<512x128xf32> -> vector<512x128xf32>
    %8 = arith.addf %6, %7 : vector<512x128xf32>
    %c0_6 = arith.constant 0 : index
    %c0_7 = arith.constant 0 : index
    %9 = vector.load %arg7[%c0_6, %c0_7] : memref<512x128xf32, #tpu.memory_space<vmem>>, vector<512x128xf32>
    tpu.vector_store %arg7[%c0_6, %c0_7], %8 {strides = array<i32>} : memref<512x128xf32, #tpu.memory_space<vmem>>, vector<512x128xf32>,
    %c0_i32_8 = arith.constant 0 : i32
    %10 = arith.cmpi eq, %arg2, %c0_i32_8 : i32
    %11 = arith.extui %10 : i1 to i32
    %c0_i32_9 = arith.constant 0 : i32
    %12 = arith.cmpi ne, %11, %c0_i32_9 : i32
    scf.if %12 {
      %c0_10 = arith.constant 0 : index
      %c0_11 = arith.constant 0 : index
      %13 = vector.load %arg7[%c0_10, %c0_11] : memref<512x128xf32, #tpu.memory_space<vmem>>, vector<512x128xf32>
      %c0_12 = arith.constant 0 : index
      %c0_13 = arith.constant 0 : index
      %14 = vector.load %arg5[%c0_12, %c0_13] : memref<1x128xf32, #tpu.memory_space<vmem>>, vector<1x128xf32>
      %15 = vector.broadcast %14 : vector<1x128xf32> to vector<512x128xf32>
      %16 = arith.addf %13, %15 : vector<512x128xf32>
      %cst_14 = arith.constant 0.000000e+00 : f32
      %17 = vector.broadcast %cst_14 : f32 to vector<512x128xf32>
      %18 = arith.maximumf %16, %17 : vector<512x128xf32>
      %19 = arith.truncf %18 : vector<512x128xf32> to vector<512x128xbf16>
      %c0_15 = arith.constant 0 : index
      %c0_16 = arith.constant 0 : index
      %20 = vector.load %arg6[%c0_15, %c0_16] : memref<512x128xbf16, #tpu.memory_space<vmem>>, vector<512x128xbf16>
      tpu.vector_store %arg6[%c0_15, %c0_16], %19 {strides = array<i32>} : memref<512x128xbf16, #tpu.memory_space<vmem>>, vector<512x128xbf16>,
    } else {
    }
    return
  }
  func.func @transform_0(%arg0: i32, %arg1: i32, %arg2: i32) -> (i32, i32) {
    %c0_i32 = arith.constant 0 : i32
    return %arg0, %arg2 : i32, i32
  }
  func.func @transform_1(%arg0: i32, %arg1: i32, %arg2: i32) -> (i32, i32) {
    %c0_i32 = arith.constant 0 : i32
    return %arg2, %arg1 : i32, i32
  }
  func.func @transform_2(%arg0: i32, %arg1: i32, %arg2: i32) -> (i32, i32) {
    %c0_i32 = arith.constant 0 : i32
    %c0_i32_0 = arith.constant 0 : i32
    return %c0_i32, %arg1 : i32, i32
  }
  func.func @transform_3(%arg0: i32, %arg1: i32, %arg2: i32) -> (i32, i32) {
    %c0_i32 = arith.constant 0 : i32
    return %arg0, %arg1 : i32, i32
  }
}

module attributes {stable_mosaic.version = 11 : i64} {
  func.func @_linear_kernel(%arg0: i32, %arg1: i32, %arg2: i32, %arg3: memref<128x1152xbf16, #tpu.memory_space<vmem>>, %arg4: memref<1152x512xbf16, #tpu.memory_space<vmem>>, %arg5: memref<1x512xf32, #tpu.memory_space<vmem>>, %arg6: memref<128x512xbf16, #tpu.memory_space<vmem>>, %arg7: memref<128x512xf32, #tpu.memory_space<vmem>>) attributes {dimension_semantics = [#tpu.dimension_semantics<parallel>, #tpu.dimension_semantics<parallel>, #tpu.dimension_semantics<arbitrary>], iteration_bounds = array<i64: 1, 4, 1>, scalar_prefetch = 0 : i64, scratch_operands = 1 : i64, tpu.core_type = #tpu.core_type<tc>, window_params = [{transform_indices = @transform_0, window_bounds = array<i64: 128, 1152>}, {transform_indices = @transform_1, window_bounds = array<i64: 1152, 512>}, {transform_indices = @transform_2, window_bounds = array<i64: 1, 512>}, {transform_indices = @transform_3, window_bounds = array<i64: 128, 512>}]} {
    %c0_i32 = arith.constant 0 : i32
    %0 = arith.cmpi eq, %arg2, %c0_i32 : i32
    %1 = arith.extui %0 : i1 to i32
    %c0_i32_0 = arith.constant 0 : i32
    %2 = arith.cmpi ne, %1, %c0_i32_0 : i32
    scf.if %2 {
      %cst_10 = arith.constant 0.000000e+00 : f32
      %12 = vector.broadcast %cst_10 : f32 to vector<128x512xf32>
      %c0_11 = arith.constant 0 : index
      %c0_12 = arith.constant 0 : index
      %13 = vector.load %arg7[%c0_11, %c0_12] : memref<128x512xf32, #tpu.memory_space<vmem>>, vector<128x512xf32>
      tpu.vector_store %arg7[%c0_11, %c0_12], %12 {strides = array<i32>} : memref<128x512xf32, #tpu.memory_space<vmem>>, vector<128x512xf32>,
    } else {
    }
    %c0 = arith.constant 0 : index
    %c0_1 = arith.constant 0 : index
    %3 = vector.load %arg3[%c0, %c0_1] : memref<128x1152xbf16, #tpu.memory_space<vmem>>, vector<128x1152xbf16>
    %c0_2 = arith.constant 0 : index
    %c0_3 = arith.constant 0 : index
    %4 = vector.load %arg4[%c0_2, %c0_3] : memref<1152x512xbf16, #tpu.memory_space<vmem>>, vector<1152x512xbf16>
    %c0_4 = arith.constant 0 : index
    %c0_5 = arith.constant 0 : index
    %5 = vector.load %arg7[%c0_4, %c0_5] : memref<128x512xf32, #tpu.memory_space<vmem>>, vector<128x512xf32>
    %cst = arith.constant dense<0.000000e+00> : vector<128x512xf32>
    %6 = tpu.matmul %3, %4, %cst {dimension_numbers = #tpu.dot_dimension_numbers<[1], [0], [0], [1], [0, 0, 1, 1], [], []>} : vector<128x1152xbf16>, vector<1152x512xbf16>, vector<128x512xf32> -> vector<128x512xf32>
    %7 = arith.addf %5, %6 : vector<128x512xf32>
    %c0_6 = arith.constant 0 : index
    %c0_7 = arith.constant 0 : index
    %8 = vector.load %arg7[%c0_6, %c0_7] : memref<128x512xf32, #tpu.memory_space<vmem>>, vector<128x512xf32>
    tpu.vector_store %arg7[%c0_6, %c0_7], %7 {strides = array<i32>} : memref<128x512xf32, #tpu.memory_space<vmem>>, vector<128x512xf32>,
    %c0_i32_8 = arith.constant 0 : i32
    %9 = arith.cmpi eq, %arg2, %c0_i32_8 : i32
    %10 = arith.extui %9 : i1 to i32
    %c0_i32_9 = arith.constant 0 : i32
    %11 = arith.cmpi ne, %10, %c0_i32_9 : i32
    scf.if %11 {
      %c0_10 = arith.constant 0 : index
      %c0_11 = arith.constant 0 : index
      %12 = vector.load %arg7[%c0_10, %c0_11] : memref<128x512xf32, #tpu.memory_space<vmem>>, vector<128x512xf32>
      %c0_12 = arith.constant 0 : index
      %c0_13 = arith.constant 0 : index
      %13 = vector.load %arg5[%c0_12, %c0_13] : memref<1x512xf32, #tpu.memory_space<vmem>>, vector<1x512xf32>
      %14 = vector.broadcast %13 : vector<1x512xf32> to vector<128x512xf32>
      %15 = arith.addf %12, %14 : vector<128x512xf32>
      %cst_14 = arith.constant 0.000000e+00 : f32
      %16 = vector.broadcast %cst_14 : f32 to vector<128x512xf32>
      %17 = arith.maximumf %15, %16 : vector<128x512xf32>
      %18 = arith.truncf %17 : vector<128x512xf32> to vector<128x512xbf16>
      %c0_15 = arith.constant 0 : index
      %c0_16 = arith.constant 0 : index
      %19 = vector.load %arg6[%c0_15, %c0_16] : memref<128x512xbf16, #tpu.memory_space<vmem>>, vector<128x512xbf16>
      tpu.vector_store %arg6[%c0_15, %c0_16], %18 {strides = array<i32>} : memref<128x512xbf16, #tpu.memory_space<vmem>>, vector<128x512xbf16>,
    } else {
    }
    return
  }
  func.func @transform_0(%arg0: i32, %arg1: i32, %arg2: i32) -> (i32, i32) {
    %c0_i32 = arith.constant 0 : i32
    return %arg0, %arg2 : i32, i32
  }
  func.func @transform_1(%arg0: i32, %arg1: i32, %arg2: i32) -> (i32, i32) {
    %c0_i32 = arith.constant 0 : i32
    return %arg2, %arg1 : i32, i32
  }
  func.func @transform_2(%arg0: i32, %arg1: i32, %arg2: i32) -> (i32, i32) {
    %c0_i32 = arith.constant 0 : i32
    %c0_i32_0 = arith.constant 0 : i32
    return %c0_i32, %arg1 : i32, i32
  }
  func.func @transform_3(%arg0: i32, %arg1: i32, %arg2: i32) -> (i32, i32) {
    %c0_i32 = arith.constant 0 : i32
    return %arg0, %arg1 : i32, i32
  }
}

module attributes {stable_mosaic.version = 11 : i64} {
  func.func @_linear_kernel(%arg0: i32, %arg1: i32, %arg2: i32, %arg3: memref<8x2048xbf16, #tpu.memory_space<vmem>>, %arg4: memref<2048x512xbf16, #tpu.memory_space<vmem>>, %arg5: memref<1x512xf32, #tpu.memory_space<vmem>>, %arg6: memref<1x512xf32, #tpu.memory_space<vmem>>, %arg7: memref<1x512xf32, #tpu.memory_space<vmem>>, %arg8: memref<8x512xbf16, #tpu.memory_space<vmem>>, %arg9: memref<8x512xf32, #tpu.memory_space<vmem>>) attributes {dimension_semantics = [#tpu.dimension_semantics<parallel>, #tpu.dimension_semantics<parallel>, #tpu.dimension_semantics<arbitrary>], iteration_bounds = array<i64: 1, 8, 1>, scalar_prefetch = 0 : i64, scratch_operands = 1 : i64, tpu.core_type = #tpu.core_type<tc>, window_params = [{transform_indices = @transform_0, window_bounds = array<i64: 8, 2048>}, {transform_indices = @transform_1, window_bounds = array<i64: 2048, 512>}, {transform_indices = @transform_2, window_bounds = array<i64: 1, 512>}, {transform_indices = @transform_3, window_bounds = array<i64: 1, 512>}, {transform_indices = @transform_4, window_bounds = array<i64: 1, 512>}, {transform_indices = @transform_5, window_bounds = array<i64: 8, 512>}]} {
    %c0_i32 = arith.constant 0 : i32
    %0 = arith.cmpi eq, %arg2, %c0_i32 : i32
    %1 = arith.extui %0 : i1 to i32
    %c0_i32_0 = arith.constant 0 : i32
    %2 = arith.cmpi ne, %1, %c0_i32_0 : i32
    scf.if %2 {
      %cst_10 = arith.constant 0.000000e+00 : f32
      %12 = vector.broadcast %cst_10 : f32 to vector<8x512xf32>
      %c0_11 = arith.constant 0 : index
      %c0_12 = arith.constant 0 : index
      %13 = vector.load %arg9[%c0_11, %c0_12] : memref<8x512xf32, #tpu.memory_space<vmem>>, vector<8x512xf32>
      tpu.vector_store %arg9[%c0_11, %c0_12], %12 {strides = array<i32>} : memref<8x512xf32, #tpu.memory_space<vmem>>, vector<8x512xf32>,
    } else {
    }
    %c0 = arith.constant 0 : index
    %c0_1 = arith.constant 0 : index
    %3 = vector.load %arg3[%c0, %c0_1] : memref<8x2048xbf16, #tpu.memory_space<vmem>>, vector<8x2048xbf16>
    %c0_2 = arith.constant 0 : index
    %c0_3 = arith.constant 0 : index
    %4 = vector.load %arg4[%c0_2, %c0_3] : memref<2048x512xbf16, #tpu.memory_space<vmem>>, vector<2048x512xbf16>
    %c0_4 = arith.constant 0 : index
    %c0_5 = arith.constant 0 : index
    %5 = vector.load %arg9[%c0_4, %c0_5] : memref<8x512xf32, #tpu.memory_space<vmem>>, vector<8x512xf32>
    %cst = arith.constant dense<0.000000e+00> : vector<8x512xf32>
    %6 = tpu.matmul %3, %4, %cst {dimension_numbers = #tpu.dot_dimension_numbers<[1], [0], [0], [1], [0, 0, 1, 1], [], []>} : vector<8x2048xbf16>, vector<2048x512xbf16>, vector<8x512xf32> -> vector<8x512xf32>
    %7 = arith.addf %5, %6 : vector<8x512xf32>
    %c0_6 = arith.constant 0 : index
    %c0_7 = arith.constant 0 : index
    %8 = vector.load %arg9[%c0_6, %c0_7] : memref<8x512xf32, #tpu.memory_space<vmem>>, vector<8x512xf32>
    tpu.vector_store %arg9[%c0_6, %c0_7], %7 {strides = array<i32>} : memref<8x512xf32, #tpu.memory_space<vmem>>, vector<8x512xf32>,
    %c0_i32_8 = arith.constant 0 : i32
    %9 = arith.cmpi eq, %arg2, %c0_i32_8 : i32
    %10 = arith.extui %9 : i1 to i32
    %c0_i32_9 = arith.constant 0 : i32
    %11 = arith.cmpi ne, %10, %c0_i32_9 : i32
    scf.if %11 {
      %c0_10 = arith.constant 0 : index
      %c0_11 = arith.constant 0 : index
      %12 = vector.load %arg9[%c0_10, %c0_11] : memref<8x512xf32, #tpu.memory_space<vmem>>, vector<8x512xf32>
      %c0_12 = arith.constant 0 : index
      %c0_13 = arith.constant 0 : index
      %13 = vector.load %arg5[%c0_12, %c0_13] : memref<1x512xf32, #tpu.memory_space<vmem>>, vector<1x512xf32>
      %14 = vector.broadcast %13 : vector<1x512xf32> to vector<8x512xf32>
      %15 = arith.addf %12, %14 : vector<8x512xf32>
      %cst_14 = arith.constant dense<0.000000e+00> : vector<512xf32>
      %16 = vector.multi_reduction <add>, %15, %cst_14 [0] : vector<8x512xf32> to vector<512xf32>
      %17 = vector.shape_cast %16 : vector<512xf32> to vector<1x512xf32>
      %cst_15 = arith.constant 8.000000e+00 : f32
      %18 = vector.broadcast %cst_15 : f32 to vector<1x512xf32>
      %19 = arith.divf %17, %18 : vector<1x512xf32>
      %20 = vector.broadcast %19 : vector<1x512xf32> to vector<8x512xf32>
      %21 = arith.subf %15, %20 : vector<8x512xf32>
      %22 = arith.mulf %21, %21 : vector<8x512xf32>
      %cst_16 = arith.constant dense<0.000000e+00> : vector<512xf32>
      %23 = vector.multi_reduction <add>, %22, %cst_16 [0] : vector<8x512xf32> to vector<512xf32>
      %24 = vector.shape_cast %23 : vector<512xf32> to vector<1x512xf32>
      %cst_17 = arith.constant 8.000000e+00 : f32
      %25 = vector.broadcast %cst_17 : f32 to vector<1x512xf32>
      %26 = arith.divf %24, %25 : vector<1x512xf32>
      %27 = vector.broadcast %19 : vector<1x512xf32> to vector<8x512xf32>
      %28 = arith.subf %15, %27 : vector<8x512xf32>
      %cst_18 = arith.constant 9.99999974E-6 : f32
      %29 = vector.broadcast %cst_18 : f32 to vector<1x512xf32>
      %30 = arith.addf %26, %29 : vector<1x512xf32>
      %31 = math.rsqrt %30 : vector<1x512xf32>
      %32 = vector.broadcast %31 : vector<1x512xf32> to vector<8x512xf32>
      %33 = arith.mulf %28, %32 : vector<8x512xf32>
      %c0_19 = arith.constant 0 : index
      %c0_20 = arith.constant 0 : index
      %34 = vector.load %arg6[%c0_19, %c0_20] : memref<1x512xf32, #tpu.memory_space<vmem>>, vector<1x512xf32>
      %35 = vector.broadcast %34 : vector<1x512xf32> to vector<8x512xf32>
      %36 = arith.mulf %33, %35 : vector<8x512xf32>
      %c0_21 = arith.constant 0 : index
      %c0_22 = arith.constant 0 : index
      %37 = vector.load %arg7[%c0_21, %c0_22] : memref<1x512xf32, #tpu.memory_space<vmem>>, vector<1x512xf32>
      %38 = vector.broadcast %37 : vector<1x512xf32> to vector<8x512xf32>
      %39 = arith.addf %36, %38 : vector<8x512xf32>
      %cst_23 = arith.constant 0.000000e+00 : f32
      %40 = vector.broadcast %cst_23 : f32 to vector<8x512xf32>
      %41 = arith.maximumf %39, %40 : vector<8x512xf32>
      %42 = arith.truncf %41 : vector<8x512xf32> to vector<8x512xbf16>
      %c0_24 = arith.constant 0 : index
      %c0_25 = arith.constant 0 : index
      %43 = vector.load %arg8[%c0_24, %c0_25] : memref<8x512xbf16, #tpu.memory_space<vmem>>, vector<8x512xbf16>
      tpu.vector_store %arg8[%c0_24, %c0_25], %42 {strides = array<i32>} : memref<8x512xbf16, #tpu.memory_space<vmem>>, vector<8x512xbf16>,
    } else {
    }
    return
  }
  func.func @transform_0(%arg0: i32, %arg1: i32, %arg2: i32) -> (i32, i32) {
    %c0_i32 = arith.constant 0 : i32
    return %arg0, %arg2 : i32, i32
  }
  func.func @transform_1(%arg0: i32, %arg1: i32, %arg2: i32) -> (i32, i32) {
    %c0_i32 = arith.constant 0 : i32
    return %arg2, %arg1 : i32, i32
  }
  func.func @transform_2(%arg0: i32, %arg1: i32, %arg2: i32) -> (i32, i32) {
    %c0_i32 = arith.constant 0 : i32
    %c0_i32_0 = arith.constant 0 : i32
    return %c0_i32, %arg1 : i32, i32
  }
  func.func @transform_3(%arg0: i32, %arg1: i32, %arg2: i32) -> (i32, i32) {
    %c0_i32 = arith.constant 0 : i32
    %c0_i32_0 = arith.constant 0 : i32
    return %c0_i32, %arg1 : i32, i32
  }
  func.func @transform_4(%arg0: i32, %arg1: i32, %arg2: i32) -> (i32, i32) {
    %c0_i32 = arith.constant 0 : i32
    %c0_i32_0 = arith.constant 0 : i32
    return %c0_i32, %arg1 : i32, i32
  }
  func.func @transform_5(%arg0: i32, %arg1: i32, %arg2: i32) -> (i32, i32) {
    %c0_i32 = arith.constant 0 : i32
    return %arg0, %arg1 : i32, i32
  }
}

module attributes {stable_mosaic.version = 11 : i64} {
  func.func @_linear_kernel(%arg0: i32, %arg1: i32, %arg2: i32, %arg3: memref<8x2048xbf16, #tpu.memory_space<vmem>>, %arg4: memref<2048x128xbf16, #tpu.memory_space<vmem>>, %arg5: memref<1x128xf32, #tpu.memory_space<vmem>>, %arg6: memref<1x128xf32, #tpu.memory_space<vmem>>, %arg7: memref<1x128xf32, #tpu.memory_space<vmem>>, %arg8: memref<8x128xbf16, #tpu.memory_space<vmem>>, %arg9: memref<8x128xf32, #tpu.memory_space<vmem>>) attributes {dimension_semantics = [#tpu.dimension_semantics<parallel>, #tpu.dimension_semantics<parallel>, #tpu.dimension_semantics<arbitrary>], iteration_bounds = array<i64: 1, 2, 2>, scalar_prefetch = 0 : i64, scratch_operands = 1 : i64, tpu.core_type = #tpu.core_type<tc>, window_params = [{transform_indices = @transform_0, window_bounds = array<i64: 8, 2048>}, {transform_indices = @transform_1, window_bounds = array<i64: 2048, 128>}, {transform_indices = @transform_2, window_bounds = array<i64: 1, 128>}, {transform_indices = @transform_3, window_bounds = array<i64: 1, 128>}, {transform_indices = @transform_4, window_bounds = array<i64: 1, 128>}, {transform_indices = @transform_5, window_bounds = array<i64: 8, 128>}]} {
    %c0_i32 = arith.constant 0 : i32
    %0 = arith.cmpi eq, %arg2, %c0_i32 : i32
    %1 = arith.extui %0 : i1 to i32
    %c0_i32_0 = arith.constant 0 : i32
    %2 = arith.cmpi ne, %1, %c0_i32_0 : i32
    scf.if %2 {
      %cst_9 = arith.constant 0.000000e+00 : f32
      %12 = vector.broadcast %cst_9 : f32 to vector<8x128xf32>
      %c0_10 = arith.constant 0 : index
      %c0_11 = arith.constant 0 : index
      %13 = vector.load %arg9[%c0_10, %c0_11] : memref<8x128xf32, #tpu.memory_space<vmem>>, vector<8x128xf32>
      tpu.vector_store %arg9[%c0_10, %c0_11], %12 {strides = array<i32>} : memref<8x128xf32, #tpu.memory_space<vmem>>, vector<8x128xf32>,
    } else {
    }
    %c0 = arith.constant 0 : index
    %c0_1 = arith.constant 0 : index
    %3 = vector.load %arg3[%c0, %c0_1] : memref<8x2048xbf16, #tpu.memory_space<vmem>>, vector<8x2048xbf16>
    %c0_2 = arith.constant 0 : index
    %c0_3 = arith.constant 0 : index
    %4 = vector.load %arg4[%c0_2, %c0_3] : memref<2048x128xbf16, #tpu.memory_space<vmem>>, vector<2048x128xbf16>
    %c0_4 = arith.constant 0 : index
    %c0_5 = arith.constant 0 : index
    %5 = vector.load %arg9[%c0_4, %c0_5] : memref<8x128xf32, #tpu.memory_space<vmem>>, vector<8x128xf32>
    %cst = arith.constant dense<0.000000e+00> : vector<8x128xf32>
    %6 = tpu.matmul %3, %4, %cst {dimension_numbers = #tpu.dot_dimension_numbers<[1], [0], [0], [1], [0, 0, 1, 1], [], []>} : vector<8x2048xbf16>, vector<2048x128xbf16>, vector<8x128xf32> -> vector<8x128xf32>
    %7 = arith.addf %5, %6 : vector<8x128xf32>
    %c0_6 = arith.constant 0 : index
    %c0_7 = arith.constant 0 : index
    %8 = vector.load %arg9[%c0_6, %c0_7] : memref<8x128xf32, #tpu.memory_space<vmem>>, vector<8x128xf32>
    tpu.vector_store %arg9[%c0_6, %c0_7], %7 {strides = array<i32>} : memref<8x128xf32, #tpu.memory_space<vmem>>, vector<8x128xf32>,
    %c1_i32 = arith.constant 1 : i32
    %9 = arith.cmpi eq, %arg2, %c1_i32 : i32
    %10 = arith.extui %9 : i1 to i32
    %c0_i32_8 = arith.constant 0 : i32
    %11 = arith.cmpi ne, %10, %c0_i32_8 : i32
    scf.if %11 {
      %c0_9 = arith.constant 0 : index
      %c0_10 = arith.constant 0 : index
      %12 = vector.load %arg9[%c0_9, %c0_10] : memref<8x128xf32, #tpu.memory_space<vmem>>, vector<8x128xf32>
      %c0_11 = arith.constant 0 : index
      %c0_12 = arith.constant 0 : index
      %13 = vector.load %arg5[%c0_11, %c0_12] : memref<1x128xf32, #tpu.memory_space<vmem>>, vector<1x128xf32>
      %14 = vector.broadcast %13 : vector<1x128xf32> to vector<8x128xf32>
      %15 = arith.addf %12, %14 : vector<8x128xf32>
      %cst_13 = arith.constant dense<0.000000e+00> : vector<128xf32>
      %16 = vector.multi_reduction <add>, %15, %cst_13 [0] : vector<8x128xf32> to vector<128xf32>
      %17 = vector.shape_cast %16 : vector<128xf32> to vector<1x128xf32>
      %cst_14 = arith.constant 8.000000e+00 : f32
      %18 = vector.broadcast %cst_14 : f32 to vector<1x128xf32>
      %19 = arith.divf %17, %18 : vector<1x128xf32>
      %20 = vector.broadcast %19 : vector<1x128xf32> to vector<8x128xf32>
      %21 = arith.subf %15, %20 : vector<8x128xf32>
      %22 = arith.mulf %21, %21 : vector<8x128xf32>
      %cst_15 = arith.constant dense<0.000000e+00> : vector<128xf32>
      %23 = vector.multi_reduction <add>, %22, %cst_15 [0] : vector<8x128xf32> to vector<128xf32>
      %24 = vector.shape_cast %23 : vector<128xf32> to vector<1x128xf32>
      %cst_16 = arith.constant 8.000000e+00 : f32
      %25 = vector.broadcast %cst_16 : f32 to vector<1x128xf32>
      %26 = arith.divf %24, %25 : vector<1x128xf32>
      %27 = vector.broadcast %19 : vector<1x128xf32> to vector<8x128xf32>
      %28 = arith.subf %15, %27 : vector<8x128xf32>
      %cst_17 = arith.constant 9.99999974E-6 : f32
      %29 = vector.broadcast %cst_17 : f32 to vector<1x128xf32>
      %30 = arith.addf %26, %29 : vector<1x128xf32>
      %31 = math.rsqrt %30 : vector<1x128xf32>
      %32 = vector.broadcast %31 : vector<1x128xf32> to vector<8x128xf32>
      %33 = arith.mulf %28, %32 : vector<8x128xf32>
      %c0_18 = arith.constant 0 : index
      %c0_19 = arith.constant 0 : index
      %34 = vector.load %arg6[%c0_18, %c0_19] : memref<1x128xf32, #tpu.memory_space<vmem>>, vector<1x128xf32>
      %35 = vector.broadcast %34 : vector<1x128xf32> to vector<8x128xf32>
      %36 = arith.mulf %33, %35 : vector<8x128xf32>
      %c0_20 = arith.constant 0 : index
      %c0_21 = arith.constant 0 : index
      %37 = vector.load %arg7[%c0_20, %c0_21] : memref<1x128xf32, #tpu.memory_space<vmem>>, vector<1x128xf32>
      %38 = vector.broadcast %37 : vector<1x128xf32> to vector<8x128xf32>
      %39 = arith.addf %36, %38 : vector<8x128xf32>
      %40 = arith.truncf %39 : vector<8x128xf32> to vector<8x128xbf16>
      %c0_22 = arith.constant 0 : index
      %c0_23 = arith.constant 0 : index
      %41 = vector.load %arg8[%c0_22, %c0_23] : memref<8x128xbf16, #tpu.memory_space<vmem>>, vector<8x128xbf16>
      tpu.vector_store %arg8[%c0_22, %c0_23], %40 {strides = array<i32>} : memref<8x128xbf16, #tpu.memory_space<vmem>>, vector<8x128xbf16>,
    } else {
    }
    return
  }
  func.func @transform_0(%arg0: i32, %arg1: i32, %arg2: i32) -> (i32, i32) {
    %c0_i32 = arith.constant 0 : i32
    return %arg0, %arg2 : i32, i32
  }
  func.func @transform_1(%arg0: i32, %arg1: i32, %arg2: i32) -> (i32, i32) {
    %c0_i32 = arith.constant 0 : i32
    return %arg2, %arg1 : i32, i32
  }
  func.func @transform_2(%arg0: i32, %arg1: i32, %arg2: i32) -> (i32, i32) {
    %c0_i32 = arith.constant 0 : i32
    %c0_i32_0 = arith.constant 0 : i32
    return %c0_i32, %arg1 : i32, i32
  }
  func.func @transform_3(%arg0: i32, %arg1: i32, %arg2: i32) -> (i32, i32) {
    %c0_i32 = arith.constant 0 : i32
    %c0_i32_0 = arith.constant 0 : i32
    return %c0_i32, %arg1 : i32, i32
  }
  func.func @transform_4(%arg0: i32, %arg1: i32, %arg2: i32) -> (i32, i32) {
    %c0_i32 = arith.constant 0 : i32
    %c0_i32_0 = arith.constant 0 : i32
    return %c0_i32, %arg1 : i32, i32
  }
  func.func @transform_5(%arg0: i32, %arg1: i32, %arg2: i32) -> (i32, i32) {
    %c0_i32 = arith.constant 0 : i32
    return %arg0, %arg1 : i32, i32
  }
}

module attributes {stable_mosaic.version = 11 : i64} {
  func.func @_linear_kernel(%arg0: i32, %arg1: i32, %arg2: i32, %arg3: memref<8x256xbf16, #tpu.memory_space<vmem>>, %arg4: memref<256x512xbf16, #tpu.memory_space<vmem>>, %arg5: memref<1x512xf32, #tpu.memory_space<vmem>>, %arg6: memref<1x512xf32, #tpu.memory_space<vmem>>, %arg7: memref<1x512xf32, #tpu.memory_space<vmem>>, %arg8: memref<8x512xbf16, #tpu.memory_space<vmem>>, %arg9: memref<8x512xf32, #tpu.memory_space<vmem>>) attributes {dimension_semantics = [#tpu.dimension_semantics<parallel>, #tpu.dimension_semantics<parallel>, #tpu.dimension_semantics<arbitrary>], iteration_bounds = array<i64: 1, 8, 1>, scalar_prefetch = 0 : i64, scratch_operands = 1 : i64, tpu.core_type = #tpu.core_type<tc>, window_params = [{transform_indices = @transform_0, window_bounds = array<i64: 8, 256>}, {transform_indices = @transform_1, window_bounds = array<i64: 256, 512>}, {transform_indices = @transform_2, window_bounds = array<i64: 1, 512>}, {transform_indices = @transform_3, window_bounds = array<i64: 1, 512>}, {transform_indices = @transform_4, window_bounds = array<i64: 1, 512>}, {transform_indices = @transform_5, window_bounds = array<i64: 8, 512>}]} {
    %c0_i32 = arith.constant 0 : i32
    %0 = arith.cmpi eq, %arg2, %c0_i32 : i32
    %1 = arith.extui %0 : i1 to i32
    %c0_i32_0 = arith.constant 0 : i32
    %2 = arith.cmpi ne, %1, %c0_i32_0 : i32
    scf.if %2 {
      %cst_10 = arith.constant 0.000000e+00 : f32
      %12 = vector.broadcast %cst_10 : f32 to vector<8x512xf32>
      %c0_11 = arith.constant 0 : index
      %c0_12 = arith.constant 0 : index
      %13 = vector.load %arg9[%c0_11, %c0_12] : memref<8x512xf32, #tpu.memory_space<vmem>>, vector<8x512xf32>
      tpu.vector_store %arg9[%c0_11, %c0_12], %12 {strides = array<i32>} : memref<8x512xf32, #tpu.memory_space<vmem>>, vector<8x512xf32>,
    } else {
    }
    %c0 = arith.constant 0 : index
    %c0_1 = arith.constant 0 : index
    %3 = vector.load %arg3[%c0, %c0_1] : memref<8x256xbf16, #tpu.memory_space<vmem>>, vector<8x256xbf16>
    %c0_2 = arith.constant 0 : index
    %c0_3 = arith.constant 0 : index
    %4 = vector.load %arg4[%c0_2, %c0_3] : memref<256x512xbf16, #tpu.memory_space<vmem>>, vector<256x512xbf16>
    %c0_4 = arith.constant 0 : index
    %c0_5 = arith.constant 0 : index
    %5 = vector.load %arg9[%c0_4, %c0_5] : memref<8x512xf32, #tpu.memory_space<vmem>>, vector<8x512xf32>
    %cst = arith.constant dense<0.000000e+00> : vector<8x512xf32>
    %6 = tpu.matmul %3, %4, %cst {dimension_numbers = #tpu.dot_dimension_numbers<[1], [0], [0], [1], [0, 0, 1, 1], [], []>} : vector<8x256xbf16>, vector<256x512xbf16>, vector<8x512xf32> -> vector<8x512xf32>
    %7 = arith.addf %5, %6 : vector<8x512xf32>
    %c0_6 = arith.constant 0 : index
    %c0_7 = arith.constant 0 : index
    %8 = vector.load %arg9[%c0_6, %c0_7] : memref<8x512xf32, #tpu.memory_space<vmem>>, vector<8x512xf32>
    tpu.vector_store %arg9[%c0_6, %c0_7], %7 {strides = array<i32>} : memref<8x512xf32, #tpu.memory_space<vmem>>, vector<8x512xf32>,
    %c0_i32_8 = arith.constant 0 : i32
    %9 = arith.cmpi eq, %arg2, %c0_i32_8 : i32
    %10 = arith.extui %9 : i1 to i32
    %c0_i32_9 = arith.constant 0 : i32
    %11 = arith.cmpi ne, %10, %c0_i32_9 : i32
    scf.if %11 {
      %c0_10 = arith.constant 0 : index
      %c0_11 = arith.constant 0 : index
      %12 = vector.load %arg9[%c0_10, %c0_11] : memref<8x512xf32, #tpu.memory_space<vmem>>, vector<8x512xf32>
      %c0_12 = arith.constant 0 : index
      %c0_13 = arith.constant 0 : index
      %13 = vector.load %arg5[%c0_12, %c0_13] : memref<1x512xf32, #tpu.memory_space<vmem>>, vector<1x512xf32>
      %14 = vector.broadcast %13 : vector<1x512xf32> to vector<8x512xf32>
      %15 = arith.addf %12, %14 : vector<8x512xf32>
      %cst_14 = arith.constant dense<0.000000e+00> : vector<512xf32>
      %16 = vector.multi_reduction <add>, %15, %cst_14 [0] : vector<8x512xf32> to vector<512xf32>
      %17 = vector.shape_cast %16 : vector<512xf32> to vector<1x512xf32>
      %cst_15 = arith.constant 8.000000e+00 : f32
      %18 = vector.broadcast %cst_15 : f32 to vector<1x512xf32>
      %19 = arith.divf %17, %18 : vector<1x512xf32>
      %20 = vector.broadcast %19 : vector<1x512xf32> to vector<8x512xf32>
      %21 = arith.subf %15, %20 : vector<8x512xf32>
      %22 = arith.mulf %21, %21 : vector<8x512xf32>
      %cst_16 = arith.constant dense<0.000000e+00> : vector<512xf32>
      %23 = vector.multi_reduction <add>, %22, %cst_16 [0] : vector<8x512xf32> to vector<512xf32>
      %24 = vector.shape_cast %23 : vector<512xf32> to vector<1x512xf32>
      %cst_17 = arith.constant 8.000000e+00 : f32
      %25 = vector.broadcast %cst_17 : f32 to vector<1x512xf32>
      %26 = arith.divf %24, %25 : vector<1x512xf32>
      %27 = vector.broadcast %19 : vector<1x512xf32> to vector<8x512xf32>
      %28 = arith.subf %15, %27 : vector<8x512xf32>
      %cst_18 = arith.constant 9.99999974E-6 : f32
      %29 = vector.broadcast %cst_18 : f32 to vector<1x512xf32>
      %30 = arith.addf %26, %29 : vector<1x512xf32>
      %31 = math.rsqrt %30 : vector<1x512xf32>
      %32 = vector.broadcast %31 : vector<1x512xf32> to vector<8x512xf32>
      %33 = arith.mulf %28, %32 : vector<8x512xf32>
      %c0_19 = arith.constant 0 : index
      %c0_20 = arith.constant 0 : index
      %34 = vector.load %arg6[%c0_19, %c0_20] : memref<1x512xf32, #tpu.memory_space<vmem>>, vector<1x512xf32>
      %35 = vector.broadcast %34 : vector<1x512xf32> to vector<8x512xf32>
      %36 = arith.mulf %33, %35 : vector<8x512xf32>
      %c0_21 = arith.constant 0 : index
      %c0_22 = arith.constant 0 : index
      %37 = vector.load %arg7[%c0_21, %c0_22] : memref<1x512xf32, #tpu.memory_space<vmem>>, vector<1x512xf32>
      %38 = vector.broadcast %37 : vector<1x512xf32> to vector<8x512xf32>
      %39 = arith.addf %36, %38 : vector<8x512xf32>
      %cst_23 = arith.constant 0.000000e+00 : f32
      %40 = vector.broadcast %cst_23 : f32 to vector<8x512xf32>
      %41 = arith.maximumf %39, %40 : vector<8x512xf32>
      %42 = arith.truncf %41 : vector<8x512xf32> to vector<8x512xbf16>
      %c0_24 = arith.constant 0 : index
      %c0_25 = arith.constant 0 : index
      %43 = vector.load %arg8[%c0_24, %c0_25] : memref<8x512xbf16, #tpu.memory_space<vmem>>, vector<8x512xbf16>
      tpu.vector_store %arg8[%c0_24, %c0_25], %42 {strides = array<i32>} : memref<8x512xbf16, #tpu.memory_space<vmem>>, vector<8x512xbf16>,
    } else {
    }
    return
  }
  func.func @transform_0(%arg0: i32, %arg1: i32, %arg2: i32) -> (i32, i32) {
    %c0_i32 = arith.constant 0 : i32
    return %arg0, %arg2 : i32, i32
  }
  func.func @transform_1(%arg0: i32, %arg1: i32, %arg2: i32) -> (i32, i32) {
    %c0_i32 = arith.constant 0 : i32
    return %arg2, %arg1 : i32, i32
  }
  func.func @transform_2(%arg0: i32, %arg1: i32, %arg2: i32) -> (i32, i32) {
    %c0_i32 = arith.constant 0 : i32
    %c0_i32_0 = arith.constant 0 : i32
    return %c0_i32, %arg1 : i32, i32
  }
  func.func @transform_3(%arg0: i32, %arg1: i32, %arg2: i32) -> (i32, i32) {
    %c0_i32 = arith.constant 0 : i32
    %c0_i32_0 = arith.constant 0 : i32
    return %c0_i32, %arg1 : i32, i32
  }
  func.func @transform_4(%arg0: i32, %arg1: i32, %arg2: i32) -> (i32, i32) {
    %c0_i32 = arith.constant 0 : i32
    %c0_i32_0 = arith.constant 0 : i32
    return %c0_i32, %arg1 : i32, i32
  }
  func.func @transform_5(%arg0: i32, %arg1: i32, %arg2: i32) -> (i32, i32) {
    %c0_i32 = arith.constant 0 : i32
    return %arg0, %arg1 : i32, i32
  }
}

module attributes {stable_mosaic.version = 11 : i64} {
  func.func @_linear_kernel(%arg0: i32, %arg1: i32, %arg2: i32, %arg3: memref<8x2048xbf16, #tpu.memory_space<vmem>>, %arg4: memref<2048x128xbf16, #tpu.memory_space<vmem>>, %arg5: memref<1x128xf32, #tpu.memory_space<vmem>>, %arg6: memref<8x128xf32, #tpu.memory_space<vmem>>, %arg7: memref<8x128xf32, #tpu.memory_space<vmem>>) attributes {dimension_semantics = [#tpu.dimension_semantics<parallel>, #tpu.dimension_semantics<parallel>, #tpu.dimension_semantics<arbitrary>], iteration_bounds = array<i64: 1, 1, 2>, scalar_prefetch = 0 : i64, scratch_operands = 1 : i64, tpu.core_type = #tpu.core_type<tc>, window_params = [{transform_indices = @transform_0, window_bounds = array<i64: 8, 2048>}, {transform_indices = @transform_1, window_bounds = array<i64: 2048, 128>}, {transform_indices = @transform_2, window_bounds = array<i64: 1, 128>}, {transform_indices = @transform_3, window_bounds = array<i64: 8, 128>}]} {
    %c0_i32 = arith.constant 0 : i32
    %0 = arith.cmpi eq, %arg2, %c0_i32 : i32
    %1 = arith.extui %0 : i1 to i32
    %c0_i32_0 = arith.constant 0 : i32
    %2 = arith.cmpi ne, %1, %c0_i32_0 : i32
    scf.if %2 {
      %cst_9 = arith.constant 0.000000e+00 : f32
      %12 = vector.broadcast %cst_9 : f32 to vector<8x128xf32>
      %c0_10 = arith.constant 0 : index
      %c0_11 = arith.constant 0 : index
      %13 = vector.load %arg7[%c0_10, %c0_11] : memref<8x128xf32, #tpu.memory_space<vmem>>, vector<8x128xf32>
      tpu.vector_store %arg7[%c0_10, %c0_11], %12 {strides = array<i32>} : memref<8x128xf32, #tpu.memory_space<vmem>>, vector<8x128xf32>,
    } else {
    }
    %c0 = arith.constant 0 : index
    %c0_1 = arith.constant 0 : index
    %3 = vector.load %arg3[%c0, %c0_1] : memref<8x2048xbf16, #tpu.memory_space<vmem>>, vector<8x2048xbf16>
    %c0_2 = arith.constant 0 : index
    %c0_3 = arith.constant 0 : index
    %4 = vector.load %arg4[%c0_2, %c0_3] : memref<2048x128xbf16, #tpu.memory_space<vmem>>, vector<2048x128xbf16>
    %c0_4 = arith.constant 0 : index
    %c0_5 = arith.constant 0 : index
    %5 = vector.load %arg7[%c0_4, %c0_5] : memref<8x128xf32, #tpu.memory_space<vmem>>, vector<8x128xf32>
    %cst = arith.constant dense<0.000000e+00> : vector<8x128xf32>
    %6 = tpu.matmul %3, %4, %cst {dimension_numbers = #tpu.dot_dimension_numbers<[1], [0], [0], [1], [0, 0, 1, 1], [], []>} : vector<8x2048xbf16>, vector<2048x128xbf16>, vector<8x128xf32> -> vector<8x128xf32>
    %7 = arith.addf %5, %6 : vector<8x128xf32>
    %c0_6 = arith.constant 0 : index
    %c0_7 = arith.constant 0 : index
    %8 = vector.load %arg7[%c0_6, %c0_7] : memref<8x128xf32, #tpu.memory_space<vmem>>, vector<8x128xf32>
    tpu.vector_store %arg7[%c0_6, %c0_7], %7 {strides = array<i32>} : memref<8x128xf32, #tpu.memory_space<vmem>>, vector<8x128xf32>,
    %c1_i32 = arith.constant 1 : i32
    %9 = arith.cmpi eq, %arg2, %c1_i32 : i32
    %10 = arith.extui %9 : i1 to i32
    %c0_i32_8 = arith.constant 0 : i32
    %11 = arith.cmpi ne, %10, %c0_i32_8 : i32
    scf.if %11 {
      %c0_9 = arith.constant 0 : index
      %c0_10 = arith.constant 0 : index
      %12 = vector.load %arg7[%c0_9, %c0_10] : memref<8x128xf32, #tpu.memory_space<vmem>>, vector<8x128xf32>
      %c0_11 = arith.constant 0 : index
      %c0_12 = arith.constant 0 : index
      %13 = vector.load %arg5[%c0_11, %c0_12] : memref<1x128xf32, #tpu.memory_space<vmem>>, vector<1x128xf32>
      %14 = vector.broadcast %13 : vector<1x128xf32> to vector<8x128xf32>
      %15 = arith.addf %12, %14 : vector<8x128xf32>
      %c0_13 = arith.constant 0 : index
      %c0_14 = arith.constant 0 : index
      %16 = vector.load %arg6[%c0_13, %c0_14] : memref<8x128xf32, #tpu.memory_space<vmem>>, vector<8x128xf32>
      tpu.vector_store %arg6[%c0_13, %c0_14], %15 {strides = array<i32>} : memref<8x128xf32, #tpu.memory_space<vmem>>, vector<8x128xf32>,
    } else {
    }
    return
  }
  func.func @transform_0(%arg0: i32, %arg1: i32, %arg2: i32) -> (i32, i32) {
    %c0_i32 = arith.constant 0 : i32
    return %arg0, %arg2 : i32, i32
  }
  func.func @transform_1(%arg0: i32, %arg1: i32, %arg2: i32) -> (i32, i32) {
    %c0_i32 = arith.constant 0 : i32
    return %arg2, %arg1 : i32, i32
  }
  func.func @transform_2(%arg0: i32, %arg1: i32, %arg2: i32) -> (i32, i32) {
    %c0_i32 = arith.constant 0 : i32
    %c0_i32_0 = arith.constant 0 : i32
    return %c0_i32, %arg1 : i32, i32
  }
  func.func @transform_3(%arg0: i32, %arg1: i32, %arg2: i32) -> (i32, i32) {
    %c0_i32 = arith.constant 0 : i32
    return %arg0, %arg1 : i32, i32
  }
}

module attributes {stable_mosaic.version = 11 : i64} {
  func.func @_supclu_kernel(%arg0: memref<1x8xi32, #tpu.memory_space<vmem>>, %arg1: memref<8x1xi32, #tpu.memory_space<vmem>>, %arg2: memref<8x128xf32, #tpu.memory_space<vmem>>, %arg3: memref<1xf32, #tpu.memory_space<smem>>) attributes {dimension_semantics = [], scalar_prefetch = 0 : i64, scratch_operands = 0 : i64, tpu.core_type = #tpu.core_type<tc>} {
    %c0 = arith.constant 0 : index
    %c0_0 = arith.constant 0 : index
    %0 = vector.load %arg2[%c0, %c0_0] : memref<8x128xf32, #tpu.memory_space<vmem>>, vector<8x128xf32>
    %1 = arith.mulf %0, %0 : vector<8x128xf32>
    %cst = arith.constant dense<0.000000e+00> : vector<8xf32>
    %2 = vector.multi_reduction <add>, %1, %cst [1] : vector<8x128xf32> to vector<8xf32>
    %3 = vector.shape_cast %2 : vector<8xf32> to vector<8x1xf32>
    %cst_1 = arith.constant 1.000000e-24 : f32
    %4 = vector.broadcast %cst_1 : f32 to vector<8x1xf32>
    %5 = arith.addf %3, %4 : vector<8x1xf32>
    %6 = math.rsqrt %5 : vector<8x1xf32>
    %7 = vector.broadcast %6 : vector<8x1xf32> to vector<8x128xf32>
    %8 = arith.mulf %0, %7 : vector<8x128xf32>
    %cst_2 = arith.constant dense<0.000000e+00> : vector<8x8xf32>
    %9 = tpu.matmul %8, %8, %cst_2 {dimension_numbers = #tpu.dot_dimension_numbers<[1], [1], [0], [0], [0, 0, 1, 0], [], []>} : vector<8x128xf32>, vector<8x128xf32>, vector<8x8xf32> -> vector<8x8xf32>
    %cst_3 = arith.constant 14.2857141 : f32
    %10 = vector.broadcast %cst_3 : f32 to vector<8x8xf32>
    %11 = arith.mulf %9, %10 : vector<8x8xf32>
    %cst_4 = arith.constant dense<0xFF800000> : vector<8xf32>
    %12 = vector.multi_reduction <maximumf>, %11, %cst_4 [1] : vector<8x8xf32> to vector<8xf32>
    %13 = vector.shape_cast %12 : vector<8xf32> to vector<8x1xf32>
    %14 = vector.broadcast %13 : vector<8x1xf32> to vector<8x8xf32>
    %15 = arith.subf %11, %14 : vector<8x8xf32>
    %16 = tpu.iota {dimensions = array<i32: 0>} : vector<8x8xi32>
    %17 = tpu.iota {dimensions = array<i32: 1>} : vector<8x8xi32>
    %18 = arith.cmpi ne, %16, %17 : vector<8x8xi32>
    %19 = arith.extui %18 : vector<8x8xi1> to vector<8x8xi32>
    %20 = arith.sitofp %19 : vector<8x8xi32> to vector<8x8xf32>
    %c0_5 = arith.constant 0 : index
    %c0_6 = arith.constant 0 : index
    %21 = vector.load %arg1[%c0_5, %c0_6] : memref<8x1xi32, #tpu.memory_space<vmem>>, vector<8x1xi32>
    %c0_7 = arith.constant 0 : index
    %c0_8 = arith.constant 0 : index
    %22 = vector.load %arg0[%c0_7, %c0_8] : memref<1x8xi32, #tpu.memory_space<vmem>>, vector<1x8xi32>
    %23 = vector.broadcast %21 : vector<8x1xi32> to vector<8x8xi32>
    %24 = vector.broadcast %22 : vector<1x8xi32> to vector<8x8xi32>
    %25 = arith.cmpi eq, %23, %24 : vector<8x8xi32>
    %26 = arith.extui %25 : vector<8x8xi1> to vector<8x8xi32>
    %27 = arith.sitofp %26 : vector<8x8xi32> to vector<8x8xf32>
    %28 = arith.mulf %27, %20 : vector<8x8xf32>
    %29 = math.exp %15 : vector<8x8xf32>
    %30 = arith.mulf %29, %20 : vector<8x8xf32>
    %cst_9 = arith.constant dense<0.000000e+00> : vector<8xf32>
    %31 = vector.multi_reduction <add>, %30, %cst_9 [1] : vector<8x8xf32> to vector<8xf32>
    %32 = vector.shape_cast %31 : vector<8xf32> to vector<8x1xf32>
    %33 = math.log %32 : vector<8x1xf32>
    %34 = vector.broadcast %33 : vector<8x1xf32> to vector<8x8xf32>
    %35 = arith.subf %15, %34 : vector<8x8xf32>
    %cst_10 = arith.constant dense<0.000000e+00> : vector<8xf32>
    %36 = vector.multi_reduction <add>, %28, %cst_10 [1] : vector<8x8xf32> to vector<8xf32>
    %37 = vector.shape_cast %36 : vector<8xf32> to vector<8x1xf32>
    %cst_11 = arith.constant 1.000000e+00 : f32
    %38 = vector.broadcast %cst_11 : f32 to vector<8x1xf32>
    %39 = arith.maximumf %37, %38 : vector<8x1xf32>
    %40 = arith.mulf %28, %35 : vector<8x8xf32>
    %cst_12 = arith.constant dense<0.000000e+00> : vector<8xf32>
    %41 = vector.multi_reduction <add>, %40, %cst_12 [1] : vector<8x8xf32> to vector<8xf32>
    %42 = vector.shape_cast %41 : vector<8xf32> to vector<8x1xf32>
    %43 = tpu.reciprocal %39 {approx = true} : vector<8x1xf32> -> vector<8x1xf32>
    %44 = arith.mulf %42, %43 : vector<8x1xf32>
    %45 = vector.shape_cast %44 : vector<8x1xf32> to vector<1x8x1xf32>
    %cst_13 = arith.constant dense<0.000000e+00> : vector<1xf32>
    %46 = vector.multi_reduction <add>, %45, %cst_13 [1, 2] : vector<1x8x1xf32> to vector<1xf32>
    %47 = vector.shape_cast %46 : vector<1xf32> to vector<1x1x1xf32>
    %48 = vector.extract %47[0, 0, 0] : f32 from vector<1x1x1xf32>
    %cst_14 = arith.constant 8.000000e+00 : f32
    %49 = arith.divf %48, %cst_14 : f32
    %cst_15 = arith.constant -1.000000e+00 : f32
    %50 = arith.mulf %cst_15, %49 : f32
    %c0_16 = arith.constant 0 : index
    %51 = memref.load %arg3[%c0_16] : memref<1xf32, #tpu.memory_space<smem>>
    memref.store %50, %arg3[%c0_16] : memref<1xf32, #tpu.memory_space<smem>>
    return
  }
}

module attributes {stable_mosaic.version = 11 : i64} {
  func.func @_linear_kernel(%arg0: i32, %arg1: i32, %arg2: i32, %arg3: memref<8x2048xbf16, #tpu.memory_space<vmem>>, %arg4: memref<2048x128xbf16, #tpu.memory_space<vmem>>, %arg5: memref<1x128xf32, #tpu.memory_space<vmem>>, %arg6: memref<8x128xf32, #tpu.memory_space<vmem>>, %arg7: memref<8x128xf32, #tpu.memory_space<vmem>>) attributes {dimension_semantics = [#tpu.dimension_semantics<parallel>, #tpu.dimension_semantics<parallel>, #tpu.dimension_semantics<arbitrary>], iteration_bounds = array<i64: 1, 1, 1>, scalar_prefetch = 0 : i64, scratch_operands = 1 : i64, tpu.core_type = #tpu.core_type<tc>, window_params = [{transform_indices = @transform_0, window_bounds = array<i64: 8, 2048>}, {transform_indices = @transform_1, window_bounds = array<i64: 2048, 128>}, {transform_indices = @transform_2, window_bounds = array<i64: 1, 128>}, {transform_indices = @transform_3, window_bounds = array<i64: 8, 128>}]} {
    %c0_i32 = arith.constant 0 : i32
    %0 = arith.cmpi eq, %arg2, %c0_i32 : i32
    %1 = arith.extui %0 : i1 to i32
    %c0_i32_0 = arith.constant 0 : i32
    %2 = arith.cmpi ne, %1, %c0_i32_0 : i32
    scf.if %2 {
      %cst_10 = arith.constant 0.000000e+00 : f32
      %12 = vector.broadcast %cst_10 : f32 to vector<8x128xf32>
      %c0_11 = arith.constant 0 : index
      %c0_12 = arith.constant 0 : index
      %13 = vector.load %arg7[%c0_11, %c0_12] : memref<8x128xf32, #tpu.memory_space<vmem>>, vector<8x128xf32>
      tpu.vector_store %arg7[%c0_11, %c0_12], %12 {strides = array<i32>} : memref<8x128xf32, #tpu.memory_space<vmem>>, vector<8x128xf32>,
    } else {
    }
    %c0 = arith.constant 0 : index
    %c0_1 = arith.constant 0 : index
    %3 = vector.load %arg3[%c0, %c0_1] : memref<8x2048xbf16, #tpu.memory_space<vmem>>, vector<8x2048xbf16>
    %c0_2 = arith.constant 0 : index
    %c0_3 = arith.constant 0 : index
    %4 = vector.load %arg4[%c0_2, %c0_3] : memref<2048x128xbf16, #tpu.memory_space<vmem>>, vector<2048x128xbf16>
    %c0_4 = arith.constant 0 : index
    %c0_5 = arith.constant 0 : index
    %5 = vector.load %arg7[%c0_4, %c0_5] : memref<8x128xf32, #tpu.memory_space<vmem>>, vector<8x128xf32>
    %cst = arith.constant dense<0.000000e+00> : vector<8x128xf32>
    %6 = tpu.matmul %3, %4, %cst {dimension_numbers = #tpu.dot_dimension_numbers<[1], [0], [0], [1], [0, 0, 1, 1], [], []>} : vector<8x2048xbf16>, vector<2048x128xbf16>, vector<8x128xf32> -> vector<8x128xf32>
    %7 = arith.addf %5, %6 : vector<8x128xf32>
    %c0_6 = arith.constant 0 : index
    %c0_7 = arith.constant 0 : index
    %8 = vector.load %arg7[%c0_6, %c0_7] : memref<8x128xf32, #tpu.memory_space<vmem>>, vector<8x128xf32>
    tpu.vector_store %arg7[%c0_6, %c0_7], %7 {strides = array<i32>} : memref<8x128xf32, #tpu.memory_space<vmem>>, vector<8x128xf32>,
    %c0_i32_8 = arith.constant 0 : i32
    %9 = arith.cmpi eq, %arg2, %c0_i32_8 : i32
    %10 = arith.extui %9 : i1 to i32
    %c0_i32_9 = arith.constant 0 : i32
    %11 = arith.cmpi ne, %10, %c0_i32_9 : i32
    scf.if %11 {
      %c0_10 = arith.constant 0 : index
      %c0_11 = arith.constant 0 : index
      %12 = vector.load %arg7[%c0_10, %c0_11] : memref<8x128xf32, #tpu.memory_space<vmem>>, vector<8x128xf32>
      %c0_12 = arith.constant 0 : index
      %c0_13 = arith.constant 0 : index
      %13 = vector.load %arg5[%c0_12, %c0_13] : memref<1x128xf32, #tpu.memory_space<vmem>>, vector<1x128xf32>
      %14 = vector.broadcast %13 : vector<1x128xf32> to vector<8x128xf32>
      %15 = arith.addf %12, %14 : vector<8x128xf32>
      %c0_14 = arith.constant 0 : index
      %c0_15 = arith.constant 0 : index
      %16 = vector.load %arg6[%c0_14, %c0_15] : memref<8x128xf32, #tpu.memory_space<vmem>>, vector<8x128xf32>
      tpu.vector_store %arg6[%c0_14, %c0_15], %15 {strides = array<i32>} : memref<8x128xf32, #tpu.memory_space<vmem>>, vector<8x128xf32>,
    } else {
    }
    return
  }
  func.func @transform_0(%arg0: i32, %arg1: i32, %arg2: i32) -> (i32, i32) {
    %c0_i32 = arith.constant 0 : i32
    return %arg0, %arg2 : i32, i32
  }
  func.func @transform_1(%arg0: i32, %arg1: i32, %arg2: i32) -> (i32, i32) {
    %c0_i32 = arith.constant 0 : i32
    return %arg2, %arg1 : i32, i32
  }
  func.func @transform_2(%arg0: i32, %arg1: i32, %arg2: i32) -> (i32, i32) {
    %c0_i32 = arith.constant 0 : i32
    %c0_i32_0 = arith.constant 0 : i32
    return %c0_i32, %arg1 : i32, i32
  }
  func.func @transform_3(%arg0: i32, %arg1: i32, %arg2: i32) -> (i32, i32) {
    %c0_i32 = arith.constant 0 : i32
    return %arg0, %arg1 : i32, i32
  }
}

module attributes {stable_mosaic.version = 11 : i64} {
  func.func @_ce_kernel(%arg0: memref<8x128xf32, #tpu.memory_space<vmem>>, %arg1: memref<8x128xf32, #tpu.memory_space<vmem>>, %arg2: memref<1xf32, #tpu.memory_space<smem>>) attributes {dimension_semantics = [], scalar_prefetch = 0 : i64, scratch_operands = 0 : i64, tpu.core_type = #tpu.core_type<tc>} {
    %c0 = arith.constant 0 : index
    %c0_0 = arith.constant 0 : index
    %0 = vector.load %arg0[%c0, %c0_0] : memref<8x128xf32, #tpu.memory_space<vmem>>, vector<8x128xf32>
    %cst = arith.constant dense<0xFF800000> : vector<8xf32>
    %1 = vector.multi_reduction <maximumf>, %0, %cst [1] : vector<8x128xf32> to vector<8xf32>
    %2 = vector.shape_cast %1 : vector<8xf32> to vector<8x1xf32>
    %3 = vector.broadcast %2 : vector<8x1xf32> to vector<8x128xf32>
    %4 = arith.subf %0, %3 : vector<8x128xf32>
    %5 = math.exp %4 : vector<8x128xf32>
    %cst_1 = arith.constant dense<0.000000e+00> : vector<8xf32>
    %6 = vector.multi_reduction <add>, %5, %cst_1 [1] : vector<8x128xf32> to vector<8xf32>
    %7 = vector.shape_cast %6 : vector<8xf32> to vector<8x1xf32>
    %8 = math.log %7 : vector<8x1xf32>
    %9 = arith.addf %2, %8 : vector<8x1xf32>
    %c0_2 = arith.constant 0 : index
    %c0_3 = arith.constant 0 : index
    %10 = vector.load %arg1[%c0_2, %c0_3] : memref<8x128xf32, #tpu.memory_space<vmem>>, vector<8x128xf32>
    %11 = arith.mulf %0, %10 : vector<8x128xf32>
    %cst_4 = arith.constant dense<0.000000e+00> : vector<8xf32>
    %12 = vector.multi_reduction <add>, %11, %cst_4 [1] : vector<8x128xf32> to vector<8xf32>
    %13 = vector.shape_cast %12 : vector<8xf32> to vector<8x1xf32>
    %14 = arith.subf %9, %13 : vector<8x1xf32>
    %15 = vector.shape_cast %14 : vector<8x1xf32> to vector<1x8x1xf32>
    %cst_5 = arith.constant dense<0.000000e+00> : vector<1xf32>
    %16 = vector.multi_reduction <add>, %15, %cst_5 [1, 2] : vector<1x8x1xf32> to vector<1xf32>
    %17 = vector.shape_cast %16 : vector<1xf32> to vector<1x1x1xf32>
    %18 = vector.extract %17[0, 0, 0] : f32 from vector<1x1x1xf32>
    %cst_6 = arith.constant 8.000000e+00 : f32
    %19 = arith.divf %18, %cst_6 : f32
    %c0_7 = arith.constant 0 : index
    %20 = memref.load %arg2[%c0_7] : memref<1xf32, #tpu.memory_space<smem>>
    memref.store %19, %arg2[%c0_7] : memref<1xf32, #tpu.memory_space<smem>>
    return
  }
}

</mosaic_0001>

<bundles_post_ra>
// kernel: apnet_forward.9
= control target key start
LH: loop header
LB: loop body
LE: loop exit
PB: predicated region body
PF: predicated region fallthrough
CT: control target
= control target key end

     0   :  { %8 = vsyncpa [#allocation4], 0  ;;  %s2283_s0 = inlined_call_operand.vmem [shape: f32[512,27], index: 0, kind: input, shape index: {}]   ;;  %s2284_s1 = inlined_call_operand.hbm [shape: bf16[27,128], index: 1, kind: input, shape index: {}]   ;;  %s2285_s2 = inlined_call_operand.hbm [shape: f32[1,128], index: 2, kind: input, shape index: {}]   ;;  %s2286_s3 = inlined_call_operand.vmem [shape: bf16[512,128], index: 3, kind: output, shape index: {}]  }
   0x1   :  { %9 = vsyncpa [#allocation6], 0  ;;  %s1848_s12 = smov [#allocation3]   ;;  %s1800_s16 = scalar_lea.hbm %s2284_s1, 256 }
   0x2   :  { %s17_s13 = sshll.u32 %s1848_s12, 4  ;;  %p1801_p0 = scmp.ne.s32.totalorder %s2284_s1, %s1800_s16  ;;  %s18_s13 = int_to_ptr.vmem [resolvable:$true] %s17_s13 }
   0x3   :  { %p1804_p1 = scmp.lt.u32.totalorder %s1800_s16, %s2284_s1 }
   0x5   :  { %p1806_p2 = pnand %p1804_p1, %p1801_p0 }
   0x7   :  { %1809 = shalt.err (!%p1806_p2)
}
   0x8   :  { %s1810_s21 = scalar_lea.vmem %s18_s13, 256  ;;  %p1815_p4 = scmp.lt.s32.totalorder %s18_s13, %s18_s13 }
   0x9   :  { %p1811_p3 = scmp.ne.s32.totalorder %s18_s13, %s1810_s21  ;;  %p1816_p5 = scmp.lt.s32.totalorder %s1810_s21, %s1810_s21 }
   0xb   :  { %p1817_p6 = por %p1816_p5, %p1815_p4 }
   0xd   :  { %p1818_p7 = pnand %p1817_p6, %p1811_p3 }
   0xf   :  { %1821 = shalt.err (!%p1818_p7)
}
  0x10   :  { %s1849_s22 = smov 64   ;;  %s1850_s23 = smov 4  }
  0x11   :  { %23 = dma.hbm_to_vmem [thread:$0]  %s2284_s1, 256, %s18_s13, [#allocation4], %s1849_s22, %s1849_s22, %s1850_s23  }
  0x12   :  { %s1851_s26 = smov [#allocation5]   ;;  %s1822_s30 = scalar_lea.hbm %s2285_s2, 16 }
  0x13   :  { %s30_s27 = sshll.u32 %s1851_s26, 4  ;;  %p1823_p8 = scmp.ne.s32.totalorder %s2285_s2, %s1822_s30  ;;  %s31_s27 = int_to_ptr.vmem [resolvable:$true] %s30_s27 }
  0x14   :  { %p1826_p9 = scmp.lt.u32.totalorder %s1822_s30, %s2285_s2 }
  0x16   :  { %p1828_p10 = pnand %p1826_p9, %p1823_p8 }
  0x18   :  { %1831 = shalt.err (!%p1828_p10)
}
  0x19   :  { %s1832_s8 = scalar_lea.vmem %s31_s27, 16  ;;  %s1836_s1 = scalar_lea.vmem %s31_s27, 32 }
  0x1a   :  { %p1833_p11 = scmp.ne.s32.totalorder %s31_s27, %s1832_s8  ;;  %p1837_p12 = scmp.lt.s32.totalorder %s31_s27, %s31_s27 }
  0x1b   :  { %p1838_p13 = scmp.lt.s32.totalorder %s1836_s1, %s1832_s8 }
  0x1d   :  { %p1839_p0 = por %p1838_p13, %p1837_p12 }
  0x1f   :  { %p1840_p1 = pnand %p1839_p0, %p1833_p11 }
  0x21   :  { %1843 = shalt.err (!%p1840_p1)
}
  0x22   :  { %33 = dma.hbm_to_vmem [thread:$0]  %s2285_s2, 16, %s31_s27, [#allocation6]  }
  0x23   :  { %1844 = dma.done.wait [#allocation4], 256  }
  0x24   :  { %1845 = vsyncadd [#allocation4], 4294967040 }
  0x25   :  { %1846 = dma.done.wait [#allocation6], 16  }
  0x26   :  { %1847 = vsyncadd [#allocation6], 4294967280  ;;  %vm381_vm0 = vcmask 1044480   ;;  %vm382_vm1 = vcmask 1045504   ;;  %v1852_v0 = vmov 65535   ;;  %v1798_v2 = vld [vmem:[#allocation3] sm:$0xff]  }
  0x27   :  { %v383_v1 = vsel %vm381_vm0, 4294967295, %v1852_v0  ;;  %v1799_v4 = vld [vmem:[#allocation3 + $0x8] sm:$0x3f]   ;;  %1721 = vmatprep.subr.bf16.mxu0 %v1798_v2  ;;  %1789 = vmatprep.subr.bf16.mxu1 %v1798_v2  ;;  %v109_v5 = vld [vmem:[%s2283_s0] sm:$0xff]  ;;  %vm284_vm2 = vcmask 220160   ;;  %v111_v11 = vld [vmem:[%s2283_s0 + $0x10] sm:$0xff] }
  0x28   :  { %v384_v3 = vsel %vm382_vm1, %v383_v1, 0  ;;  %v110_v6 = vld [vmem:[%s2283_s0 + $0x8] sm:$0xff]  ;;  %v141_v7 = vld [vmem:[%s2283_s0 + $0x100] sm:$0xff]  ;;  %1722 = vmatpush3.bf16.msra.mxu0 %v1798_v2  ;;  %1791 = vmatpush3.bf16.msra.mxu1 %v1798_v2  ;;  %v112_v12 = vld [vmem:[%s2283_s0 + $0x18] sm:$0xff] }
  0x29   :  { %v386_v8 = vand.u32 %v1799_v4, %v384_v3  ;;  %v173_v9 = vpack.c.bf16 %v110_v6, %v109_v5  ;;  %v142_v10 = vld [vmem:[%s2283_s0 + $0x108] sm:$0xff]  ;;  %v143_v14 = vld [vmem:[%s2283_s0 + $0x110] sm:$0xff]  ;;  %v144_v15 = vld [vmem:[%s2283_s0 + $0x118] sm:$0xff]  ;;  %v174_v20 = vpack.c.bf16 %v112_v12, %v111_v11 }
  0x2a   :  { %v189_v13 = vpack.c.bf16 %v142_v10, %v141_v7  ;;  %v113_v16 = vld [vmem:[%s2283_s0 + $0x20] sm:$0xff]  ;;  %v114_v17 = vld [vmem:[%s2283_s0 + $0x28] sm:$0xff]  ;;  %v190_v21 = vpack.c.bf16 %v144_v15, %v143_v14  ;;  %v115_v24 = vld [vmem:[%s2283_s0 + $0x30] sm:$0xff] }
  0x2b   :  { %1723 = vmatprep.subr.bf16.mxu0 %v386_v8  ;;  %1790 = vmatprep.subr.bf16.mxu1 %v386_v8  ;;  %v145_v18 = vld [vmem:[%s2283_s0 + $0x120] sm:$0xff]  ;;  %v146_v19 = vld [vmem:[%s2283_s0 + $0x128] sm:$0xff]  ;;  %v175_v22 = vpack.c.bf16 %v114_v17, %v113_v16  ;;  %v116_v25 = vld [vmem:[%s2283_s0 + $0x38] sm:$0xff] }
  0x2c   :  { %1725 = vmatprep.mubr.msk.bf16.mxu0 %vm284_vm2, %v173_v9  ;;  %1757 = vmatprep.mubr.msk.bf16.mxu1 %vm284_vm2, %v189_v13  ;;  %v191_v23 = vpack.c.bf16 %v146_v19, %v145_v18  ;;  %v147_v26 = vld [vmem:[%s2283_s0 + $0x130] sm:$0xff]  ;;  %v148_v27 = vld [vmem:[%s2283_s0 + $0x138] sm:$0xff]  ;;  %v117_v28 = vld [vmem:[%s2283_s0 + $0x40] sm:$0xff]  ;;  %v176_v32 = vpack.c.bf16 %v116_v25, %v115_v24 }
  0x2d   :  { %1724 = vmatpush3.bf16.msra.mxu0 %v386_v8  ;;  %1792 = vmatpush3.bf16.msra.mxu1 %v386_v8  ;;  %v118_v29 = vld [vmem:[%s2283_s0 + $0x48] sm:$0xff]  ;;  %v149_v30 = vld [vmem:[%s2283_s0 + $0x140] sm:$0xff]  ;;  %v192_v33 = vpack.c.bf16 %v148_v27, %v147_v26  ;;  %v119_v36 = vld [vmem:[%s2283_s0 + $0x50] sm:$0xff] }
  0x2e   :  { %v150_v31 = vld [vmem:[%s2283_s0 + $0x148] sm:$0xff]  ;;  %v177_v34 = vpack.c.bf16 %v118_v29, %v117_v28  ;;  %v120_v37 = vld [vmem:[%s2283_s0 + $0x58] sm:$0xff]  ;;  %v151_v38 = vld [vmem:[%s2283_s0 + $0x150] sm:$0xff] }
  0x2f   :  { %v193_v35 = vpack.c.bf16 %v150_v31, %v149_v30  ;;  %v152_v39 = vld [vmem:[%s2283_s0 + $0x158] sm:$0xff]  ;;  %v121_v40 = vld [vmem:[%s2283_s0 + $0x60] sm:$0xff]  ;;  %v122_v41 = vld [vmem:[%s2283_s0 + $0x68] sm:$0xff]  ;;  %v178_v44 = vpack.c.bf16 %v120_v37, %v119_v36 }
  0x30   :  { %1726 = vmatmul.mubr.msk.bf16.vlgmr.msra.gmra.mrb[0].mxu0 %vm284_vm2, %v174_v20  ;;  %1758 = vmatmul.mubr.msk.bf16.vlgmr.msra.gmra.mrb[0].mxu1 %vm284_vm2, %v190_v21  ;;  %v153_v42 = vld [vmem:[%s2283_s0 + $0x160] sm:$0xff]  ;;  %v154_v43 = vld [vmem:[%s2283_s0 + $0x168] sm:$0xff]  ;;  %v194_v45 = vpack.c.bf16 %v152_v39, %v151_v38  ;;  %v179_v46 = vpack.c.bf16 %v122_v41, %v121_v40  ;;  %v123_v48 = vld [vmem:[%s2283_s0 + $0x70] sm:$0xff] }
  0x31   :  { %1729 = vmatprep.mubr.msk.bf16.mxu0 %vm284_vm2, %v175_v22  ;;  %1761 = vmatprep.mubr.msk.bf16.mxu1 %vm284_vm2, %v191_v23  ;;  %v195_v47 = vpack.c.bf16 %v154_v43, %v153_v42  ;;  %v124_v49 = vld [vmem:[%s2283_s0 + $0x78] sm:$0xff]  ;;  %v155_v50 = vld [vmem:[%s2283_s0 + $0x170] sm:$0xff]  ;;  %v125_v52 = vld [vmem:[%s2283_s0 + $0x80] sm:$0xff] }
  0x32   :  { %v156_v51 = vld [vmem:[%s2283_s0 + $0x178] sm:$0xff]  ;;  %v126_v53 = vld [vmem:[%s2283_s0 + $0x88] sm:$0xff]  ;;  %v157_v54 = vld [vmem:[%s2283_s0 + $0x180] sm:$0xff]  ;;  %v180_v56 = vpack.c.bf16 %v124_v49, %v123_v48 }
  0x33   :  { %v158_v55 = vld [vmem:[%s2283_s0 + $0x188] sm:$0xff]  ;;  %v196_v57 = vpack.c.bf16 %v156_v51, %v155_v50  ;;  %v181_v58 = vpack.c.bf16 %v126_v53, %v125_v52  ;;  %v127_v60 = vld [vmem:[%s2283_s0 + $0x90] sm:$0xff]  ;;  %v128_v61 = vld [vmem:[%s2283_s0 + $0x98] sm:$0xff] }
  0x34   :  { %v197_v59 = vpack.c.bf16 %v158_v55, %v157_v54  ;;  %v159_v62 = vld [vmem:[%s2283_s0 + $0x190] sm:$0xff]  ;;  %v160_v63 = vld [vmem:[%s2283_s0 + $0x198] sm:$0xff]  ;;  %v129_v0 = vld [vmem:[%s2283_s0 + $0xa0] sm:$0xff]  ;;  %v182_v4 = vpack.c.bf16 %v128_v61, %v127_v60 }
  0x35   :  { %v130_v1 = vld [vmem:[%s2283_s0 + $0xa8] sm:$0xff]  ;;  %v161_v2 = vld [vmem:[%s2283_s0 + $0x1a0] sm:$0xff]  ;;  %v198_v5 = vpack.c.bf16 %v160_v63, %v159_v62  ;;  %v131_v8 = vld [vmem:[%s2283_s0 + $0xb0] sm:$0xff] }
  0x36   :  { %v162_v3 = vld [vmem:[%s2283_s0 + $0x1a8] sm:$0xff]  ;;  %v183_v6 = vpack.c.bf16 %v130_v1, %v129_v0  ;;  %v132_v9 = vld [vmem:[%s2283_s0 + $0xb8] sm:$0xff]  ;;  %v163_v10 = vld [vmem:[%s2283_s0 + $0x1b0] sm:$0xff] }
  0x37   :  { %v199_v7 = vpack.c.bf16 %v162_v3, %v161_v2  ;;  %v164_v11 = vld [vmem:[%s2283_s0 + $0x1b8] sm:$0xff]  ;;  %v133_v12 = vld [vmem:[%s2283_s0 + $0xc0] sm:$0xff]  ;;  %v134_v13 = vld [vmem:[%s2283_s0 + $0xc8] sm:$0xff]  ;;  %v184_v16 = vpack.c.bf16 %v132_v9, %v131_v8 }
  0x38   :  { %1730 = vmatmul.mubr.msk.bf16.gmra.mrb[4].mxu0 %vm284_vm2, %v176_v32  ;;  %1762 = vmatmul.mubr.msk.bf16.gmra.mrb[4].mxu1 %vm284_vm2, %v192_v33  ;;  %v165_v14 = vld [vmem:[%s2283_s0 + $0x1c0] sm:$0xff]  ;;  %v166_v15 = vld [vmem:[%s2283_s0 + $0x1c8] sm:$0xff]  ;;  %v200_v17 = vpack.c.bf16 %v164_v11, %v163_v10  ;;  %v185_v18 = vpack.c.bf16 %v134_v13, %v133_v12  ;;  %v135_v20 = vld [vmem:[%s2283_s0 + $0xd0] sm:$0xff] }
  0x39   :  { %1733 = vmatprep.mubr.msk.bf16.mxu0 %vm284_vm2, %v177_v34  ;;  %1765 = vmatprep.mubr.msk.bf16.mxu1 %vm284_vm2, %v193_v35  ;;  %v201_v19 = vpack.c.bf16 %v166_v15, %v165_v14  ;;  %v136_v21 = vld [vmem:[%s2283_s0 + $0xd8] sm:$0xff]  ;;  %v167_v22 = vld [vmem:[%s2283_s0 + $0x1d0] sm:$0xff]  ;;  %v137_v24 = vld [vmem:[%s2283_s0 + $0xe0] sm:$0xff] }
  0x3a   :  { %v168_v23 = vld [vmem:[%s2283_s0 + $0x1d8] sm:$0xff]  ;;  %v138_v25 = vld [vmem:[%s2283_s0 + $0xe8] sm:$0xff]  ;;  %v169_v26 = vld [vmem:[%s2283_s0 + $0x1e0] sm:$0xff]  ;;  %v186_v28 = vpack.c.bf16 %v136_v21, %v135_v20 }
  0x3b   :  { %v170_v27 = vld [vmem:[%s2283_s0 + $0x1e8] sm:$0xff]  ;;  %v202_v29 = vpack.c.bf16 %v168_v23, %v167_v22  ;;  %v187_v30 = vpack.c.bf16 %v138_v25, %v137_v24  ;;  %v139_v32 = vld [vmem:[%s2283_s0 + $0xf0] sm:$0xff]  ;;  %v140_v33 = vld [vmem:[%s2283_s0 + $0xf8] sm:$0xff] }
  0x3c   :  { %v203_v31 = vpack.c.bf16 %v170_v27, %v169_v26  ;;  %v171_v34 = vld [vmem:[%s2283_s0 + $0x1f0] sm:$0xff]  ;;  %v172_v35 = vld [vmem:[%s2283_s0 + $0x1f8] sm:$0xff]  ;;  %v188_v36 = vpack.c.bf16 %v140_v33, %v139_v32 }
  0x3d   :  { %v204_v37 = vpack.c.bf16 %v172_v35, %v171_v34  ;;  %v2121_v38 = vld [vmem:[#allocation5] ss:$0 sm:$0xff] }
  0x40   :  { %1734 = vmatmul.mubr.msk.bf16.gmra.mrb[8].mxu0 %vm284_vm2, %v178_v44  ;;  %1766 = vmatmul.mubr.msk.bf16.gmra.mrb[8].mxu1 %vm284_vm2, %v194_v45 }
  0x41   :  { %1737 = vmatprep.mubr.msk.bf16.mxu0 %vm284_vm2, %v179_v46  ;;  %1769 = vmatprep.mubr.msk.bf16.mxu1 %vm284_vm2, %v195_v47 }
  0x48   :  { %1738 = vmatmul.mubr.msk.bf16.gmra.mrb[12].mxu0 %vm284_vm2, %v180_v56  ;;  %1770 = vmatmul.mubr.msk.bf16.gmra.mrb[12].mxu1 %vm284_vm2, %v196_v57 }
  0x49   :  { %1741 = vmatprep.mubr.msk.bf16.mxu0 %vm284_vm2, %v181_v58  ;;  %1773 = vmatprep.mubr.msk.bf16.mxu1 %vm284_vm2, %v197_v59 }
  0x50   :  { %1742 = vmatmul.mubr.msk.bf16.gmra.mrb[16].mxu0 %vm284_vm2, %v182_v4  ;;  %1774 = vmatmul.mubr.msk.bf16.gmra.mrb[16].mxu1 %vm284_vm2, %v198_v5 }
  0x51   :  { %1745 = vmatprep.mubr.msk.bf16.mxu0 %vm284_vm2, %v183_v6  ;;  %1777 = vmatprep.mubr.msk.bf16.mxu1 %vm284_vm2, %v199_v7 }
  0x58   :  { %1746 = vmatmul.mubr.msk.bf16.gmra.mrb[20].mxu0 %vm284_vm2, %v184_v16  ;;  %1778 = vmatmul.mubr.msk.bf16.gmra.mrb[20].mxu1 %vm284_vm2, %v200_v17 }
  0x59   :  { %1749 = vmatprep.mubr.msk.bf16.mxu0 %vm284_vm2, %v185_v18  ;;  %1781 = vmatprep.mubr.msk.bf16.mxu1 %vm284_vm2, %v201_v19 }
  0x60   :  { %1750 = vmatmul.mubr.msk.bf16.gmra.mrb[24].mxu0 %vm284_vm2, %v186_v28  ;;  %1782 = vmatmul.mubr.msk.bf16.gmra.mrb[24].mxu1 %vm284_vm2, %v202_v29 }
  0x61   :  { %1753 = vmatprep.mubr.msk.bf16.mxu0 %vm284_vm2, %v187_v30  ;;  %1785 = vmatprep.mubr.msk.bf16.mxu1 %vm284_vm2, %v203_v31 }
  0x68   :  { %1754 = vmatmul.mubr.msk.bf16.gmra.mrb[28].mxu0 %vm284_vm2, %v188_v36  ;;  %1786 = vmatmul.mubr.msk.bf16.gmra.mrb[28].mxu1 %vm284_vm2, %v204_v37 }
 0x103   :  { %v1727_v39 = vpop.f32.mrb[0].mxu0  ;;  %v1759_v40 = vpop.f32.mrb[0].mxu1 }
 0x104   :  { %v881_v41 = vadd.f32 %v1727_v39, %v2121_v38  ;;  %v913_v42 = vadd.f32 %v1759_v40, %v2121_v38  ;;  %v422_v43 = vpop.f32.mrb[1].mxu0  ;;  %v550_v44 = vpop.f32.mrb[1].mxu1 }
 0x105   :  { %v879_v45 = vadd.f32 %v2121_v38, %v422_v43  ;;  %v911_v46 = vadd.f32 %v2121_v38, %v550_v44  ;;  %v1728_v47 = vpop.f32.mrb[2].mxu0  ;;  %v1760_v48 = vpop.f32.mrb[2].mxu1 }
 0x106   :  { %v882_v49 = vadd.f32 %v1728_v47, %v2121_v38  ;;  %v914_v50 = vadd.f32 %v1760_v48, %v2121_v38  ;;  %v425_v51 = vpop.f32.mrb[3].mxu0  ;;  %v553_v52 = vpop.f32.mrb[3].mxu1  ;;  %v945_v55 = vmax.f32 %v881_v41, 0.0  ;;  %v977_v56 = vmax.f32 %v913_v42, 0.0 }
 0x107   :  { %v880_v53 = vadd.f32 %v2121_v38, %v425_v51  ;;  %v912_v54 = vadd.f32 %v2121_v38, %v553_v52  ;;  %v943_v59 = vmax.f32 %v879_v45, 0.0  ;;  %v975_v60 = vmax.f32 %v911_v46, 0.0 }
 0x108   :  { %v946_v57 = vmax.f32 %v882_v49, 0.0  ;;  %v978_v58 = vmax.f32 %v914_v50, 0.0 }
 0x109   :  { %v944_v61 = vmax.f32 %v880_v53, 0.0  ;;  %v976_v62 = vmax.f32 %v912_v54, 0.0 }
 0x10a   :  { %v1504_v63 = vpack.c.bf16 %v946_v57, %v945_v55  ;;  %v1584_v0 = vpack.c.bf16 %v978_v58, %v977_v56 }
 0x10b   :  { %v1499_v1 = vpack.c.bf16 %v944_v61, %v943_v59  ;;  %v1579_v2 = vpack.c.bf16 %v976_v62, %v975_v60  ;;  %v1731_v3 = vpop.f32.mrb[4].mxu0  ;;  %v1763_v4 = vpop.f32.mrb[4].mxu1 }
 0x10c   :  { %1656 = vst [vmem:[%s2286_s3 + $0x8] sm:$0xff] %v1504_v63   ;;  %1672 = vst [vmem:[%s2286_s3 + $0x88] sm:$0xff] %v1584_v0   ;;  %v885_v5 = vadd.f32 %v1731_v3, %v2121_v38  ;;  %v917_v6 = vadd.f32 %v1763_v4, %v2121_v38  ;;  %v438_v7 = vpop.f32.mrb[5].mxu0  ;;  %v566_v8 = vpop.f32.mrb[5].mxu1 }
 0x10d   :  { %1500 = vst [vmem:[%s2286_s3] sm:$0xff] %v1499_v1   ;;  %1671 = vst [vmem:[%s2286_s3 + $0x80] sm:$0xff] %v1579_v2   ;;  %v883_v9 = vadd.f32 %v2121_v38, %v438_v7  ;;  %v915_v10 = vadd.f32 %v2121_v38, %v566_v8  ;;  %v1732_v11 = vpop.f32.mrb[6].mxu0  ;;  %v1764_v12 = vpop.f32.mrb[6].mxu1 }
 0x10e   :  { %v886_v13 = vadd.f32 %v1732_v11, %v2121_v38  ;;  %v918_v14 = vadd.f32 %v1764_v12, %v2121_v38  ;;  %v441_v15 = vpop.f32.mrb[7].mxu0  ;;  %v569_v16 = vpop.f32.mrb[7].mxu1  ;;  %v949_v19 = vmax.f32 %v885_v5, 0.0  ;;  %v981_v20 = vmax.f32 %v917_v6, 0.0 }
 0x10f   :  { %v884_v17 = vadd.f32 %v2121_v38, %v441_v15  ;;  %v916_v18 = vadd.f32 %v2121_v38, %v569_v16  ;;  %v947_v23 = vmax.f32 %v883_v9, 0.0  ;;  %v979_v24 = vmax.f32 %v915_v10, 0.0 }
 0x110   :  { %v950_v21 = vmax.f32 %v886_v13, 0.0  ;;  %v982_v22 = vmax.f32 %v918_v14, 0.0 }
 0x111   :  { %v948_v25 = vmax.f32 %v884_v17, 0.0  ;;  %v980_v26 = vmax.f32 %v916_v18, 0.0 }
 0x112   :  { %v1514_v27 = vpack.c.bf16 %v950_v21, %v949_v19  ;;  %v1594_v28 = vpack.c.bf16 %v982_v22, %v981_v20 }
 0x113   :  { %v1509_v29 = vpack.c.bf16 %v948_v25, %v947_v23  ;;  %v1589_v30 = vpack.c.bf16 %v980_v26, %v979_v24  ;;  %v1735_v31 = vpop.f32.mrb[8].mxu0  ;;  %v1767_v32 = vpop.f32.mrb[8].mxu1 }
 0x114   :  { %1658 = vst [vmem:[%s2286_s3 + $0x18] sm:$0xff] %v1514_v27   ;;  %1674 = vst [vmem:[%s2286_s3 + $0x98] sm:$0xff] %v1594_v28   ;;  %v889_v33 = vadd.f32 %v1735_v31, %v2121_v38  ;;  %v921_v34 = vadd.f32 %v1767_v32, %v2121_v38  ;;  %v454_v35 = vpop.f32.mrb[9].mxu0  ;;  %v582_v36 = vpop.f32.mrb[9].mxu1 }
 0x115   :  { %1657 = vst [vmem:[%s2286_s3 + $0x10] sm:$0xff] %v1509_v29   ;;  %1673 = vst [vmem:[%s2286_s3 + $0x90] sm:$0xff] %v1589_v30   ;;  %v887_v37 = vadd.f32 %v2121_v38, %v454_v35  ;;  %v919_v39 = vadd.f32 %v2121_v38, %v582_v36  ;;  %v1736_v40 = vpop.f32.mrb[10].mxu0  ;;  %v1768_v41 = vpop.f32.mrb[10].mxu1 }
 0x116   :  { %v890_v42 = vadd.f32 %v1736_v40, %v2121_v38  ;;  %v922_v43 = vadd.f32 %v1768_v41, %v2121_v38  ;;  %v457_v44 = vpop.f32.mrb[11].mxu0  ;;  %v585_v45 = vpop.f32.mrb[11].mxu1  ;;  %v953_v48 = vmax.f32 %v889_v33, 0.0  ;;  %v985_v49 = vmax.f32 %v921_v34, 0.0 }
 0x117   :  { %v888_v46 = vadd.f32 %v2121_v38, %v457_v44  ;;  %v920_v47 = vadd.f32 %v2121_v38, %v585_v45  ;;  %v951_v52 = vmax.f32 %v887_v37, 0.0  ;;  %v983_v53 = vmax.f32 %v919_v39, 0.0 }
 0x118   :  { %v954_v50 = vmax.f32 %v890_v42, 0.0  ;;  %v986_v51 = vmax.f32 %v922_v43, 0.0 }
 0x119   :  { %v952_v54 = vmax.f32 %v888_v46, 0.0  ;;  %v984_v55 = vmax.f32 %v920_v47, 0.0 }
 0x11a   :  { %v1524_v56 = vpack.c.bf16 %v954_v50, %v953_v48  ;;  %v1604_v57 = vpack.c.bf16 %v986_v51, %v985_v49 }
 0x11b   :  { %v1519_v58 = vpack.c.bf16 %v952_v54, %v951_v52  ;;  %v1599_v59 = vpack.c.bf16 %v984_v55, %v983_v53  ;;  %v1739_v60 = vpop.f32.mrb[12].mxu0  ;;  %v1771_v61 = vpop.f32.mrb[12].mxu1 }
 0x11c   :  { %1660 = vst [vmem:[%s2286_s3 + $0x28] sm:$0xff] %v1524_v56   ;;  %1676 = vst [vmem:[%s2286_s3 + $0xa8] sm:$0xff] %v1604_v57   ;;  %v893_v62 = vadd.f32 %v1739_v60, %v2121_v38  ;;  %v925_v63 = vadd.f32 %v1771_v61, %v2121_v38  ;;  %v470_v0 = vpop.f32.mrb[13].mxu0  ;;  %v598_v1 = vpop.f32.mrb[13].mxu1 }
 0x11d   :  { %1659 = vst [vmem:[%s2286_s3 + $0x20] sm:$0xff] %v1519_v58   ;;  %1675 = vst [vmem:[%s2286_s3 + $0xa0] sm:$0xff] %v1599_v59   ;;  %v891_v2 = vadd.f32 %v2121_v38, %v470_v0  ;;  %v923_v3 = vadd.f32 %v2121_v38, %v598_v1  ;;  %v1740_v4 = vpop.f32.mrb[14].mxu0  ;;  %v1772_v5 = vpop.f32.mrb[14].mxu1 }
 0x11e   :  { %v894_v6 = vadd.f32 %v1740_v4, %v2121_v38  ;;  %v926_v7 = vadd.f32 %v1772_v5, %v2121_v38  ;;  %v473_v8 = vpop.f32.mrb[15].mxu0  ;;  %v601_v9 = vpop.f32.mrb[15].mxu1  ;;  %v957_v12 = vmax.f32 %v893_v62, 0.0  ;;  %v989_v13 = vmax.f32 %v925_v63, 0.0 }
 0x11f   :  { %v892_v10 = vadd.f32 %v2121_v38, %v473_v8  ;;  %v924_v11 = vadd.f32 %v2121_v38, %v601_v9  ;;  %v955_v16 = vmax.f32 %v891_v2, 0.0  ;;  %v987_v17 = vmax.f32 %v923_v3, 0.0 }
 0x120   :  { %v958_v14 = vmax.f32 %v894_v6, 0.0  ;;  %v990_v15 = vmax.f32 %v926_v7, 0.0 }
 0x121   :  { %v956_v18 = vmax.f32 %v892_v10, 0.0  ;;  %v988_v19 = vmax.f32 %v924_v11, 0.0 }
 0x122   :  { %v1534_v20 = vpack.c.bf16 %v958_v14, %v957_v12  ;;  %v1614_v21 = vpack.c.bf16 %v990_v15, %v989_v13 }
 0x123   :  { %v1529_v22 = vpack.c.bf16 %v956_v18, %v955_v16  ;;  %v1609_v23 = vpack.c.bf16 %v988_v19, %v987_v17  ;;  %v1743_v24 = vpop.f32.mrb[16].mxu0  ;;  %v1775_v25 = vpop.f32.mrb[16].mxu1 }
 0x124   :  { %1662 = vst [vmem:[%s2286_s3 + $0x38] sm:$0xff] %v1534_v20   ;;  %1678 = vst [vmem:[%s2286_s3 + $0xb8] sm:$0xff] %v1614_v21   ;;  %v897_v26 = vadd.f32 %v1743_v24, %v2121_v38  ;;  %v929_v27 = vadd.f32 %v1775_v25, %v2121_v38  ;;  %v486_v28 = vpop.f32.mrb[17].mxu0  ;;  %v614_v29 = vpop.f32.mrb[17].mxu1 }
 0x125   :  { %1661 = vst [vmem:[%s2286_s3 + $0x30] sm:$0xff] %v1529_v22   ;;  %1677 = vst [vmem:[%s2286_s3 + $0xb0] sm:$0xff] %v1609_v23   ;;  %v895_v30 = vadd.f32 %v2121_v38, %v486_v28  ;;  %v927_v31 = vadd.f32 %v2121_v38, %v614_v29  ;;  %v1744_v32 = vpop.f32.mrb[18].mxu0  ;;  %v1776_v33 = vpop.f32.mrb[18].mxu1 }
 0x126   :  { %v898_v34 = vadd.f32 %v1744_v32, %v2121_v38  ;;  %v930_v35 = vadd.f32 %v1776_v33, %v2121_v38  ;;  %v489_v36 = vpop.f32.mrb[19].mxu0  ;;  %v617_v37 = vpop.f32.mrb[19].mxu1  ;;  %v961_v41 = vmax.f32 %v897_v26, 0.0  ;;  %v993_v42 = vmax.f32 %v929_v27, 0.0 }
 0x127   :  { %v896_v39 = vadd.f32 %v2121_v38, %v489_v36  ;;  %v928_v40 = vadd.f32 %v2121_v38, %v617_v37  ;;  %v959_v45 = vmax.f32 %v895_v30, 0.0  ;;  %v991_v46 = vmax.f32 %v927_v31, 0.0 }
 0x128   :  { %v962_v43 = vmax.f32 %v898_v34, 0.0  ;;  %v994_v44 = vmax.f32 %v930_v35, 0.0 }
 0x129   :  { %v960_v47 = vmax.f32 %v896_v39, 0.0  ;;  %v992_v48 = vmax.f32 %v928_v40, 0.0 }
 0x12a   :  { %v1544_v49 = vpack.c.bf16 %v962_v43, %v961_v41  ;;  %v1624_v50 = vpack.c.bf16 %v994_v44, %v993_v42 }
 0x12b   :  { %v1539_v51 = vpack.c.bf16 %v960_v47, %v959_v45  ;;  %v1619_v52 = vpack.c.bf16 %v992_v48, %v991_v46  ;;  %v1747_v53 = vpop.f32.mrb[20].mxu0  ;;  %v1779_v54 = vpop.f32.mrb[20].mxu1 }
 0x12c   :  { %1664 = vst [vmem:[%s2286_s3 + $0x48] sm:$0xff] %v1544_v49   ;;  %1680 = vst [vmem:[%s2286_s3 + $0xc8] sm:$0xff] %v1624_v50   ;;  %v901_v55 = vadd.f32 %v1747_v53, %v2121_v38  ;;  %v933_v56 = vadd.f32 %v1779_v54, %v2121_v38  ;;  %v502_v57 = vpop.f32.mrb[21].mxu0  ;;  %v630_v58 = vpop.f32.mrb[21].mxu1 }
 0x12d   :  { %1663 = vst [vmem:[%s2286_s3 + $0x40] sm:$0xff] %v1539_v51   ;;  %1679 = vst [vmem:[%s2286_s3 + $0xc0] sm:$0xff] %v1619_v52   ;;  %v899_v59 = vadd.f32 %v2121_v38, %v502_v57  ;;  %v931_v60 = vadd.f32 %v2121_v38, %v630_v58  ;;  %v1748_v61 = vpop.f32.mrb[22].mxu0  ;;  %v1780_v62 = vpop.f32.mrb[22].mxu1 }
 0x12e   :  { %v902_v63 = vadd.f32 %v1748_v61, %v2121_v38  ;;  %v934_v0 = vadd.f32 %v1780_v62, %v2121_v38  ;;  %v505_v1 = vpop.f32.mrb[23].mxu0  ;;  %v633_v2 = vpop.f32.mrb[23].mxu1  ;;  %v965_v5 = vmax.f32 %v901_v55, 0.0  ;;  %v997_v6 = vmax.f32 %v933_v56, 0.0 }
 0x12f   :  { %v900_v3 = vadd.f32 %v2121_v38, %v505_v1  ;;  %v932_v4 = vadd.f32 %v2121_v38, %v633_v2  ;;  %v963_v9 = vmax.f32 %v899_v59, 0.0  ;;  %v995_v10 = vmax.f32 %v931_v60, 0.0 }
 0x130   :  { %v966_v7 = vmax.f32 %v902_v63, 0.0  ;;  %v998_v8 = vmax.f32 %v934_v0, 0.0 }
 0x131   :  { %v964_v11 = vmax.f32 %v900_v3, 0.0  ;;  %v996_v12 = vmax.f32 %v932_v4, 0.0 }
 0x132   :  { %v1554_v13 = vpack.c.bf16 %v966_v7, %v965_v5  ;;  %v1634_v14 = vpack.c.bf16 %v998_v8, %v997_v6 }
 0x133   :  { %v1549_v15 = vpack.c.bf16 %v964_v11, %v963_v9  ;;  %v1629_v16 = vpack.c.bf16 %v996_v12, %v995_v10  ;;  %v1751_v17 = vpop.f32.mrb[24].mxu0  ;;  %v1783_v18 = vpop.f32.mrb[24].mxu1 }
 0x134   :  { %1666 = vst [vmem:[%s2286_s3 + $0x58] sm:$0xff] %v1554_v13   ;;  %1682 = vst [vmem:[%s2286_s3 + $0xd8] sm:$0xff] %v1634_v14   ;;  %v905_v19 = vadd.f32 %v1751_v17, %v2121_v38  ;;  %v937_v20 = vadd.f32 %v1783_v18, %v2121_v38  ;;  %v518_v21 = vpop.f32.mrb[25].mxu0  ;;  %v646_v22 = vpop.f32.mrb[25].mxu1 }
 0x135   :  { %1665 = vst [vmem:[%s2286_s3 + $0x50] sm:$0xff] %v1549_v15   ;;  %1681 = vst [vmem:[%s2286_s3 + $0xd0] sm:$0xff] %v1629_v16   ;;  %v903_v23 = vadd.f32 %v2121_v38, %v518_v21  ;;  %v935_v24 = vadd.f32 %v2121_v38, %v646_v22  ;;  %v1752_v25 = vpop.f32.mrb[26].mxu0  ;;  %v1784_v26 = vpop.f32.mrb[26].mxu1 }
 0x136   :  { %v906_v27 = vadd.f32 %v1752_v25, %v2121_v38  ;;  %v938_v28 = vadd.f32 %v1784_v26, %v2121_v38  ;;  %v521_v29 = vpop.f32.mrb[27].mxu0  ;;  %v649_v30 = vpop.f32.mrb[27].mxu1  ;;  %v969_v33 = vmax.f32 %v905_v19, 0.0  ;;  %v1001_v34 = vmax.f32 %v937_v20, 0.0 }
 0x137   :  { %v904_v31 = vadd.f32 %v2121_v38, %v521_v29  ;;  %v936_v32 = vadd.f32 %v2121_v38, %v649_v30  ;;  %v967_v37 = vmax.f32 %v903_v23, 0.0  ;;  %v999_v39 = vmax.f32 %v935_v24, 0.0 }
 0x138   :  { %v970_v35 = vmax.f32 %v906_v27, 0.0  ;;  %v1002_v36 = vmax.f32 %v938_v28, 0.0 }
 0x139   :  { %v968_v40 = vmax.f32 %v904_v31, 0.0  ;;  %v1000_v41 = vmax.f32 %v936_v32, 0.0 }
 0x13a   :  { %v1564_v42 = vpack.c.bf16 %v970_v35, %v969_v33  ;;  %v1644_v43 = vpack.c.bf16 %v1002_v36, %v1001_v34 }
 0x13b   :  { %v1559_v44 = vpack.c.bf16 %v968_v40, %v967_v37  ;;  %v1639_v45 = vpack.c.bf16 %v1000_v41, %v999_v39  ;;  %v1755_v46 = vpop.f32.mrb[28].mxu0  ;;  %v1787_v47 = vpop.f32.mrb[28].mxu1 }
 0x13c   :  { %1668 = vst [vmem:[%s2286_s3 + $0x68] sm:$0xff] %v1564_v42   ;;  %1684 = vst [vmem:[%s2286_s3 + $0xe8] sm:$0xff] %v1644_v43   ;;  %v909_v48 = vadd.f32 %v1755_v46, %v2121_v38  ;;  %v941_v49 = vadd.f32 %v1787_v47, %v2121_v38  ;;  %v534_v50 = vpop.f32.mrb[29].mxu0  ;;  %v662_v51 = vpop.f32.mrb[29].mxu1 }
 0x13d   :  { %1667 = vst [vmem:[%s2286_s3 + $0x60] sm:$0xff] %v1559_v44   ;;  %1683 = vst [vmem:[%s2286_s3 + $0xe0] sm:$0xff] %v1639_v45   ;;  %v907_v52 = vadd.f32 %v2121_v38, %v534_v50  ;;  %v939_v53 = vadd.f32 %v2121_v38, %v662_v51  ;;  %v1756_v54 = vpop.f32.mrb[30].mxu0  ;;  %v1788_v55 = vpop.f32.mrb[30].mxu1 }
 0x13e   :  { %v910_v56 = vadd.f32 %v1756_v54, %v2121_v38  ;;  %v942_v57 = vadd.f32 %v1788_v55, %v2121_v38  ;;  %v537_v58 = vpop.f32.mrb[31].mxu0  ;;  %v665_v59 = vpop.f32.mrb[31].mxu1  ;;  %v973_v62 = vmax.f32 %v909_v48, 0.0  ;;  %v1005_v63 = vmax.f32 %v941_v49, 0.0 }
 0x13f   :  { %v908_v60 = vadd.f32 %v2121_v38, %v537_v58  ;;  %v940_v61 = vadd.f32 %v2121_v38, %v665_v59  ;;  %v971_v2 = vmax.f32 %v907_v52, 0.0  ;;  %v1003_v3 = vmax.f32 %v939_v53, 0.0 }
 0x140   :  { %v974_v0 = vmax.f32 %v910_v56, 0.0  ;;  %v1006_v1 = vmax.f32 %v942_v57, 0.0 }
 0x141   :  { %v972_v4 = vmax.f32 %v908_v60, 0.0  ;;  %v1004_v5 = vmax.f32 %v940_v61, 0.0 }
 0x142   :  { %v1574_v6 = vpack.c.bf16 %v974_v0, %v973_v62  ;;  %v1654_v7 = vpack.c.bf16 %v1006_v1, %v1005_v63 }
 0x143   :  { %v1569_v8 = vpack.c.bf16 %v972_v4, %v971_v2  ;;  %v1649_v9 = vpack.c.bf16 %v1004_v5, %v1003_v3 }
 0x144   :  { %1670 = vst [vmem:[%s2286_s3 + $0x78] sm:$0xff] %v1574_v6   ;;  %1686 = vst [vmem:[%s2286_s3 + $0xf8] sm:$0xff] %v1654_v7  }
 0x145   :  { %1669 = vst [vmem:[%s2286_s3 + $0x70] sm:$0xff] %v1569_v8   ;;  %1685 = vst [vmem:[%s2286_s3 + $0xf0] sm:$0xff] %v1649_v9  }
 0x146   :  { %1331 = vsyncpa [#allocation4], 1 }
 0x147   :  { %1332 = vsyncpa [#allocation6], 1 }

// kernel: apnet_forward.10
= control target key start
LH: loop header
LB: loop body
LE: loop exit
PB: predicated region body
PF: predicated region fallthrough
CT: control target
= control target key end

     0   :  { %s6390_s12 = smov 0   ;;  %s6392_s13 = smov 0   ;;  %s7728_s0 = inlined_call_operand.vmem [shape: bf16[128,1152], index: 0, kind: input, shape index: {}]   ;;  %s7729_s1 = inlined_call_operand.vmem [shape: bf16[1152,2048], index: 1, kind: input, shape index: {}]   ;;  %s7730_s2 = inlined_call_operand.vmem [shape: f32[1,2048], index: 2, kind: input, shape index: {}]   ;;  %s7731_s3 = inlined_call_operand.vmem [shape: bf16[128,2048], index: 3, kind: output, shape index: {}]  }
   0x1   :  { %s6394_s14 = smov 0   ;;  %s6396_s15 = smov 0  }
   0x2   :  { %s6398_s16 = smov 0  }
   0x3 LB: > { %s28_s17 = sadd.s32 1, %s6363_s15  ;;  %s5053_s18 = sadd.s32 4294967295, %s6367_s16   ;;  %s6367_s16 = sphi %s6398_s16, %s13_s16   ;;  %s6363_s15 = sphi %s6396_s15, %s7736_s15   ;;  %s6359_s14 = sphi %s6394_s14, %s7735_s14   ;;  %s6355_s13 = sphi %s6392_s13, %s7734_s13   ;;  %s6351_s12 = sphi %s6390_s12, %s7733_s12  }
   0x4   : > { %p30_p0 = scmp.ge.s32.totalorder %s28_s17, 4  ;;  %p76_p1 = scmp.ne.s32.totalorder %s6355_s13, %s6351_s12 }
   0x5   : > { %p77_p2 = scmp.eq.s32.totalorder %s6367_s16, 0  ;;  %p134_p4 = scmp.eq.s32.totalorder %s5053_s18, 3 }
   0x6   : > { %s7738_s17 = smov (%p30_p0, %s28_s17), 0  ;;  %s69_s20 = sadd.s32 1, %s6355_s13 }
   0x7   : > { %p78_p3 = por %p77_p2, %p76_p1  ;;  %s65_s19 = ssub.s32 %s6363_s15, %s7738_s17 }
   0x8   : > { %p67_p5 = scmp.eq.s32.totalorder %s65_s19, 0  ;;  %p6425_p6 = por %p134_p4, %p76_p1 }
   0x9   : > { %p5057_p7 = scmp.ge.s32.totalorder %s6367_s16, 4 }
   0xa   : > { %s6430_s22 = scalar_select %p67_p5, %s6355_s13, %s69_s20  }
   0xb   : > { %171 = sbr.rel (%p5057_p7) target bundleno = 166 (0xa6), region = 20 }
  0x12   : > { %174 = sbr.rel (!%p78_p3) target bundleno = 166 (0xa6), region = 24  ;;  %s176_s23 = sand.u32 (%p78_p3), 1, %s6355_s13  }
  0x13   : > { %s5460_s24 = sshll.u32 (%p78_p3), %s6363_s15, 4  ;;  %s5750_s25 = smul.u32 (%p78_p3), 2304, %s176_s23 }
  0x14   : > { %s6438_s28 = scalar_lea.vmem (%p78_p3), %s7729_s1, %s5460_s24 }
  0x15   : > { %v197_v0 = vld [vmem:[%s6438_s28] sm:$0xff] (%p78_p3)  ;;  %v199_v1 = vld [vmem:[%s6438_s28 + $0x8] sm:$0xff] (%p78_p3)  ;;  %s6446_s29 = scalar_lea.vmem (%p78_p3), [#allocation3], %s5750_s25 }
  0x16   : > { %v201_v2 = vld [vmem:[%s6438_s28 + $0x40] sm:$0xff] (%p78_p3)  ;;  %v203_v3 = vld [vmem:[%s6438_s28 + $0x48] sm:$0xff] (%p78_p3)  ;;  %198 = vst [vmem:[%s6446_s29] sm:$0xff] (%p78_p3), %v197_v0  ;;  %200 = vst [vmem:[%s6446_s29 + $0x8] sm:$0xff] (%p78_p3), %v199_v1 }
  0x17   : > { %v205_v4 = vld [vmem:[%s6438_s28 + $0x80] sm:$0xff] (%p78_p3)  ;;  %v207_v5 = vld [vmem:[%s6438_s28 + $0x88] sm:$0xff] (%p78_p3)  ;;  %202 = vst [vmem:[%s6446_s29 + $0x10] sm:$0xff] (%p78_p3), %v201_v2  ;;  %204 = vst [vmem:[%s6446_s29 + $0x18] sm:$0xff] (%p78_p3), %v203_v3 }
  0x18   : > { %206 = vst [vmem:[%s6446_s29 + $0x20] sm:$0xff] (%p78_p3), %v205_v4  ;;  %208 = vst [vmem:[%s6446_s29 + $0x28] sm:$0xff] (%p78_p3), %v207_v5  ;;  %v209_v6 = vld [vmem:[%s6438_s28 + $0xc0] sm:$0xff] (%p78_p3)  ;;  %v211_v7 = vld [vmem:[%s6438_s28 + $0xc8] sm:$0xff] (%p78_p3) }
  0x19   : > { %v213_v8 = vld [vmem:[%s6438_s28 + $0x100] sm:$0xff]  ;;  %210 = vst [vmem:[%s6446_s29 + $0x30] sm:$0xff] %v209_v6  ;;  %212 = vst [vmem:[%s6446_s29 + $0x38] sm:$0xff] %v211_v7  ;;  %v215_v9 = vld [vmem:[%s6438_s28 + $0x108] sm:$0xff] }
  0x1a   : > { %214 = vst [vmem:[%s6446_s29 + $0x40] sm:$0xff] %v213_v8  ;;  %v217_v10 = vld [vmem:[%s6438_s28 + $0x140] sm:$0xff]  ;;  %v219_v11 = vld [vmem:[%s6438_s28 + $0x148] sm:$0xff]  ;;  %216 = vst [vmem:[%s6446_s29 + $0x48] sm:$0xff] %v215_v9 }
  0x1b   : > { %218 = vst [vmem:[%s6446_s29 + $0x50] sm:$0xff] %v217_v10  ;;  %220 = vst [vmem:[%s6446_s29 + $0x58] sm:$0xff] %v219_v11  ;;  %v221_v12 = vld [vmem:[%s6438_s28 + $0x180] sm:$0xff]  ;;  %v223_v13 = vld [vmem:[%s6438_s28 + $0x188] sm:$0xff] }
  0x1c   : > { %v225_v14 = vld [vmem:[%s6438_s28 + $0x1c0] sm:$0xff]  ;;  %222 = vst [vmem:[%s6446_s29 + $0x60] sm:$0xff] %v221_v12  ;;  %224 = vst [vmem:[%s6446_s29 + $0x68] sm:$0xff] %v223_v13  ;;  %v227_v15 = vld [vmem:[%s6438_s28 + $0x1c8] sm:$0xff] }
  0x1d   : > { %226 = vst [vmem:[%s6446_s29 + $0x70] sm:$0xff] %v225_v14  ;;  %v229_v16 = vld [vmem:[%s6438_s28 + $0x200] sm:$0xff]  ;;  %v231_v17 = vld [vmem:[%s6438_s28 + $0x208] sm:$0xff]  ;;  %228 = vst [vmem:[%s6446_s29 + $0x78] sm:$0xff] %v227_v15 }
  0x1e   : > { %230 = vst [vmem:[%s6446_s29 + $0x80] sm:$0xff] %v229_v16  ;;  %232 = vst [vmem:[%s6446_s29 + $0x88] sm:$0xff] %v231_v17  ;;  %v233_v18 = vld [vmem:[%s6438_s28 + $0x240] sm:$0xff]  ;;  %v235_v19 = vld [vmem:[%s6438_s28 + $0x248] sm:$0xff] }
  0x1f   : > { %v237_v20 = vld [vmem:[%s6438_s28 + $0x280] sm:$0xff]  ;;  %234 = vst [vmem:[%s6446_s29 + $0x90] sm:$0xff] %v233_v18  ;;  %236 = vst [vmem:[%s6446_s29 + $0x98] sm:$0xff] %v235_v19  ;;  %v239_v21 = vld [vmem:[%s6438_s28 + $0x288] sm:$0xff] }
  0x20   : > { %238 = vst [vmem:[%s6446_s29 + $0xa0] sm:$0xff] %v237_v20  ;;  %v241_v22 = vld [vmem:[%s6438_s28 + $0x2c0] sm:$0xff]  ;;  %v243_v23 = vld [vmem:[%s6438_s28 + $0x2c8] sm:$0xff]  ;;  %240 = vst [vmem:[%s6446_s29 + $0xa8] sm:$0xff] %v239_v21 }
  0x21   : > { %242 = vst [vmem:[%s6446_s29 + $0xb0] sm:$0xff] %v241_v22  ;;  %244 = vst [vmem:[%s6446_s29 + $0xb8] sm:$0xff] %v243_v23  ;;  %v245_v24 = vld [vmem:[%s6438_s28 + $0x300] sm:$0xff]  ;;  %v247_v25 = vld [vmem:[%s6438_s28 + $0x308] sm:$0xff] }
  0x22   : > { %v249_v26 = vld [vmem:[%s6438_s28 + $0x340] sm:$0xff]  ;;  %246 = vst [vmem:[%s6446_s29 + $0xc0] sm:$0xff] %v245_v24  ;;  %248 = vst [vmem:[%s6446_s29 + $0xc8] sm:$0xff] %v247_v25  ;;  %v251_v27 = vld [vmem:[%s6438_s28 + $0x348] sm:$0xff] }
  0x23   : > { %250 = vst [vmem:[%s6446_s29 + $0xd0] sm:$0xff] %v249_v26  ;;  %v253_v28 = vld [vmem:[%s6438_s28 + $0x380] sm:$0xff]  ;;  %v255_v29 = vld [vmem:[%s6438_s28 + $0x388] sm:$0xff]  ;;  %252 = vst [vmem:[%s6446_s29 + $0xd8] sm:$0xff] %v251_v27 }
  0x24   : > { %254 = vst [vmem:[%s6446_s29 + $0xe0] sm:$0xff] %v253_v28  ;;  %256 = vst [vmem:[%s6446_s29 + $0xe8] sm:$0xff] %v255_v29  ;;  %v257_v30 = vld [vmem:[%s6438_s28 + $0x3c0] sm:$0xff]  ;;  %v259_v31 = vld [vmem:[%s6438_s28 + $0x3c8] sm:$0xff] }
  0x25   : > { %v261_v32 = vld [vmem:[%s6438_s28 + $0x400] sm:$0xff]  ;;  %258 = vst [vmem:[%s6446_s29 + $0xf0] sm:$0xff] %v257_v30  ;;  %260 = vst [vmem:[%s6446_s29 + $0xf8] sm:$0xff] %v259_v31  ;;  %v263_v33 = vld [vmem:[%s6438_s28 + $0x408] sm:$0xff] }
  0x26   : > { %262 = vst [vmem:[%s6446_s29 + $0x100] sm:$0xff] %v261_v32  ;;  %v265_v34 = vld [vmem:[%s6438_s28 + $0x440] sm:$0xff]  ;;  %v267_v35 = vld [vmem:[%s6438_s28 + $0x448] sm:$0xff]  ;;  %264 = vst [vmem:[%s6446_s29 + $0x108] sm:$0xff] %v263_v33 }
  0x27   : > { %266 = vst [vmem:[%s6446_s29 + $0x110] sm:$0xff] %v265_v34  ;;  %268 = vst [vmem:[%s6446_s29 + $0x118] sm:$0xff] %v267_v35  ;;  %v269_v36 = vld [vmem:[%s6438_s28 + $0x480] sm:$0xff]  ;;  %v271_v37 = vld [vmem:[%s6438_s28 + $0x488] sm:$0xff] }
  0x28   : > { %v273_v38 = vld [vmem:[%s6438_s28 + $0x4c0] sm:$0xff]  ;;  %270 = vst [vmem:[%s6446_s29 + $0x120] sm:$0xff] %v269_v36  ;;  %272 = vst [vmem:[%s6446_s29 + $0x128] sm:$0xff] %v271_v37  ;;  %v275_v39 = vld [vmem:[%s6438_s28 + $0x4c8] sm:$0xff] }
  0x29   : > { %274 = vst [vmem:[%s6446_s29 + $0x130] sm:$0xff] %v273_v38  ;;  %v277_v40 = vld [vmem:[%s6438_s28 + $0x500] sm:$0xff]  ;;  %v279_v41 = vld [vmem:[%s6438_s28 + $0x508] sm:$0xff]  ;;  %276 = vst [vmem:[%s6446_s29 + $0x138] sm:$0xff] %v275_v39 }
  0x2a   : > { %278 = vst [vmem:[%s6446_s29 + $0x140] sm:$0xff] %v277_v40  ;;  %280 = vst [vmem:[%s6446_s29 + $0x148] sm:$0xff] %v279_v41  ;;  %v281_v42 = vld [vmem:[%s6438_s28 + $0x540] sm:$0xff]  ;;  %v283_v43 = vld [vmem:[%s6438_s28 + $0x548] sm:$0xff] }
  0x2b   : > { %v285_v44 = vld [vmem:[%s6438_s28 + $0x580] sm:$0xff]  ;;  %282 = vst [vmem:[%s6446_s29 + $0x150] sm:$0xff] %v281_v42  ;;  %284 = vst [vmem:[%s6446_s29 + $0x158] sm:$0xff] %v283_v43  ;;  %v287_v45 = vld [vmem:[%s6438_s28 + $0x588] sm:$0xff] }
  0x2c   : > { %286 = vst [vmem:[%s6446_s29 + $0x160] sm:$0xff] %v285_v44  ;;  %v289_v46 = vld [vmem:[%s6438_s28 + $0x5c0] sm:$0xff]  ;;  %v291_v47 = vld [vmem:[%s6438_s28 + $0x5c8] sm:$0xff]  ;;  %288 = vst [vmem:[%s6446_s29 + $0x168] sm:$0xff] %v287_v45 }
  0x2d   : > { %290 = vst [vmem:[%s6446_s29 + $0x170] sm:$0xff] %v289_v46  ;;  %292 = vst [vmem:[%s6446_s29 + $0x178] sm:$0xff] %v291_v47  ;;  %v293_v48 = vld [vmem:[%s6438_s28 + $0x600] sm:$0xff]  ;;  %v295_v49 = vld [vmem:[%s6438_s28 + $0x608] sm:$0xff] }
  0x2e   : > { %v297_v50 = vld [vmem:[%s6438_s28 + $0x640] sm:$0xff]  ;;  %294 = vst [vmem:[%s6446_s29 + $0x180] sm:$0xff] %v293_v48  ;;  %296 = vst [vmem:[%s6446_s29 + $0x188] sm:$0xff] %v295_v49  ;;  %v299_v51 = vld [vmem:[%s6438_s28 + $0x648] sm:$0xff] }
  0x2f   : > { %298 = vst [vmem:[%s6446_s29 + $0x190] sm:$0xff] %v297_v50  ;;  %v301_v52 = vld [vmem:[%s6438_s28 + $0x680] sm:$0xff]  ;;  %v303_v53 = vld [vmem:[%s6438_s28 + $0x688] sm:$0xff]  ;;  %300 = vst [vmem:[%s6446_s29 + $0x198] sm:$0xff] %v299_v51 }
  0x30   : > { %302 = vst [vmem:[%s6446_s29 + $0x1a0] sm:$0xff] %v301_v52  ;;  %304 = vst [vmem:[%s6446_s29 + $0x1a8] sm:$0xff] %v303_v53  ;;  %v305_v54 = vld [vmem:[%s6438_s28 + $0x6c0] sm:$0xff]  ;;  %v307_v55 = vld [vmem:[%s6438_s28 + $0x6c8] sm:$0xff] }
  0x31   : > { %v309_v56 = vld [vmem:[%s6438_s28 + $0x700] sm:$0xff]  ;;  %306 = vst [vmem:[%s6446_s29 + $0x1b0] sm:$0xff] %v305_v54  ;;  %308 = vst [vmem:[%s6446_s29 + $0x1b8] sm:$0xff] %v307_v55  ;;  %v311_v57 = vld [vmem:[%s6438_s28 + $0x708] sm:$0xff] }
  0x32   : > { %310 = vst [vmem:[%s6446_s29 + $0x1c0] sm:$0xff] %v309_v56  ;;  %v313_v58 = vld [vmem:[%s6438_s28 + $0x740] sm:$0xff]  ;;  %v315_v59 = vld [vmem:[%s6438_s28 + $0x748] sm:$0xff]  ;;  %312 = vst [vmem:[%s6446_s29 + $0x1c8] sm:$0xff] %v311_v57 }
  0x33   : > { %314 = vst [vmem:[%s6446_s29 + $0x1d0] sm:$0xff] %v313_v58  ;;  %316 = vst [vmem:[%s6446_s29 + $0x1d8] sm:$0xff] %v315_v59  ;;  %v317_v60 = vld [vmem:[%s6438_s28 + $0x780] sm:$0xff]  ;;  %v319_v61 = vld [vmem:[%s6438_s28 + $0x788] sm:$0xff] }
  0x34   : > { %v321_v62 = vld [vmem:[%s6438_s28 + $0x7c0] sm:$0xff]  ;;  %318 = vst [vmem:[%s6446_s29 + $0x1e0] sm:$0xff] %v317_v60  ;;  %320 = vst [vmem:[%s6446_s29 + $0x1e8] sm:$0xff] %v319_v61  ;;  %v323_v63 = vld [vmem:[%s6438_s28 + $0x7c8] sm:$0xff] }
  0x35   : > { %322 = vst [vmem:[%s6446_s29 + $0x1f0] sm:$0xff] %v321_v62  ;;  %v325_v0 = vld [vmem:[%s6438_s28 + $0x800] sm:$0xff]  ;;  %v327_v1 = vld [vmem:[%s6438_s28 + $0x808] sm:$0xff]  ;;  %324 = vst [vmem:[%s6446_s29 + $0x1f8] sm:$0xff] %v323_v63 }
  0x36   : > { %326 = vst [vmem:[%s6446_s29 + $0x200] sm:$0xff] %v325_v0  ;;  %328 = vst [vmem:[%s6446_s29 + $0x208] sm:$0xff] %v327_v1  ;;  %v329_v2 = vld [vmem:[%s6438_s28 + $0x840] sm:$0xff]  ;;  %v331_v3 = vld [vmem:[%s6438_s28 + $0x848] sm:$0xff] }
  0x37   : > { %v333_v4 = vld [vmem:[%s6438_s28 + $0x880] sm:$0xff]  ;;  %330 = vst [vmem:[%s6446_s29 + $0x210] sm:$0xff] %v329_v2  ;;  %332 = vst [vmem:[%s6446_s29 + $0x218] sm:$0xff] %v331_v3  ;;  %v335_v5 = vld [vmem:[%s6438_s28 + $0x888] sm:$0xff] }
  0x38   : > { %334 = vst [vmem:[%s6446_s29 + $0x220] sm:$0xff] %v333_v4  ;;  %v337_v6 = vld [vmem:[%s6438_s28 + $0x8c0] sm:$0xff]  ;;  %v339_v7 = vld [vmem:[%s6438_s28 + $0x8c8] sm:$0xff]  ;;  %336 = vst [vmem:[%s6446_s29 + $0x228] sm:$0xff] %v335_v5 }
  0x39   : > { %338 = vst [vmem:[%s6446_s29 + $0x230] sm:$0xff] %v337_v6  ;;  %340 = vst [vmem:[%s6446_s29 + $0x238] sm:$0xff] %v339_v7  ;;  %v341_v8 = vld [vmem:[%s6438_s28 + $0x900] sm:$0xff]  ;;  %v343_v9 = vld [vmem:[%s6438_s28 + $0x908] sm:$0xff] }
  0x3a   : > { %v345_v10 = vld [vmem:[%s6438_s28 + $0x940] sm:$0xff]  ;;  %342 = vst [vmem:[%s6446_s29 + $0x240] sm:$0xff] %v341_v8  ;;  %344 = vst [vmem:[%s6446_s29 + $0x248] sm:$0xff] %v343_v9  ;;  %v347_v11 = vld [vmem:[%s6438_s28 + $0x948] sm:$0xff] }
  0x3b   : > { %346 = vst [vmem:[%s6446_s29 + $0x250] sm:$0xff] %v345_v10  ;;  %v349_v12 = vld [vmem:[%s6438_s28 + $0x980] sm:$0xff]  ;;  %v351_v13 = vld [vmem:[%s6438_s28 + $0x988] sm:$0xff]  ;;  %348 = vst [vmem:[%s6446_s29 + $0x258] sm:$0xff] %v347_v11 }
  0x3c   : > { %350 = vst [vmem:[%s6446_s29 + $0x260] sm:$0xff] %v349_v12  ;;  %352 = vst [vmem:[%s6446_s29 + $0x268] sm:$0xff] %v351_v13  ;;  %v353_v14 = vld [vmem:[%s6438_s28 + $0x9c0] sm:$0xff]  ;;  %v355_v15 = vld [vmem:[%s6438_s28 + $0x9c8] sm:$0xff] }
  0x3d   : > { %v357_v16 = vld [vmem:[%s6438_s28 + $0xa00] sm:$0xff]  ;;  %354 = vst [vmem:[%s6446_s29 + $0x270] sm:$0xff] %v353_v14  ;;  %356 = vst [vmem:[%s6446_s29 + $0x278] sm:$0xff] %v355_v15  ;;  %v359_v17 = vld [vmem:[%s6438_s28 + $0xa08] sm:$0xff] }
  0x3e   : > { %358 = vst [vmem:[%s6446_s29 + $0x280] sm:$0xff] %v357_v16  ;;  %v361_v18 = vld [vmem:[%s6438_s28 + $0xa40] sm:$0xff]  ;;  %v363_v19 = vld [vmem:[%s6438_s28 + $0xa48] sm:$0xff]  ;;  %360 = vst [vmem:[%s6446_s29 + $0x288] sm:$0xff] %v359_v17 }
  0x3f   : > { %362 = vst [vmem:[%s6446_s29 + $0x290] sm:$0xff] %v361_v18  ;;  %364 = vst [vmem:[%s6446_s29 + $0x298] sm:$0xff] %v363_v19  ;;  %v365_v20 = vld [vmem:[%s6438_s28 + $0xa80] sm:$0xff]  ;;  %v367_v21 = vld [vmem:[%s6438_s28 + $0xa88] sm:$0xff] }
  0x40   : > { %v369_v22 = vld [vmem:[%s6438_s28 + $0xac0] sm:$0xff]  ;;  %366 = vst [vmem:[%s6446_s29 + $0x2a0] sm:$0xff] %v365_v20  ;;  %368 = vst [vmem:[%s6446_s29 + $0x2a8] sm:$0xff] %v367_v21  ;;  %v371_v23 = vld [vmem:[%s6438_s28 + $0xac8] sm:$0xff] }
  0x41   : > { %370 = vst [vmem:[%s6446_s29 + $0x2b0] sm:$0xff] %v369_v22  ;;  %v373_v24 = vld [vmem:[%s6438_s28 + $0xb00] sm:$0xff]  ;;  %v375_v25 = vld [vmem:[%s6438_s28 + $0xb08] sm:$0xff]  ;;  %372 = vst [vmem:[%s6446_s29 + $0x2b8] sm:$0xff] %v371_v23 }
  0x42   : > { %374 = vst [vmem:[%s6446_s29 + $0x2c0] sm:$0xff] %v373_v24  ;;  %376 = vst [vmem:[%s6446_s29 + $0x2c8] sm:$0xff] %v375_v25  ;;  %v377_v26 = vld [vmem:[%s6438_s28 + $0xb40] sm:$0xff]  ;;  %v379_v27 = vld [vmem:[%s6438_s28 + $0xb48] sm:$0xff] }
  0x43   : > { %v381_v28 = vld [vmem:[%s6438_s28 + $0xb80] sm:$0xff]  ;;  %378 = vst [vmem:[%s6446_s29 + $0x2d0] sm:$0xff] %v377_v26  ;;  %380 = vst [vmem:[%s6446_s29 + $0x2d8] sm:$0xff] %v379_v27  ;;  %v383_v29 = vld [vmem:[%s6438_s28 + $0xb88] sm:$0xff] }
  0x44   : > { %382 = vst [vmem:[%s6446_s29 + $0x2e0] sm:$0xff] %v381_v28  ;;  %v385_v30 = vld [vmem:[%s6438_s28 + $0xbc0] sm:$0xff]  ;;  %v387_v31 = vld [vmem:[%s6438_s28 + $0xbc8] sm:$0xff]  ;;  %384 = vst [vmem:[%s6446_s29 + $0x2e8] sm:$0xff] %v383_v29 }
  0x45   : > { %386 = vst [vmem:[%s6446_s29 + $0x2f0] sm:$0xff] %v385_v30  ;;  %388 = vst [vmem:[%s6446_s29 + $0x2f8] sm:$0xff] %v387_v31  ;;  %v389_v32 = vld [vmem:[%s6438_s28 + $0xc00] sm:$0xff]  ;;  %v391_v33 = vld [vmem:[%s6438_s28 + $0xc08] sm:$0xff] }
  0x46   : > { %v393_v34 = vld [vmem:[%s6438_s28 + $0xc40] sm:$0xff]  ;;  %390 = vst [vmem:[%s6446_s29 + $0x300] sm:$0xff] %v389_v32  ;;  %392 = vst [vmem:[%s6446_s29 + $0x308] sm:$0xff] %v391_v33  ;;  %v395_v35 = vld [vmem:[%s6438_s28 + $0xc48] sm:$0xff] }
  0x47   : > { %394 = vst [vmem:[%s6446_s29 + $0x310] sm:$0xff] %v393_v34  ;;  %v397_v36 = vld [vmem:[%s6438_s28 + $0xc80] sm:$0xff]  ;;  %v399_v37 = vld [vmem:[%s6438_s28 + $0xc88] sm:$0xff]  ;;  %396 = vst [vmem:[%s6446_s29 + $0x318] sm:$0xff] %v395_v35 }
  0x48   : > { %398 = vst [vmem:[%s6446_s29 + $0x320] sm:$0xff] %v397_v36  ;;  %400 = vst [vmem:[%s6446_s29 + $0x328] sm:$0xff] %v399_v37  ;;  %v401_v38 = vld [vmem:[%s6438_s28 + $0xcc0] sm:$0xff]  ;;  %v403_v39 = vld [vmem:[%s6438_s28 + $0xcc8] sm:$0xff] }
  0x49   : > { %v405_v40 = vld [vmem:[%s6438_s28 + $0xd00] sm:$0xff]  ;;  %402 = vst [vmem:[%s6446_s29 + $0x330] sm:$0xff] %v401_v38  ;;  %404 = vst [vmem:[%s6446_s29 + $0x338] sm:$0xff] %v403_v39  ;;  %v407_v41 = vld [vmem:[%s6438_s28 + $0xd08] sm:$0xff] }
  0x4a   : > { %406 = vst [vmem:[%s6446_s29 + $0x340] sm:$0xff] %v405_v40  ;;  %v409_v42 = vld [vmem:[%s6438_s28 + $0xd40] sm:$0xff]  ;;  %v411_v43 = vld [vmem:[%s6438_s28 + $0xd48] sm:$0xff]  ;;  %408 = vst [vmem:[%s6446_s29 + $0x348] sm:$0xff] %v407_v41 }
  0x4b   : > { %410 = vst [vmem:[%s6446_s29 + $0x350] sm:$0xff] %v409_v42  ;;  %412 = vst [vmem:[%s6446_s29 + $0x358] sm:$0xff] %v411_v43  ;;  %v413_v44 = vld [vmem:[%s6438_s28 + $0xd80] sm:$0xff]  ;;  %v415_v45 = vld [vmem:[%s6438_s28 + $0xd88] sm:$0xff] }
  0x4c   : > { %v417_v46 = vld [vmem:[%s6438_s28 + $0xdc0] sm:$0xff]  ;;  %414 = vst [vmem:[%s6446_s29 + $0x360] sm:$0xff] %v413_v44  ;;  %416 = vst [vmem:[%s6446_s29 + $0x368] sm:$0xff] %v415_v45  ;;  %v419_v47 = vld [vmem:[%s6438_s28 + $0xdc8] sm:$0xff] }
  0x4d   : > { %418 = vst [vmem:[%s6446_s29 + $0x370] sm:$0xff] %v417_v46  ;;  %v421_v48 = vld [vmem:[%s6438_s28 + $0xe00] sm:$0xff]  ;;  %v423_v49 = vld [vmem:[%s6438_s28 + $0xe08] sm:$0xff]  ;;  %420 = vst [vmem:[%s6446_s29 + $0x378] sm:$0xff] %v419_v47 }
  0x4e   : > { %422 = vst [vmem:[%s6446_s29 + $0x380] sm:$0xff] %v421_v48  ;;  %424 = vst [vmem:[%s6446_s29 + $0x388] sm:$0xff] %v423_v49  ;;  %v425_v50 = vld [vmem:[%s6438_s28 + $0xe40] sm:$0xff]  ;;  %v427_v51 = vld [vmem:[%s6438_s28 + $0xe48] sm:$0xff] }
  0x4f   : > { %v429_v52 = vld [vmem:[%s6438_s28 + $0xe80] sm:$0xff]  ;;  %426 = vst [vmem:[%s6446_s29 + $0x390] sm:$0xff] %v425_v50  ;;  %428 = vst [vmem:[%s6446_s29 + $0x398] sm:$0xff] %v427_v51  ;;  %v431_v53 = vld [vmem:[%s6438_s28 + $0xe88] sm:$0xff] }
  0x50   : > { %430 = vst [vmem:[%s6446_s29 + $0x3a0] sm:$0xff] %v429_v52  ;;  %v433_v54 = vld [vmem:[%s6438_s28 + $0xec0] sm:$0xff]  ;;  %v435_v55 = vld [vmem:[%s6438_s28 + $0xec8] sm:$0xff]  ;;  %432 = vst [vmem:[%s6446_s29 + $0x3a8] sm:$0xff] %v431_v53 }
  0x51   : > { %434 = vst [vmem:[%s6446_s29 + $0x3b0] sm:$0xff] %v433_v54  ;;  %436 = vst [vmem:[%s6446_s29 + $0x3b8] sm:$0xff] %v435_v55  ;;  %v437_v56 = vld [vmem:[%s6438_s28 + $0xf00] sm:$0xff]  ;;  %v439_v57 = vld [vmem:[%s6438_s28 + $0xf08] sm:$0xff] }
  0x52   : > { %v441_v58 = vld [vmem:[%s6438_s28 + $0xf40] sm:$0xff]  ;;  %438 = vst [vmem:[%s6446_s29 + $0x3c0] sm:$0xff] %v437_v56  ;;  %440 = vst [vmem:[%s6446_s29 + $0x3c8] sm:$0xff] %v439_v57  ;;  %v443_v59 = vld [vmem:[%s6438_s28 + $0xf48] sm:$0xff] }
  0x53   : > { %442 = vst [vmem:[%s6446_s29 + $0x3d0] sm:$0xff] %v441_v58  ;;  %v445_v60 = vld [vmem:[%s6438_s28 + $0xf80] sm:$0xff]  ;;  %v447_v61 = vld [vmem:[%s6438_s28 + $0xf88] sm:$0xff]  ;;  %444 = vst [vmem:[%s6446_s29 + $0x3d8] sm:$0xff] %v443_v59 }
  0x54   : > { %446 = vst [vmem:[%s6446_s29 + $0x3e0] sm:$0xff] %v445_v60  ;;  %448 = vst [vmem:[%s6446_s29 + $0x3e8] sm:$0xff] %v447_v61  ;;  %v449_v62 = vld [vmem:[%s6438_s28 + $0xfc0] sm:$0xff]  ;;  %v451_v63 = vld [vmem:[%s6438_s28 + $0xfc8] sm:$0xff] }
  0x55   : > { %v453_v0 = vld [vmem:[%s6438_s28 + $0x1000] sm:$0xff]  ;;  %450 = vst [vmem:[%s6446_s29 + $0x3f0] sm:$0xff] %v449_v62  ;;  %452 = vst [vmem:[%s6446_s29 + $0x3f8] sm:$0xff] %v451_v63  ;;  %v455_v1 = vld [vmem:[%s6438_s28 + $0x1008] sm:$0xff] }
  0x56   : > { %454 = vst [vmem:[%s6446_s29 + $0x400] sm:$0xff] %v453_v0  ;;  %v457_v2 = vld [vmem:[%s6438_s28 + $0x1040] sm:$0xff]  ;;  %v459_v3 = vld [vmem:[%s6438_s28 + $0x1048] sm:$0xff]  ;;  %456 = vst [vmem:[%s6446_s29 + $0x408] sm:$0xff] %v455_v1 }
  0x57   : > { %458 = vst [vmem:[%s6446_s29 + $0x410] sm:$0xff] %v457_v2  ;;  %460 = vst [vmem:[%s6446_s29 + $0x418] sm:$0xff] %v459_v3  ;;  %v461_v4 = vld [vmem:[%s6438_s28 + $0x1080] sm:$0xff]  ;;  %v463_v5 = vld [vmem:[%s6438_s28 + $0x1088] sm:$0xff] }
  0x58   : > { %v465_v6 = vld [vmem:[%s6438_s28 + $0x10c0] sm:$0xff]  ;;  %462 = vst [vmem:[%s6446_s29 + $0x420] sm:$0xff] %v461_v4  ;;  %464 = vst [vmem:[%s6446_s29 + $0x428] sm:$0xff] %v463_v5  ;;  %v467_v7 = vld [vmem:[%s6438_s28 + $0x10c8] sm:$0xff] }
  0x59   : > { %466 = vst [vmem:[%s6446_s29 + $0x430] sm:$0xff] %v465_v6  ;;  %v469_v8 = vld [vmem:[%s6438_s28 + $0x1100] sm:$0xff]  ;;  %v471_v9 = vld [vmem:[%s6438_s28 + $0x1108] sm:$0xff]  ;;  %468 = vst [vmem:[%s6446_s29 + $0x438] sm:$0xff] %v467_v7 }
  0x5a   : > { %470 = vst [vmem:[%s6446_s29 + $0x440] sm:$0xff] %v469_v8  ;;  %472 = vst [vmem:[%s6446_s29 + $0x448] sm:$0xff] %v471_v9  ;;  %v473_v10 = vld [vmem:[%s6438_s28 + $0x1140] sm:$0xff]  ;;  %v475_v11 = vld [vmem:[%s6438_s28 + $0x1148] sm:$0xff] }
  0x5b   : > { %v477_v12 = vld [vmem:[%s6438_s28 + $0x1180] sm:$0xff]  ;;  %474 = vst [vmem:[%s6446_s29 + $0x450] sm:$0xff] %v473_v10  ;;  %476 = vst [vmem:[%s6446_s29 + $0x458] sm:$0xff] %v475_v11  ;;  %v479_v13 = vld [vmem:[%s6438_s28 + $0x1188] sm:$0xff] }
  0x5c   : > { %478 = vst [vmem:[%s6446_s29 + $0x460] sm:$0xff] %v477_v12  ;;  %v481_v14 = vld [vmem:[%s6438_s28 + $0x11c0] sm:$0xff]  ;;  %v483_v15 = vld [vmem:[%s6438_s28 + $0x11c8] sm:$0xff]  ;;  %480 = vst [vmem:[%s6446_s29 + $0x468] sm:$0xff] %v479_v13 }
  0x5d   : > { %482 = vst [vmem:[%s6446_s29 + $0x470] sm:$0xff] %v481_v14  ;;  %484 = vst [vmem:[%s6446_s29 + $0x478] sm:$0xff] %v483_v15  ;;  %v485_v16 = vld [vmem:[%s6438_s28 + $0x1200] sm:$0xff]  ;;  %v487_v17 = vld [vmem:[%s6438_s28 + $0x1208] sm:$0xff] }
  0x5e   : > { %v489_v18 = vld [vmem:[%s6438_s28 + $0x1240] sm:$0xff]  ;;  %486 = vst [vmem:[%s6446_s29 + $0x480] sm:$0xff] %v485_v16  ;;  %488 = vst [vmem:[%s6446_s29 + $0x488] sm:$0xff] %v487_v17  ;;  %v491_v19 = vld [vmem:[%s6438_s28 + $0x1248] sm:$0xff] }
  0x5f   : > { %490 = vst [vmem:[%s6446_s29 + $0x490] sm:$0xff] %v489_v18  ;;  %v493_v20 = vld [vmem:[%s6438_s28 + $0x1280] sm:$0xff]  ;;  %v495_v21 = vld [vmem:[%s6438_s28 + $0x1288] sm:$0xff]  ;;  %492 = vst [vmem:[%s6446_s29 + $0x498] sm:$0xff] %v491_v19 }
  0x60   : > { %494 = vst [vmem:[%s6446_s29 + $0x4a0] sm:$0xff] %v493_v20  ;;  %496 = vst [vmem:[%s6446_s29 + $0x4a8] sm:$0xff] %v495_v21  ;;  %v497_v22 = vld [vmem:[%s6438_s28 + $0x12c0] sm:$0xff]  ;;  %v499_v23 = vld [vmem:[%s6438_s28 + $0x12c8] sm:$0xff] }
  0x61   : > { %v501_v24 = vld [vmem:[%s6438_s28 + $0x1300] sm:$0xff]  ;;  %498 = vst [vmem:[%s6446_s29 + $0x4b0] sm:$0xff] %v497_v22  ;;  %500 = vst [vmem:[%s6446_s29 + $0x4b8] sm:$0xff] %v499_v23  ;;  %v503_v25 = vld [vmem:[%s6438_s28 + $0x1308] sm:$0xff] }
  0x62   : > { %502 = vst [vmem:[%s6446_s29 + $0x4c0] sm:$0xff] %v501_v24  ;;  %v505_v26 = vld [vmem:[%s6438_s28 + $0x1340] sm:$0xff]  ;;  %v507_v27 = vld [vmem:[%s6438_s28 + $0x1348] sm:$0xff]  ;;  %504 = vst [vmem:[%s6446_s29 + $0x4c8] sm:$0xff] %v503_v25 }
  0x63   : > { %506 = vst [vmem:[%s6446_s29 + $0x4d0] sm:$0xff] %v505_v26  ;;  %508 = vst [vmem:[%s6446_s29 + $0x4d8] sm:$0xff] %v507_v27  ;;  %v509_v28 = vld [vmem:[%s6438_s28 + $0x1380] sm:$0xff]  ;;  %v511_v29 = vld [vmem:[%s6438_s28 + $0x1388] sm:$0xff] }
  0x64   : > { %v513_v30 = vld [vmem:[%s6438_s28 + $0x13c0] sm:$0xff]  ;;  %510 = vst [vmem:[%s6446_s29 + $0x4e0] sm:$0xff] %v509_v28  ;;  %512 = vst [vmem:[%s6446_s29 + $0x4e8] sm:$0xff] %v511_v29  ;;  %v515_v31 = vld [vmem:[%s6438_s28 + $0x13c8] sm:$0xff] }
  0x65   : > { %514 = vst [vmem:[%s6446_s29 + $0x4f0] sm:$0xff] %v513_v30  ;;  %v517_v32 = vld [vmem:[%s6438_s28 + $0x1400] sm:$0xff]  ;;  %v519_v33 = vld [vmem:[%s6438_s28 + $0x1408] sm:$0xff]  ;;  %516 = vst [vmem:[%s6446_s29 + $0x4f8] sm:$0xff] %v515_v31 }
  0x66   : > { %518 = vst [vmem:[%s6446_s29 + $0x500] sm:$0xff] %v517_v32  ;;  %520 = vst [vmem:[%s6446_s29 + $0x508] sm:$0xff] %v519_v33  ;;  %v521_v34 = vld [vmem:[%s6438_s28 + $0x1440] sm:$0xff]  ;;  %v523_v35 = vld [vmem:[%s6438_s28 + $0x1448] sm:$0xff] }
  0x67   : > { %v525_v36 = vld [vmem:[%s6438_s28 + $0x1480] sm:$0xff]  ;;  %522 = vst [vmem:[%s6446_s29 + $0x510] sm:$0xff] %v521_v34  ;;  %524 = vst [vmem:[%s6446_s29 + $0x518] sm:$0xff] %v523_v35  ;;  %v527_v37 = vld [vmem:[%s6438_s28 + $0x1488] sm:$0xff] }
  0x68   : > { %526 = vst [vmem:[%s6446_s29 + $0x520] sm:$0xff] %v525_v36  ;;  %v529_v38 = vld [vmem:[%s6438_s28 + $0x14c0] sm:$0xff]  ;;  %v531_v39 = vld [vmem:[%s6438_s28 + $0x14c8] sm:$0xff]  ;;  %528 = vst [vmem:[%s6446_s29 + $0x528] sm:$0xff] %v527_v37 }
  0x69   : > { %530 = vst [vmem:[%s6446_s29 + $0x530] sm:$0xff] %v529_v38  ;;  %532 = vst [vmem:[%s6446_s29 + $0x538] sm:$0xff] %v531_v39  ;;  %v533_v40 = vld [vmem:[%s6438_s28 + $0x1500] sm:$0xff]  ;;  %v535_v41 = vld [vmem:[%s6438_s28 + $0x1508] sm:$0xff] }
  0x6a   : > { %v537_v42 = vld [vmem:[%s6438_s28 + $0x1540] sm:$0xff]  ;;  %534 = vst [vmem:[%s6446_s29 + $0x540] sm:$0xff] %v533_v40  ;;  %536 = vst [vmem:[%s6446_s29 + $0x548] sm:$0xff] %v535_v41  ;;  %v539_v43 = vld [vmem:[%s6438_s28 + $0x1548] sm:$0xff] }
  0x6b   : > { %538 = vst [vmem:[%s6446_s29 + $0x550] sm:$0xff] %v537_v42  ;;  %v541_v44 = vld [vmem:[%s6438_s28 + $0x1580] sm:$0xff]  ;;  %v543_v45 = vld [vmem:[%s6438_s28 + $0x1588] sm:$0xff]  ;;  %540 = vst [vmem:[%s6446_s29 + $0x558] sm:$0xff] %v539_v43 }
  0x6c   : > { %542 = vst [vmem:[%s6446_s29 + $0x560] sm:$0xff] %v541_v44  ;;  %544 = vst [vmem:[%s6446_s29 + $0x568] sm:$0xff] %v543_v45  ;;  %v545_v46 = vld [vmem:[%s6438_s28 + $0x15c0] sm:$0xff]  ;;  %v547_v47 = vld [vmem:[%s6438_s28 + $0x15c8] sm:$0xff] }
  0x6d   : > { %v549_v48 = vld [vmem:[%s6438_s28 + $0x1600] sm:$0xff]  ;;  %546 = vst [vmem:[%s6446_s29 + $0x570] sm:$0xff] %v545_v46  ;;  %548 = vst [vmem:[%s6446_s29 + $0x578] sm:$0xff] %v547_v47  ;;  %v551_v49 = vld [vmem:[%s6438_s28 + $0x1608] sm:$0xff] }
  0x6e   : > { %550 = vst [vmem:[%s6446_s29 + $0x580] sm:$0xff] %v549_v48  ;;  %v553_v50 = vld [vmem:[%s6438_s28 + $0x1640] sm:$0xff]  ;;  %v555_v51 = vld [vmem:[%s6438_s28 + $0x1648] sm:$0xff]  ;;  %552 = vst [vmem:[%s6446_s29 + $0x588] sm:$0xff] %v551_v49 }
  0x6f   : > { %554 = vst [vmem:[%s6446_s29 + $0x590] sm:$0xff] %v553_v50  ;;  %556 = vst [vmem:[%s6446_s29 + $0x598] sm:$0xff] %v555_v51  ;;  %v557_v52 = vld [vmem:[%s6438_s28 + $0x1680] sm:$0xff]  ;;  %v559_v53 = vld [vmem:[%s6438_s28 + $0x1688] sm:$0xff] }
  0x70   : > { %v561_v54 = vld [vmem:[%s6438_s28 + $0x16c0] sm:$0xff]  ;;  %558 = vst [vmem:[%s6446_s29 + $0x5a0] sm:$0xff] %v557_v52  ;;  %560 = vst [vmem:[%s6446_s29 + $0x5a8] sm:$0xff] %v559_v53  ;;  %v563_v55 = vld [vmem:[%s6438_s28 + $0x16c8] sm:$0xff] }
  0x71   : > { %562 = vst [vmem:[%s6446_s29 + $0x5b0] sm:$0xff] %v561_v54  ;;  %v565_v56 = vld [vmem:[%s6438_s28 + $0x1700] sm:$0xff]  ;;  %v567_v57 = vld [vmem:[%s6438_s28 + $0x1708] sm:$0xff]  ;;  %564 = vst [vmem:[%s6446_s29 + $0x5b8] sm:$0xff] %v563_v55 }
  0x72   : > { %566 = vst [vmem:[%s6446_s29 + $0x5c0] sm:$0xff] %v565_v56  ;;  %568 = vst [vmem:[%s6446_s29 + $0x5c8] sm:$0xff] %v567_v57  ;;  %v569_v58 = vld [vmem:[%s6438_s28 + $0x1740] sm:$0xff]  ;;  %v571_v59 = vld [vmem:[%s6438_s28 + $0x1748] sm:$0xff] }
  0x73   : > { %v573_v60 = vld [vmem:[%s6438_s28 + $0x1780] sm:$0xff]  ;;  %570 = vst [vmem:[%s6446_s29 + $0x5d0] sm:$0xff] %v569_v58  ;;  %572 = vst [vmem:[%s6446_s29 + $0x5d8] sm:$0xff] %v571_v59  ;;  %v575_v61 = vld [vmem:[%s6438_s28 + $0x1788] sm:$0xff] }
  0x74   : > { %574 = vst [vmem:[%s6446_s29 + $0x5e0] sm:$0xff] %v573_v60  ;;  %v577_v62 = vld [vmem:[%s6438_s28 + $0x17c0] sm:$0xff]  ;;  %v579_v63 = vld [vmem:[%s6438_s28 + $0x17c8] sm:$0xff]  ;;  %576 = vst [vmem:[%s6446_s29 + $0x5e8] sm:$0xff] %v575_v61 }
  0x75   : > { %578 = vst [vmem:[%s6446_s29 + $0x5f0] sm:$0xff] %v577_v62  ;;  %580 = vst [vmem:[%s6446_s29 + $0x5f8] sm:$0xff] %v579_v63  ;;  %v581_v0 = vld [vmem:[%s6438_s28 + $0x1800] sm:$0xff]  ;;  %v583_v1 = vld [vmem:[%s6438_s28 + $0x1808] sm:$0xff] }
  0x76   : > { %v585_v2 = vld [vmem:[%s6438_s28 + $0x1840] sm:$0xff]  ;;  %582 = vst [vmem:[%s6446_s29 + $0x600] sm:$0xff] %v581_v0  ;;  %584 = vst [vmem:[%s6446_s29 + $0x608] sm:$0xff] %v583_v1  ;;  %v587_v3 = vld [vmem:[%s6438_s28 + $0x1848] sm:$0xff] }
  0x77   : > { %586 = vst [vmem:[%s6446_s29 + $0x610] sm:$0xff] %v585_v2  ;;  %v589_v4 = vld [vmem:[%s6438_s28 + $0x1880] sm:$0xff]  ;;  %v591_v5 = vld [vmem:[%s6438_s28 + $0x1888] sm:$0xff]  ;;  %588 = vst [vmem:[%s6446_s29 + $0x618] sm:$0xff] %v587_v3 }
  0x78   : > { %590 = vst [vmem:[%s6446_s29 + $0x620] sm:$0xff] %v589_v4  ;;  %592 = vst [vmem:[%s6446_s29 + $0x628] sm:$0xff] %v591_v5  ;;  %v593_v6 = vld [vmem:[%s6438_s28 + $0x18c0] sm:$0xff]  ;;  %v595_v7 = vld [vmem:[%s6438_s28 + $0x18c8] sm:$0xff] }
  0x79   : > { %v597_v8 = vld [vmem:[%s6438_s28 + $0x1900] sm:$0xff]  ;;  %594 = vst [vmem:[%s6446_s29 + $0x630] sm:$0xff] %v593_v6  ;;  %596 = vst [vmem:[%s6446_s29 + $0x638] sm:$0xff] %v595_v7  ;;  %v599_v9 = vld [vmem:[%s6438_s28 + $0x1908] sm:$0xff] }
  0x7a   : > { %598 = vst [vmem:[%s6446_s29 + $0x640] sm:$0xff] %v597_v8  ;;  %v601_v10 = vld [vmem:[%s6438_s28 + $0x1940] sm:$0xff]  ;;  %v603_v11 = vld [vmem:[%s6438_s28 + $0x1948] sm:$0xff]  ;;  %600 = vst [vmem:[%s6446_s29 + $0x648] sm:$0xff] %v599_v9 }
  0x7b   : > { %602 = vst [vmem:[%s6446_s29 + $0x650] sm:$0xff] %v601_v10  ;;  %604 = vst [vmem:[%s6446_s29 + $0x658] sm:$0xff] %v603_v11  ;;  %v605_v12 = vld [vmem:[%s6438_s28 + $0x1980] sm:$0xff]  ;;  %v607_v13 = vld [vmem:[%s6438_s28 + $0x1988] sm:$0xff] }
  0x7c   : > { %v609_v14 = vld [vmem:[%s6438_s28 + $0x19c0] sm:$0xff]  ;;  %606 = vst [vmem:[%s6446_s29 + $0x660] sm:$0xff] %v605_v12  ;;  %608 = vst [vmem:[%s6446_s29 + $0x668] sm:$0xff] %v607_v13  ;;  %v611_v15 = vld [vmem:[%s6438_s28 + $0x19c8] sm:$0xff] }
  0x7d   : > { %610 = vst [vmem:[%s6446_s29 + $0x670] sm:$0xff] %v609_v14  ;;  %v613_v16 = vld [vmem:[%s6438_s28 + $0x1a00] sm:$0xff]  ;;  %v615_v17 = vld [vmem:[%s6438_s28 + $0x1a08] sm:$0xff]  ;;  %612 = vst [vmem:[%s6446_s29 + $0x678] sm:$0xff] %v611_v15 }
  0x7e   : > { %614 = vst [vmem:[%s6446_s29 + $0x680] sm:$0xff] %v613_v16  ;;  %616 = vst [vmem:[%s6446_s29 + $0x688] sm:$0xff] %v615_v17  ;;  %v617_v18 = vld [vmem:[%s6438_s28 + $0x1a40] sm:$0xff]  ;;  %v619_v19 = vld [vmem:[%s6438_s28 + $0x1a48] sm:$0xff] }
  0x7f   : > { %v621_v20 = vld [vmem:[%s6438_s28 + $0x1a80] sm:$0xff]  ;;  %618 = vst [vmem:[%s6446_s29 + $0x690] sm:$0xff] %v617_v18  ;;  %620 = vst [vmem:[%s6446_s29 + $0x698] sm:$0xff] %v619_v19  ;;  %v623_v21 = vld [vmem:[%s6438_s28 + $0x1a88] sm:$0xff] }
  0x80   : > { %622 = vst [vmem:[%s6446_s29 + $0x6a0] sm:$0xff] %v621_v20  ;;  %v625_v22 = vld [vmem:[%s6438_s28 + $0x1ac0] sm:$0xff]  ;;  %v627_v23 = vld [vmem:[%s6438_s28 + $0x1ac8] sm:$0xff]  ;;  %624 = vst [vmem:[%s6446_s29 + $0x6a8] sm:$0xff] %v623_v21 }
  0x81   : > { %626 = vst [vmem:[%s6446_s29 + $0x6b0] sm:$0xff] %v625_v22  ;;  %628 = vst [vmem:[%s6446_s29 + $0x6b8] sm:$0xff] %v627_v23  ;;  %v629_v24 = vld [vmem:[%s6438_s28 + $0x1b00] sm:$0xff]  ;;  %v631_v25 = vld [vmem:[%s6438_s28 + $0x1b08] sm:$0xff] }
  0x82   : > { %v633_v26 = vld [vmem:[%s6438_s28 + $0x1b40] sm:$0xff]  ;;  %630 = vst [vmem:[%s6446_s29 + $0x6c0] sm:$0xff] %v629_v24  ;;  %632 = vst [vmem:[%s6446_s29 + $0x6c8] sm:$0xff] %v631_v25  ;;  %v635_v27 = vld [vmem:[%s6438_s28 + $0x1b48] sm:$0xff] }
  0x83   : > { %634 = vst [vmem:[%s6446_s29 + $0x6d0] sm:$0xff] %v633_v26  ;;  %v637_v28 = vld [vmem:[%s6438_s28 + $0x1b80] sm:$0xff]  ;;  %v639_v29 = vld [vmem:[%s6438_s28 + $0x1b88] sm:$0xff]  ;;  %636 = vst [vmem:[%s6446_s29 + $0x6d8] sm:$0xff] %v635_v27 }
  0x84   : > { %638 = vst [vmem:[%s6446_s29 + $0x6e0] sm:$0xff] %v637_v28  ;;  %640 = vst [vmem:[%s6446_s29 + $0x6e8] sm:$0xff] %v639_v29  ;;  %v641_v30 = vld [vmem:[%s6438_s28 + $0x1bc0] sm:$0xff]  ;;  %v643_v31 = vld [vmem:[%s6438_s28 + $0x1bc8] sm:$0xff] }
  0x85   : > { %v645_v32 = vld [vmem:[%s6438_s28 + $0x1c00] sm:$0xff]  ;;  %642 = vst [vmem:[%s6446_s29 + $0x6f0] sm:$0xff] %v641_v30  ;;  %644 = vst [vmem:[%s6446_s29 + $0x6f8] sm:$0xff] %v643_v31  ;;  %v647_v33 = vld [vmem:[%s6438_s28 + $0x1c08] sm:$0xff] }
  0x86   : > { %646 = vst [vmem:[%s6446_s29 + $0x700] sm:$0xff] %v645_v32  ;;  %v649_v34 = vld [vmem:[%s6438_s28 + $0x1c40] sm:$0xff]  ;;  %v651_v35 = vld [vmem:[%s6438_s28 + $0x1c48] sm:$0xff]  ;;  %648 = vst [vmem:[%s6446_s29 + $0x708] sm:$0xff] %v647_v33 }
  0x87   : > { %650 = vst [vmem:[%s6446_s29 + $0x710] sm:$0xff] %v649_v34  ;;  %652 = vst [vmem:[%s6446_s29 + $0x718] sm:$0xff] %v651_v35  ;;  %v653_v36 = vld [vmem:[%s6438_s28 + $0x1c80] sm:$0xff]  ;;  %v655_v37 = vld [vmem:[%s6438_s28 + $0x1c88] sm:$0xff] }
  0x88   : > { %v657_v38 = vld [vmem:[%s6438_s28 + $0x1cc0] sm:$0xff]  ;;  %654 = vst [vmem:[%s6446_s29 + $0x720] sm:$0xff] %v653_v36  ;;  %656 = vst [vmem:[%s6446_s29 + $0x728] sm:$0xff] %v655_v37  ;;  %v659_v39 = vld [vmem:[%s6438_s28 + $0x1cc8] sm:$0xff] }
  0x89   : > { %658 = vst [vmem:[%s6446_s29 + $0x730] sm:$0xff] %v657_v38  ;;  %v661_v40 = vld [vmem:[%s6438_s28 + $0x1d00] sm:$0xff]  ;;  %v663_v41 = vld [vmem:[%s6438_s28 + $0x1d08] sm:$0xff]  ;;  %660 = vst [vmem:[%s6446_s29 + $0x738] sm:$0xff] %v659_v39 }
  0x8a   : > { %662 = vst [vmem:[%s6446_s29 + $0x740] sm:$0xff] %v661_v40  ;;  %664 = vst [vmem:[%s6446_s29 + $0x748] sm:$0xff] %v663_v41  ;;  %v665_v42 = vld [vmem:[%s6438_s28 + $0x1d40] sm:$0xff]  ;;  %v667_v43 = vld [vmem:[%s6438_s28 + $0x1d48] sm:$0xff] }
  0x8b   : > { %v669_v44 = vld [vmem:[%s6438_s28 + $0x1d80] sm:$0xff]  ;;  %666 = vst [vmem:[%s6446_s29 + $0x750] sm:$0xff] %v665_v42  ;;  %668 = vst [vmem:[%s6446_s29 + $0x758] sm:$0xff] %v667_v43  ;;  %v671_v45 = vld [vmem:[%s6438_s28 + $0x1d88] sm:$0xff] }
  0x8c   : > { %670 = vst [vmem:[%s6446_s29 + $0x760] sm:$0xff] %v669_v44  ;;  %v673_v46 = vld [vmem:[%s6438_s28 + $0x1dc0] sm:$0xff]  ;;  %v675_v47 = vld [vmem:[%s6438_s28 + $0x1dc8] sm:$0xff]  ;;  %672 = vst [vmem:[%s6446_s29 + $0x768] sm:$0xff] %v671_v45 }
  0x8d   : > { %674 = vst [vmem:[%s6446_s29 + $0x770] sm:$0xff] %v673_v46  ;;  %676 = vst [vmem:[%s6446_s29 + $0x778] sm:$0xff] %v675_v47  ;;  %v677_v48 = vld [vmem:[%s6438_s28 + $0x1e00] sm:$0xff]  ;;  %v679_v49 = vld [vmem:[%s6438_s28 + $0x1e08] sm:$0xff] }
  0x8e   : > { %v681_v50 = vld [vmem:[%s6438_s28 + $0x1e40] sm:$0xff]  ;;  %678 = vst [vmem:[%s6446_s29 + $0x780] sm:$0xff] %v677_v48  ;;  %680 = vst [vmem:[%s6446_s29 + $0x788] sm:$0xff] %v679_v49  ;;  %v683_v51 = vld [vmem:[%s6438_s28 + $0x1e48] sm:$0xff] }
  0x8f   : > { %682 = vst [vmem:[%s6446_s29 + $0x790] sm:$0xff] %v681_v50  ;;  %v685_v52 = vld [vmem:[%s6438_s28 + $0x1e80] sm:$0xff]  ;;  %v687_v53 = vld [vmem:[%s6438_s28 + $0x1e88] sm:$0xff]  ;;  %684 = vst [vmem:[%s6446_s29 + $0x798] sm:$0xff] %v683_v51 }
  0x90   : > { %686 = vst [vmem:[%s6446_s29 + $0x7a0] sm:$0xff] %v685_v52  ;;  %688 = vst [vmem:[%s6446_s29 + $0x7a8] sm:$0xff] %v687_v53  ;;  %v689_v54 = vld [vmem:[%s6438_s28 + $0x1ec0] sm:$0xff]  ;;  %v691_v55 = vld [vmem:[%s6438_s28 + $0x1ec8] sm:$0xff] }
  0x91   : > { %v693_v56 = vld [vmem:[%s6438_s28 + $0x1f00] sm:$0xff]  ;;  %690 = vst [vmem:[%s6446_s29 + $0x7b0] sm:$0xff] %v689_v54  ;;  %692 = vst [vmem:[%s6446_s29 + $0x7b8] sm:$0xff] %v691_v55  ;;  %v695_v57 = vld [vmem:[%s6438_s28 + $0x1f08] sm:$0xff] }
  0x92   : > { %694 = vst [vmem:[%s6446_s29 + $0x7c0] sm:$0xff] %v693_v56  ;;  %v697_v58 = vld [vmem:[%s6438_s28 + $0x1f40] sm:$0xff]  ;;  %v699_v59 = vld [vmem:[%s6438_s28 + $0x1f48] sm:$0xff]  ;;  %696 = vst [vmem:[%s6446_s29 + $0x7c8] sm:$0xff] %v695_v57 }
  0x93   : > { %698 = vst [vmem:[%s6446_s29 + $0x7d0] sm:$0xff] %v697_v58  ;;  %700 = vst [vmem:[%s6446_s29 + $0x7d8] sm:$0xff] %v699_v59  ;;  %v701_v60 = vld [vmem:[%s6438_s28 + $0x1f80] sm:$0xff]  ;;  %v703_v61 = vld [vmem:[%s6438_s28 + $0x1f88] sm:$0xff] }
  0x94   : > { %v705_v62 = vld [vmem:[%s6438_s28 + $0x1fc0] sm:$0xff]  ;;  %702 = vst [vmem:[%s6446_s29 + $0x7e0] sm:$0xff] %v701_v60  ;;  %704 = vst [vmem:[%s6446_s29 + $0x7e8] sm:$0xff] %v703_v61  ;;  %v707_v63 = vld [vmem:[%s6438_s28 + $0x1fc8] sm:$0xff] }
  0x95   : > { %706 = vst [vmem:[%s6446_s29 + $0x7f0] sm:$0xff] %v705_v62  ;;  %v709_v0 = vld [vmem:[%s6438_s28 + $0x2000] sm:$0xff]  ;;  %v711_v1 = vld [vmem:[%s6438_s28 + $0x2008] sm:$0xff]  ;;  %708 = vst [vmem:[%s6446_s29 + $0x7f8] sm:$0xff] %v707_v63 }
  0x96   : > { %710 = vst [vmem:[%s6446_s29 + $0x800] sm:$0xff] %v709_v0  ;;  %712 = vst [vmem:[%s6446_s29 + $0x808] sm:$0xff] %v711_v1  ;;  %v713_v2 = vld [vmem:[%s6438_s28 + $0x2040] sm:$0xff]  ;;  %v715_v3 = vld [vmem:[%s6438_s28 + $0x2048] sm:$0xff] }
  0x97   : > { %v717_v4 = vld [vmem:[%s6438_s28 + $0x2080] sm:$0xff]  ;;  %714 = vst [vmem:[%s6446_s29 + $0x810] sm:$0xff] %v713_v2  ;;  %716 = vst [vmem:[%s6446_s29 + $0x818] sm:$0xff] %v715_v3  ;;  %v719_v5 = vld [vmem:[%s6438_s28 + $0x2088] sm:$0xff] }
  0x98   : > { %718 = vst [vmem:[%s6446_s29 + $0x820] sm:$0xff] %v717_v4  ;;  %v721_v6 = vld [vmem:[%s6438_s28 + $0x20c0] sm:$0xff]  ;;  %v723_v7 = vld [vmem:[%s6438_s28 + $0x20c8] sm:$0xff]  ;;  %720 = vst [vmem:[%s6446_s29 + $0x828] sm:$0xff] %v719_v5 }
  0x99   : > { %722 = vst [vmem:[%s6446_s29 + $0x830] sm:$0xff] %v721_v6  ;;  %724 = vst [vmem:[%s6446_s29 + $0x838] sm:$0xff] %v723_v7  ;;  %v725_v8 = vld [vmem:[%s6438_s28 + $0x2100] sm:$0xff]  ;;  %v727_v9 = vld [vmem:[%s6438_s28 + $0x2108] sm:$0xff] }
  0x9a   : > { %v729_v10 = vld [vmem:[%s6438_s28 + $0x2140] sm:$0xff]  ;;  %726 = vst [vmem:[%s6446_s29 + $0x840] sm:$0xff] %v725_v8  ;;  %728 = vst [vmem:[%s6446_s29 + $0x848] sm:$0xff] %v727_v9  ;;  %v731_v11 = vld [vmem:[%s6438_s28 + $0x2148] sm:$0xff] }
  0x9b   : > { %730 = vst [vmem:[%s6446_s29 + $0x850] sm:$0xff] %v729_v10  ;;  %v733_v12 = vld [vmem:[%s6438_s28 + $0x2180] sm:$0xff]  ;;  %v735_v13 = vld [vmem:[%s6438_s28 + $0x2188] sm:$0xff]  ;;  %732 = vst [vmem:[%s6446_s29 + $0x858] sm:$0xff] %v731_v11 }
  0x9c   : > { %734 = vst [vmem:[%s6446_s29 + $0x860] sm:$0xff] %v733_v12  ;;  %736 = vst [vmem:[%s6446_s29 + $0x868] sm:$0xff] %v735_v13  ;;  %v737_v14 = vld [vmem:[%s6438_s28 + $0x21c0] sm:$0xff]  ;;  %v739_v15 = vld [vmem:[%s6438_s28 + $0x21c8] sm:$0xff] }
  0x9d   : > { %v741_v16 = vld [vmem:[%s6438_s28 + $0x2200] sm:$0xff]  ;;  %738 = vst [vmem:[%s6446_s29 + $0x870] sm:$0xff] %v737_v14  ;;  %740 = vst [vmem:[%s6446_s29 + $0x878] sm:$0xff] %v739_v15  ;;  %v743_v17 = vld [vmem:[%s6438_s28 + $0x2208] sm:$0xff] }
  0x9e   : > { %742 = vst [vmem:[%s6446_s29 + $0x880] sm:$0xff] %v741_v16  ;;  %v745_v18 = vld [vmem:[%s6438_s28 + $0x2240] sm:$0xff]  ;;  %v747_v19 = vld [vmem:[%s6438_s28 + $0x2248] sm:$0xff]  ;;  %744 = vst [vmem:[%s6446_s29 + $0x888] sm:$0xff] %v743_v17 }
  0x9f   : > { %746 = vst [vmem:[%s6446_s29 + $0x890] sm:$0xff] %v745_v18  ;;  %748 = vst [vmem:[%s6446_s29 + $0x898] sm:$0xff] %v747_v19  ;;  %v749_v20 = vld [vmem:[%s6438_s28 + $0x2280] sm:$0xff]  ;;  %v751_v21 = vld [vmem:[%s6438_s28 + $0x2288] sm:$0xff] }
  0xa0   : > { %v753_v22 = vld [vmem:[%s6438_s28 + $0x22c0] sm:$0xff]  ;;  %750 = vst [vmem:[%s6446_s29 + $0x8a0] sm:$0xff] %v749_v20  ;;  %752 = vst [vmem:[%s6446_s29 + $0x8a8] sm:$0xff] %v751_v21  ;;  %v755_v23 = vld [vmem:[%s6438_s28 + $0x22c8] sm:$0xff] }
  0xa1   : > { %754 = vst [vmem:[%s6446_s29 + $0x8b0] sm:$0xff] %v753_v22  ;;  %v757_v24 = vld [vmem:[%s6438_s28 + $0x2300] sm:$0xff]  ;;  %v759_v25 = vld [vmem:[%s6438_s28 + $0x2308] sm:$0xff]  ;;  %756 = vst [vmem:[%s6446_s29 + $0x8b8] sm:$0xff] %v755_v23 }
  0xa2   : > { %758 = vst [vmem:[%s6446_s29 + $0x8c0] sm:$0xff] %v757_v24  ;;  %760 = vst [vmem:[%s6446_s29 + $0x8c8] sm:$0xff] %v759_v25  ;;  %v761_v26 = vld [vmem:[%s6438_s28 + $0x2340] sm:$0xff]  ;;  %v763_v27 = vld [vmem:[%s6438_s28 + $0x2348] sm:$0xff] }
  0xa3   : > { %v765_v28 = vld [vmem:[%s6438_s28 + $0x2380] sm:$0xff]  ;;  %762 = vst [vmem:[%s6446_s29 + $0x8d0] sm:$0xff] %v761_v26  ;;  %764 = vst [vmem:[%s6446_s29 + $0x8d8] sm:$0xff] %v763_v27  ;;  %v767_v29 = vld [vmem:[%s6438_s28 + $0x2388] sm:$0xff] }
  0xa4   : > { %766 = vst [vmem:[%s6446_s29 + $0x8e0] sm:$0xff] %v765_v28  ;;  %v769_v30 = vld [vmem:[%s6438_s28 + $0x23c0] sm:$0xff]  ;;  %v771_v31 = vld [vmem:[%s6438_s28 + $0x23c8] sm:$0xff]  ;;  %768 = vst [vmem:[%s6446_s29 + $0x8e8] sm:$0xff] %v767_v29 }
  0xa5   : > { %770 = vst [vmem:[%s6446_s29 + $0x8f0] sm:$0xff] %v769_v30  ;;  %772 = vst [vmem:[%s6446_s29 + $0x8f8] sm:$0xff] %v771_v31 }
  0xa6 PF: > { %p5060_p8 = scmp.ge.s32.totalorder %s6367_s16, 1  ;;  %p785_p9 = scmp.lt.s32.totalorder %s6367_s16, 5 }
  0xa8   : > { %p786_p10 = pnand %p5060_p8, %p785_p9 }
  0xa9   : > { %s792_s30 = sand.u32 (!%p786_p10), 1, %s6351_s12   ;;  %v5891_v32 = vld [vmem:[%s7728_s0 + $0x4] ss:$36 sps:$4 sm:$0xff] (!%p786_p10)   ;;  %s5062_s18 = sshll.u32 (!%p786_p10), %s6359_s14, 2 }
  0xaa   : > { %789 = sbr.rel (%p786_p10) target bundleno = 781 (0x30d), region = 51  ;;  %3190 = vmatprep.mubr.bf16.mxu0 (!%p786_p10), %v5891_v32  ;;  %3755 = vmatprep.mubr.bf16.mxu1 (!%p786_p10), %v5891_v32  ;;  %p843_p11 = scmp.lt.s32.totalorder (!%p786_p10), %s5062_s18, 15 }
  0xab   : > { %s5751_s4 = smul.u32 (!%p786_p10), 2304, %s792_s30  ;;  %s5061_s24 = sshll.u32 (!%p786_p10), %s792_s30, 8 }
  0xac   : > { %s7551_s12 = scalar_lea.vmem (!%p786_p10), [#allocation4], %s5061_s24 }
  0xad   : > { %s7026_s7 = scalar_lea.vmem (!%p786_p10), [#allocation3], %s5751_s4 }
  0xae   : > { %v5793_v33 = vld [vmem:[%s7026_s7 + $0x4] ss:$16 sps:$4 sm:$0xff] (!%p786_p10)   ;;  %v5795_v34 = vld [vmem:[%s7026_s7 + $0xc] ss:$16 sps:$4 sm:$0xff] (!%p786_p10)   ;;  %v5797_v35 = vld [vmem:[%s7026_s7] ss:$16 sps:$4 sm:$0xff] (!%p786_p10)  }
  0xaf   : > { %3158 = vmatprep.subr.bf16.mxu0 (!%p786_p10), %v5793_v33  ;;  %v5798_v36 = vld [vmem:[%s7026_s7 + $0x8] ss:$16 sps:$4 sm:$0xff] (!%p786_p10)   ;;  %3723 = vmatprep.subr.bf16.mxu1 (!%p786_p10), %v5795_v34  ;;  %v5799_v37 = vld [vmem:[%s7026_s7 + $0x24] ss:$16 sps:$4 sm:$0xff] (!%p786_p10)   ;;  %v5801_v38 = vld [vmem:[%s7026_s7 + $0x2c] ss:$16 sps:$4 sm:$0xff] (!%p786_p10)  }
  0xb0   : > { %3159 = vmatpush1.bf16.msra.mxu0 (!%p786_p10), %v5797_v35  ;;  %3724 = vmatpush1.bf16.msra.mxu1 (!%p786_p10), %v5798_v36  ;;  %v5803_v39 = vld [vmem:[%s7026_s7 + $0x20] ss:$16 sps:$4 sm:$0xff] (!%p786_p10)   ;;  %v5804_v40 = vld [vmem:[%s7026_s7 + $0x28] ss:$16 sps:$4 sm:$0xff] (!%p786_p10)   ;;  %v5805_v41 = vld [vmem:[%s7026_s7 + $0x44] ss:$16 sps:$4 sm:$0xff] (!%p786_p10)  }
  0xb1   : > { %3160 = vmatprep.subr.bf16.mxu0 %v5799_v37  ;;  %3725 = vmatprep.subr.bf16.mxu1 %v5801_v38  ;;  %v5807_v42 = vld [vmem:[%s7026_s7 + $0x4c] ss:$16 sps:$4 sm:$0xff]   ;;  %v5809_v43 = vld [vmem:[%s7026_s7 + $0x40] ss:$16 sps:$4 sm:$0xff]   ;;  %v5810_v44 = vld [vmem:[%s7026_s7 + $0x48] ss:$16 sps:$4 sm:$0xff]  }
  0xb2   : > { %v5811_v45 = vld [vmem:[%s7026_s7 + $0x64] ss:$16 sps:$4 sm:$0xff]   ;;  %v5813_v46 = vld [vmem:[%s7026_s7 + $0x6c] ss:$16 sps:$4 sm:$0xff]   ;;  %v5815_v47 = vld [vmem:[%s7026_s7 + $0x60] ss:$16 sps:$4 sm:$0xff]  }
  0xb3   : > { %v5816_v48 = vld [vmem:[%s7026_s7 + $0x68] ss:$16 sps:$4 sm:$0xff]   ;;  %v5817_v49 = vld [vmem:[%s7026_s7 + $0x84] ss:$16 sps:$4 sm:$0xff]   ;;  %v5819_v50 = vld [vmem:[%s7026_s7 + $0x8c] ss:$16 sps:$4 sm:$0xff]  }
  0xb4   : > { %3161 = vmatpush1.bf16.msra.mxu0 %v5803_v39  ;;  %3726 = vmatpush1.bf16.msra.mxu1 %v5804_v40  ;;  %v5821_v51 = vld [vmem:[%s7026_s7 + $0x80] ss:$16 sps:$4 sm:$0xff]   ;;  %v5822_v52 = vld [vmem:[%s7026_s7 + $0x88] ss:$16 sps:$4 sm:$0xff]   ;;  %v5823_v53 = vld [vmem:[%s7026_s7 + $0xa4] ss:$16 sps:$4 sm:$0xff]  }
  0xb5   : > { %3162 = vmatprep.subr.bf16.mxu0 %v5805_v41  ;;  %3727 = vmatprep.subr.bf16.mxu1 %v5807_v42  ;;  %v5825_v54 = vld [vmem:[%s7026_s7 + $0xac] ss:$16 sps:$4 sm:$0xff]   ;;  %v5827_v55 = vld [vmem:[%s7026_s7 + $0xa0] ss:$16 sps:$4 sm:$0xff]   ;;  %v5828_v56 = vld [vmem:[%s7026_s7 + $0xa8] ss:$16 sps:$4 sm:$0xff]  }
  0xb6   : > { %v5829_v57 = vld [vmem:[%s7026_s7 + $0xc4] ss:$16 sps:$4 sm:$0xff]   ;;  %v5831_v58 = vld [vmem:[%s7026_s7 + $0xcc] ss:$16 sps:$4 sm:$0xff]   ;;  %v5833_v59 = vld [vmem:[%s7026_s7 + $0xc0] ss:$16 sps:$4 sm:$0xff]  }
  0xb7   : > { %v5834_v60 = vld [vmem:[%s7026_s7 + $0xc8] ss:$16 sps:$4 sm:$0xff]   ;;  %v5835_v61 = vld [vmem:[%s7026_s7 + $0xe4] ss:$16 sps:$4 sm:$0xff]   ;;  %v5837_v62 = vld [vmem:[%s7026_s7 + $0xec] ss:$16 sps:$4 sm:$0xff]  }
  0xb8   : > { %3163 = vmatpush1.bf16.msra.mxu0 %v5809_v43  ;;  %3728 = vmatpush1.bf16.msra.mxu1 %v5810_v44  ;;  %v5839_v63 = vld [vmem:[%s7026_s7 + $0xe0] ss:$16 sps:$4 sm:$0xff]   ;;  %v5840_v0 = vld [vmem:[%s7026_s7 + $0xe8] ss:$16 sps:$4 sm:$0xff]   ;;  %v5841_v1 = vld [vmem:[%s7026_s7 + $0x104] ss:$16 sps:$4 sm:$0xff]  }
  0xb9   : > { %3164 = vmatprep.subr.bf16.mxu0 %v5811_v45  ;;  %3729 = vmatprep.subr.bf16.mxu1 %v5813_v46  ;;  %v5843_v2 = vld [vmem:[%s7026_s7 + $0x10c] ss:$16 sps:$4 sm:$0xff]   ;;  %v5845_v3 = vld [vmem:[%s7026_s7 + $0x100] ss:$16 sps:$4 sm:$0xff]   ;;  %v5846_v4 = vld [vmem:[%s7026_s7 + $0x108] ss:$16 sps:$4 sm:$0xff]  }
  0xba   : > { %v5847_v5 = vld [vmem:[%s7026_s7 + $0x124] ss:$16 sps:$4 sm:$0xff]   ;;  %v5849_v6 = vld [vmem:[%s7026_s7 + $0x12c] ss:$16 sps:$4 sm:$0xff]   ;;  %v5851_v7 = vld [vmem:[%s7026_s7 + $0x120] ss:$16 sps:$4 sm:$0xff]  }
  0xbb   : > { %v5852_v8 = vld [vmem:[%s7026_s7 + $0x128] ss:$16 sps:$4 sm:$0xff]   ;;  %v5853_v9 = vld [vmem:[%s7026_s7 + $0x144] ss:$16 sps:$4 sm:$0xff]   ;;  %v5855_v10 = vld [vmem:[%s7026_s7 + $0x14c] ss:$16 sps:$4 sm:$0xff]  }
  0xbc   : > { %3165 = vmatpush1.bf16.msra.mxu0 %v5815_v47  ;;  %3730 = vmatpush1.bf16.msra.mxu1 %v5816_v48  ;;  %v5857_v11 = vld [vmem:[%s7026_s7 + $0x140] ss:$16 sps:$4 sm:$0xff]   ;;  %v5858_v12 = vld [vmem:[%s7026_s7 + $0x148] ss:$16 sps:$4 sm:$0xff]   ;;  %v5859_v13 = vld [vmem:[%s7026_s7 + $0x164] ss:$16 sps:$4 sm:$0xff]  }
  0xbd   : > { %3166 = vmatprep.subr.bf16.mxu0 %v5817_v49  ;;  %3731 = vmatprep.subr.bf16.mxu1 %v5819_v50  ;;  %v5861_v14 = vld [vmem:[%s7026_s7 + $0x16c] ss:$16 sps:$4 sm:$0xff]   ;;  %v5863_v15 = vld [vmem:[%s7026_s7 + $0x160] ss:$16 sps:$4 sm:$0xff]   ;;  %v5864_v16 = vld [vmem:[%s7026_s7 + $0x168] ss:$16 sps:$4 sm:$0xff]  }
  0xbe   : > { %v5865_v17 = vld [vmem:[%s7026_s7 + $0x184] ss:$16 sps:$4 sm:$0xff]   ;;  %v5867_v18 = vld [vmem:[%s7026_s7 + $0x18c] ss:$16 sps:$4 sm:$0xff]   ;;  %v5869_v19 = vld [vmem:[%s7026_s7 + $0x180] ss:$16 sps:$4 sm:$0xff]  }
  0xbf   : > { %v5870_v20 = vld [vmem:[%s7026_s7 + $0x188] ss:$16 sps:$4 sm:$0xff]   ;;  %v5871_v21 = vld [vmem:[%s7026_s7 + $0x1a4] ss:$16 sps:$4 sm:$0xff]   ;;  %v5873_v22 = vld [vmem:[%s7026_s7 + $0x1ac] ss:$16 sps:$4 sm:$0xff]  }
  0xc0   : > { %3167 = vmatpush1.bf16.msra.mxu0 %v5821_v51  ;;  %3732 = vmatpush1.bf16.msra.mxu1 %v5822_v52  ;;  %v5875_v23 = vld [vmem:[%s7026_s7 + $0x1a0] ss:$16 sps:$4 sm:$0xff]   ;;  %v5876_v24 = vld [vmem:[%s7026_s7 + $0x1a8] ss:$16 sps:$4 sm:$0xff]   ;;  %v5877_v25 = vld [vmem:[%s7026_s7 + $0x1c4] ss:$16 sps:$4 sm:$0xff]  }
  0xc1   : > { %3168 = vmatprep.subr.bf16.mxu0 %v5823_v53  ;;  %3733 = vmatprep.subr.bf16.mxu1 %v5825_v54  ;;  %v5879_v26 = vld [vmem:[%s7026_s7 + $0x1cc] ss:$16 sps:$4 sm:$0xff]   ;;  %v5881_v27 = vld [vmem:[%s7026_s7 + $0x1c0] ss:$16 sps:$4 sm:$0xff]   ;;  %v5882_v28 = vld [vmem:[%s7026_s7 + $0x1c8] ss:$16 sps:$4 sm:$0xff]  }
  0xc2   : > { %v5883_v29 = vld [vmem:[%s7026_s7 + $0x1e4] ss:$16 sps:$4 sm:$0xff]   ;;  %v5885_v30 = vld [vmem:[%s7026_s7 + $0x1ec] ss:$16 sps:$4 sm:$0xff]   ;;  %v5887_v31 = vld [vmem:[%s7026_s7 + $0x1e0] ss:$16 sps:$4 sm:$0xff]  }
  0xc3   : > { %v5888_v32 = vld [vmem:[%s7026_s7 + $0x1e8] ss:$16 sps:$4 sm:$0xff]   ;;  %v5894_v33 = vld [vmem:[%s7026_s7 + $0x204] ss:$16 sps:$4 sm:$0xff]   ;;  %v5897_v34 = vld [vmem:[%s7026_s7 + $0x20c] ss:$16 sps:$4 sm:$0xff]  }
  0xc4   : > { %3169 = vmatpush1.bf16.msra.mxu0 %v5827_v55  ;;  %3734 = vmatpush1.bf16.msra.mxu1 %v5828_v56  ;;  %v5889_v35 = vld [vmem:[%s7728_s0] ss:$36 sps:$4 sm:$0xff]   ;;  %v5895_v37 = vld [vmem:[%s7026_s7 + $0x208] ss:$16 sps:$4 sm:$0xff]   ;;  %v5903_v39 = vld [vmem:[%s7026_s7 + $0x22c] ss:$16 sps:$4 sm:$0xff]  }
  0xc5   : > { %3170 = vmatprep.subr.bf16.mxu0 %v5829_v57  ;;  %3735 = vmatprep.subr.bf16.mxu1 %v5831_v58  ;;  %v5892_v36 = vld [vmem:[%s7026_s7 + $0x200] ss:$16 sps:$4 sm:$0xff]   ;;  %v5900_v38 = vld [vmem:[%s7026_s7 + $0x224] ss:$16 sps:$4 sm:$0xff]   ;;  %v5901_v42 = vld [vmem:[%s7026_s7 + $0x228] ss:$16 sps:$4 sm:$0xff]  }
  0xc6   : > { %v5904_v40 = vld [vmem:[%s7728_s0 + $0x4c] ss:$36 sps:$4 sm:$0xff]   ;;  %v5909_v43 = vld [vmem:[%s7026_s7 + $0x244] ss:$16 sps:$4 sm:$0xff]   ;;  %v5910_v47 = vld [vmem:[%s7026_s7 + $0x248] ss:$16 sps:$4 sm:$0xff]  }
  0xc7   : > { %v5898_v41 = vld [vmem:[%s7026_s7 + $0x220] ss:$16 sps:$4 sm:$0xff]   ;;  %v5912_v44 = vld [vmem:[%s7026_s7 + $0x24c] ss:$16 sps:$4 sm:$0xff]   ;;  %v5915_v48 = vld [vmem:[%s7026_s7 + $0x264] ss:$16 sps:$4 sm:$0xff]  }
  0xc8   : > { %3171 = vmatpush1.bf16.msra.mxu0 %v5833_v59  ;;  %3736 = vmatpush1.bf16.msra.mxu1 %v5834_v60  ;;  %v5906_v45 = vld [vmem:[%s7728_s0 + $0x48] ss:$36 sps:$4 sm:$0xff]   ;;  %v5907_v46 = vld [vmem:[%s7026_s7 + $0x240] ss:$16 sps:$4 sm:$0xff]   ;;  %v5919_v50 = vld [vmem:[%s7728_s0 + $0x94] ss:$36 sps:$4 sm:$0xff]  }
  0xc9   : > { %3172 = vmatprep.subr.bf16.mxu0 %v5835_v61  ;;  %3737 = vmatprep.subr.bf16.mxu1 %v5837_v62  ;;  %v5918_v49 = vld [vmem:[%s7026_s7 + $0x26c] ss:$16 sps:$4 sm:$0xff]   ;;  %v5913_v51 = vld [vmem:[%s7026_s7 + $0x260] ss:$16 sps:$4 sm:$0xff]   ;;  %v5916_v52 = vld [vmem:[%s7026_s7 + $0x268] ss:$16 sps:$4 sm:$0xff]  }
  0xca   : > { %v5924_v53 = vld [vmem:[%s7026_s7 + $0x284] ss:$16 sps:$4 sm:$0xff]   ;;  %v5927_v54 = vld [vmem:[%s7026_s7 + $0x28c] ss:$16 sps:$4 sm:$0xff]   ;;  %v5922_v56 = vld [vmem:[%s7026_s7 + $0x280] ss:$16 sps:$4 sm:$0xff]  }
  0xcb   : > { %v5921_v55 = vld [vmem:[%s7728_s0 + $0x90] ss:$36 sps:$4 sm:$0xff]   ;;  %v5925_v57 = vld [vmem:[%s7026_s7 + $0x288] ss:$16 sps:$4 sm:$0xff]   ;;  %v5933_v59 = vld [vmem:[%s7026_s7 + $0x2ac] ss:$16 sps:$4 sm:$0xff]  }
  0xcc   : > { %3173 = vmatpush1.bf16.msra.mxu0 %v5839_v63  ;;  %3738 = vmatpush1.bf16.msra.mxu1 %v5840_v0  ;;  %v5930_v58 = vld [vmem:[%s7026_s7 + $0x2a4] ss:$16 sps:$4 sm:$0xff]   ;;  %v5934_v60 = vld [vmem:[%s7728_s0 + $0xdc] ss:$36 sps:$4 sm:$0xff]   ;;  %v5931_v62 = vld [vmem:[%s7026_s7 + $0x2a8] ss:$16 sps:$4 sm:$0xff]  }
  0xcd   : > { %3174 = vmatprep.subr.bf16.mxu0 %v5841_v1  ;;  %3739 = vmatprep.subr.bf16.mxu1 %v5843_v2  ;;  %v5928_v61 = vld [vmem:[%s7026_s7 + $0x2a0] ss:$16 sps:$4 sm:$0xff]   ;;  %v5939_v63 = vld [vmem:[%s7026_s7 + $0x2c4] ss:$16 sps:$4 sm:$0xff]   ;;  %v5942_v0 = vld [vmem:[%s7026_s7 + $0x2cc] ss:$16 sps:$4 sm:$0xff]  }
  0xce   : > { %v5936_v1 = vld [vmem:[%s7728_s0 + $0xd8] ss:$36 sps:$4 sm:$0xff]   ;;  %v5937_v2 = vld [vmem:[%s7026_s7 + $0x2c0] ss:$16 sps:$4 sm:$0xff]   ;;  %s7740_s18 = smov (!%p843_p11, %s5062_s18), 15  ;;  %s5493_s30 = sshll.u32 (%p6425_p6), %s6359_s14, 4 }
  0xcf   : > { %s845_s23 = scalar_lea.vmem %s7730_s2, %s7740_s18  ;;  %s7650_s27 = scalar_lea.vmem (%p6425_p6), %s7731_s3, %s5493_s30 }
  0xd0   : > { %3175 = vmatpush1.bf16.msra.mxu0 %v5845_v3  ;;  %3740 = vmatpush1.bf16.msra.mxu1 %v5846_v4  ;;  %v5940_v3 = vld [vmem:[%s7026_s7 + $0x2c8] ss:$16 sps:$4 sm:$0xff]   ;;  %v5945_v4 = vld [vmem:[%s7026_s7 + $0x2e4] ss:$16 sps:$4 sm:$0xff]  }
  0xd1   : > { %3176 = vmatprep.subr.bf16.mxu0 %v5847_v5  ;;  %3741 = vmatprep.subr.bf16.mxu1 %v5849_v6  ;;  %v5948_v5 = vld [vmem:[%s7026_s7 + $0x2ec] ss:$16 sps:$4 sm:$0xff]   ;;  %v5949_v6 = vld [vmem:[%s7728_s0 + $0x124] ss:$36 sps:$4 sm:$0xff]  }
  0xd4   : > { %3177 = vmatpush1.bf16.msra.mxu0 %v5851_v7  ;;  %3742 = vmatpush1.bf16.msra.mxu1 %v5852_v8  ;;  %v5943_v7 = vld [vmem:[%s7026_s7 + $0x2e0] ss:$16 sps:$4 sm:$0xff]   ;;  %v5946_v8 = vld [vmem:[%s7026_s7 + $0x2e8] ss:$16 sps:$4 sm:$0xff]  }
  0xd5   : > { %3178 = vmatprep.subr.bf16.mxu0 %v5853_v9  ;;  %3743 = vmatprep.subr.bf16.mxu1 %v5855_v10  ;;  %v5954_v9 = vld [vmem:[%s7026_s7 + $0x304] ss:$16 sps:$4 sm:$0xff]   ;;  %v5957_v10 = vld [vmem:[%s7026_s7 + $0x30c] ss:$16 sps:$4 sm:$0xff]  }
  0xd8   : > { %3179 = vmatpush1.bf16.msra.mxu0 %v5857_v11  ;;  %3744 = vmatpush1.bf16.msra.mxu1 %v5858_v12  ;;  %v5951_v11 = vld [vmem:[%s7728_s0 + $0x120] ss:$36 sps:$4 sm:$0xff]  }
  0xd9   : > { %3180 = vmatprep.subr.bf16.mxu0 %v5859_v13  ;;  %3745 = vmatprep.subr.bf16.mxu1 %v5861_v14  ;;  %v5952_v12 = vld [vmem:[%s7026_s7 + $0x300] ss:$16 sps:$4 sm:$0xff]   ;;  %v5955_v13 = vld [vmem:[%s7026_s7 + $0x308] ss:$16 sps:$4 sm:$0xff]   ;;  %v5960_v14 = vld [vmem:[%s7026_s7 + $0x324] ss:$16 sps:$4 sm:$0xff]  }
  0xdc   : > { %3181 = vmatpush1.bf16.msra.mxu0 %v5863_v15  ;;  %3746 = vmatpush1.bf16.msra.mxu1 %v5864_v16  ;;  %v5963_v15 = vld [vmem:[%s7026_s7 + $0x32c] ss:$16 sps:$4 sm:$0xff]  }
  0xdd   : > { %3182 = vmatprep.subr.bf16.mxu0 %v5865_v17  ;;  %3747 = vmatprep.subr.bf16.mxu1 %v5867_v18  ;;  %v5964_v16 = vld [vmem:[%s7728_s0 + $0x16c] ss:$36 sps:$4 sm:$0xff]   ;;  %v5961_v18 = vld [vmem:[%s7026_s7 + $0x328] ss:$16 sps:$4 sm:$0xff]  }
  0xde   : > { %v5958_v17 = vld [vmem:[%s7026_s7 + $0x320] ss:$16 sps:$4 sm:$0xff]  }
  0xe0   : > { %3183 = vmatpush1.bf16.msra.mxu0 %v5869_v19  ;;  %3748 = vmatpush1.bf16.msra.mxu1 %v5870_v20  ;;  %v5969_v19 = vld [vmem:[%s7026_s7 + $0x344] ss:$16 sps:$4 sm:$0xff]   ;;  %v5972_v20 = vld [vmem:[%s7026_s7 + $0x34c] ss:$16 sps:$4 sm:$0xff]  }
  0xe1   : > { %3184 = vmatprep.subr.bf16.mxu0 %v5871_v21  ;;  %3749 = vmatprep.subr.bf16.mxu1 %v5873_v22  ;;  %v5966_v21 = vld [vmem:[%s7728_s0 + $0x168] ss:$36 sps:$4 sm:$0xff]   ;;  %v5967_v22 = vld [vmem:[%s7026_s7 + $0x340] ss:$16 sps:$4 sm:$0xff]  }
  0xe4   : > { %3185 = vmatpush1.bf16.msra.mxu0 %v5875_v23  ;;  %3750 = vmatpush1.bf16.msra.mxu1 %v5876_v24  ;;  %v5970_v23 = vld [vmem:[%s7026_s7 + $0x348] ss:$16 sps:$4 sm:$0xff]   ;;  %v5975_v24 = vld [vmem:[%s7026_s7 + $0x364] ss:$16 sps:$4 sm:$0xff]  }
  0xe5   : > { %3186 = vmatprep.subr.bf16.mxu0 %v5877_v25  ;;  %3751 = vmatprep.subr.bf16.mxu1 %v5879_v26  ;;  %v5978_v25 = vld [vmem:[%s7026_s7 + $0x36c] ss:$16 sps:$4 sm:$0xff]   ;;  %v5979_v26 = vld [vmem:[%s7728_s0 + $0x1b4] ss:$36 sps:$4 sm:$0xff]  }
  0xe8   : > { %3187 = vmatpush1.bf16.msra.mxu0 %v5881_v27  ;;  %3752 = vmatpush1.bf16.msra.mxu1 %v5882_v28  ;;  %v5973_v27 = vld [vmem:[%s7026_s7 + $0x360] ss:$16 sps:$4 sm:$0xff]   ;;  %v5976_v28 = vld [vmem:[%s7026_s7 + $0x368] ss:$16 sps:$4 sm:$0xff]  }
  0xe9   : > { %3188 = vmatprep.subr.bf16.mxu0 %v5883_v29  ;;  %3753 = vmatprep.subr.bf16.mxu1 %v5885_v30  ;;  %v5984_v29 = vld [vmem:[%s7026_s7 + $0x384] ss:$16 sps:$4 sm:$0xff]   ;;  %v5987_v30 = vld [vmem:[%s7026_s7 + $0x38c] ss:$16 sps:$4 sm:$0xff]  }
  0xec   : > { %3189 = vmatpush1.bf16.msra.mxu0 %v5887_v31  ;;  %3754 = vmatpush1.bf16.msra.mxu1 %v5888_v32  ;;  %v5981_v31 = vld [vmem:[%s7728_s0 + $0x1b0] ss:$36 sps:$4 sm:$0xff]  }
  0xed   : > { %3271 = vmatprep.subr.bf16.mxu0 %v5894_v33  ;;  %3836 = vmatprep.subr.bf16.mxu1 %v5897_v34  ;;  %v5982_v32 = vld [vmem:[%s7026_s7 + $0x380] ss:$16 sps:$4 sm:$0xff]   ;;  %v5985_v33 = vld [vmem:[%s7026_s7 + $0x388] ss:$16 sps:$4 sm:$0xff]   ;;  %v5990_v34 = vld [vmem:[%s7026_s7 + $0x3a4] ss:$16 sps:$4 sm:$0xff]  }
  0xef   : > { %3191 = vmatmul.mubr.bf16.vlgmr.msra.gmra.mrb[0].mxu0 %v5889_v35  ;;  %3756 = vmatmul.mubr.bf16.vlgmr.msra.gmra.mrb[0].mxu1 %v5889_v35  ;;  %v5993_v35 = vld [vmem:[%s7026_s7 + $0x3ac] ss:$16 sps:$4 sm:$0xff]  }
  0xf0   : > { %3272 = vmatpush1.bf16.msra.mxu0 %v5892_v36  ;;  %3837 = vmatpush1.bf16.msra.mxu1 %v5895_v37  ;;  %v5994_v36 = vld [vmem:[%s7728_s0 + $0x1fc] ss:$36 sps:$4 sm:$0xff]  }
  0xf1   : > { %3273 = vmatprep.subr.bf16.mxu0 %v5900_v38  ;;  %3838 = vmatprep.subr.bf16.mxu1 %v5903_v39  ;;  %v5988_v37 = vld [vmem:[%s7026_s7 + $0x3a0] ss:$16 sps:$4 sm:$0xff]   ;;  %v5991_v38 = vld [vmem:[%s7026_s7 + $0x3a8] ss:$16 sps:$4 sm:$0xff]   ;;  %v5999_v39 = vld [vmem:[%s7026_s7 + $0x3c4] ss:$16 sps:$4 sm:$0xff]  }
  0xf2   : > { %3200 = vmatprep.mubr.bf16.mxu0 %v5904_v40  ;;  %3765 = vmatprep.mubr.bf16.mxu1 %v5904_v40  ;;  %v6002_v40 = vld [vmem:[%s7026_s7 + $0x3cc] ss:$16 sps:$4 sm:$0xff]  }
  0xf4   : > { %3274 = vmatpush1.bf16.msra.mxu0 %v5898_v41  ;;  %3839 = vmatpush1.bf16.msra.mxu1 %v5901_v42  ;;  %v5996_v41 = vld [vmem:[%s7728_s0 + $0x1f8] ss:$36 sps:$4 sm:$0xff]   ;;  %v5997_v42 = vld [vmem:[%s7026_s7 + $0x3c0] ss:$16 sps:$4 sm:$0xff]  }
  0xf5   : > { %3275 = vmatprep.subr.bf16.mxu0 %v5909_v43  ;;  %3840 = vmatprep.subr.bf16.mxu1 %v5912_v44  ;;  %v6000_v43 = vld [vmem:[%s7026_s7 + $0x3c8] ss:$16 sps:$4 sm:$0xff]   ;;  %v6005_v44 = vld [vmem:[%s7026_s7 + $0x3e4] ss:$16 sps:$4 sm:$0xff]  }
  0xf7   : > { %3201 = vmatmul.mubr.bf16.gmra.mrb[4].mxu0 %v5906_v45  ;;  %3766 = vmatmul.mubr.bf16.gmra.mrb[4].mxu1 %v5906_v45  ;;  %v6008_v45 = vld [vmem:[%s7026_s7 + $0x3ec] ss:$16 sps:$4 sm:$0xff]  }
  0xf8   : > { %3276 = vmatpush1.bf16.msra.mxu0 %v5907_v46  ;;  %3841 = vmatpush1.bf16.msra.mxu1 %v5910_v47  ;;  %v6011_v46 = vld [vmem:[%s7728_s0 + $0xc] ss:$36 sps:$4 sm:$0xff]  }
  0xf9   : > { %3277 = vmatprep.subr.bf16.mxu0 %v5915_v48  ;;  %3842 = vmatprep.subr.bf16.mxu1 %v5918_v49  ;;  %v6003_v47 = vld [vmem:[%s7026_s7 + $0x3e0] ss:$16 sps:$4 sm:$0xff]   ;;  %v6006_v48 = vld [vmem:[%s7026_s7 + $0x3e8] ss:$16 sps:$4 sm:$0xff]   ;;  %v6014_v49 = vld [vmem:[%s7026_s7 + $0x404] ss:$16 sps:$4 sm:$0xff]  }
  0xfa   : > { %3210 = vmatprep.mubr.bf16.mxu0 %v5919_v50  ;;  %3775 = vmatprep.mubr.bf16.mxu1 %v5919_v50  ;;  %v6017_v50 = vld [vmem:[%s7026_s7 + $0x40c] ss:$16 sps:$4 sm:$0xff]  }
  0xfc   : > { %3278 = vmatpush1.bf16.msra.mxu0 %v5913_v51  ;;  %3843 = vmatpush1.bf16.msra.mxu1 %v5916_v52  ;;  %v6009_v51 = vld [vmem:[%s7728_s0 + $0x8] ss:$36 sps:$4 sm:$0xff]   ;;  %v6012_v52 = vld [vmem:[%s7026_s7 + $0x400] ss:$16 sps:$4 sm:$0xff]  }
  0xfd   : > { %3279 = vmatprep.subr.bf16.mxu0 %v5924_v53  ;;  %3844 = vmatprep.subr.bf16.mxu1 %v5927_v54  ;;  %v6015_v53 = vld [vmem:[%s7026_s7 + $0x408] ss:$16 sps:$4 sm:$0xff]   ;;  %v6020_v54 = vld [vmem:[%s7026_s7 + $0x424] ss:$16 sps:$4 sm:$0xff]  }
  0xff   : > { %3211 = vmatmul.mubr.bf16.gmra.mrb[8].mxu0 %v5921_v55  ;;  %3776 = vmatmul.mubr.bf16.gmra.mrb[8].mxu1 %v5921_v55  ;;  %v6023_v55 = vld [vmem:[%s7026_s7 + $0x42c] ss:$16 sps:$4 sm:$0xff]  }
 0x100   : > { %3280 = vmatpush1.bf16.msra.mxu0 %v5922_v56  ;;  %3845 = vmatpush1.bf16.msra.mxu1 %v5925_v57  ;;  %v6024_v56 = vld [vmem:[%s7728_s0 + $0x54] ss:$36 sps:$4 sm:$0xff]   ;;  %v6018_v57 = vld [vmem:[%s7026_s7 + $0x420] ss:$16 sps:$4 sm:$0xff]  }
 0x101   : > { %3281 = vmatprep.subr.bf16.mxu0 %v5930_v58  ;;  %3846 = vmatprep.subr.bf16.mxu1 %v5933_v59  ;;  %v6021_v58 = vld [vmem:[%s7026_s7 + $0x428] ss:$16 sps:$4 sm:$0xff]   ;;  %v6029_v59 = vld [vmem:[%s7026_s7 + $0x444] ss:$16 sps:$4 sm:$0xff]  }
 0x102   : > { %3220 = vmatprep.mubr.bf16.mxu0 %v5934_v60  ;;  %3785 = vmatprep.mubr.bf16.mxu1 %v5934_v60  ;;  %v6032_v60 = vld [vmem:[%s7026_s7 + $0x44c] ss:$16 sps:$4 sm:$0xff]  }
 0x104   : > { %3282 = vmatpush1.bf16.msra.mxu0 %v5928_v61  ;;  %3847 = vmatpush1.bf16.msra.mxu1 %v5931_v62  ;;  %v6026_v61 = vld [vmem:[%s7728_s0 + $0x50] ss:$36 sps:$4 sm:$0xff]  }
 0x105   : > { %3283 = vmatprep.subr.bf16.mxu0 %v5939_v63  ;;  %3848 = vmatprep.subr.bf16.mxu1 %v5942_v0  ;;  %v6027_v62 = vld [vmem:[%s7026_s7 + $0x440] ss:$16 sps:$4 sm:$0xff]   ;;  %v6030_v63 = vld [vmem:[%s7026_s7 + $0x448] ss:$16 sps:$4 sm:$0xff]   ;;  %v6035_v0 = vld [vmem:[%s7026_s7 + $0x464] ss:$16 sps:$4 sm:$0xff]  }
 0x107   : > { %3221 = vmatmul.mubr.bf16.gmra.mrb[12].mxu0 %v5936_v1  ;;  %3786 = vmatmul.mubr.bf16.gmra.mrb[12].mxu1 %v5936_v1  ;;  %v6038_v1 = vld [vmem:[%s7026_s7 + $0x46c] ss:$16 sps:$4 sm:$0xff]  }
 0x108   : > { %3284 = vmatpush1.bf16.msra.mxu0 %v5937_v2  ;;  %3849 = vmatpush1.bf16.msra.mxu1 %v5940_v3  ;;  %v6039_v2 = vld [vmem:[%s7728_s0 + $0x9c] ss:$36 sps:$4 sm:$0xff]  }
 0x109   : > { %3285 = vmatprep.subr.bf16.mxu0 %v5945_v4  ;;  %3850 = vmatprep.subr.bf16.mxu1 %v5948_v5  ;;  %v6033_v3 = vld [vmem:[%s7026_s7 + $0x460] ss:$16 sps:$4 sm:$0xff]   ;;  %v6036_v4 = vld [vmem:[%s7026_s7 + $0x468] ss:$16 sps:$4 sm:$0xff]   ;;  %v6044_v5 = vld [vmem:[%s7026_s7 + $0x484] ss:$16 sps:$4 sm:$0xff]  }
 0x10a   : > { %3230 = vmatprep.mubr.bf16.mxu0 %v5949_v6  ;;  %3795 = vmatprep.mubr.bf16.mxu1 %v5949_v6  ;;  %v6047_v6 = vld [vmem:[%s7026_s7 + $0x48c] ss:$16 sps:$4 sm:$0xff]  }
 0x10c   : > { %3286 = vmatpush1.bf16.msra.mxu0 %v5943_v7  ;;  %3851 = vmatpush1.bf16.msra.mxu1 %v5946_v8  ;;  %v6041_v7 = vld [vmem:[%s7728_s0 + $0x98] ss:$36 sps:$4 sm:$0xff]   ;;  %v6042_v8 = vld [vmem:[%s7026_s7 + $0x480] ss:$16 sps:$4 sm:$0xff]  }
 0x10d   : > { %3287 = vmatprep.subr.bf16.mxu0 %v5954_v9  ;;  %3852 = vmatprep.subr.bf16.mxu1 %v5957_v10  ;;  %v6045_v9 = vld [vmem:[%s7026_s7 + $0x488] ss:$16 sps:$4 sm:$0xff]   ;;  %v6050_v10 = vld [vmem:[%s7026_s7 + $0x4a4] ss:$16 sps:$4 sm:$0xff]  }
 0x10f   : > { %3231 = vmatmul.mubr.bf16.gmra.mrb[16].mxu0 %v5951_v11  ;;  %3796 = vmatmul.mubr.bf16.gmra.mrb[16].mxu1 %v5951_v11  ;;  %v6053_v11 = vld [vmem:[%s7026_s7 + $0x4ac] ss:$16 sps:$4 sm:$0xff]  }
 0x110   : > { %3288 = vmatpush1.bf16.msra.mxu0 %v5952_v12  ;;  %3853 = vmatpush1.bf16.msra.mxu1 %v5955_v13  ;;  %v6054_v12 = vld [vmem:[%s7728_s0 + $0xe4] ss:$36 sps:$4 sm:$0xff]   ;;  %v6048_v13 = vld [vmem:[%s7026_s7 + $0x4a0] ss:$16 sps:$4 sm:$0xff]  }
 0x111   : > { %3289 = vmatprep.subr.bf16.mxu0 %v5960_v14  ;;  %3854 = vmatprep.subr.bf16.mxu1 %v5963_v15  ;;  %v6051_v14 = vld [vmem:[%s7026_s7 + $0x4a8] ss:$16 sps:$4 sm:$0xff]   ;;  %v6059_v15 = vld [vmem:[%s7026_s7 + $0x4c4] ss:$16 sps:$4 sm:$0xff]  }
 0x112   : > { %3240 = vmatprep.mubr.bf16.mxu0 %v5964_v16  ;;  %3805 = vmatprep.mubr.bf16.mxu1 %v5964_v16  ;;  %v6062_v16 = vld [vmem:[%s7026_s7 + $0x4cc] ss:$16 sps:$4 sm:$0xff]  }
 0x114   : > { %3290 = vmatpush1.bf16.msra.mxu0 %v5958_v17  ;;  %3855 = vmatpush1.bf16.msra.mxu1 %v5961_v18  ;;  %v6056_v17 = vld [vmem:[%s7728_s0 + $0xe0] ss:$36 sps:$4 sm:$0xff]  }
 0x115   : > { %3291 = vmatprep.subr.bf16.mxu0 %v5969_v19  ;;  %3856 = vmatprep.subr.bf16.mxu1 %v5972_v20  ;;  %v6057_v18 = vld [vmem:[%s7026_s7 + $0x4c0] ss:$16 sps:$4 sm:$0xff]   ;;  %v6060_v19 = vld [vmem:[%s7026_s7 + $0x4c8] ss:$16 sps:$4 sm:$0xff]   ;;  %v6065_v20 = vld [vmem:[%s7026_s7 + $0x4e4] ss:$16 sps:$4 sm:$0xff]  }
 0x117   : > { %3241 = vmatmul.mubr.bf16.gmra.mrb[20].mxu0 %v5966_v21  ;;  %3806 = vmatmul.mubr.bf16.gmra.mrb[20].mxu1 %v5966_v21  ;;  %v6068_v21 = vld [vmem:[%s7026_s7 + $0x4ec] ss:$16 sps:$4 sm:$0xff]  }
 0x118   : > { %3292 = vmatpush1.bf16.msra.mxu0 %v5967_v22  ;;  %3857 = vmatpush1.bf16.msra.mxu1 %v5970_v23  ;;  %v6069_v22 = vld [vmem:[%s7728_s0 + $0x12c] ss:$36 sps:$4 sm:$0xff]  }
 0x119   : > { %3293 = vmatprep.subr.bf16.mxu0 %v5975_v24  ;;  %3858 = vmatprep.subr.bf16.mxu1 %v5978_v25  ;;  %v6063_v23 = vld [vmem:[%s7026_s7 + $0x4e0] ss:$16 sps:$4 sm:$0xff]   ;;  %v6066_v24 = vld [vmem:[%s7026_s7 + $0x4e8] ss:$16 sps:$4 sm:$0xff]   ;;  %v6074_v25 = vld [vmem:[%s7026_s7 + $0x504] ss:$16 sps:$4 sm:$0xff]  }
 0x11a   : > { %3250 = vmatprep.mubr.bf16.mxu0 %v5979_v26  ;;  %3815 = vmatprep.mubr.bf16.mxu1 %v5979_v26  ;;  %v6077_v26 = vld [vmem:[%s7026_s7 + $0x50c] ss:$16 sps:$4 sm:$0xff]  }
 0x11c   : > { %3294 = vmatpush1.bf16.msra.mxu0 %v5973_v27  ;;  %3859 = vmatpush1.bf16.msra.mxu1 %v5976_v28  ;;  %v6071_v27 = vld [vmem:[%s7728_s0 + $0x128] ss:$36 sps:$4 sm:$0xff]   ;;  %v6072_v28 = vld [vmem:[%s7026_s7 + $0x500] ss:$16 sps:$4 sm:$0xff]  }
 0x11d   : > { %3295 = vmatprep.subr.bf16.mxu0 %v5984_v29  ;;  %3860 = vmatprep.subr.bf16.mxu1 %v5987_v30  ;;  %v6075_v29 = vld [vmem:[%s7026_s7 + $0x508] ss:$16 sps:$4 sm:$0xff]   ;;  %v6080_v30 = vld [vmem:[%s7026_s7 + $0x524] ss:$16 sps:$4 sm:$0xff]  }
 0x11f   : > { %3251 = vmatmul.mubr.bf16.gmra.mrb[24].mxu0 %v5981_v31  ;;  %3816 = vmatmul.mubr.bf16.gmra.mrb[24].mxu1 %v5981_v31  ;;  %v6083_v31 = vld [vmem:[%s7026_s7 + $0x52c] ss:$16 sps:$4 sm:$0xff]  }
 0x120   : > { %3296 = vmatpush1.bf16.msra.mxu0 %v5982_v32  ;;  %3861 = vmatpush1.bf16.msra.mxu1 %v5985_v33  ;;  %v6084_v32 = vld [vmem:[%s7728_s0 + $0x174] ss:$36 sps:$4 sm:$0xff]   ;;  %v6078_v33 = vld [vmem:[%s7026_s7 + $0x520] ss:$16 sps:$4 sm:$0xff]  }
 0x121   : > { %3297 = vmatprep.subr.bf16.mxu0 %v5990_v34  ;;  %3862 = vmatprep.subr.bf16.mxu1 %v5993_v35  ;;  %v6081_v34 = vld [vmem:[%s7026_s7 + $0x528] ss:$16 sps:$4 sm:$0xff]   ;;  %v6089_v35 = vld [vmem:[%s7026_s7 + $0x544] ss:$16 sps:$4 sm:$0xff]  }
 0x122   : > { %3260 = vmatprep.mubr.bf16.mxu0 %v5994_v36  ;;  %3825 = vmatprep.mubr.bf16.mxu1 %v5994_v36  ;;  %v6092_v36 = vld [vmem:[%s7026_s7 + $0x54c] ss:$16 sps:$4 sm:$0xff]  }
 0x124   : > { %3298 = vmatpush1.bf16.msra.mxu0 %v5988_v37  ;;  %3863 = vmatpush1.bf16.msra.mxu1 %v5991_v38  ;;  %v6086_v37 = vld [vmem:[%s7728_s0 + $0x170] ss:$36 sps:$4 sm:$0xff]  }
 0x125   : > { %3299 = vmatprep.subr.bf16.mxu0 %v5999_v39  ;;  %3864 = vmatprep.subr.bf16.mxu1 %v6002_v40  ;;  %v6087_v38 = vld [vmem:[%s7026_s7 + $0x540] ss:$16 sps:$4 sm:$0xff]   ;;  %v6090_v39 = vld [vmem:[%s7026_s7 + $0x548] ss:$16 sps:$4 sm:$0xff]   ;;  %v6095_v40 = vld [vmem:[%s7026_s7 + $0x564] ss:$16 sps:$4 sm:$0xff]  }
 0x127   : > { %3261 = vmatmul.mubr.bf16.gmra.mrb[28].mxu0 %v5996_v41  ;;  %3826 = vmatmul.mubr.bf16.gmra.mrb[28].mxu1 %v5996_v41  ;;  %v6098_v41 = vld [vmem:[%s7026_s7 + $0x56c] ss:$16 sps:$4 sm:$0xff]  }
 0x128   : > { %3300 = vmatpush1.bf16.msra.mxu0 %v5997_v42  ;;  %3865 = vmatpush1.bf16.msra.mxu1 %v6000_v43  ;;  %v6099_v42 = vld [vmem:[%s7728_s0 + $0x1bc] ss:$36 sps:$4 sm:$0xff]  }
 0x129   : > { %3301 = vmatprep.subr.bf16.mxu0 %v6005_v44  ;;  %3866 = vmatprep.subr.bf16.mxu1 %v6008_v45  ;;  %v6093_v43 = vld [vmem:[%s7026_s7 + $0x560] ss:$16 sps:$4 sm:$0xff]   ;;  %v6096_v44 = vld [vmem:[%s7026_s7 + $0x568] ss:$16 sps:$4 sm:$0xff]   ;;  %v6104_v45 = vld [vmem:[%s7026_s7 + $0x584] ss:$16 sps:$4 sm:$0xff]  }
 0x12a   : > { %3303 = vmatprep.mubr.bf16.mxu0 %v6011_v46  ;;  %3868 = vmatprep.mubr.bf16.mxu1 %v6011_v46  ;;  %v6107_v46 = vld [vmem:[%s7026_s7 + $0x58c] ss:$16 sps:$4 sm:$0xff]  }
 0x12c   : > { %3302 = vmatpush1.bf16.msra.mxu0 %v6003_v47  ;;  %3867 = vmatpush1.bf16.msra.mxu1 %v6006_v48  ;;  %v6101_v47 = vld [vmem:[%s7728_s0 + $0x1b8] ss:$36 sps:$4 sm:$0xff]   ;;  %v6102_v48 = vld [vmem:[%s7026_s7 + $0x580] ss:$16 sps:$4 sm:$0xff]  }
 0x12d   : > { %3384 = vmatprep.subr.bf16.mxu0 %v6014_v49  ;;  %3949 = vmatprep.subr.bf16.mxu1 %v6017_v50  ;;  %v6105_v49 = vld [vmem:[%s7026_s7 + $0x588] ss:$16 sps:$4 sm:$0xff]   ;;  %v6110_v50 = vld [vmem:[%s7026_s7 + $0x5a4] ss:$16 sps:$4 sm:$0xff]  }
 0x12f   : > { %3304 = vmatmul.mubr.bf16.vlgmr.msra.gmra.mrb[0].mxu0 %v6009_v51  ;;  %3869 = vmatmul.mubr.bf16.vlgmr.msra.gmra.mrb[0].mxu1 %v6009_v51  ;;  %v6113_v51 = vld [vmem:[%s7026_s7 + $0x5ac] ss:$16 sps:$4 sm:$0xff]  }
 0x130   : > { %3385 = vmatpush1.bf16.msra.mxu0 %v6012_v52  ;;  %3950 = vmatpush1.bf16.msra.mxu1 %v6015_v53  ;;  %v6114_v52 = vld [vmem:[%s7728_s0 + $0x204] ss:$36 sps:$4 sm:$0xff]   ;;  %v6108_v53 = vld [vmem:[%s7026_s7 + $0x5a0] ss:$16 sps:$4 sm:$0xff]  }
 0x131   : > { %3386 = vmatprep.subr.bf16.mxu0 %v6020_v54  ;;  %3951 = vmatprep.subr.bf16.mxu1 %v6023_v55  ;;  %v6111_v54 = vld [vmem:[%s7026_s7 + $0x5a8] ss:$16 sps:$4 sm:$0xff]   ;;  %v6119_v55 = vld [vmem:[%s7026_s7 + $0x5c4] ss:$16 sps:$4 sm:$0xff]  }
 0x132   : > { %3313 = vmatprep.mubr.bf16.mxu0 %v6024_v56  ;;  %3878 = vmatprep.mubr.bf16.mxu1 %v6024_v56  ;;  %v6122_v56 = vld [vmem:[%s7026_s7 + $0x5cc] ss:$16 sps:$4 sm:$0xff]  }
 0x134   : > { %3387 = vmatpush1.bf16.msra.mxu0 %v6018_v57  ;;  %3952 = vmatpush1.bf16.msra.mxu1 %v6021_v58  ;;  %v6116_v57 = vld [vmem:[%s7728_s0 + $0x200] ss:$36 sps:$4 sm:$0xff]  }
 0x135   : > { %3388 = vmatprep.subr.bf16.mxu0 %v6029_v59  ;;  %3953 = vmatprep.subr.bf16.mxu1 %v6032_v60  ;;  %v6117_v58 = vld [vmem:[%s7026_s7 + $0x5c0] ss:$16 sps:$4 sm:$0xff]   ;;  %v6120_v59 = vld [vmem:[%s7026_s7 + $0x5c8] ss:$16 sps:$4 sm:$0xff]   ;;  %v6125_v60 = vld [vmem:[%s7026_s7 + $0x5e4] ss:$16 sps:$4 sm:$0xff]  }
 0x137   : > { %3314 = vmatmul.mubr.bf16.gmra.mrb[4].mxu0 %v6026_v61  ;;  %3879 = vmatmul.mubr.bf16.gmra.mrb[4].mxu1 %v6026_v61  ;;  %v6128_v61 = vld [vmem:[%s7026_s7 + $0x5ec] ss:$16 sps:$4 sm:$0xff]  }
 0x138   : > { %3389 = vmatpush1.bf16.msra.mxu0 %v6027_v62  ;;  %3954 = vmatpush1.bf16.msra.mxu1 %v6030_v63  ;;  %v6131_v62 = vld [vmem:[%s7728_s0 + $0x14] ss:$36 sps:$4 sm:$0xff]   ;;  %v6123_v63 = vld [vmem:[%s7026_s7 + $0x5e0] ss:$16 sps:$4 sm:$0xff]  }
 0x139   : > { %3390 = vmatprep.subr.bf16.mxu0 %v6035_v0  ;;  %3955 = vmatprep.subr.bf16.mxu1 %v6038_v1  ;;  %v6126_v0 = vld [vmem:[%s7026_s7 + $0x5e8] ss:$16 sps:$4 sm:$0xff]   ;;  %v6134_v1 = vld [vmem:[%s7026_s7 + $0x604] ss:$16 sps:$4 sm:$0xff]  }
 0x13a   : > { %3323 = vmatprep.mubr.bf16.mxu0 %v6039_v2  ;;  %3888 = vmatprep.mubr.bf16.mxu1 %v6039_v2  ;;  %v6137_v2 = vld [vmem:[%s7026_s7 + $0x60c] ss:$16 sps:$4 sm:$0xff]  }
 0x13c   : > { %3391 = vmatpush1.bf16.msra.mxu0 %v6033_v3  ;;  %3956 = vmatpush1.bf16.msra.mxu1 %v6036_v4  ;;  %v6129_v3 = vld [vmem:[%s7728_s0 + $0x10] ss:$36 sps:$4 sm:$0xff]  }
 0x13d   : > { %3392 = vmatprep.subr.bf16.mxu0 %v6044_v5  ;;  %3957 = vmatprep.subr.bf16.mxu1 %v6047_v6  ;;  %v6132_v4 = vld [vmem:[%s7026_s7 + $0x600] ss:$16 sps:$4 sm:$0xff]   ;;  %v6135_v5 = vld [vmem:[%s7026_s7 + $0x608] ss:$16 sps:$4 sm:$0xff]   ;;  %v6140_v6 = vld [vmem:[%s7026_s7 + $0x624] ss:$16 sps:$4 sm:$0xff]  }
 0x13f   : > { %3324 = vmatmul.mubr.bf16.gmra.mrb[8].mxu0 %v6041_v7  ;;  %3889 = vmatmul.mubr.bf16.gmra.mrb[8].mxu1 %v6041_v7  ;;  %v6143_v7 = vld [vmem:[%s7026_s7 + $0x62c] ss:$16 sps:$4 sm:$0xff]  }
 0x140   : > { %3393 = vmatpush1.bf16.msra.mxu0 %v6042_v8  ;;  %3958 = vmatpush1.bf16.msra.mxu1 %v6045_v9  ;;  %v6144_v8 = vld [vmem:[%s7728_s0 + $0x5c] ss:$36 sps:$4 sm:$0xff]  }
 0x141   : > { %3394 = vmatprep.subr.bf16.mxu0 %v6050_v10  ;;  %3959 = vmatprep.subr.bf16.mxu1 %v6053_v11  ;;  %v6138_v9 = vld [vmem:[%s7026_s7 + $0x620] ss:$16 sps:$4 sm:$0xff]   ;;  %v6141_v10 = vld [vmem:[%s7026_s7 + $0x628] ss:$16 sps:$4 sm:$0xff]   ;;  %v6149_v11 = vld [vmem:[%s7026_s7 + $0x644] ss:$16 sps:$4 sm:$0xff]  }
 0x142   : > { %3333 = vmatprep.mubr.bf16.mxu0 %v6054_v12  ;;  %3898 = vmatprep.mubr.bf16.mxu1 %v6054_v12  ;;  %v6152_v12 = vld [vmem:[%s7026_s7 + $0x64c] ss:$16 sps:$4 sm:$0xff]  }
 0x144   : > { %3395 = vmatpush1.bf16.msra.mxu0 %v6048_v13  ;;  %3960 = vmatpush1.bf16.msra.mxu1 %v6051_v14  ;;  %v6146_v13 = vld [vmem:[%s7728_s0 + $0x58] ss:$36 sps:$4 sm:$0xff]   ;;  %v6147_v14 = vld [vmem:[%s7026_s7 + $0x640] ss:$16 sps:$4 sm:$0xff]  }
 0x145   : > { %3396 = vmatprep.subr.bf16.mxu0 %v6059_v15  ;;  %3961 = vmatprep.subr.bf16.mxu1 %v6062_v16  ;;  %v6150_v15 = vld [vmem:[%s7026_s7 + $0x648] ss:$16 sps:$4 sm:$0xff]   ;;  %v6155_v16 = vld [vmem:[%s7026_s7 + $0x664] ss:$16 sps:$4 sm:$0xff]  }
 0x147   : > { %3334 = vmatmul.mubr.bf16.gmra.mrb[12].mxu0 %v6056_v17  ;;  %3899 = vmatmul.mubr.bf16.gmra.mrb[12].mxu1 %v6056_v17  ;;  %v6158_v17 = vld [vmem:[%s7026_s7 + $0x66c] ss:$16 sps:$4 sm:$0xff]  }
 0x148   : > { %3397 = vmatpush1.bf16.msra.mxu0 %v6057_v18  ;;  %3962 = vmatpush1.bf16.msra.mxu1 %v6060_v19  ;;  %v6159_v18 = vld [vmem:[%s7728_s0 + $0xa4] ss:$36 sps:$4 sm:$0xff]   ;;  %v6153_v19 = vld [vmem:[%s7026_s7 + $0x660] ss:$16 sps:$4 sm:$0xff]  }
 0x149   : > { %3398 = vmatprep.subr.bf16.mxu0 %v6065_v20  ;;  %3963 = vmatprep.subr.bf16.mxu1 %v6068_v21  ;;  %v6156_v20 = vld [vmem:[%s7026_s7 + $0x668] ss:$16 sps:$4 sm:$0xff]   ;;  %v6164_v21 = vld [vmem:[%s7026_s7 + $0x684] ss:$16 sps:$4 sm:$0xff]  }
 0x14a   : > { %3343 = vmatprep.mubr.bf16.mxu0 %v6069_v22  ;;  %3908 = vmatprep.mubr.bf16.mxu1 %v6069_v22  ;;  %v6167_v22 = vld [vmem:[%s7026_s7 + $0x68c] ss:$16 sps:$4 sm:$0xff]  }
 0x14c   : > { %3399 = vmatpush1.bf16.msra.mxu0 %v6063_v23  ;;  %3964 = vmatpush1.bf16.msra.mxu1 %v6066_v24  ;;  %v6161_v23 = vld [vmem:[%s7728_s0 + $0xa0] ss:$36 sps:$4 sm:$0xff]  }
 0x14d   : > { %3400 = vmatprep.subr.bf16.mxu0 %v6074_v25  ;;  %3965 = vmatprep.subr.bf16.mxu1 %v6077_v26  ;;  %v6162_v24 = vld [vmem:[%s7026_s7 + $0x680] ss:$16 sps:$4 sm:$0xff]   ;;  %v6165_v25 = vld [vmem:[%s7026_s7 + $0x688] ss:$16 sps:$4 sm:$0xff]   ;;  %v6170_v26 = vld [vmem:[%s7026_s7 + $0x6a4] ss:$16 sps:$4 sm:$0xff]  }
 0x14f   : > { %3344 = vmatmul.mubr.bf16.gmra.mrb[16].mxu0 %v6071_v27  ;;  %3909 = vmatmul.mubr.bf16.gmra.mrb[16].mxu1 %v6071_v27  ;;  %v6173_v27 = vld [vmem:[%s7026_s7 + $0x6ac] ss:$16 sps:$4 sm:$0xff]  }
 0x150   : > { %3401 = vmatpush1.bf16.msra.mxu0 %v6072_v28  ;;  %3966 = vmatpush1.bf16.msra.mxu1 %v6075_v29  ;;  %v6174_v28 = vld [vmem:[%s7728_s0 + $0xec] ss:$36 sps:$4 sm:$0xff]  }
 0x151   : > { %3402 = vmatprep.subr.bf16.mxu0 %v6080_v30  ;;  %3967 = vmatprep.subr.bf16.mxu1 %v6083_v31  ;;  %v6168_v29 = vld [vmem:[%s7026_s7 + $0x6a0] ss:$16 sps:$4 sm:$0xff]   ;;  %v6171_v30 = vld [vmem:[%s7026_s7 + $0x6a8] ss:$16 sps:$4 sm:$0xff]   ;;  %v6179_v31 = vld [vmem:[%s7026_s7 + $0x6c4] ss:$16 sps:$4 sm:$0xff]  }
 0x152   : > { %3353 = vmatprep.mubr.bf16.mxu0 %v6084_v32  ;;  %3918 = vmatprep.mubr.bf16.mxu1 %v6084_v32  ;;  %v6182_v32 = vld [vmem:[%s7026_s7 + $0x6cc] ss:$16 sps:$4 sm:$0xff]  }
 0x154   : > { %3403 = vmatpush1.bf16.msra.mxu0 %v6078_v33  ;;  %3968 = vmatpush1.bf16.msra.mxu1 %v6081_v34  ;;  %v6176_v33 = vld [vmem:[%s7728_s0 + $0xe8] ss:$36 sps:$4 sm:$0xff]   ;;  %v6177_v34 = vld [vmem:[%s7026_s7 + $0x6c0] ss:$16 sps:$4 sm:$0xff]  }
 0x155   : > { %3404 = vmatprep.subr.bf16.mxu0 %v6089_v35  ;;  %3969 = vmatprep.subr.bf16.mxu1 %v6092_v36  ;;  %v6180_v35 = vld [vmem:[%s7026_s7 + $0x6c8] ss:$16 sps:$4 sm:$0xff]   ;;  %v6185_v36 = vld [vmem:[%s7026_s7 + $0x6e4] ss:$16 sps:$4 sm:$0xff]  }
 0x157   : > { %3354 = vmatmul.mubr.bf16.gmra.mrb[20].mxu0 %v6086_v37  ;;  %3919 = vmatmul.mubr.bf16.gmra.mrb[20].mxu1 %v6086_v37  ;;  %v6188_v37 = vld [vmem:[%s7026_s7 + $0x6ec] ss:$16 sps:$4 sm:$0xff]  }
 0x158   : > { %3405 = vmatpush1.bf16.msra.mxu0 %v6087_v38  ;;  %3970 = vmatpush1.bf16.msra.mxu1 %v6090_v39  ;;  %v6189_v38 = vld [vmem:[%s7728_s0 + $0x134] ss:$36 sps:$4 sm:$0xff]   ;;  %v6183_v39 = vld [vmem:[%s7026_s7 + $0x6e0] ss:$16 sps:$4 sm:$0xff]  }
 0x159   : > { %3406 = vmatprep.subr.bf16.mxu0 %v6095_v40  ;;  %3971 = vmatprep.subr.bf16.mxu1 %v6098_v41  ;;  %v6186_v40 = vld [vmem:[%s7026_s7 + $0x6e8] ss:$16 sps:$4 sm:$0xff]   ;;  %v6194_v41 = vld [vmem:[%s7026_s7 + $0x704] ss:$16 sps:$4 sm:$0xff]  }
 0x15a   : > { %3363 = vmatprep.mubr.bf16.mxu0 %v6099_v42  ;;  %3928 = vmatprep.mubr.bf16.mxu1 %v6099_v42  ;;  %v6197_v42 = vld [vmem:[%s7026_s7 + $0x70c] ss:$16 sps:$4 sm:$0xff]  }
 0x15c   : > { %3407 = vmatpush1.bf16.msra.mxu0 %v6093_v43  ;;  %3972 = vmatpush1.bf16.msra.mxu1 %v6096_v44  ;;  %v6191_v43 = vld [vmem:[%s7728_s0 + $0x130] ss:$36 sps:$4 sm:$0xff]  }
 0x15d   : > { %3408 = vmatprep.subr.bf16.mxu0 %v6104_v45  ;;  %3973 = vmatprep.subr.bf16.mxu1 %v6107_v46  ;;  %v6192_v44 = vld [vmem:[%s7026_s7 + $0x700] ss:$16 sps:$4 sm:$0xff]   ;;  %v6195_v45 = vld [vmem:[%s7026_s7 + $0x708] ss:$16 sps:$4 sm:$0xff]   ;;  %v6200_v46 = vld [vmem:[%s7026_s7 + $0x724] ss:$16 sps:$4 sm:$0xff]  }
 0x15f   : > { %3364 = vmatmul.mubr.bf16.gmra.mrb[24].mxu0 %v6101_v47  ;;  %3929 = vmatmul.mubr.bf16.gmra.mrb[24].mxu1 %v6101_v47  ;;  %v6203_v47 = vld [vmem:[%s7026_s7 + $0x72c] ss:$16 sps:$4 sm:$0xff]  }
 0x160   : > { %3409 = vmatpush1.bf16.msra.mxu0 %v6102_v48  ;;  %3974 = vmatpush1.bf16.msra.mxu1 %v6105_v49  ;;  %v6204_v48 = vld [vmem:[%s7728_s0 + $0x17c] ss:$36 sps:$4 sm:$0xff]  }
 0x161   : > { %3410 = vmatprep.subr.bf16.mxu0 %v6110_v50  ;;  %3975 = vmatprep.subr.bf16.mxu1 %v6113_v51  ;;  %v6198_v49 = vld [vmem:[%s7026_s7 + $0x720] ss:$16 sps:$4 sm:$0xff]   ;;  %v6201_v50 = vld [vmem:[%s7026_s7 + $0x728] ss:$16 sps:$4 sm:$0xff]   ;;  %v6209_v51 = vld [vmem:[%s7026_s7 + $0x744] ss:$16 sps:$4 sm:$0xff]  }
 0x162   : > { %3373 = vmatprep.mubr.bf16.mxu0 %v6114_v52  ;;  %3938 = vmatprep.mubr.bf16.mxu1 %v6114_v52  ;;  %v6212_v52 = vld [vmem:[%s7026_s7 + $0x74c] ss:$16 sps:$4 sm:$0xff]  }
 0x164   : > { %3411 = vmatpush1.bf16.msra.mxu0 %v6108_v53  ;;  %3976 = vmatpush1.bf16.msra.mxu1 %v6111_v54  ;;  %v6206_v53 = vld [vmem:[%s7728_s0 + $0x178] ss:$36 sps:$4 sm:$0xff]   ;;  %v6207_v54 = vld [vmem:[%s7026_s7 + $0x740] ss:$16 sps:$4 sm:$0xff]  }
 0x165   : > { %3412 = vmatprep.subr.bf16.mxu0 %v6119_v55  ;;  %3977 = vmatprep.subr.bf16.mxu1 %v6122_v56  ;;  %v6210_v55 = vld [vmem:[%s7026_s7 + $0x748] ss:$16 sps:$4 sm:$0xff]   ;;  %v6215_v56 = vld [vmem:[%s7026_s7 + $0x764] ss:$16 sps:$4 sm:$0xff]  }
 0x167   : > { %3374 = vmatmul.mubr.bf16.gmra.mrb[28].mxu0 %v6116_v57  ;;  %3939 = vmatmul.mubr.bf16.gmra.mrb[28].mxu1 %v6116_v57  ;;  %v6218_v57 = vld [vmem:[%s7026_s7 + $0x76c] ss:$16 sps:$4 sm:$0xff]  }
 0x168   : > { %3413 = vmatpush1.bf16.msra.mxu0 %v6117_v58  ;;  %3978 = vmatpush1.bf16.msra.mxu1 %v6120_v59  ;;  %v6213_v58 = vld [vmem:[%s7026_s7 + $0x760] ss:$16 sps:$4 sm:$0xff]   ;;  %v6219_v59 = vld [vmem:[%s7728_s0 + $0x1c4] ss:$36 sps:$4 sm:$0xff]  }
 0x169   : > { %3414 = vmatprep.subr.bf16.mxu0 %v6125_v60  ;;  %3979 = vmatprep.subr.bf16.mxu1 %v6128_v61  ;;  %v6216_v60 = vld [vmem:[%s7026_s7 + $0x768] ss:$16 sps:$4 sm:$0xff]   ;;  %v6224_v61 = vld [vmem:[%s7026_s7 + $0x784] ss:$16 sps:$4 sm:$0xff]  }
 0x16a   : > { %3416 = vmatprep.mubr.bf16.mxu0 %v6131_v62  ;;  %3981 = vmatprep.mubr.bf16.mxu1 %v6131_v62  ;;  %v6227_v62 = vld [vmem:[%s7026_s7 + $0x78c] ss:$16 sps:$4 sm:$0xff]  }
 0x16c   : > { %3415 = vmatpush1.bf16.msra.mxu0 %v6123_v63  ;;  %3980 = vmatpush1.bf16.msra.mxu1 %v6126_v0  ;;  %v6221_v63 = vld [vmem:[%s7728_s0 + $0x1c0] ss:$36 sps:$4 sm:$0xff]  }
 0x16d   : > { %3497 = vmatprep.subr.bf16.mxu0 %v6134_v1  ;;  %4062 = vmatprep.subr.bf16.mxu1 %v6137_v2  ;;  %v6222_v0 = vld [vmem:[%s7026_s7 + $0x780] ss:$16 sps:$4 sm:$0xff]   ;;  %v6225_v1 = vld [vmem:[%s7026_s7 + $0x788] ss:$16 sps:$4 sm:$0xff]   ;;  %v6230_v2 = vld [vmem:[%s7026_s7 + $0x7a4] ss:$16 sps:$4 sm:$0xff]  }
 0x16f   : > { %3417 = vmatmul.mubr.bf16.vlgmr.msra.gmra.mrb[0].mxu0 %v6129_v3  ;;  %3982 = vmatmul.mubr.bf16.vlgmr.msra.gmra.mrb[0].mxu1 %v6129_v3  ;;  %v6233_v3 = vld [vmem:[%s7026_s7 + $0x7ac] ss:$16 sps:$4 sm:$0xff]  }
 0x170   : > { %3498 = vmatpush1.bf16.msra.mxu0 %v6132_v4  ;;  %4063 = vmatpush1.bf16.msra.mxu1 %v6135_v5  ;;  %v6234_v4 = vld [vmem:[%s7728_s0 + $0x20c] ss:$36 sps:$4 sm:$0xff]  }
 0x171   : > { %3499 = vmatprep.subr.bf16.mxu0 %v6140_v6  ;;  %4064 = vmatprep.subr.bf16.mxu1 %v6143_v7  ;;  %v6228_v5 = vld [vmem:[%s7026_s7 + $0x7a0] ss:$16 sps:$4 sm:$0xff]   ;;  %v6231_v6 = vld [vmem:[%s7026_s7 + $0x7a8] ss:$16 sps:$4 sm:$0xff]   ;;  %v6239_v7 = vld [vmem:[%s7026_s7 + $0x7c4] ss:$16 sps:$4 sm:$0xff]  }
 0x172   : > { %3426 = vmatprep.mubr.bf16.mxu0 %v6144_v8  ;;  %3991 = vmatprep.mubr.bf16.mxu1 %v6144_v8  ;;  %v6242_v8 = vld [vmem:[%s7026_s7 + $0x7cc] ss:$16 sps:$4 sm:$0xff]  }
 0x174   : > { %3500 = vmatpush1.bf16.msra.mxu0 %v6138_v9  ;;  %4065 = vmatpush1.bf16.msra.mxu1 %v6141_v10  ;;  %v6236_v9 = vld [vmem:[%s7728_s0 + $0x208] ss:$36 sps:$4 sm:$0xff]   ;;  %v6237_v10 = vld [vmem:[%s7026_s7 + $0x7c0] ss:$16 sps:$4 sm:$0xff]  }
 0x175   : > { %3501 = vmatprep.subr.bf16.mxu0 %v6149_v11  ;;  %4066 = vmatprep.subr.bf16.mxu1 %v6152_v12  ;;  %v6240_v11 = vld [vmem:[%s7026_s7 + $0x7c8] ss:$16 sps:$4 sm:$0xff]   ;;  %v6245_v12 = vld [vmem:[%s7026_s7 + $0x7e4] ss:$16 sps:$4 sm:$0xff]  }
 0x177   : > { %3427 = vmatmul.mubr.bf16.gmra.mrb[4].mxu0 %v6146_v13  ;;  %3992 = vmatmul.mubr.bf16.gmra.mrb[4].mxu1 %v6146_v13  ;;  %v6248_v13 = vld [vmem:[%s7026_s7 + $0x7ec] ss:$16 sps:$4 sm:$0xff]  }
 0x178   : > { %3502 = vmatpush1.bf16.msra.mxu0 %v6147_v14  ;;  %4067 = vmatpush1.bf16.msra.mxu1 %v6150_v15  ;;  %v6251_v14 = vld [vmem:[%s7728_s0 + $0x1c] ss:$36 sps:$4 sm:$0xff]  }
 0x179   : > { %3503 = vmatprep.subr.bf16.mxu0 %v6155_v16  ;;  %4068 = vmatprep.subr.bf16.mxu1 %v6158_v17  ;;  %v6243_v15 = vld [vmem:[%s7026_s7 + $0x7e0] ss:$16 sps:$4 sm:$0xff]   ;;  %v6246_v16 = vld [vmem:[%s7026_s7 + $0x7e8] ss:$16 sps:$4 sm:$0xff]   ;;  %v6254_v17 = vld [vmem:[%s7026_s7 + $0x804] ss:$16 sps:$4 sm:$0xff]  }
 0x17a   : > { %3436 = vmatprep.mubr.bf16.mxu0 %v6159_v18  ;;  %4001 = vmatprep.mubr.bf16.mxu1 %v6159_v18  ;;  %v6257_v18 = vld [vmem:[%s7026_s7 + $0x80c] ss:$16 sps:$4 sm:$0xff]  }
 0x17c   : > { %3504 = vmatpush1.bf16.msra.mxu0 %v6153_v19  ;;  %4069 = vmatpush1.bf16.msra.mxu1 %v6156_v20  ;;  %v6249_v19 = vld [vmem:[%s7728_s0 + $0x18] ss:$36 sps:$4 sm:$0xff]   ;;  %v6252_v20 = vld [vmem:[%s7026_s7 + $0x800] ss:$16 sps:$4 sm:$0xff]  }
 0x17d   : > { %3505 = vmatprep.subr.bf16.mxu0 %v6164_v21  ;;  %4070 = vmatprep.subr.bf16.mxu1 %v6167_v22  ;;  %v6255_v21 = vld [vmem:[%s7026_s7 + $0x808] ss:$16 sps:$4 sm:$0xff]  }
 0x17e   : > { %v6258_v22 = vld [vmem:[%s7728_s0 + $0x64] ss:$36 sps:$4 sm:$0xff]  }
 0x17f   : > { %3437 = vmatmul.mubr.bf16.gmra.mrb[8].mxu0 %v6161_v23  ;;  %4002 = vmatmul.mubr.bf16.gmra.mrb[8].mxu1 %v6161_v23  ;;  %v6263_v23 = vld [vmem:[%s7026_s7 + $0x824] ss:$16 sps:$4 sm:$0xff]  }
 0x180   : > { %3506 = vmatpush1.bf16.msra.mxu0 %v6162_v24  ;;  %4071 = vmatpush1.bf16.msra.mxu1 %v6165_v25  ;;  %v6266_v24 = vld [vmem:[%s7026_s7 + $0x82c] ss:$16 sps:$4 sm:$0xff]   ;;  %v6261_v25 = vld [vmem:[%s7026_s7 + $0x820] ss:$16 sps:$4 sm:$0xff]  }
 0x181   : > { %3507 = vmatprep.subr.bf16.mxu0 %v6170_v26  ;;  %4072 = vmatprep.subr.bf16.mxu1 %v6173_v27  ;;  %v6264_v26 = vld [vmem:[%s7026_s7 + $0x828] ss:$16 sps:$4 sm:$0xff]   ;;  %v6272_v27 = vld [vmem:[%s7026_s7 + $0x844] ss:$16 sps:$4 sm:$0xff]  }
 0x182   : > { %3446 = vmatprep.mubr.bf16.mxu0 %v6174_v28  ;;  %4011 = vmatprep.mubr.bf16.mxu1 %v6174_v28  ;;  %v6275_v28 = vld [vmem:[%s7026_s7 + $0x84c] ss:$16 sps:$4 sm:$0xff]  }
 0x184   : > { %3508 = vmatpush1.bf16.msra.mxu0 %v6168_v29  ;;  %4073 = vmatpush1.bf16.msra.mxu1 %v6171_v30  ;;  %v6260_v29 = vld [vmem:[%s7728_s0 + $0x60] ss:$36 sps:$4 sm:$0xff]   ;;  %v6267_v30 = vld [vmem:[%s7728_s0 + $0xac] ss:$36 sps:$4 sm:$0xff]  }
 0x185   : > { %3509 = vmatprep.subr.bf16.mxu0 %v6179_v31  ;;  %4074 = vmatprep.subr.bf16.mxu1 %v6182_v32  ;;  %v6270_v31 = vld [vmem:[%s7026_s7 + $0x840] ss:$16 sps:$4 sm:$0xff]   ;;  %v6273_v32 = vld [vmem:[%s7026_s7 + $0x848] ss:$16 sps:$4 sm:$0xff]  }
 0x187   : > { %3447 = vmatmul.mubr.bf16.gmra.mrb[12].mxu0 %v6176_v33  ;;  %4012 = vmatmul.mubr.bf16.gmra.mrb[12].mxu1 %v6176_v33  ;;  %v6281_v33 = vld [vmem:[%s7026_s7 + $0x864] ss:$16 sps:$4 sm:$0xff]  }
 0x188   : > { %3510 = vmatpush1.bf16.msra.mxu0 %v6177_v34  ;;  %4075 = vmatpush1.bf16.msra.mxu1 %v6180_v35  ;;  %v6284_v34 = vld [vmem:[%s7026_s7 + $0x86c] ss:$16 sps:$4 sm:$0xff]   ;;  %v6279_v35 = vld [vmem:[%s7026_s7 + $0x860] ss:$16 sps:$4 sm:$0xff]  }
 0x189   : > { %3511 = vmatprep.subr.bf16.mxu0 %v6185_v36  ;;  %4076 = vmatprep.subr.bf16.mxu1 %v6188_v37  ;;  %v6282_v36 = vld [vmem:[%s7026_s7 + $0x868] ss:$16 sps:$4 sm:$0xff]   ;;  %v6290_v37 = vld [vmem:[%s7026_s7 + $0x884] ss:$16 sps:$4 sm:$0xff]  }
 0x18a   : > { %3456 = vmatprep.mubr.bf16.mxu0 %v6189_v38  ;;  %4021 = vmatprep.mubr.bf16.mxu1 %v6189_v38  ;;  %v6293_v38 = vld [vmem:[%s7026_s7 + $0x88c] ss:$16 sps:$4 sm:$0xff]  }
 0x18c   : > { %3512 = vmatpush1.bf16.msra.mxu0 %v6183_v39  ;;  %4077 = vmatpush1.bf16.msra.mxu1 %v6186_v40  ;;  %v6269_v39 = vld [vmem:[%s7728_s0 + $0xa8] ss:$36 sps:$4 sm:$0xff]   ;;  %v6276_v40 = vld [vmem:[%s7728_s0 + $0xf4] ss:$36 sps:$4 sm:$0xff]  }
 0x18d   : > { %3513 = vmatprep.subr.bf16.mxu0 %v6194_v41  ;;  %4078 = vmatprep.subr.bf16.mxu1 %v6197_v42  ;;  %v6288_v41 = vld [vmem:[%s7026_s7 + $0x880] ss:$16 sps:$4 sm:$0xff]   ;;  %v6291_v42 = vld [vmem:[%s7026_s7 + $0x888] ss:$16 sps:$4 sm:$0xff]  }
 0x18f   : > { %3457 = vmatmul.mubr.bf16.gmra.mrb[16].mxu0 %v6191_v43  ;;  %4022 = vmatmul.mubr.bf16.gmra.mrb[16].mxu1 %v6191_v43  ;;  %v6299_v43 = vld [vmem:[%s7026_s7 + $0x8a4] ss:$16 sps:$4 sm:$0xff]  }
 0x190   : > { %3514 = vmatpush1.bf16.msra.mxu0 %v6192_v44  ;;  %4079 = vmatpush1.bf16.msra.mxu1 %v6195_v45  ;;  %v6302_v44 = vld [vmem:[%s7026_s7 + $0x8ac] ss:$16 sps:$4 sm:$0xff]   ;;  %v6297_v45 = vld [vmem:[%s7026_s7 + $0x8a0] ss:$16 sps:$4 sm:$0xff]  }
 0x191   : > { %3515 = vmatprep.subr.bf16.mxu0 %v6200_v46  ;;  %4080 = vmatprep.subr.bf16.mxu1 %v6203_v47  ;;  %v6300_v46 = vld [vmem:[%s7026_s7 + $0x8a8] ss:$16 sps:$4 sm:$0xff]   ;;  %v6308_v47 = vld [vmem:[%s7026_s7 + $0x8c4] ss:$16 sps:$4 sm:$0xff]  }
 0x192   : > { %3466 = vmatprep.mubr.bf16.mxu0 %v6204_v48  ;;  %4031 = vmatprep.mubr.bf16.mxu1 %v6204_v48  ;;  %v6311_v48 = vld [vmem:[%s7026_s7 + $0x8cc] ss:$16 sps:$4 sm:$0xff]  }
 0x194   : > { %3516 = vmatpush1.bf16.msra.mxu0 %v6198_v49  ;;  %4081 = vmatpush1.bf16.msra.mxu1 %v6201_v50  ;;  %v6278_v49 = vld [vmem:[%s7728_s0 + $0xf0] ss:$36 sps:$4 sm:$0xff]   ;;  %v6285_v50 = vld [vmem:[%s7728_s0 + $0x13c] ss:$36 sps:$4 sm:$0xff]  }
 0x195   : > { %3517 = vmatprep.subr.bf16.mxu0 %v6209_v51  ;;  %4082 = vmatprep.subr.bf16.mxu1 %v6212_v52  ;;  %v6306_v51 = vld [vmem:[%s7026_s7 + $0x8c0] ss:$16 sps:$4 sm:$0xff]   ;;  %v6309_v52 = vld [vmem:[%s7026_s7 + $0x8c8] ss:$16 sps:$4 sm:$0xff]  }
 0x197   : > { %3467 = vmatmul.mubr.bf16.gmra.mrb[20].mxu0 %v6206_v53  ;;  %4032 = vmatmul.mubr.bf16.gmra.mrb[20].mxu1 %v6206_v53  ;;  %v6317_v53 = vld [vmem:[%s7026_s7 + $0x8e4] ss:$16 sps:$4 sm:$0xff]  }
 0x198   : > { %3518 = vmatpush1.bf16.msra.mxu0 %v6207_v54  ;;  %4083 = vmatpush1.bf16.msra.mxu1 %v6210_v55  ;;  %v6320_v54 = vld [vmem:[%s7026_s7 + $0x8ec] ss:$16 sps:$4 sm:$0xff]   ;;  %v6315_v55 = vld [vmem:[%s7026_s7 + $0x8e0] ss:$16 sps:$4 sm:$0xff]  }
 0x199   : > { %3519 = vmatprep.subr.bf16.mxu0 %v6215_v56  ;;  %4084 = vmatprep.subr.bf16.mxu1 %v6218_v57  ;;  %v6318_v56 = vld [vmem:[%s7026_s7 + $0x8e8] ss:$16 sps:$4 sm:$0xff]  }
 0x19a   : > { %3476 = vmatprep.mubr.bf16.mxu0 %v6219_v59  ;;  %4041 = vmatprep.mubr.bf16.mxu1 %v6219_v59  ;;  %v6287_v57 = vld [vmem:[%s7728_s0 + $0x138] ss:$36 sps:$4 sm:$0xff]   ;;  %v6296_v59 = vld [vmem:[%s7728_s0 + $0x180] ss:$36 sps:$4 sm:$0xff]  }
 0x19c   : > { %3520 = vmatpush1.bf16.msra.mxu0 %v6213_v58  ;;  %4085 = vmatpush1.bf16.msra.mxu1 %v6216_v60  ;;  %v6294_v58 = vld [vmem:[%s7728_s0 + $0x184] ss:$36 sps:$4 sm:$0xff]   ;;  %v6303_v60 = vld [vmem:[%s7728_s0 + $0x1cc] ss:$36 sps:$4 sm:$0xff]  }
 0x19d   : > { %3521 = vmatprep.subr.bf16.mxu0 %v6224_v61  ;;  %4086 = vmatprep.subr.bf16.mxu1 %v6227_v62  ;;  %v6305_v61 = vld [vmem:[%s7728_s0 + $0x1c8] ss:$36 sps:$4 sm:$0xff]   ;;  %v6312_v62 = vld [vmem:[%s7728_s0 + $0x214] ss:$36 sps:$4 sm:$0xff]  }
 0x19f   : > { %3477 = vmatmul.mubr.bf16.gmra.mrb[24].mxu0 %v6221_v63  ;;  %4042 = vmatmul.mubr.bf16.gmra.mrb[24].mxu1 %v6221_v63  ;;  %v6314_v63 = vld [vmem:[%s7728_s0 + $0x210] ss:$36 sps:$4 sm:$0xff]  }
 0x1a0   : > { %3522 = vmatpush1.bf16.msra.mxu0 %v6222_v0  ;;  %4087 = vmatpush1.bf16.msra.mxu1 %v6225_v1  ;;  %v6369_v0 = vmov 0   ;;  %v6321_v1 = vld [vmem:[%s7728_s0 + $0x20] ss:$36 sps:$4 sm:$0xff]  }
 0x1a1   : > { %3523 = vmatprep.subr.bf16.mxu0 %v6230_v2  ;;  %4088 = vmatprep.subr.bf16.mxu1 %v6233_v3  ;;  %v6322_v2 = vld [vmem:[%s7728_s0 + $0x68] ss:$36 sps:$4 sm:$0xff]   ;;  %v6323_v3 = vld [vmem:[%s7728_s0 + $0xb0] ss:$36 sps:$4 sm:$0xff]  }
 0x1a2   : > { %3486 = vmatprep.mubr.bf16.mxu0 %v6234_v4  ;;  %4051 = vmatprep.mubr.bf16.mxu1 %v6234_v4  ;;  %v6324_v4 = vld [vmem:[%s7728_s0 + $0xf8] ss:$36 sps:$4 sm:$0xff]  }
 0x1a4   : > { %3524 = vmatpush1.bf16.msra.mxu0 %v6228_v5  ;;  %4089 = vmatpush1.bf16.msra.mxu1 %v6231_v6  ;;  %v6325_v5 = vld [vmem:[%s7728_s0 + $0x140] ss:$36 sps:$4 sm:$0xff]   ;;  %v6326_v6 = vld [vmem:[%s7728_s0 + $0x188] ss:$36 sps:$4 sm:$0xff]  }
 0x1a5   : > { %3525 = vmatprep.subr.bf16.mxu0 %v6239_v7  ;;  %4090 = vmatprep.subr.bf16.mxu1 %v6242_v8  ;;  %v6327_v7 = vld [vmem:[%s7728_s0 + $0x1d0] ss:$36 sps:$4 sm:$0xff]   ;;  %v6328_v8 = vld [vmem:[%s7728_s0 + $0x218] ss:$36 sps:$4 sm:$0xff]  }
 0x1a7   : > { %3487 = vmatmul.mubr.bf16.gmra.mrb[28].mxu0 %v6236_v9  ;;  %4052 = vmatmul.mubr.bf16.gmra.mrb[28].mxu1 %v6236_v9  ;;  %v4485_v9 = vlaneseq }
 0x1a8   : > { %3526 = vmatpush1.bf16.msra.mxu0 %v6237_v10  ;;  %4091 = vmatpush1.bf16.msra.mxu1 %v6240_v11 }
 0x1a9   : > { %3527 = vmatprep.subr.bf16.mxu0 %v6245_v12  ;;  %4092 = vmatprep.subr.bf16.mxu1 %v6248_v13  ;;  %v4486_v10 = vshrl.u32 %v4485_v9, 7  ;;  %v4483_v13 = vld [vmem:[%s845_s23] sm:$0xf] }
 0x1aa   : > { %3529 = vmatprep.mubr.bf16.mxu0 %v6251_v14  ;;  %4094 = vmatprep.mubr.bf16.mxu1 %v6251_v14 }
 0x1ab   : > { %v4487_v11 = vsub.s32 0, %v4486_v10  ;;  %v4495_v12 = vsub.s32 2, %v4486_v10  ;;  %v4491_v14 = vsub.s32 1, %v4486_v10 }
 0x1ac   : > { %3528 = vmatpush1.bf16.msra.mxu0 %v6243_v15  ;;  %4093 = vmatpush1.bf16.msra.mxu1 %v6246_v16  ;;  %v4499_v15 = vsub.s32 3, %v4486_v10 }
 0x1ad   : > { %3610 = vmatprep.subr.bf16.mxu0 %v6254_v17  ;;  %4175 = vmatprep.subr.bf16.mxu1 %v6257_v18  ;;  %v7533_v16 = vrot.slane %v4483_v13, %v4487_v11  ;;  %v7535_v17 = vrot.slane %v4483_v13, %v4495_v12  ;;  %v7537_v18 = vrot.slane %v4483_v13, %v4491_v14 }
 0x1af   : > { %3530 = vmatmul.mubr.bf16.vlgmr.msra.gmra.mrb[0].mxu0 %v6249_v19  ;;  %4095 = vmatmul.mubr.bf16.vlgmr.msra.gmra.mrb[0].mxu1 %v6249_v19  ;;  %v7539_v19 = vrot.slane %v4483_v13, %v4499_v15 }
 0x1b0   : > { %3611 = vmatpush1.bf16.msra.mxu0 %v6252_v20  ;;  %4176 = vmatpush1.bf16.msra.mxu1 %v6255_v21 }
 0x1b1   : > { %3539 = vmatprep.mubr.bf16.mxu0 %v6258_v22  ;;  %4104 = vmatprep.mubr.bf16.mxu1 %v6258_v22 }
 0x1b2   : > { %3612 = vmatprep.subr.bf16.mxu0 %v6263_v23  ;;  %4177 = vmatprep.subr.bf16.mxu1 %v6266_v24 }
 0x1b4   : > { %3613 = vmatpush1.bf16.msra.mxu0 %v6261_v25  ;;  %4178 = vmatpush1.bf16.msra.mxu1 %v6264_v26 }
 0x1b5   : > { %3614 = vmatprep.subr.bf16.mxu0 %v6272_v27  ;;  %4179 = vmatprep.subr.bf16.mxu1 %v6275_v28 }
 0x1b7   : > { %3540 = vmatmul.mubr.bf16.gmra.mrb[4].mxu0 %v6260_v29  ;;  %4105 = vmatmul.mubr.bf16.gmra.mrb[4].mxu1 %v6260_v29 }
 0x1b8   : > { %3549 = vmatprep.mubr.bf16.mxu0 %v6267_v30  ;;  %4114 = vmatprep.mubr.bf16.mxu1 %v6267_v30 }
 0x1b9   : > { %3615 = vmatpush1.bf16.msra.mxu0 %v6270_v31  ;;  %4180 = vmatpush1.bf16.msra.mxu1 %v6273_v32 }
 0x1ba   : > { %3616 = vmatprep.subr.bf16.mxu0 %v6281_v33  ;;  %4181 = vmatprep.subr.bf16.mxu1 %v6284_v34 }
 0x1bd   : > { %3617 = vmatpush1.bf16.msra.mxu0 %v6279_v35  ;;  %4182 = vmatpush1.bf16.msra.mxu1 %v6282_v36 }
 0x1be   : > { %3618 = vmatprep.subr.bf16.mxu0 %v6290_v37  ;;  %4183 = vmatprep.subr.bf16.mxu1 %v6293_v38 }
 0x1bf   : > { %3550 = vmatmul.mubr.bf16.gmra.mrb[8].mxu0 %v6269_v39  ;;  %4115 = vmatmul.mubr.bf16.gmra.mrb[8].mxu1 %v6269_v39 }
 0x1c0   : > { %3559 = vmatprep.mubr.bf16.mxu0 %v6276_v40  ;;  %4124 = vmatprep.mubr.bf16.mxu1 %v6276_v40 }
 0x1c1   : > { %3619 = vmatpush1.bf16.msra.mxu0 %v6288_v41  ;;  %4184 = vmatpush1.bf16.msra.mxu1 %v6291_v42 }
 0x1c2   : > { %3620 = vmatprep.subr.bf16.mxu0 %v6299_v43  ;;  %4185 = vmatprep.subr.bf16.mxu1 %v6302_v44 }
 0x1c5   : > { %3621 = vmatpush1.bf16.msra.mxu0 %v6297_v45  ;;  %4186 = vmatpush1.bf16.msra.mxu1 %v6300_v46 }
 0x1c6   : > { %3622 = vmatprep.subr.bf16.mxu0 %v6308_v47  ;;  %4187 = vmatprep.subr.bf16.mxu1 %v6311_v48 }
 0x1c7   : > { %3560 = vmatmul.mubr.bf16.gmra.mrb[12].mxu0 %v6278_v49  ;;  %4125 = vmatmul.mubr.bf16.gmra.mrb[12].mxu1 %v6278_v49 }
 0x1c8   : > { %3569 = vmatprep.mubr.bf16.mxu0 %v6285_v50  ;;  %4134 = vmatprep.mubr.bf16.mxu1 %v6285_v50 }
 0x1c9   : > { %3623 = vmatpush1.bf16.msra.mxu0 %v6306_v51  ;;  %4188 = vmatpush1.bf16.msra.mxu1 %v6309_v52 }
 0x1ca   : > { %3624 = vmatprep.subr.bf16.mxu0 %v6317_v53  ;;  %4189 = vmatprep.subr.bf16.mxu1 %v6320_v54 }
 0x1cd   : > { %3625 = vmatpush1.bf16.msra.mxu0 %v6315_v55  ;;  %4190 = vmatpush1.bf16.msra.mxu1 %v6318_v56 }
 0x1cf   : > { %3570 = vmatmul.mubr.bf16.gmra.mrb[16].mxu0 %v6287_v57  ;;  %4135 = vmatmul.mubr.bf16.gmra.mrb[16].mxu1 %v6287_v57 }
 0x1d0   : > { %3579 = vmatprep.mubr.bf16.mxu0 %v6294_v58  ;;  %4144 = vmatprep.mubr.bf16.mxu1 %v6294_v58 }
 0x1d7   : > { %3580 = vmatmul.mubr.bf16.gmra.mrb[20].mxu0 %v6296_v59  ;;  %4145 = vmatmul.mubr.bf16.gmra.mrb[20].mxu1 %v6296_v59 }
 0x1d8   : > { %3589 = vmatprep.mubr.bf16.mxu0 %v6303_v60  ;;  %4154 = vmatprep.mubr.bf16.mxu1 %v6303_v60 }
 0x1df   : > { %3590 = vmatmul.mubr.bf16.gmra.mrb[24].mxu0 %v6305_v61  ;;  %4155 = vmatmul.mubr.bf16.gmra.mrb[24].mxu1 %v6305_v61 }
 0x1e0   : > { %3599 = vmatprep.mubr.bf16.mxu0 %v6312_v62  ;;  %4164 = vmatprep.mubr.bf16.mxu1 %v6312_v62 }
 0x1e7   : > { %3600 = vmatmul.mubr.bf16.gmra.mrb[28].mxu0 %v6314_v63  ;;  %4165 = vmatmul.mubr.bf16.gmra.mrb[28].mxu1 %v6314_v63 }
 0x1e8   : > { %3642 = vmatprep.mubr.bf16.mxu0 %v6369_v0  ;;  %4207 = vmatprep.mubr.bf16.mxu1 %v6369_v0 }
 0x1ef   : > { %3643 = vmatmul.mubr.bf16.vlgmr.msra.gmra.mrb[0].mxu0 %v6321_v1  ;;  %4208 = vmatmul.mubr.bf16.vlgmr.msra.gmra.mrb[0].mxu1 %v6321_v1 }
 0x1f0   : > { %3652 = vmatprep.mubr.bf16.mxu0 %v6369_v0  ;;  %4217 = vmatprep.mubr.bf16.mxu1 %v6369_v0 }
 0x1f7   : > { %3653 = vmatmul.mubr.bf16.gmra.mrb[4].mxu0 %v6322_v2  ;;  %4218 = vmatmul.mubr.bf16.gmra.mrb[4].mxu1 %v6322_v2 }
 0x1f8   : > { %3662 = vmatprep.mubr.bf16.mxu0 %v6369_v0  ;;  %4227 = vmatprep.mubr.bf16.mxu1 %v6369_v0 }
 0x1ff   : > { %3663 = vmatmul.mubr.bf16.gmra.mrb[8].mxu0 %v6323_v3  ;;  %4228 = vmatmul.mubr.bf16.gmra.mrb[8].mxu1 %v6323_v3 }
 0x200   : > { %3672 = vmatprep.mubr.bf16.mxu0 %v6369_v0  ;;  %4237 = vmatprep.mubr.bf16.mxu1 %v6369_v0 }
 0x207   : > { %3673 = vmatmul.mubr.bf16.gmra.mrb[12].mxu0 %v6324_v4  ;;  %4238 = vmatmul.mubr.bf16.gmra.mrb[12].mxu1 %v6324_v4 }
 0x208   : > { %3682 = vmatprep.mubr.bf16.mxu0 %v6369_v0  ;;  %4247 = vmatprep.mubr.bf16.mxu1 %v6369_v0 }
 0x20f   : > { %3683 = vmatmul.mubr.bf16.gmra.mrb[16].mxu0 %v6325_v5  ;;  %4248 = vmatmul.mubr.bf16.gmra.mrb[16].mxu1 %v6325_v5 }
 0x210   : > { %3692 = vmatprep.mubr.bf16.mxu0 %v6369_v0  ;;  %4257 = vmatprep.mubr.bf16.mxu1 %v6369_v0 }
 0x217   : > { %3693 = vmatmul.mubr.bf16.gmra.mrb[20].mxu0 %v6326_v6  ;;  %4258 = vmatmul.mubr.bf16.gmra.mrb[20].mxu1 %v6326_v6 }
 0x218   : > { %3702 = vmatprep.mubr.bf16.mxu0 %v6369_v0  ;;  %4267 = vmatprep.mubr.bf16.mxu1 %v6369_v0 }
 0x21f   : > { %3703 = vmatmul.mubr.bf16.gmra.mrb[24].mxu0 %v6327_v7  ;;  %4268 = vmatmul.mubr.bf16.gmra.mrb[24].mxu1 %v6327_v7 }
 0x220   : > { %3712 = vmatprep.mubr.bf16.mxu0 %v6369_v0  ;;  %4277 = vmatprep.mubr.bf16.mxu1 %v6369_v0 }
 0x227   : > { %3713 = vmatmul.mubr.bf16.gmra.mrb[28].mxu0 %v6328_v8  ;;  %4278 = vmatmul.mubr.bf16.gmra.mrb[28].mxu1 %v6328_v8 }
 0x2c2   : > { %v3644_v20 = vpop.f32.mrb[0].mxu0  ;;  %v4209_v21 = vpop.f32.mrb[0].mxu1 }
 0x2c3   : > { %v4505_v22 = vadd.f32 %v7533_v16, %v3644_v20  ;;  %v4507_v23 = vadd.f32 %v7535_v17, %v4209_v21  ;;  %v3646_v24 = vpop.f32.mrb[1].mxu0  ;;  %v4211_v25 = vpop.f32.mrb[1].mxu1 }
 0x2c4   : > { %v4506_v26 = vadd.f32 %v7537_v18, %v3646_v24  ;;  %v4508_v27 = vadd.f32 %v7539_v19, %v4211_v25  ;;  %v3648_v28 = vpop.f32.mrb[2].mxu0  ;;  %v4213_v29 = vpop.f32.mrb[2].mxu1 }
 0x2c5   : > { %v4569_v30 = vmax.f32 %v4505_v22, 0.0  ;;  %v4571_v31 = vmax.f32 %v4507_v23, 0.0  ;;  %v4509_v32 = vadd.f32 %v7533_v16, %v3648_v28  ;;  %v4511_v33 = vadd.f32 %v7535_v17, %v4213_v29  ;;  %v3650_v34 = vpop.f32.mrb[3].mxu0  ;;  %v4215_v35 = vpop.f32.mrb[3].mxu1 }
 0x2c6   : > { %v4570_v36 = vmax.f32 %v4506_v26, 0.0  ;;  %v4572_v37 = vmax.f32 %v4508_v27, 0.0  ;;  %v4510_v38 = vadd.f32 %v7537_v18, %v3650_v34  ;;  %v4512_v39 = vadd.f32 %v7539_v19, %v4215_v35 }
 0x2c7   : > { %v4573_v40 = vmax.f32 %v4509_v32, 0.0  ;;  %v4575_v41 = vmax.f32 %v4511_v33, 0.0 }
 0x2c8   : > { %v5461_v42 = vpack.c.bf16 %v4570_v36, %v4569_v30  ;;  %v5462_v43 = vpack.c.bf16 %v4572_v37, %v4571_v31  ;;  %v4574_v44 = vmax.f32 %v4510_v38, 0.0  ;;  %v4576_v45 = vmax.f32 %v4512_v39, 0.0 }
 0x2ca   : > { %4825 = vst [vmem:[%s7551_s12] sm:$0xff] %v5461_v42  ;;  %4826 = vst [vmem:[%s7551_s12 + $0x8] sm:$0xff] %v5462_v43  ;;  %v5463_v46 = vpack.c.bf16 %v4574_v44, %v4573_v40  ;;  %v5464_v47 = vpack.c.bf16 %v4576_v45, %v4575_v41  ;;  %v3654_v48 = vpop.f32.mrb[4].mxu0  ;;  %v4219_v49 = vpop.f32.mrb[4].mxu1 }
 0x2cb   : > { %v4513_v50 = vadd.f32 %v7533_v16, %v3654_v48  ;;  %v4515_v51 = vadd.f32 %v7535_v17, %v4219_v49  ;;  %v3656_v52 = vpop.f32.mrb[5].mxu0  ;;  %v4221_v53 = vpop.f32.mrb[5].mxu1 }
 0x2cc   : > { %4827 = vst [vmem:[%s7551_s12 + $0x10] sm:$0xff] %v5463_v46  ;;  %4828 = vst [vmem:[%s7551_s12 + $0x18] sm:$0xff] %v5464_v47  ;;  %v4514_v54 = vadd.f32 %v7537_v18, %v3656_v52  ;;  %v4516_v55 = vadd.f32 %v7539_v19, %v4221_v53  ;;  %v3658_v56 = vpop.f32.mrb[6].mxu0  ;;  %v4223_v57 = vpop.f32.mrb[6].mxu1 }
 0x2cd   : > { %v4577_v58 = vmax.f32 %v4513_v50, 0.0  ;;  %v4579_v59 = vmax.f32 %v4515_v51, 0.0  ;;  %v4517_v60 = vadd.f32 %v7533_v16, %v3658_v56  ;;  %v4519_v61 = vadd.f32 %v7535_v17, %v4223_v57  ;;  %v3660_v62 = vpop.f32.mrb[7].mxu0  ;;  %v4225_v63 = vpop.f32.mrb[7].mxu1 }
 0x2ce   : > { %v4578_v0 = vmax.f32 %v4514_v54, 0.0  ;;  %v4580_v1 = vmax.f32 %v4516_v55, 0.0  ;;  %v4518_v2 = vadd.f32 %v7537_v18, %v3660_v62  ;;  %v4520_v3 = vadd.f32 %v7539_v19, %v4225_v63 }
 0x2cf   : > { %v4581_v4 = vmax.f32 %v4517_v60, 0.0  ;;  %v4583_v5 = vmax.f32 %v4519_v61, 0.0 }
 0x2d0   : > { %v5465_v6 = vpack.c.bf16 %v4578_v0, %v4577_v58  ;;  %v5466_v7 = vpack.c.bf16 %v4580_v1, %v4579_v59  ;;  %v4582_v8 = vmax.f32 %v4518_v2, 0.0  ;;  %v4584_v9 = vmax.f32 %v4520_v3, 0.0 }
 0x2d2   : > { %4829 = vst [vmem:[%s7551_s12 + $0x20] sm:$0xff] %v5465_v6  ;;  %4830 = vst [vmem:[%s7551_s12 + $0x28] sm:$0xff] %v5466_v7  ;;  %v5467_v10 = vpack.c.bf16 %v4582_v8, %v4581_v4  ;;  %v5468_v11 = vpack.c.bf16 %v4584_v9, %v4583_v5  ;;  %v3664_v12 = vpop.f32.mrb[8].mxu0  ;;  %v4229_v13 = vpop.f32.mrb[8].mxu1 }
 0x2d3   : > { %v4521_v14 = vadd.f32 %v7533_v16, %v3664_v12  ;;  %v4523_v15 = vadd.f32 %v7535_v17, %v4229_v13  ;;  %v3666_v20 = vpop.f32.mrb[9].mxu0  ;;  %v4231_v21 = vpop.f32.mrb[9].mxu1 }
 0x2d4   : > { %4831 = vst [vmem:[%s7551_s12 + $0x30] sm:$0xff] %v5467_v10  ;;  %4832 = vst [vmem:[%s7551_s12 + $0x38] sm:$0xff] %v5468_v11  ;;  %v4522_v22 = vadd.f32 %v7537_v18, %v3666_v20  ;;  %v4524_v23 = vadd.f32 %v7539_v19, %v4231_v21  ;;  %v3668_v24 = vpop.f32.mrb[10].mxu0  ;;  %v4233_v25 = vpop.f32.mrb[10].mxu1 }
 0x2d5   : > { %v4585_v26 = vmax.f32 %v4521_v14, 0.0  ;;  %v4587_v27 = vmax.f32 %v4523_v15, 0.0  ;;  %v4525_v28 = vadd.f32 %v7533_v16, %v3668_v24  ;;  %v4527_v29 = vadd.f32 %v7535_v17, %v4233_v25  ;;  %v3670_v30 = vpop.f32.mrb[11].mxu0  ;;  %v4235_v31 = vpop.f32.mrb[11].mxu1 }
 0x2d6   : > { %v4586_v32 = vmax.f32 %v4522_v22, 0.0  ;;  %v4588_v33 = vmax.f32 %v4524_v23, 0.0  ;;  %v4526_v34 = vadd.f32 %v7537_v18, %v3670_v30  ;;  %v4528_v35 = vadd.f32 %v7539_v19, %v4235_v31 }
 0x2d7   : > { %v4589_v36 = vmax.f32 %v4525_v28, 0.0  ;;  %v4591_v37 = vmax.f32 %v4527_v29, 0.0 }
 0x2d8   : > { %v5469_v38 = vpack.c.bf16 %v4586_v32, %v4585_v26  ;;  %v5470_v39 = vpack.c.bf16 %v4588_v33, %v4587_v27  ;;  %v4590_v40 = vmax.f32 %v4526_v34, 0.0  ;;  %v4592_v41 = vmax.f32 %v4528_v35, 0.0 }
 0x2da   : > { %4833 = vst [vmem:[%s7551_s12 + $0x40] sm:$0xff] %v5469_v38  ;;  %4834 = vst [vmem:[%s7551_s12 + $0x48] sm:$0xff] %v5470_v39  ;;  %v5471_v42 = vpack.c.bf16 %v4590_v40, %v4589_v36  ;;  %v5472_v43 = vpack.c.bf16 %v4592_v41, %v4591_v37  ;;  %v3674_v44 = vpop.f32.mrb[12].mxu0  ;;  %v4239_v45 = vpop.f32.mrb[12].mxu1 }
 0x2db   : > { %v4529_v46 = vadd.f32 %v7533_v16, %v3674_v44  ;;  %v4531_v47 = vadd.f32 %v7535_v17, %v4239_v45  ;;  %v3676_v48 = vpop.f32.mrb[13].mxu0  ;;  %v4241_v49 = vpop.f32.mrb[13].mxu1 }
 0x2dc   : > { %4835 = vst [vmem:[%s7551_s12 + $0x50] sm:$0xff] %v5471_v42  ;;  %4836 = vst [vmem:[%s7551_s12 + $0x58] sm:$0xff] %v5472_v43  ;;  %v4530_v50 = vadd.f32 %v7537_v18, %v3676_v48  ;;  %v4532_v51 = vadd.f32 %v7539_v19, %v4241_v49  ;;  %v3678_v52 = vpop.f32.mrb[14].mxu0  ;;  %v4243_v53 = vpop.f32.mrb[14].mxu1 }
 0x2dd   : > { %v4593_v54 = vmax.f32 %v4529_v46, 0.0  ;;  %v4595_v55 = vmax.f32 %v4531_v47, 0.0  ;;  %v4533_v56 = vadd.f32 %v7533_v16, %v3678_v52  ;;  %v4535_v57 = vadd.f32 %v7535_v17, %v4243_v53  ;;  %v3680_v58 = vpop.f32.mrb[15].mxu0  ;;  %v4245_v59 = vpop.f32.mrb[15].mxu1 }
 0x2de   : > { %v4594_v60 = vmax.f32 %v4530_v50, 0.0  ;;  %v4596_v61 = vmax.f32 %v4532_v51, 0.0  ;;  %v4534_v62 = vadd.f32 %v7537_v18, %v3680_v58  ;;  %v4536_v63 = vadd.f32 %v7539_v19, %v4245_v59 }
 0x2df   : > { %v4597_v0 = vmax.f32 %v4533_v56, 0.0  ;;  %v4599_v1 = vmax.f32 %v4535_v57, 0.0 }
 0x2e0   : > { %v5473_v2 = vpack.c.bf16 %v4594_v60, %v4593_v54  ;;  %v5474_v3 = vpack.c.bf16 %v4596_v61, %v4595_v55  ;;  %v4598_v4 = vmax.f32 %v4534_v62, 0.0  ;;  %v4600_v5 = vmax.f32 %v4536_v63, 0.0 }
 0x2e2   : > { %4837 = vst [vmem:[%s7551_s12 + $0x60] sm:$0xff] %v5473_v2  ;;  %4838 = vst [vmem:[%s7551_s12 + $0x68] sm:$0xff] %v5474_v3  ;;  %v5475_v6 = vpack.c.bf16 %v4598_v4, %v4597_v0  ;;  %v5476_v7 = vpack.c.bf16 %v4600_v5, %v4599_v1  ;;  %v3684_v8 = vpop.f32.mrb[16].mxu0  ;;  %v4249_v9 = vpop.f32.mrb[16].mxu1 }
 0x2e3   : > { %v4537_v10 = vadd.f32 %v7533_v16, %v3684_v8  ;;  %v4539_v11 = vadd.f32 %v7535_v17, %v4249_v9  ;;  %v3686_v12 = vpop.f32.mrb[17].mxu0  ;;  %v4251_v13 = vpop.f32.mrb[17].mxu1 }
 0x2e4   : > { %4839 = vst [vmem:[%s7551_s12 + $0x70] sm:$0xff] %v5475_v6  ;;  %4840 = vst [vmem:[%s7551_s12 + $0x78] sm:$0xff] %v5476_v7  ;;  %v4538_v14 = vadd.f32 %v7537_v18, %v3686_v12  ;;  %v4540_v15 = vadd.f32 %v7539_v19, %v4251_v13  ;;  %v3688_v20 = vpop.f32.mrb[18].mxu0  ;;  %v4253_v21 = vpop.f32.mrb[18].mxu1 }
 0x2e5   : > { %v4601_v22 = vmax.f32 %v4537_v10, 0.0  ;;  %v4603_v23 = vmax.f32 %v4539_v11, 0.0  ;;  %v4541_v24 = vadd.f32 %v7533_v16, %v3688_v20  ;;  %v4543_v25 = vadd.f32 %v7535_v17, %v4253_v21  ;;  %v3690_v26 = vpop.f32.mrb[19].mxu0  ;;  %v4255_v27 = vpop.f32.mrb[19].mxu1 }
 0x2e6   : > { %v4602_v28 = vmax.f32 %v4538_v14, 0.0  ;;  %v4604_v29 = vmax.f32 %v4540_v15, 0.0  ;;  %v4542_v30 = vadd.f32 %v7537_v18, %v3690_v26  ;;  %v4544_v31 = vadd.f32 %v7539_v19, %v4255_v27 }
 0x2e7   : > { %v4605_v32 = vmax.f32 %v4541_v24, 0.0  ;;  %v4607_v33 = vmax.f32 %v4543_v25, 0.0 }
 0x2e8   : > { %v5477_v34 = vpack.c.bf16 %v4602_v28, %v4601_v22  ;;  %v5478_v35 = vpack.c.bf16 %v4604_v29, %v4603_v23  ;;  %v4606_v36 = vmax.f32 %v4542_v30, 0.0  ;;  %v4608_v37 = vmax.f32 %v4544_v31, 0.0 }
 0x2ea   : > { %4841 = vst [vmem:[%s7551_s12 + $0x80] sm:$0xff] %v5477_v34  ;;  %4842 = vst [vmem:[%s7551_s12 + $0x88] sm:$0xff] %v5478_v35  ;;  %v5479_v38 = vpack.c.bf16 %v4606_v36, %v4605_v32  ;;  %v5480_v39 = vpack.c.bf16 %v4608_v37, %v4607_v33  ;;  %v3694_v40 = vpop.f32.mrb[20].mxu0  ;;  %v4259_v41 = vpop.f32.mrb[20].mxu1 }
 0x2eb   : > { %v4545_v42 = vadd.f32 %v7533_v16, %v3694_v40  ;;  %v4547_v43 = vadd.f32 %v7535_v17, %v4259_v41  ;;  %v3696_v44 = vpop.f32.mrb[21].mxu0  ;;  %v4261_v45 = vpop.f32.mrb[21].mxu1 }
 0x2ec   : > { %4843 = vst [vmem:[%s7551_s12 + $0x90] sm:$0xff] %v5479_v38  ;;  %4844 = vst [vmem:[%s7551_s12 + $0x98] sm:$0xff] %v5480_v39  ;;  %v4546_v46 = vadd.f32 %v7537_v18, %v3696_v44  ;;  %v4548_v47 = vadd.f32 %v7539_v19, %v4261_v45  ;;  %v3698_v48 = vpop.f32.mrb[22].mxu0  ;;  %v4263_v49 = vpop.f32.mrb[22].mxu1 }
 0x2ed   : > { %v4609_v50 = vmax.f32 %v4545_v42, 0.0  ;;  %v4611_v51 = vmax.f32 %v4547_v43, 0.0  ;;  %v4549_v52 = vadd.f32 %v7533_v16, %v3698_v48  ;;  %v4551_v53 = vadd.f32 %v7535_v17, %v4263_v49  ;;  %v3700_v54 = vpop.f32.mrb[23].mxu0  ;;  %v4265_v55 = vpop.f32.mrb[23].mxu1 }
 0x2ee   : > { %v4610_v56 = vmax.f32 %v4546_v46, 0.0  ;;  %v4612_v57 = vmax.f32 %v4548_v47, 0.0  ;;  %v4550_v58 = vadd.f32 %v7537_v18, %v3700_v54  ;;  %v4552_v59 = vadd.f32 %v7539_v19, %v4265_v55 }
 0x2ef   : > { %v4613_v60 = vmax.f32 %v4549_v52, 0.0  ;;  %v4615_v61 = vmax.f32 %v4551_v53, 0.0 }
 0x2f0   : > { %v5481_v62 = vpack.c.bf16 %v4610_v56, %v4609_v50  ;;  %v5482_v63 = vpack.c.bf16 %v4612_v57, %v4611_v51  ;;  %v4614_v0 = vmax.f32 %v4550_v58, 0.0  ;;  %v4616_v1 = vmax.f32 %v4552_v59, 0.0 }
 0x2f2   : > { %4845 = vst [vmem:[%s7551_s12 + $0xa0] sm:$0xff] %v5481_v62  ;;  %4846 = vst [vmem:[%s7551_s12 + $0xa8] sm:$0xff] %v5482_v63  ;;  %v5483_v2 = vpack.c.bf16 %v4614_v0, %v4613_v60  ;;  %v5484_v3 = vpack.c.bf16 %v4616_v1, %v4615_v61  ;;  %v3704_v4 = vpop.f32.mrb[24].mxu0  ;;  %v4269_v5 = vpop.f32.mrb[24].mxu1  ;;  %v4886_v62 = vld [vmem:[%s7551_s12 + $0x10] sm:$0xff] (%p6425_p6)  ;;  %v4888_v63 = vld [vmem:[%s7551_s12 + $0x18] sm:$0xff] (%p6425_p6) }
 0x2f3   : > { %v4553_v6 = vadd.f32 %v7533_v16, %v3704_v4  ;;  %v4555_v7 = vadd.f32 %v7535_v17, %v4269_v5  ;;  %v3706_v8 = vpop.f32.mrb[25].mxu0  ;;  %v4271_v9 = vpop.f32.mrb[25].mxu1  ;;  %v4890_v0 = vld [vmem:[%s7551_s12 + $0x20] sm:$0xff] (%p6425_p6)  ;;  %v4892_v1 = vld [vmem:[%s7551_s12 + $0x28] sm:$0xff] (%p6425_p6)  ;;  %4887 = vst [vmem:[%s7650_s27 + $0x40] sm:$0xff] (%p6425_p6), %v4886_v62  ;;  %4889 = vst [vmem:[%s7650_s27 + $0x48] sm:$0xff] (%p6425_p6), %v4888_v63 }
 0x2f4   : > { %4847 = vst [vmem:[%s7551_s12 + $0xb0] sm:$0xff] %v5483_v2  ;;  %4848 = vst [vmem:[%s7551_s12 + $0xb8] sm:$0xff] %v5484_v3  ;;  %v4554_v10 = vadd.f32 %v7537_v18, %v3706_v8  ;;  %v4556_v11 = vadd.f32 %v7539_v19, %v4271_v9  ;;  %v3708_v12 = vpop.f32.mrb[26].mxu0  ;;  %v4273_v13 = vpop.f32.mrb[26].mxu1  ;;  %v4894_v2 = vld [vmem:[%s7551_s12 + $0x30] sm:$0xff] (%p6425_p6)  ;;  %v4896_v3 = vld [vmem:[%s7551_s12 + $0x38] sm:$0xff] (%p6425_p6) }
 0x2f5   : > { %v4617_v14 = vmax.f32 %v4553_v6, 0.0  ;;  %v4619_v15 = vmax.f32 %v4555_v7, 0.0  ;;  %v4557_v20 = vadd.f32 %v7533_v16, %v3708_v12  ;;  %v4559_v21 = vadd.f32 %v7535_v17, %v4273_v13  ;;  %v3710_v22 = vpop.f32.mrb[27].mxu0  ;;  %v4275_v23 = vpop.f32.mrb[27].mxu1  ;;  %4891 = vst [vmem:[%s7650_s27 + $0x80] sm:$0xff] (%p6425_p6), %v4890_v0  ;;  %4893 = vst [vmem:[%s7650_s27 + $0x88] sm:$0xff] (%p6425_p6), %v4892_v1 }
 0x2f6   : > { %v4618_v24 = vmax.f32 %v4554_v10, 0.0  ;;  %v4620_v25 = vmax.f32 %v4556_v11, 0.0  ;;  %v4558_v26 = vadd.f32 %v7537_v18, %v3710_v22  ;;  %v4560_v27 = vadd.f32 %v7539_v19, %v4275_v23  ;;  %v4898_v4 = vld [vmem:[%s7551_s12 + $0x40] sm:$0xff] (%p6425_p6)  ;;  %4895 = vst [vmem:[%s7650_s27 + $0xc0] sm:$0xff] (%p6425_p6), %v4894_v2  ;;  %4897 = vst [vmem:[%s7650_s27 + $0xc8] sm:$0xff] (%p6425_p6), %v4896_v3  ;;  %v4900_v5 = vld [vmem:[%s7551_s12 + $0x48] sm:$0xff] (%p6425_p6) }
 0x2f7   : > { %v4621_v28 = vmax.f32 %v4557_v20, 0.0  ;;  %v4623_v29 = vmax.f32 %v4559_v21, 0.0  ;;  %4899 = vst [vmem:[%s7650_s27 + $0x100] sm:$0xff] (%p6425_p6), %v4898_v4  ;;  %v4902_v6 = vld [vmem:[%s7551_s12 + $0x50] sm:$0xff] (%p6425_p6)  ;;  %v4904_v7 = vld [vmem:[%s7551_s12 + $0x58] sm:$0xff] (%p6425_p6)  ;;  %4901 = vst [vmem:[%s7650_s27 + $0x108] sm:$0xff] (%p6425_p6), %v4900_v5 }
 0x2f8   : > { %v5485_v30 = vpack.c.bf16 %v4618_v24, %v4617_v14  ;;  %v5486_v31 = vpack.c.bf16 %v4620_v25, %v4619_v15  ;;  %v4622_v32 = vmax.f32 %v4558_v26, 0.0  ;;  %v4624_v33 = vmax.f32 %v4560_v27, 0.0  ;;  %4903 = vst [vmem:[%s7650_s27 + $0x140] sm:$0xff] (%p6425_p6), %v4902_v6  ;;  %4905 = vst [vmem:[%s7650_s27 + $0x148] sm:$0xff] (%p6425_p6), %v4904_v7  ;;  %v4906_v8 = vld [vmem:[%s7551_s12 + $0x60] sm:$0xff] (%p6425_p6)  ;;  %v4908_v9 = vld [vmem:[%s7551_s12 + $0x68] sm:$0xff] (%p6425_p6) }
 0x2f9   : > { %v4910_v10 = vld [vmem:[%s7551_s12 + $0x70] sm:$0xff] (%p6425_p6)  ;;  %4907 = vst [vmem:[%s7650_s27 + $0x180] sm:$0xff] (%p6425_p6), %v4906_v8  ;;  %4909 = vst [vmem:[%s7650_s27 + $0x188] sm:$0xff] (%p6425_p6), %v4908_v9  ;;  %v4912_v11 = vld [vmem:[%s7551_s12 + $0x78] sm:$0xff] (%p6425_p6) }
 0x2fa   : > { %4849 = vst [vmem:[%s7551_s12 + $0xc0] sm:$0xff] %v5485_v30  ;;  %4850 = vst [vmem:[%s7551_s12 + $0xc8] sm:$0xff] %v5486_v31  ;;  %v5487_v34 = vpack.c.bf16 %v4622_v32, %v4621_v28  ;;  %v5488_v35 = vpack.c.bf16 %v4624_v33, %v4623_v29  ;;  %v3714_v36 = vpop.f32.mrb[28].mxu0  ;;  %v4279_v37 = vpop.f32.mrb[28].mxu1  ;;  %v4914_v12 = vld [vmem:[%s7551_s12 + $0x80] sm:$0xff] (%p6425_p6)  ;;  %v4916_v13 = vld [vmem:[%s7551_s12 + $0x88] sm:$0xff] (%p6425_p6) }
 0x2fb   : > { %v4561_v38 = vadd.f32 %v7533_v16, %v3714_v36  ;;  %v4563_v39 = vadd.f32 %v7535_v17, %v4279_v37  ;;  %v3716_v40 = vpop.f32.mrb[29].mxu0  ;;  %v4281_v41 = vpop.f32.mrb[29].mxu1  ;;  %4911 = vst [vmem:[%s7650_s27 + $0x1c0] sm:$0xff] (%p6425_p6), %v4910_v10  ;;  %4913 = vst [vmem:[%s7650_s27 + $0x1c8] sm:$0xff] (%p6425_p6), %v4912_v11  ;;  %v4918_v14 = vld [vmem:[%s7551_s12 + $0x90] sm:$0xff] (%p6425_p6)  ;;  %v4920_v15 = vld [vmem:[%s7551_s12 + $0x98] sm:$0xff] (%p6425_p6) }
 0x2fc   : > { %4851 = vst [vmem:[%s7551_s12 + $0xd0] sm:$0xff] %v5487_v34  ;;  %4852 = vst [vmem:[%s7551_s12 + $0xd8] sm:$0xff] %v5488_v35  ;;  %v4562_v42 = vadd.f32 %v7537_v18, %v3716_v40  ;;  %v4564_v43 = vadd.f32 %v7539_v19, %v4281_v41  ;;  %v3718_v44 = vpop.f32.mrb[30].mxu0  ;;  %v4283_v45 = vpop.f32.mrb[30].mxu1  ;;  %v4922_v20 = vld [vmem:[%s7551_s12 + $0xa0] sm:$0xff] (%p6425_p6)  ;;  %v4924_v21 = vld [vmem:[%s7551_s12 + $0xa8] sm:$0xff] (%p6425_p6) }
 0x2fd   : > { %v4625_v46 = vmax.f32 %v4561_v38, 0.0  ;;  %v4627_v47 = vmax.f32 %v4563_v39, 0.0  ;;  %v4565_v48 = vadd.f32 %v7533_v16, %v3718_v44  ;;  %v4567_v49 = vadd.f32 %v7535_v17, %v4283_v45  ;;  %v3720_v50 = vpop.f32.mrb[31].mxu0  ;;  %v4285_v51 = vpop.f32.mrb[31].mxu1  ;;  %4915 = vst [vmem:[%s7650_s27 + $0x200] sm:$0xff] (%p6425_p6), %v4914_v12  ;;  %4917 = vst [vmem:[%s7650_s27 + $0x208] sm:$0xff] (%p6425_p6), %v4916_v13 }
 0x2fe   : > { %v4626_v52 = vmax.f32 %v4562_v42, 0.0  ;;  %v4628_v53 = vmax.f32 %v4564_v43, 0.0  ;;  %v4566_v54 = vadd.f32 %v7537_v18, %v3720_v50  ;;  %v4568_v55 = vadd.f32 %v7539_v19, %v4285_v51  ;;  %4863 = sbr.rel (!%p6425_p6) target bundleno = 781 (0x30d), region = 67  ;;  %v4882_v18 = vld [vmem:[%s7551_s12] sm:$0xff] (%p6425_p6)  ;;  %v4884_v19 = vld [vmem:[%s7551_s12 + $0x8] sm:$0xff] (%p6425_p6)  ;;  %4919 = vst [vmem:[%s7650_s27 + $0x240] sm:$0xff] (%p6425_p6), %v4918_v14 }
 0x2ff   : > { %v4629_v56 = vmax.f32 %v4565_v48, 0.0  ;;  %v4631_v57 = vmax.f32 %v4567_v49, 0.0  ;;  %4883 = vst [vmem:[%s7650_s27] sm:$0xff] (%p6425_p6), %v4882_v18  ;;  %4885 = vst [vmem:[%s7650_s27 + $0x8] sm:$0xff] (%p6425_p6), %v4884_v19  ;;  %v4926_v22 = vld [vmem:[%s7551_s12 + $0xb0] sm:$0xff] (%p6425_p6)  ;;  %v4928_v23 = vld [vmem:[%s7551_s12 + $0xb8] sm:$0xff] (%p6425_p6) }
 0x300   : > { %v5489_v58 = vpack.c.bf16 %v4626_v52, %v4625_v46  ;;  %v5490_v59 = vpack.c.bf16 %v4628_v53, %v4627_v47  ;;  %v4630_v60 = vmax.f32 %v4566_v54, 0.0  ;;  %v4632_v61 = vmax.f32 %v4568_v55, 0.0  ;;  %4921 = vst [vmem:[%s7650_s27 + $0x248] sm:$0xff] (%p6425_p6), %v4920_v15  ;;  %4923 = vst [vmem:[%s7650_s27 + $0x280] sm:$0xff] (%p6425_p6), %v4922_v20 }
 0x301   : > { %4925 = vst [vmem:[%s7650_s27 + $0x288] sm:$0xff] (%p6425_p6), %v4924_v21  ;;  %4927 = vst [vmem:[%s7650_s27 + $0x2c0] sm:$0xff] (%p6425_p6), %v4926_v22  ;;  %v4930_v24 = vld [vmem:[%s7551_s12 + $0xc0] sm:$0xff] (%p6425_p6)  ;;  %v4932_v25 = vld [vmem:[%s7551_s12 + $0xc8] sm:$0xff] (%p6425_p6) }
 0x302   : > { %4853 = vst [vmem:[%s7551_s12 + $0xe0] sm:$0xff] %v5489_v58  ;;  %4854 = vst [vmem:[%s7551_s12 + $0xe8] sm:$0xff] %v5490_v59  ;;  %v5491_v16 = vpack.c.bf16 %v4630_v60, %v4629_v56  ;;  %v5492_v17 = vpack.c.bf16 %v4632_v61, %v4631_v57 }
 0x303   : > { %4929 = vst [vmem:[%s7650_s27 + $0x2c8] sm:$0xff] (%p6425_p6), %v4928_v23  ;;  %v4934_v26 = vld [vmem:[%s7551_s12 + $0xd0] sm:$0xff] (%p6425_p6)  ;;  %4931 = vst [vmem:[%s7650_s27 + $0x300] sm:$0xff] (%p6425_p6), %v4930_v24  ;;  %v4936_v27 = vld [vmem:[%s7551_s12 + $0xd8] sm:$0xff] (%p6425_p6) }
 0x304   : > { %4855 = vst [vmem:[%s7551_s12 + $0xf0] sm:$0xff] %v5491_v16  ;;  %4856 = vst [vmem:[%s7551_s12 + $0xf8] sm:$0xff] %v5492_v17 }
 0x305   : > { %4933 = vst [vmem:[%s7650_s27 + $0x308] sm:$0xff] %v4932_v25  ;;  %4935 = vst [vmem:[%s7650_s27 + $0x340] sm:$0xff] %v4934_v26 }
 0x306   : > { %4937 = vst [vmem:[%s7650_s27 + $0x348] sm:$0xff] %v4936_v27 }
 0x309   : > { %v4938_v28 = vld [vmem:[%s7551_s12 + $0xe0] sm:$0xff]  ;;  %v4940_v29 = vld [vmem:[%s7551_s12 + $0xe8] sm:$0xff] }
 0x30a   : > { %4939 = vst [vmem:[%s7650_s27 + $0x380] sm:$0xff] %v4938_v28  ;;  %4941 = vst [vmem:[%s7650_s27 + $0x388] sm:$0xff] %v4940_v29 }
 0x30b   : > { %v4942_v30 = vld [vmem:[%s7551_s12 + $0xf0] sm:$0xff]  ;;  %v4944_v31 = vld [vmem:[%s7551_s12 + $0xf8] sm:$0xff] }
 0x30c   : > { %4943 = vst [vmem:[%s7650_s27 + $0x3c0] sm:$0xff] %v4942_v30  ;;  %4945 = vst [vmem:[%s7650_s27 + $0x3c8] sm:$0xff] %v4944_v31 }
 0x30d PF: > { %s13_s16 = sadd.s32 1, %s6367_s16   ;;  %s7733_s12 = smov %s6355_s13 }
 0x30e   : > { %p10_p12 = scmp.ge.s32.totalorder %s13_s16, 6   ;;  %s7734_s13 = smov %s6430_s22 }
 0x30f   : > { %s7735_s14 = smov %s6363_s15  ;;  %s7736_s15 = smov %s7738_s17 }
 0x310   :  { %12 = sbr.rel (!%p10_p12) target bundleno = 3 (0x3), region = 127 }

// kernel: apnet_forward.11
= control target key start
LH: loop header
LB: loop body
LE: loop exit
PB: predicated region body
PF: predicated region fallthrough
CT: control target
= control target key end

     0   :  { %10 = vsyncpa [#allocation4], 0  ;;  %s6887_s0 = inlined_call_operand.vmem [shape: bf16[8,2048], index: 0, kind: input, shape index: {}]   ;;  %s6888_s1 = inlined_call_operand.hbm [shape: bf16[2048,4096], index: 1, kind: input, shape index: {}]   ;;  %s6889_s2 = inlined_call_operand.vmem [shape: f32[1,4096], index: 2, kind: input, shape index: {}]   ;;  %s6890_s3 = inlined_call_operand.vmem [shape: f32[1,4096], index: 3, kind: input, shape index: {}]   ;;  %s6891_s4 = inlined_call_operand.vmem [shape: f32[1,4096], index: 4, kind: input, shape index: {}]   ;;  %s6892_s5 = inlined_call_operand.vmem [shape: bf16[8,4096], index: 5, kind: output, shape index: {}]  }
   0x1   :  { %12 = vsyncpa [#allocation4 + $0x1], 0  ;;  %s6033_s18 = smov 0   ;;  %s6035_s19 = smov 0  }
   0x2   :  { %s6037_s20 = smov 0   ;;  %s6039_s21 = smov 0  }
   0x3   :  { %s6041_s22 = smov 0   ;;  %s6043_s23 = smov 0  }
   0x4 LB: > { %s4517_s24 = sadd.s32 4294967295, %s5997_s23   ;;  %s33_s25 = sadd.s32 1, %s5993_s22  ;;  %s5997_s23 = sphi %s6043_s23, %s18_s23   ;;  %s5993_s22 = sphi %s6041_s22, %s6901_s22   ;;  %s5989_s21 = sphi %s6039_s21, %s6900_s21   ;;  %s5985_s20 = sphi %s6037_s20, %s6899_s20   ;;  %s5981_s19 = sphi %s6035_s19, %s6898_s19   ;;  %s5977_s18 = sphi %s6033_s18, %s6897_s18  }
   0x5   : > { %p35_p0 = scmp.ge.s32.totalorder %s33_s25, 8  ;;  %s74_s26 = sadd.s32 1, %s5985_s20 }
   0x6   : > { %p81_p1 = scmp.ne.s32.totalorder %s5985_s20, %s5981_s19  ;;  %p82_p2 = scmp.eq.s32.totalorder %s5997_s23, 0 }
   0x7   : > { %s6903_s25 = smov (%p35_p0, %s33_s25), 0  ;;  %p87_p4 = scmp.ne.s32.totalorder %s5981_s19, %s5977_s18 }
   0x8   : > { %p6069_p3 = por %p82_p2, %p81_p1  ;;  %s70_s28 = ssub.s32 %s5993_s22, %s6903_s25 }
   0x9   : > { %p88_p5 = scmp.eq.s32.totalorder %s4517_s24, 0  ;;  %p72_p6 = scmp.eq.s32.totalorder %s70_s28, 0 }
   0xa   : > { %p5073_p8 = scmp.lt.s32.totalorder %s5997_s23, 8  ;;  %s230_s6 = sand.u32 1, %s5985_s20  }
   0xb   : > { %p6076_p7 = por %p88_p5, %p87_p4  ;;  %s5064_s7 = sshll.u32 %s5993_s22, 8 }
   0xc   : > { %s6082_s30 = scalar_select %p72_p6, %s5985_s20, %s74_s26  }
   0xd   : > { %s4522_s8 = sshll.u32 %s230_s6, 12  ;;  %s6089_s11 = scalar_lea.hbm %s6888_s1, %s5064_s7 }
   0xe   : > { %s234_s12 = scalar_lea.vmem [#allocation3], %s4522_s8  ;;  %p6093_p9 = pnand %p5073_p8, %p6069_p3 }
   0xf   : > { %s244_s13 = sshll.u32 %s234_s12, 4  ;;  %s6100_s15 = scalar_lea.sflag [#allocation4], %s230_s6  ;;  %s6097_s13 = int_to_ptr.vmem [resolvable:$true] %s244_s13 }
  0x10   : > { %s5917_s16 = scalar_lea.hbm %s6089_s11, 65536  ;;  %p5919_p12 = pneg %p6093_p9 }
  0x11   : > { %p5918_p11 = scmp.ne.s32.totalorder %s6089_s11, %s5917_s16  ;;  %s5922_s24 = scalar_lea.hbm %s6888_s1, 524288 }
  0x12   : > { %p5923_p1 = scmp.lt.u32.totalorder %s6089_s11, %s6888_s1  ;;  %p5924_p2 = scmp.lt.u32.totalorder %s5922_s24, %s5917_s16 }
  0x13   : > { %p5920_p13 = pnand %p5919_p12, %p5918_p11  ;;  %p5926_p4 = scmp.lt.u32.totalorder %s5917_s16, %s6089_s11 }
  0x14   : > { %p5925_p3 = por %p5924_p2, %p5923_p1 }
  0x15   : > { %p5921_p0 = pneg %p5920_p13 }
  0x16   : > { %p5927_p5 = por %p5926_p4, %p5925_p3 }
  0x18   : > { %p5928_p6 = pnand %p5927_p5, %p5921_p0 }
  0x1a   : > { %5931 = shalt.err (!%p5928_p6)
}
  0x1b   : > { %s5932_s28 = scalar_lea.vmem %s6097_s13, 65536  ;;  %s5999_s6 = smov [#allocation3]  }
  0x1c   : > { %p5933_p8 = scmp.ne.s32.totalorder %s6097_s13, %s5932_s28  ;;  %s5937_s7 = sshll.u32 %s5999_s6, 4  ;;  %s5938_s7 = int_to_ptr.vmem [resolvable:$false] %s5937_s7 }
  0x1d   : > { %s5939_s8 = scalar_lea.vmem %s5938_s7, 131072  ;;  %p5940_p10 = scmp.lt.s32.totalorder %s6097_s13, %s5938_s7 }
  0x1e   : > { %p5935_p11 = pnand %p5933_p8, %p5919_p12  ;;  %p5941_p1 = scmp.lt.s32.totalorder %s5939_s8, %s5932_s28 }
  0x20   : > { %p5936_p13 = pneg %p5935_p11  ;;  %p5942_p2 = por %p5941_p1, %p5940_p10 }
  0x22   : > { %p5943_p3 = pnand %p5942_p2, %p5936_p13 }
  0x24   : > { %5946 = shalt.err (!%p5943_p3)
}
  0x25   : > { %s6000_s9 = smov 2048   ;;  %s6001_s10 = smov 256  }
  0x26   : > { %s6002_s12 = smov 16   ;;  %p276_p12 = scmp.lt.s32.totalorder %s5997_s23, 9 }
  0x27   : > { %5072 = dma.hbm_to_vmem [thread:$0]  (!%p6093_p9), %s6089_s11, 65536, %s6097_s13, %s6100_s15, %s6000_s9, %s6001_s10, %s6002_s12  }
  0x28   : > { %p6896_p0 = scmp.ge.s32.totalorder %s5997_s23, 1 }
  0x2a   : > { %p277_p4 = pnand %p6896_p0, %p276_p12 }
  0x2b   : > { %s282_s16 = sand.u32 (!%p277_p4), 1, %s5981_s19  }
  0x2c   : > { %280 = sbr.rel (%p277_p4) target bundleno = 840 (0x348), region = 40  ;;  %s4526_s17 = sshll.u32 (!%p277_p4), %s282_s16, 12 }
  0x2d   : > { %s283_s18 = scalar_lea.sflag (!%p277_p4), [#allocation4], %s282_s16  ;;  %s6132_s24 = scalar_lea.vmem (!%p277_p4), [#allocation3], %s4526_s17 }
  0x33   : > { %5972 = dma.done.wait (%p6076_p7), %s283_s18, 65536  }
  0x34   : > { %5974 = vsyncadd (%p6076_p7), %s283_s18, 4294901760  ;;  %v5125_v0 = vld [vmem:[%s6132_s24 + $0x4] ss:$16 sps:$4 sm:$0xff]   ;;  %v5129_v2 = vld [vmem:[%s6132_s24] ss:$16 sps:$4 sm:$0xff]   ;;  %s4527_s18 = sshll.u32 %s5989_s21, 2 }
  0x35   : > { %v5127_v1 = vld [vmem:[%s6132_s24 + $0x204] ss:$16 sps:$4 sm:$0xff]   ;;  %3523 = vmatprep.subr.bf16.mxu0 %v5125_v0  ;;  %v5130_v3 = vld [vmem:[%s6132_s24 + $0x200] ss:$16 sps:$4 sm:$0xff]   ;;  %v384_v48 = vld [vmem:[%s6887_s0 + $0x8] sm:$0xff]  ;;  %p351_p7 = scmp.lt.s32.totalorder %s4527_s18, 31 }
  0x36   : > { %3564 = vmatprep.subr.bf16.mxu1 %v5127_v1  ;;  %v5131_v4 = vld [vmem:[%s6132_s24 + $0x24] ss:$16 sps:$4 sm:$0xff]   ;;  %3524 = vmatpush1.bf16.msra.mxu0 %v5129_v2  ;;  %v5135_v6 = vld [vmem:[%s6132_s24 + $0x20] ss:$16 sps:$4 sm:$0xff]   ;;  %v6194_v51 = vcombine.high %v384_v48, %v384_v48 }
  0x37   : > { %3565 = vmatpush1.bf16.msra.mxu1 %v5130_v3  ;;  %v5133_v5 = vld [vmem:[%s6132_s24 + $0x224] ss:$16 sps:$4 sm:$0xff]   ;;  %3525 = vmatprep.subr.bf16.mxu0 %v5131_v4  ;;  %v5136_v7 = vld [vmem:[%s6132_s24 + $0x220] ss:$16 sps:$4 sm:$0xff]   ;;  %s6905_s18 = smov (!%p351_p7, %s4527_s18), 31 }
  0x38   : > { %3566 = vmatprep.subr.bf16.mxu1 %v5133_v5  ;;  %v5137_v8 = vld [vmem:[%s6132_s24 + $0x44] ss:$16 sps:$4 sm:$0xff]   ;;  %v5141_v10 = vld [vmem:[%s6132_s24 + $0x40] ss:$16 sps:$4 sm:$0xff]   ;;  %3596 = vmatprep.mubr.bf16.mxu1 %v6194_v51  ;;  %s353_s11 = scalar_lea.vmem %s6889_s2, %s6905_s18  ;;  %s358_s15 = scalar_lea.vmem %s6890_s3, %s6905_s18 }
  0x39   : > { %v5139_v9 = vld [vmem:[%s6132_s24 + $0x244] ss:$16 sps:$4 sm:$0xff]   ;;  %v5142_v11 = vld [vmem:[%s6132_s24 + $0x240] ss:$16 sps:$4 sm:$0xff]   ;;  %s4531_s28 = sshll.u32 %s6905_s18, 2 }
  0x3a   : > { %3526 = vmatpush1.bf16.msra.mxu0 %v5135_v6  ;;  %v5143_v12 = vld [vmem:[%s6132_s24 + $0x64] ss:$16 sps:$4 sm:$0xff]   ;;  %v5147_v14 = vld [vmem:[%s6132_s24 + $0x60] ss:$16 sps:$4 sm:$0xff]   ;;  %s6847_s8 = scalar_lea.vmem %s6892_s5, %s4531_s28 }
  0x3b   : > { %3567 = vmatpush1.bf16.msra.mxu1 %v5136_v7  ;;  %3527 = vmatprep.subr.bf16.mxu0 %v5137_v8  ;;  %v5145_v13 = vld [vmem:[%s6132_s24 + $0x264] ss:$16 sps:$4 sm:$0xff]   ;;  %v5148_v15 = vld [vmem:[%s6132_s24 + $0x260] ss:$16 sps:$4 sm:$0xff]   ;;  %v6218_v7 = vcombine.low %v384_v48, %v384_v48 }
  0x3c   : > { %3568 = vmatprep.subr.bf16.mxu1 %v5139_v9  ;;  %v5149_v16 = vld [vmem:[%s6132_s24 + $0x84] ss:$16 sps:$4 sm:$0xff]   ;;  %v5153_v18 = vld [vmem:[%s6132_s24 + $0x80] ss:$16 sps:$4 sm:$0xff]  }
  0x3d   : > { %v5151_v17 = vld [vmem:[%s6132_s24 + $0x284] ss:$16 sps:$4 sm:$0xff]   ;;  %v5154_v19 = vld [vmem:[%s6132_s24 + $0x280] ss:$16 sps:$4 sm:$0xff]  }
  0x3e   : > { %3528 = vmatpush1.bf16.msra.mxu0 %v5141_v10  ;;  %v5155_v20 = vld [vmem:[%s6132_s24 + $0xa4] ss:$16 sps:$4 sm:$0xff]   ;;  %v5159_v22 = vld [vmem:[%s6132_s24 + $0xa0] ss:$16 sps:$4 sm:$0xff]  }
  0x3f   : > { %3569 = vmatpush1.bf16.msra.mxu1 %v5142_v11  ;;  %3529 = vmatprep.subr.bf16.mxu0 %v5143_v12  ;;  %v5157_v21 = vld [vmem:[%s6132_s24 + $0x2a4] ss:$16 sps:$4 sm:$0xff]   ;;  %v5160_v23 = vld [vmem:[%s6132_s24 + $0x2a0] ss:$16 sps:$4 sm:$0xff]  }
  0x40   : > { %3570 = vmatprep.subr.bf16.mxu1 %v5145_v13  ;;  %v5161_v24 = vld [vmem:[%s6132_s24 + $0xc4] ss:$16 sps:$4 sm:$0xff]   ;;  %v5165_v26 = vld [vmem:[%s6132_s24 + $0xc0] ss:$16 sps:$4 sm:$0xff]  }
  0x41   : > { %v5163_v25 = vld [vmem:[%s6132_s24 + $0x2c4] ss:$16 sps:$4 sm:$0xff]   ;;  %v5166_v27 = vld [vmem:[%s6132_s24 + $0x2c0] ss:$16 sps:$4 sm:$0xff]  }
  0x42   : > { %3530 = vmatpush1.bf16.msra.mxu0 %v5147_v14  ;;  %v5167_v28 = vld [vmem:[%s6132_s24 + $0xe4] ss:$16 sps:$4 sm:$0xff]   ;;  %v5171_v30 = vld [vmem:[%s6132_s24 + $0xe0] ss:$16 sps:$4 sm:$0xff]  }
  0x43   : > { %3571 = vmatpush1.bf16.msra.mxu1 %v5148_v15  ;;  %3531 = vmatprep.subr.bf16.mxu0 %v5149_v16  ;;  %v5169_v29 = vld [vmem:[%s6132_s24 + $0x2e4] ss:$16 sps:$4 sm:$0xff]   ;;  %v5172_v31 = vld [vmem:[%s6132_s24 + $0x2e0] ss:$16 sps:$4 sm:$0xff]  }
  0x44   : > { %3572 = vmatprep.subr.bf16.mxu1 %v5151_v17  ;;  %v5173_v32 = vld [vmem:[%s6132_s24 + $0x104] ss:$16 sps:$4 sm:$0xff]   ;;  %v5177_v34 = vld [vmem:[%s6132_s24 + $0x100] ss:$16 sps:$4 sm:$0xff]  }
  0x45   : > { %v5175_v33 = vld [vmem:[%s6132_s24 + $0x304] ss:$16 sps:$4 sm:$0xff]   ;;  %v5178_v35 = vld [vmem:[%s6132_s24 + $0x300] ss:$16 sps:$4 sm:$0xff]  }
  0x46   : > { %3532 = vmatpush1.bf16.msra.mxu0 %v5153_v18  ;;  %v5179_v36 = vld [vmem:[%s6132_s24 + $0x124] ss:$16 sps:$4 sm:$0xff]   ;;  %v5183_v38 = vld [vmem:[%s6132_s24 + $0x120] ss:$16 sps:$4 sm:$0xff]  }
  0x47   : > { %3573 = vmatpush1.bf16.msra.mxu1 %v5154_v19  ;;  %3533 = vmatprep.subr.bf16.mxu0 %v5155_v20  ;;  %v5181_v37 = vld [vmem:[%s6132_s24 + $0x324] ss:$16 sps:$4 sm:$0xff]   ;;  %v5184_v39 = vld [vmem:[%s6132_s24 + $0x320] ss:$16 sps:$4 sm:$0xff]  }
  0x48   : > { %3574 = vmatprep.subr.bf16.mxu1 %v5157_v21  ;;  %v5185_v40 = vld [vmem:[%s6132_s24 + $0x144] ss:$16 sps:$4 sm:$0xff]   ;;  %v5189_v42 = vld [vmem:[%s6132_s24 + $0x140] ss:$16 sps:$4 sm:$0xff]  }
  0x49   : > { %v5187_v41 = vld [vmem:[%s6132_s24 + $0x344] ss:$16 sps:$4 sm:$0xff]   ;;  %v5190_v43 = vld [vmem:[%s6132_s24 + $0x340] ss:$16 sps:$4 sm:$0xff]  }
  0x4a   : > { %3534 = vmatpush1.bf16.msra.mxu0 %v5159_v22  ;;  %v5191_v44 = vld [vmem:[%s6132_s24 + $0x164] ss:$16 sps:$4 sm:$0xff]   ;;  %v5195_v49 = vld [vmem:[%s6132_s24 + $0x160] ss:$16 sps:$4 sm:$0xff]  }
  0x4b   : > { %3575 = vmatpush1.bf16.msra.mxu1 %v5160_v23  ;;  %3535 = vmatprep.subr.bf16.mxu0 %v5161_v24  ;;  %v5193_v45 = vld [vmem:[%s6132_s24 + $0x364] ss:$16 sps:$4 sm:$0xff]   ;;  %v5196_v50 = vld [vmem:[%s6132_s24 + $0x360] ss:$16 sps:$4 sm:$0xff]  }
  0x4c   : > { %3576 = vmatprep.subr.bf16.mxu1 %v5163_v25  ;;  %v383_v46 = vld [vmem:[%s6887_s0] sm:$0xff] }
  0x4d   : > { %v6187_v47 = vcombine.high %v383_v46, %v383_v46  ;;  %v5197_v52 = vld [vmem:[%s6132_s24 + $0x184] ss:$16 sps:$4 sm:$0xff]   ;;  %v5201_v54 = vld [vmem:[%s6132_s24 + $0x180] ss:$16 sps:$4 sm:$0xff]   ;;  %v6216_v6 = vcombine.low %v383_v46, %v383_v46 }
  0x4e   : > { %3536 = vmatpush1.bf16.msra.mxu0 %v5165_v26  ;;  %v5199_v53 = vld [vmem:[%s6132_s24 + $0x384] ss:$16 sps:$4 sm:$0xff]   ;;  %v5202_v55 = vld [vmem:[%s6132_s24 + $0x380] ss:$16 sps:$4 sm:$0xff]  }
  0x4f   : > { %3577 = vmatpush1.bf16.msra.mxu1 %v5166_v27  ;;  %3537 = vmatprep.subr.bf16.mxu0 %v5167_v28  ;;  %v5203_v56 = vld [vmem:[%s6132_s24 + $0x1a4] ss:$16 sps:$4 sm:$0xff]   ;;  %v5207_v58 = vld [vmem:[%s6132_s24 + $0x1a0] ss:$16 sps:$4 sm:$0xff]  }
  0x50   : > { %3578 = vmatprep.subr.bf16.mxu1 %v5169_v29  ;;  %3555 = vmatprep.mubr.bf16.mxu0 %v6187_v47  ;;  %v5205_v57 = vld [vmem:[%s6132_s24 + $0x3a4] ss:$16 sps:$4 sm:$0xff]   ;;  %v5208_v59 = vld [vmem:[%s6132_s24 + $0x3a0] ss:$16 sps:$4 sm:$0xff]  }
  0x51   : > { %v5209_v60 = vld [vmem:[%s6132_s24 + $0x1c4] ss:$16 sps:$4 sm:$0xff]   ;;  %v5213_v62 = vld [vmem:[%s6132_s24 + $0x1c0] ss:$16 sps:$4 sm:$0xff]  }
  0x52   : > { %3538 = vmatpush1.bf16.msra.mxu0 %v5171_v30  ;;  %v5211_v61 = vld [vmem:[%s6132_s24 + $0x3c4] ss:$16 sps:$4 sm:$0xff]   ;;  %v5214_v63 = vld [vmem:[%s6132_s24 + $0x3c0] ss:$16 sps:$4 sm:$0xff]  }
  0x53   : > { %3579 = vmatpush1.bf16.msra.mxu1 %v5172_v31  ;;  %3539 = vmatprep.subr.bf16.mxu0 %v5173_v32  ;;  %v5215_v0 = vld [vmem:[%s6132_s24 + $0x1e4] ss:$16 sps:$4 sm:$0xff]   ;;  %v5219_v2 = vld [vmem:[%s6132_s24 + $0x1e0] ss:$16 sps:$4 sm:$0xff]  }
  0x54   : > { %3580 = vmatprep.subr.bf16.mxu1 %v5175_v33  ;;  %v5217_v1 = vld [vmem:[%s6132_s24 + $0x3e4] ss:$16 sps:$4 sm:$0xff]   ;;  %v5220_v3 = vld [vmem:[%s6132_s24 + $0x3e0] ss:$16 sps:$4 sm:$0xff]   ;;  %v6254_v33 = vld [vmem:[%s6887_s0 + $0x18] sm:$0xff] }
  0x55   : > { %v5227_v4 = vld [vmem:[%s6132_s24 + $0x404] ss:$16 sps:$4 sm:$0xff]   ;;  %v5225_v8 = vld [vmem:[%s6132_s24 + $0x400] ss:$16 sps:$4 sm:$0xff]  }
  0x56   : > { %3540 = vmatpush1.bf16.msra.mxu0 %v5177_v34  ;;  %v5230_v5 = vld [vmem:[%s6132_s24 + $0x604] ss:$16 sps:$4 sm:$0xff]   ;;  %v5228_v9 = vld [vmem:[%s6132_s24 + $0x600] ss:$16 sps:$4 sm:$0xff]  }
  0x57   : > { %3581 = vmatpush1.bf16.msra.mxu1 %v5178_v35  ;;  %3541 = vmatprep.subr.bf16.mxu0 %v5179_v36  ;;  %v5233_v10 = vld [vmem:[%s6132_s24 + $0x424] ss:$16 sps:$4 sm:$0xff]   ;;  %v5231_v12 = vld [vmem:[%s6132_s24 + $0x420] ss:$16 sps:$4 sm:$0xff]  }
  0x58   : > { %3582 = vmatprep.subr.bf16.mxu1 %v5181_v37  ;;  %v5236_v11 = vld [vmem:[%s6132_s24 + $0x624] ss:$16 sps:$4 sm:$0xff]   ;;  %v5234_v13 = vld [vmem:[%s6132_s24 + $0x620] ss:$16 sps:$4 sm:$0xff]   ;;  %v6264_v37 = vcombine.high %v6254_v33, %v6254_v33 }
  0x59   : > { %v5239_v14 = vld [vmem:[%s6132_s24 + $0x444] ss:$16 sps:$4 sm:$0xff]   ;;  %v5237_v16 = vld [vmem:[%s6132_s24 + $0x440] ss:$16 sps:$4 sm:$0xff]  }
  0x5a   : > { %3542 = vmatpush1.bf16.msra.mxu0 %v5183_v38  ;;  %v5242_v15 = vld [vmem:[%s6132_s24 + $0x644] ss:$16 sps:$4 sm:$0xff]   ;;  %v5240_v17 = vld [vmem:[%s6132_s24 + $0x640] ss:$16 sps:$4 sm:$0xff]  }
  0x5b   : > { %3583 = vmatpush1.bf16.msra.mxu1 %v5184_v39  ;;  %3543 = vmatprep.subr.bf16.mxu0 %v5185_v40  ;;  %v5245_v18 = vld [vmem:[%s6132_s24 + $0x464] ss:$16 sps:$4 sm:$0xff]   ;;  %v5243_v20 = vld [vmem:[%s6132_s24 + $0x460] ss:$16 sps:$4 sm:$0xff]  }
  0x5c   : > { %3584 = vmatprep.subr.bf16.mxu1 %v5187_v41  ;;  %v5248_v19 = vld [vmem:[%s6132_s24 + $0x664] ss:$16 sps:$4 sm:$0xff]   ;;  %v5246_v21 = vld [vmem:[%s6132_s24 + $0x660] ss:$16 sps:$4 sm:$0xff]  }
  0x5d   : > { %v5251_v22 = vld [vmem:[%s6132_s24 + $0x484] ss:$16 sps:$4 sm:$0xff]   ;;  %v5249_v24 = vld [vmem:[%s6132_s24 + $0x480] ss:$16 sps:$4 sm:$0xff]  }
  0x5e   : > { %3544 = vmatpush1.bf16.msra.mxu0 %v5189_v42  ;;  %v5254_v23 = vld [vmem:[%s6132_s24 + $0x684] ss:$16 sps:$4 sm:$0xff]   ;;  %v5252_v25 = vld [vmem:[%s6132_s24 + $0x680] ss:$16 sps:$4 sm:$0xff]  }
  0x5f   : > { %3585 = vmatpush1.bf16.msra.mxu1 %v5190_v43  ;;  %3545 = vmatprep.subr.bf16.mxu0 %v5191_v44  ;;  %v5257_v26 = vld [vmem:[%s6132_s24 + $0x4a4] ss:$16 sps:$4 sm:$0xff]   ;;  %v5255_v28 = vld [vmem:[%s6132_s24 + $0x4a0] ss:$16 sps:$4 sm:$0xff]  }
  0x60   : > { %3586 = vmatprep.subr.bf16.mxu1 %v5193_v45  ;;  %v5260_v27 = vld [vmem:[%s6132_s24 + $0x6a4] ss:$16 sps:$4 sm:$0xff]   ;;  %v5258_v29 = vld [vmem:[%s6132_s24 + $0x6a0] ss:$16 sps:$4 sm:$0xff]  }
  0x61   : > { %v5263_v30 = vld [vmem:[%s6132_s24 + $0x4c4] ss:$16 sps:$4 sm:$0xff]   ;;  %v5261_v34 = vld [vmem:[%s6132_s24 + $0x4c0] ss:$16 sps:$4 sm:$0xff]  }
  0x62   : > { %3546 = vmatpush1.bf16.msra.mxu0 %v5195_v49  ;;  %v5266_v31 = vld [vmem:[%s6132_s24 + $0x6c4] ss:$16 sps:$4 sm:$0xff]   ;;  %v5264_v35 = vld [vmem:[%s6132_s24 + $0x6c0] ss:$16 sps:$4 sm:$0xff]  }
  0x63   : > { %3587 = vmatpush1.bf16.msra.mxu1 %v5196_v50  ;;  %3547 = vmatprep.subr.bf16.mxu0 %v5197_v52  ;;  %v6249_v32 = vld [vmem:[%s6887_s0 + $0x10] sm:$0xff] }
  0x64   : > { %3588 = vmatprep.subr.bf16.mxu1 %v5199_v53  ;;  %v6260_v36 = vcombine.high %v6249_v32, %v6249_v32  ;;  %v5269_v38 = vld [vmem:[%s6132_s24 + $0x4e4] ss:$16 sps:$4 sm:$0xff]   ;;  %v5267_v40 = vld [vmem:[%s6132_s24 + $0x4e0] ss:$16 sps:$4 sm:$0xff]  }
  0x65   : > { %v5272_v39 = vld [vmem:[%s6132_s24 + $0x6e4] ss:$16 sps:$4 sm:$0xff]   ;;  %v5270_v41 = vld [vmem:[%s6132_s24 + $0x6e0] ss:$16 sps:$4 sm:$0xff]  }
  0x66   : > { %3548 = vmatpush1.bf16.msra.mxu0 %v5201_v54  ;;  %v5275_v42 = vld [vmem:[%s6132_s24 + $0x504] ss:$16 sps:$4 sm:$0xff]   ;;  %v5273_v44 = vld [vmem:[%s6132_s24 + $0x500] ss:$16 sps:$4 sm:$0xff]  }
  0x67   : > { %3589 = vmatpush1.bf16.msra.mxu1 %v5202_v55  ;;  %3549 = vmatprep.subr.bf16.mxu0 %v5203_v56  ;;  %v5278_v43 = vld [vmem:[%s6132_s24 + $0x704] ss:$16 sps:$4 sm:$0xff]   ;;  %v5276_v45 = vld [vmem:[%s6132_s24 + $0x700] ss:$16 sps:$4 sm:$0xff]  }
  0x68   : > { %3590 = vmatprep.subr.bf16.mxu1 %v5205_v57  ;;  %v5281_v46 = vld [vmem:[%s6132_s24 + $0x524] ss:$16 sps:$4 sm:$0xff]   ;;  %v5279_v49 = vld [vmem:[%s6132_s24 + $0x520] ss:$16 sps:$4 sm:$0xff]  }
  0x69   : > { %v5284_v48 = vld [vmem:[%s6132_s24 + $0x724] ss:$16 sps:$4 sm:$0xff]   ;;  %v5282_v50 = vld [vmem:[%s6132_s24 + $0x720] ss:$16 sps:$4 sm:$0xff]  }
  0x6a   : > { %3550 = vmatpush1.bf16.msra.mxu0 %v5207_v58  ;;  %v5287_v52 = vld [vmem:[%s6132_s24 + $0x544] ss:$16 sps:$4 sm:$0xff]   ;;  %v5285_v54 = vld [vmem:[%s6132_s24 + $0x540] ss:$16 sps:$4 sm:$0xff]  }
  0x6b   : > { %3591 = vmatpush1.bf16.msra.mxu1 %v5208_v59  ;;  %3551 = vmatprep.subr.bf16.mxu0 %v5209_v60  ;;  %v5290_v53 = vld [vmem:[%s6132_s24 + $0x744] ss:$16 sps:$4 sm:$0xff]   ;;  %v5288_v55 = vld [vmem:[%s6132_s24 + $0x740] ss:$16 sps:$4 sm:$0xff]  }
  0x6c   : > { %3592 = vmatprep.subr.bf16.mxu1 %v5211_v61  ;;  %v5293_v56 = vld [vmem:[%s6132_s24 + $0x564] ss:$16 sps:$4 sm:$0xff]   ;;  %v5291_v58 = vld [vmem:[%s6132_s24 + $0x560] ss:$16 sps:$4 sm:$0xff]  }
  0x6d   : > { %v5296_v57 = vld [vmem:[%s6132_s24 + $0x764] ss:$16 sps:$4 sm:$0xff]   ;;  %v5294_v59 = vld [vmem:[%s6132_s24 + $0x760] ss:$16 sps:$4 sm:$0xff]  }
  0x6e   : > { %3552 = vmatpush1.bf16.msra.mxu0 %v5213_v62  ;;  %v5299_v60 = vld [vmem:[%s6132_s24 + $0x584] ss:$16 sps:$4 sm:$0xff]   ;;  %v5297_v62 = vld [vmem:[%s6132_s24 + $0x580] ss:$16 sps:$4 sm:$0xff]  }
  0x6f   : > { %3593 = vmatpush1.bf16.msra.mxu1 %v5214_v63  ;;  %3553 = vmatprep.subr.bf16.mxu0 %v5215_v0  ;;  %v5302_v61 = vld [vmem:[%s6132_s24 + $0x784] ss:$16 sps:$4 sm:$0xff]   ;;  %v5300_v63 = vld [vmem:[%s6132_s24 + $0x780] ss:$16 sps:$4 sm:$0xff]  }
  0x70   : > { %3594 = vmatprep.subr.bf16.mxu1 %v5217_v1  ;;  %v5305_v0 = vld [vmem:[%s6132_s24 + $0x5a4] ss:$16 sps:$4 sm:$0xff]  }
  0x71   : > { %v5308_v1 = vld [vmem:[%s6132_s24 + $0x7a4] ss:$16 sps:$4 sm:$0xff]  }
  0x72   : > { %3554 = vmatpush1.bf16.msra.mxu0 %v5219_v2  ;;  %v5303_v2 = vld [vmem:[%s6132_s24 + $0x5a0] ss:$16 sps:$4 sm:$0xff]  }
  0x73   : > { %3595 = vmatpush1.bf16.msra.mxu1 %v5220_v3  ;;  %3605 = vmatprep.subr.bf16.mxu0 %v5227_v4  ;;  %v5306_v3 = vld [vmem:[%s6132_s24 + $0x7a0] ss:$16 sps:$4 sm:$0xff]   ;;  %v5311_v4 = vld [vmem:[%s6132_s24 + $0x5c4] ss:$16 sps:$4 sm:$0xff]  }
  0x74   : > { %3646 = vmatprep.subr.bf16.mxu1 %v5230_v5  ;;  %v5314_v5 = vld [vmem:[%s6132_s24 + $0x7c4] ss:$16 sps:$4 sm:$0xff]  }
  0x75   : > { %3556 = vmatmul.mubr.bf16.vlgmr.msra.gmra.mrb[0].mxu0 %v6216_v6 }
  0x76   : > { %3597 = vmatmul.mubr.bf16.vlgmr.msra.gmra.mrb[0].mxu1 %v6218_v7  ;;  %3606 = vmatpush1.bf16.msra.mxu0 %v5225_v8  ;;  %v5309_v8 = vld [vmem:[%s6132_s24 + $0x5c0] ss:$16 sps:$4 sm:$0xff]  }
  0x77   : > { %3647 = vmatpush1.bf16.msra.mxu1 %v5228_v9  ;;  %3607 = vmatprep.subr.bf16.mxu0 %v5233_v10  ;;  %v5312_v9 = vld [vmem:[%s6132_s24 + $0x7c0] ss:$16 sps:$4 sm:$0xff]   ;;  %v5317_v10 = vld [vmem:[%s6132_s24 + $0x5e4] ss:$16 sps:$4 sm:$0xff]  }
  0x78   : > { %3648 = vmatprep.subr.bf16.mxu1 %v5236_v11  ;;  %3637 = vmatprep.mubr.bf16.mxu0 %v6260_v36  ;;  %v5320_v11 = vld [vmem:[%s6132_s24 + $0x7e4] ss:$16 sps:$4 sm:$0xff]  }
  0x79   : > { %3678 = vmatprep.mubr.bf16.mxu1 %v6264_v37 }
  0x7a   : > { %3608 = vmatpush1.bf16.msra.mxu0 %v5231_v12  ;;  %v5315_v12 = vld [vmem:[%s6132_s24 + $0x5e0] ss:$16 sps:$4 sm:$0xff]  }
  0x7b   : > { %3649 = vmatpush1.bf16.msra.mxu1 %v5234_v13  ;;  %3609 = vmatprep.subr.bf16.mxu0 %v5239_v14  ;;  %v5318_v13 = vld [vmem:[%s6132_s24 + $0x7e0] ss:$16 sps:$4 sm:$0xff]   ;;  %v5327_v14 = vld [vmem:[%s6132_s24 + $0x804] ss:$16 sps:$4 sm:$0xff]  }
  0x7c   : > { %3650 = vmatprep.subr.bf16.mxu1 %v5242_v15  ;;  %v5330_v15 = vld [vmem:[%s6132_s24 + $0xa04] ss:$16 sps:$4 sm:$0xff]  }
  0x7e   : > { %3610 = vmatpush1.bf16.msra.mxu0 %v5237_v16  ;;  %v6308_v16 = vcombine.low %v6249_v32, %v6249_v32  ;;  %v5345_v32 = vld [vmem:[%s6132_s24 + $0x864] ss:$16 sps:$4 sm:$0xff]  }
  0x7f   : > { %3651 = vmatpush1.bf16.msra.mxu1 %v5240_v17  ;;  %3611 = vmatprep.subr.bf16.mxu0 %v5245_v18  ;;  %v6312_v17 = vcombine.low %v6254_v33, %v6254_v33  ;;  %v5325_v18 = vld [vmem:[%s6132_s24 + $0x800] ss:$16 sps:$4 sm:$0xff]   ;;  %v5348_v33 = vld [vmem:[%s6132_s24 + $0xa64] ss:$16 sps:$4 sm:$0xff]  }
  0x80   : > { %3652 = vmatprep.subr.bf16.mxu1 %v5248_v19  ;;  %v5328_v19 = vld [vmem:[%s6132_s24 + $0xa00] ss:$16 sps:$4 sm:$0xff]  }
  0x82   : > { %3612 = vmatpush1.bf16.msra.mxu0 %v5243_v20  ;;  %v5333_v20 = vld [vmem:[%s6132_s24 + $0x824] ss:$16 sps:$4 sm:$0xff]  }
  0x83   : > { %3653 = vmatpush1.bf16.msra.mxu1 %v5246_v21  ;;  %3613 = vmatprep.subr.bf16.mxu0 %v5251_v22  ;;  %v5336_v21 = vld [vmem:[%s6132_s24 + $0xa24] ss:$16 sps:$4 sm:$0xff]  }
  0x84   : > { %3654 = vmatprep.subr.bf16.mxu1 %v5254_v23  ;;  %v6321_v22 = vld [vmem:[%s6887_s0 + $0x20] sm:$0xff]  ;;  %v6326_v23 = vld [vmem:[%s6887_s0 + $0x28] sm:$0xff] }
  0x86   : > { %3614 = vmatpush1.bf16.msra.mxu0 %v5249_v24  ;;  %v6330_v24 = vcombine.high %v6321_v22, %v6321_v22 }
  0x87   : > { %3655 = vmatpush1.bf16.msra.mxu1 %v5252_v25  ;;  %3615 = vmatprep.subr.bf16.mxu0 %v5257_v26  ;;  %v6334_v25 = vcombine.high %v6326_v23, %v6326_v23  ;;  %v5331_v26 = vld [vmem:[%s6132_s24 + $0x820] ss:$16 sps:$4 sm:$0xff]  }
  0x88   : > { %3656 = vmatprep.subr.bf16.mxu1 %v5260_v27  ;;  %v5334_v27 = vld [vmem:[%s6132_s24 + $0xa20] ss:$16 sps:$4 sm:$0xff]  }
  0x8a   : > { %3616 = vmatpush1.bf16.msra.mxu0 %v5255_v28  ;;  %v5339_v28 = vld [vmem:[%s6132_s24 + $0x844] ss:$16 sps:$4 sm:$0xff]  }
  0x8b   : > { %3657 = vmatpush1.bf16.msra.mxu1 %v5258_v29  ;;  %3617 = vmatprep.subr.bf16.mxu0 %v5263_v30  ;;  %v5342_v29 = vld [vmem:[%s6132_s24 + $0xa44] ss:$16 sps:$4 sm:$0xff]   ;;  %v5337_v30 = vld [vmem:[%s6132_s24 + $0x840] ss:$16 sps:$4 sm:$0xff]  }
  0x8c   : > { %3658 = vmatprep.subr.bf16.mxu1 %v5266_v31  ;;  %v5340_v31 = vld [vmem:[%s6132_s24 + $0xa40] ss:$16 sps:$4 sm:$0xff]  }
  0x8e   : > { %3618 = vmatpush1.bf16.msra.mxu0 %v5261_v34  ;;  %v5343_v34 = vld [vmem:[%s6132_s24 + $0x860] ss:$16 sps:$4 sm:$0xff]  }
  0x8f   : > { %3659 = vmatpush1.bf16.msra.mxu1 %v5264_v35  ;;  %3619 = vmatprep.subr.bf16.mxu0 %v5269_v38  ;;  %v5346_v35 = vld [vmem:[%s6132_s24 + $0xa60] ss:$16 sps:$4 sm:$0xff]   ;;  %v5351_v38 = vld [vmem:[%s6132_s24 + $0x884] ss:$16 sps:$4 sm:$0xff]  }
  0x90   : > { %3660 = vmatprep.subr.bf16.mxu1 %v5272_v39  ;;  %v5354_v39 = vld [vmem:[%s6132_s24 + $0xa84] ss:$16 sps:$4 sm:$0xff]  }
  0x92   : > { %3620 = vmatpush1.bf16.msra.mxu0 %v5267_v40  ;;  %v5349_v40 = vld [vmem:[%s6132_s24 + $0x880] ss:$16 sps:$4 sm:$0xff]  }
  0x93   : > { %3661 = vmatpush1.bf16.msra.mxu1 %v5270_v41  ;;  %3621 = vmatprep.subr.bf16.mxu0 %v5275_v42  ;;  %v5352_v41 = vld [vmem:[%s6132_s24 + $0xa80] ss:$16 sps:$4 sm:$0xff]   ;;  %v5357_v42 = vld [vmem:[%s6132_s24 + $0x8a4] ss:$16 sps:$4 sm:$0xff]  }
  0x94   : > { %3662 = vmatprep.subr.bf16.mxu1 %v5278_v43  ;;  %v5360_v43 = vld [vmem:[%s6132_s24 + $0xaa4] ss:$16 sps:$4 sm:$0xff]  }
  0x96   : > { %3622 = vmatpush1.bf16.msra.mxu0 %v5273_v44  ;;  %v5355_v44 = vld [vmem:[%s6132_s24 + $0x8a0] ss:$16 sps:$4 sm:$0xff]  }
  0x97   : > { %3663 = vmatpush1.bf16.msra.mxu1 %v5276_v45  ;;  %3623 = vmatprep.subr.bf16.mxu0 %v5281_v46  ;;  %v5358_v45 = vld [vmem:[%s6132_s24 + $0xaa0] ss:$16 sps:$4 sm:$0xff]   ;;  %v5363_v46 = vld [vmem:[%s6132_s24 + $0x8c4] ss:$16 sps:$4 sm:$0xff]  }
  0x98   : > { %3664 = vmatprep.subr.bf16.mxu1 %v5284_v48  ;;  %v5366_v48 = vld [vmem:[%s6132_s24 + $0xac4] ss:$16 sps:$4 sm:$0xff]  }
  0x9a   : > { %3624 = vmatpush1.bf16.msra.mxu0 %v5279_v49  ;;  %v5361_v49 = vld [vmem:[%s6132_s24 + $0x8c0] ss:$16 sps:$4 sm:$0xff]  }
  0x9b   : > { %3665 = vmatpush1.bf16.msra.mxu1 %v5282_v50  ;;  %3625 = vmatprep.subr.bf16.mxu0 %v5287_v52  ;;  %v5364_v50 = vld [vmem:[%s6132_s24 + $0xac0] ss:$16 sps:$4 sm:$0xff]   ;;  %v5369_v52 = vld [vmem:[%s6132_s24 + $0x8e4] ss:$16 sps:$4 sm:$0xff]  }
  0x9c   : > { %3666 = vmatprep.subr.bf16.mxu1 %v5290_v53  ;;  %v5372_v53 = vld [vmem:[%s6132_s24 + $0xae4] ss:$16 sps:$4 sm:$0xff]  }
  0x9e   : > { %3626 = vmatpush1.bf16.msra.mxu0 %v5285_v54  ;;  %v5367_v54 = vld [vmem:[%s6132_s24 + $0x8e0] ss:$16 sps:$4 sm:$0xff]  }
  0x9f   : > { %3667 = vmatpush1.bf16.msra.mxu1 %v5288_v55  ;;  %3627 = vmatprep.subr.bf16.mxu0 %v5293_v56  ;;  %v5370_v55 = vld [vmem:[%s6132_s24 + $0xae0] ss:$16 sps:$4 sm:$0xff]   ;;  %v5375_v56 = vld [vmem:[%s6132_s24 + $0x904] ss:$16 sps:$4 sm:$0xff]  }
  0xa0   : > { %3668 = vmatprep.subr.bf16.mxu1 %v5296_v57  ;;  %v5378_v57 = vld [vmem:[%s6132_s24 + $0xb04] ss:$16 sps:$4 sm:$0xff]  }
  0xa2   : > { %3628 = vmatpush1.bf16.msra.mxu0 %v5291_v58  ;;  %v5373_v58 = vld [vmem:[%s6132_s24 + $0x900] ss:$16 sps:$4 sm:$0xff]  }
  0xa3   : > { %3669 = vmatpush1.bf16.msra.mxu1 %v5294_v59  ;;  %3629 = vmatprep.subr.bf16.mxu0 %v5299_v60  ;;  %v5376_v59 = vld [vmem:[%s6132_s24 + $0xb00] ss:$16 sps:$4 sm:$0xff]   ;;  %v5381_v60 = vld [vmem:[%s6132_s24 + $0x924] ss:$16 sps:$4 sm:$0xff]  }
  0xa4   : > { %3670 = vmatprep.subr.bf16.mxu1 %v5302_v61  ;;  %v5384_v61 = vld [vmem:[%s6132_s24 + $0xb24] ss:$16 sps:$4 sm:$0xff]  }
  0xa6   : > { %3630 = vmatpush1.bf16.msra.mxu0 %v5297_v62  ;;  %v5379_v62 = vld [vmem:[%s6132_s24 + $0x920] ss:$16 sps:$4 sm:$0xff]  }
  0xa7   : > { %3671 = vmatpush1.bf16.msra.mxu1 %v5300_v63  ;;  %3631 = vmatprep.subr.bf16.mxu0 %v5305_v0  ;;  %v5382_v63 = vld [vmem:[%s6132_s24 + $0xb20] ss:$16 sps:$4 sm:$0xff]   ;;  %v5387_v0 = vld [vmem:[%s6132_s24 + $0x944] ss:$16 sps:$4 sm:$0xff]  }
  0xa8   : > { %3672 = vmatprep.subr.bf16.mxu1 %v5308_v1  ;;  %v5390_v1 = vld [vmem:[%s6132_s24 + $0xb44] ss:$16 sps:$4 sm:$0xff]  }
  0xaa   : > { %3632 = vmatpush1.bf16.msra.mxu0 %v5303_v2  ;;  %v5385_v2 = vld [vmem:[%s6132_s24 + $0x940] ss:$16 sps:$4 sm:$0xff]  }
  0xab   : > { %3673 = vmatpush1.bf16.msra.mxu1 %v5306_v3  ;;  %3633 = vmatprep.subr.bf16.mxu0 %v5311_v4  ;;  %v5388_v3 = vld [vmem:[%s6132_s24 + $0xb40] ss:$16 sps:$4 sm:$0xff]   ;;  %v5393_v4 = vld [vmem:[%s6132_s24 + $0x964] ss:$16 sps:$4 sm:$0xff]  }
  0xac   : > { %3674 = vmatprep.subr.bf16.mxu1 %v5314_v5  ;;  %v5396_v5 = vld [vmem:[%s6132_s24 + $0xb64] ss:$16 sps:$4 sm:$0xff]  }
  0xae   : > { %3634 = vmatpush1.bf16.msra.mxu0 %v5309_v8  ;;  %v5391_v8 = vld [vmem:[%s6132_s24 + $0x960] ss:$16 sps:$4 sm:$0xff]  }
  0xaf   : > { %3675 = vmatpush1.bf16.msra.mxu1 %v5312_v9  ;;  %3635 = vmatprep.subr.bf16.mxu0 %v5317_v10  ;;  %v5394_v9 = vld [vmem:[%s6132_s24 + $0xb60] ss:$16 sps:$4 sm:$0xff]   ;;  %v5399_v10 = vld [vmem:[%s6132_s24 + $0x984] ss:$16 sps:$4 sm:$0xff]  }
  0xb0   : > { %3676 = vmatprep.subr.bf16.mxu1 %v5320_v11  ;;  %v5402_v11 = vld [vmem:[%s6132_s24 + $0xb84] ss:$16 sps:$4 sm:$0xff]  }
  0xb2   : > { %3636 = vmatpush1.bf16.msra.mxu0 %v5315_v12  ;;  %v5397_v12 = vld [vmem:[%s6132_s24 + $0x980] ss:$16 sps:$4 sm:$0xff]  }
  0xb3   : > { %3677 = vmatpush1.bf16.msra.mxu1 %v5318_v13  ;;  %3687 = vmatprep.subr.bf16.mxu0 %v5327_v14  ;;  %v5400_v13 = vld [vmem:[%s6132_s24 + $0xb80] ss:$16 sps:$4 sm:$0xff]   ;;  %v5405_v14 = vld [vmem:[%s6132_s24 + $0x9a4] ss:$16 sps:$4 sm:$0xff]  }
  0xb4   : > { %3728 = vmatprep.subr.bf16.mxu1 %v5330_v15  ;;  %v5408_v15 = vld [vmem:[%s6132_s24 + $0xba4] ss:$16 sps:$4 sm:$0xff]  }
  0xb5   : > { %3638 = vmatmul.mubr.bf16.vlgmr.msra.gmra.mrb[4].mxu0 %v6308_v16 }
  0xb6   : > { %3679 = vmatmul.mubr.bf16.vlgmr.msra.gmra.mrb[4].mxu1 %v6312_v17  ;;  %3688 = vmatpush1.bf16.msra.mxu0 %v5325_v18  ;;  %v5403_v18 = vld [vmem:[%s6132_s24 + $0x9a0] ss:$16 sps:$4 sm:$0xff]  }
  0xb7   : > { %3729 = vmatpush1.bf16.msra.mxu1 %v5328_v19  ;;  %3689 = vmatprep.subr.bf16.mxu0 %v5333_v20  ;;  %v5406_v19 = vld [vmem:[%s6132_s24 + $0xba0] ss:$16 sps:$4 sm:$0xff]   ;;  %v5411_v20 = vld [vmem:[%s6132_s24 + $0x9c4] ss:$16 sps:$4 sm:$0xff]  }
  0xb8   : > { %3730 = vmatprep.subr.bf16.mxu1 %v5336_v21  ;;  %3719 = vmatprep.mubr.bf16.mxu0 %v6330_v24  ;;  %v5414_v21 = vld [vmem:[%s6132_s24 + $0xbc4] ss:$16 sps:$4 sm:$0xff]  }
  0xb9   : > { %3760 = vmatprep.mubr.bf16.mxu1 %v6334_v25 }
  0xba   : > { %3690 = vmatpush1.bf16.msra.mxu0 %v5331_v26  ;;  %v5409_v26 = vld [vmem:[%s6132_s24 + $0x9c0] ss:$16 sps:$4 sm:$0xff]  }
  0xbb   : > { %3731 = vmatpush1.bf16.msra.mxu1 %v5334_v27  ;;  %3691 = vmatprep.subr.bf16.mxu0 %v5339_v28  ;;  %v5412_v27 = vld [vmem:[%s6132_s24 + $0xbc0] ss:$16 sps:$4 sm:$0xff]   ;;  %v5417_v28 = vld [vmem:[%s6132_s24 + $0x9e4] ss:$16 sps:$4 sm:$0xff]  }
  0xbc   : > { %3732 = vmatprep.subr.bf16.mxu1 %v5342_v29  ;;  %v5420_v29 = vld [vmem:[%s6132_s24 + $0xbe4] ss:$16 sps:$4 sm:$0xff]  }
  0xbe   : > { %3692 = vmatpush1.bf16.msra.mxu0 %v5337_v30  ;;  %v5415_v30 = vld [vmem:[%s6132_s24 + $0x9e0] ss:$16 sps:$4 sm:$0xff]  }
  0xbf   : > { %3733 = vmatpush1.bf16.msra.mxu1 %v5340_v31  ;;  %3693 = vmatprep.subr.bf16.mxu0 %v5345_v32  ;;  %v5418_v31 = vld [vmem:[%s6132_s24 + $0xbe0] ss:$16 sps:$4 sm:$0xff]   ;;  %v5427_v32 = vld [vmem:[%s6132_s24 + $0xc04] ss:$16 sps:$4 sm:$0xff]  }
  0xc0   : > { %3734 = vmatprep.subr.bf16.mxu1 %v5348_v33  ;;  %v5430_v33 = vld [vmem:[%s6132_s24 + $0xe04] ss:$16 sps:$4 sm:$0xff]  }
  0xc2   : > { %3694 = vmatpush1.bf16.msra.mxu0 %v5343_v34  ;;  %v5425_v34 = vld [vmem:[%s6132_s24 + $0xc00] ss:$16 sps:$4 sm:$0xff]  }
  0xc3   : > { %3735 = vmatpush1.bf16.msra.mxu1 %v5346_v35  ;;  %3695 = vmatprep.subr.bf16.mxu0 %v5351_v38  ;;  %v5428_v35 = vld [vmem:[%s6132_s24 + $0xe00] ss:$16 sps:$4 sm:$0xff]   ;;  %v6404_v38 = vcombine.low %v6321_v22, %v6321_v22  ;;  %v5433_v22 = vld [vmem:[%s6132_s24 + $0xc24] ss:$16 sps:$4 sm:$0xff]  }
  0xc4   : > { %3736 = vmatprep.subr.bf16.mxu1 %v5354_v39  ;;  %v6408_v39 = vcombine.low %v6326_v23, %v6326_v23  ;;  %v5436_v23 = vld [vmem:[%s6132_s24 + $0xe24] ss:$16 sps:$4 sm:$0xff]  }
  0xc6   : > { %3696 = vmatpush1.bf16.msra.mxu0 %v5349_v40  ;;  %v6413_v40 = vld [vmem:[%s6887_s0 + $0x30] sm:$0xff] }
  0xc7   : > { %3737 = vmatpush1.bf16.msra.mxu1 %v5352_v41  ;;  %3697 = vmatprep.subr.bf16.mxu0 %v5357_v42  ;;  %v6418_v41 = vld [vmem:[%s6887_s0 + $0x38] sm:$0xff]  ;;  %v6424_v42 = vcombine.high %v6413_v40, %v6413_v40 }
  0xc8   : > { %3738 = vmatprep.subr.bf16.mxu1 %v5360_v43  ;;  %v6428_v43 = vcombine.high %v6418_v41, %v6418_v41 }
  0xca   : > { %3698 = vmatpush1.bf16.msra.mxu0 %v5355_v44  ;;  %v5431_v44 = vld [vmem:[%s6132_s24 + $0xc20] ss:$16 sps:$4 sm:$0xff]  }
  0xcb   : > { %3739 = vmatpush1.bf16.msra.mxu1 %v5358_v45  ;;  %3699 = vmatprep.subr.bf16.mxu0 %v5363_v46  ;;  %v5434_v45 = vld [vmem:[%s6132_s24 + $0xe20] ss:$16 sps:$4 sm:$0xff]   ;;  %v5439_v46 = vld [vmem:[%s6132_s24 + $0xc44] ss:$16 sps:$4 sm:$0xff]  }
  0xcc   : > { %3740 = vmatprep.subr.bf16.mxu1 %v5366_v48  ;;  %v5442_v48 = vld [vmem:[%s6132_s24 + $0xe44] ss:$16 sps:$4 sm:$0xff]  }
  0xce   : > { %3700 = vmatpush1.bf16.msra.mxu0 %v5361_v49  ;;  %v5437_v49 = vld [vmem:[%s6132_s24 + $0xc40] ss:$16 sps:$4 sm:$0xff]  }
  0xcf   : > { %3741 = vmatpush1.bf16.msra.mxu1 %v5364_v50  ;;  %3701 = vmatprep.subr.bf16.mxu0 %v5369_v52  ;;  %v5440_v50 = vld [vmem:[%s6132_s24 + $0xe40] ss:$16 sps:$4 sm:$0xff]   ;;  %v5445_v52 = vld [vmem:[%s6132_s24 + $0xc64] ss:$16 sps:$4 sm:$0xff]  }
  0xd0   : > { %3742 = vmatprep.subr.bf16.mxu1 %v5372_v53  ;;  %v5448_v53 = vld [vmem:[%s6132_s24 + $0xe64] ss:$16 sps:$4 sm:$0xff]  }
  0xd2   : > { %3702 = vmatpush1.bf16.msra.mxu0 %v5367_v54  ;;  %v5443_v54 = vld [vmem:[%s6132_s24 + $0xc60] ss:$16 sps:$4 sm:$0xff]  }
  0xd3   : > { %3743 = vmatpush1.bf16.msra.mxu1 %v5370_v55  ;;  %3703 = vmatprep.subr.bf16.mxu0 %v5375_v56  ;;  %v5446_v55 = vld [vmem:[%s6132_s24 + $0xe60] ss:$16 sps:$4 sm:$0xff]   ;;  %v5451_v56 = vld [vmem:[%s6132_s24 + $0xc84] ss:$16 sps:$4 sm:$0xff]  }
  0xd4   : > { %3744 = vmatprep.subr.bf16.mxu1 %v5378_v57  ;;  %v5454_v57 = vld [vmem:[%s6132_s24 + $0xe84] ss:$16 sps:$4 sm:$0xff]  }
  0xd6   : > { %3704 = vmatpush1.bf16.msra.mxu0 %v5373_v58  ;;  %v5449_v58 = vld [vmem:[%s6132_s24 + $0xc80] ss:$16 sps:$4 sm:$0xff]  }
  0xd7   : > { %3745 = vmatpush1.bf16.msra.mxu1 %v5376_v59  ;;  %3705 = vmatprep.subr.bf16.mxu0 %v5381_v60  ;;  %v5452_v59 = vld [vmem:[%s6132_s24 + $0xe80] ss:$16 sps:$4 sm:$0xff]   ;;  %v5457_v60 = vld [vmem:[%s6132_s24 + $0xca4] ss:$16 sps:$4 sm:$0xff]  }
  0xd8   : > { %3746 = vmatprep.subr.bf16.mxu1 %v5384_v61  ;;  %v5460_v61 = vld [vmem:[%s6132_s24 + $0xea4] ss:$16 sps:$4 sm:$0xff]  }
  0xda   : > { %3706 = vmatpush1.bf16.msra.mxu0 %v5379_v62  ;;  %v5455_v62 = vld [vmem:[%s6132_s24 + $0xca0] ss:$16 sps:$4 sm:$0xff]  }
  0xdb   : > { %3747 = vmatpush1.bf16.msra.mxu1 %v5382_v63  ;;  %3707 = vmatprep.subr.bf16.mxu0 %v5387_v0  ;;  %v5458_v63 = vld [vmem:[%s6132_s24 + $0xea0] ss:$16 sps:$4 sm:$0xff]   ;;  %v5463_v0 = vld [vmem:[%s6132_s24 + $0xcc4] ss:$16 sps:$4 sm:$0xff]  }
  0xdc   : > { %3748 = vmatprep.subr.bf16.mxu1 %v5390_v1  ;;  %v5466_v1 = vld [vmem:[%s6132_s24 + $0xec4] ss:$16 sps:$4 sm:$0xff]  }
  0xde   : > { %3708 = vmatpush1.bf16.msra.mxu0 %v5385_v2  ;;  %v5461_v2 = vld [vmem:[%s6132_s24 + $0xcc0] ss:$16 sps:$4 sm:$0xff]  }
  0xdf   : > { %3749 = vmatpush1.bf16.msra.mxu1 %v5388_v3  ;;  %3709 = vmatprep.subr.bf16.mxu0 %v5393_v4  ;;  %v5464_v3 = vld [vmem:[%s6132_s24 + $0xec0] ss:$16 sps:$4 sm:$0xff]   ;;  %v5469_v4 = vld [vmem:[%s6132_s24 + $0xce4] ss:$16 sps:$4 sm:$0xff]  }
  0xe0   : > { %3750 = vmatprep.subr.bf16.mxu1 %v5396_v5  ;;  %v5472_v5 = vld [vmem:[%s6132_s24 + $0xee4] ss:$16 sps:$4 sm:$0xff]  }
  0xe2   : > { %3710 = vmatpush1.bf16.msra.mxu0 %v5391_v8  ;;  %v5467_v8 = vld [vmem:[%s6132_s24 + $0xce0] ss:$16 sps:$4 sm:$0xff]  }
  0xe3   : > { %3751 = vmatpush1.bf16.msra.mxu1 %v5394_v9  ;;  %3711 = vmatprep.subr.bf16.mxu0 %v5399_v10  ;;  %v5470_v9 = vld [vmem:[%s6132_s24 + $0xee0] ss:$16 sps:$4 sm:$0xff]   ;;  %v5475_v10 = vld [vmem:[%s6132_s24 + $0xd04] ss:$16 sps:$4 sm:$0xff]  }
  0xe4   : > { %3752 = vmatprep.subr.bf16.mxu1 %v5402_v11  ;;  %v5478_v11 = vld [vmem:[%s6132_s24 + $0xf04] ss:$16 sps:$4 sm:$0xff]  }
  0xe6   : > { %3712 = vmatpush1.bf16.msra.mxu0 %v5397_v12  ;;  %v5473_v12 = vld [vmem:[%s6132_s24 + $0xd00] ss:$16 sps:$4 sm:$0xff]  }
  0xe7   : > { %3753 = vmatpush1.bf16.msra.mxu1 %v5400_v13  ;;  %3713 = vmatprep.subr.bf16.mxu0 %v5405_v14  ;;  %v5476_v13 = vld [vmem:[%s6132_s24 + $0xf00] ss:$16 sps:$4 sm:$0xff]   ;;  %v5481_v14 = vld [vmem:[%s6132_s24 + $0xd24] ss:$16 sps:$4 sm:$0xff]  }
  0xe8   : > { %3754 = vmatprep.subr.bf16.mxu1 %v5408_v15  ;;  %v5484_v15 = vld [vmem:[%s6132_s24 + $0xf24] ss:$16 sps:$4 sm:$0xff]  }
  0xea   : > { %3714 = vmatpush1.bf16.msra.mxu0 %v5403_v18  ;;  %v5479_v18 = vld [vmem:[%s6132_s24 + $0xd20] ss:$16 sps:$4 sm:$0xff]  }
  0xeb   : > { %3755 = vmatpush1.bf16.msra.mxu1 %v5406_v19  ;;  %3715 = vmatprep.subr.bf16.mxu0 %v5411_v20  ;;  %v5482_v19 = vld [vmem:[%s6132_s24 + $0xf20] ss:$16 sps:$4 sm:$0xff]   ;;  %v5487_v20 = vld [vmem:[%s6132_s24 + $0xd44] ss:$16 sps:$4 sm:$0xff]  }
  0xec   : > { %3756 = vmatprep.subr.bf16.mxu1 %v5414_v21  ;;  %v5490_v21 = vld [vmem:[%s6132_s24 + $0xf44] ss:$16 sps:$4 sm:$0xff]  }
  0xee   : > { %3716 = vmatpush1.bf16.msra.mxu0 %v5409_v26  ;;  %v5485_v26 = vld [vmem:[%s6132_s24 + $0xd40] ss:$16 sps:$4 sm:$0xff]  }
  0xef   : > { %3757 = vmatpush1.bf16.msra.mxu1 %v5412_v27  ;;  %3717 = vmatprep.subr.bf16.mxu0 %v5417_v28  ;;  %v5488_v27 = vld [vmem:[%s6132_s24 + $0xf40] ss:$16 sps:$4 sm:$0xff]   ;;  %v5493_v28 = vld [vmem:[%s6132_s24 + $0xd64] ss:$16 sps:$4 sm:$0xff]  }
  0xf0   : > { %3758 = vmatprep.subr.bf16.mxu1 %v5420_v29  ;;  %v5496_v29 = vld [vmem:[%s6132_s24 + $0xf64] ss:$16 sps:$4 sm:$0xff]  }
  0xf2   : > { %3718 = vmatpush1.bf16.msra.mxu0 %v5415_v30  ;;  %v5491_v30 = vld [vmem:[%s6132_s24 + $0xd60] ss:$16 sps:$4 sm:$0xff]  }
  0xf3   : > { %3759 = vmatpush1.bf16.msra.mxu1 %v5418_v31  ;;  %3769 = vmatprep.subr.bf16.mxu0 %v5427_v32  ;;  %v5494_v31 = vld [vmem:[%s6132_s24 + $0xf60] ss:$16 sps:$4 sm:$0xff]   ;;  %v5499_v32 = vld [vmem:[%s6132_s24 + $0xd84] ss:$16 sps:$4 sm:$0xff]  }
  0xf4   : > { %3810 = vmatprep.subr.bf16.mxu1 %v5430_v33  ;;  %v5502_v33 = vld [vmem:[%s6132_s24 + $0xf84] ss:$16 sps:$4 sm:$0xff]  }
  0xf5   : > { %3720 = vmatmul.mubr.bf16.vlgmr.msra.gmra.mrb[8].mxu0 %v6404_v38 }
  0xf6   : > { %3761 = vmatmul.mubr.bf16.vlgmr.msra.gmra.mrb[8].mxu1 %v6408_v39  ;;  %3770 = vmatpush1.bf16.msra.mxu0 %v5425_v34  ;;  %v5497_v34 = vld [vmem:[%s6132_s24 + $0xd80] ss:$16 sps:$4 sm:$0xff]  }
  0xf7   : > { %3811 = vmatpush1.bf16.msra.mxu1 %v5428_v35  ;;  %3771 = vmatprep.subr.bf16.mxu0 %v5433_v22  ;;  %v5500_v35 = vld [vmem:[%s6132_s24 + $0xf80] ss:$16 sps:$4 sm:$0xff]   ;;  %v5505_v22 = vld [vmem:[%s6132_s24 + $0xda4] ss:$16 sps:$4 sm:$0xff]  }
  0xf8   : > { %3812 = vmatprep.subr.bf16.mxu1 %v5436_v23  ;;  %3801 = vmatprep.mubr.bf16.mxu0 %v6424_v42  ;;  %v5508_v23 = vld [vmem:[%s6132_s24 + $0xfa4] ss:$16 sps:$4 sm:$0xff]  }
  0xf9   : > { %3842 = vmatprep.mubr.bf16.mxu1 %v6428_v43 }
  0xfa   : > { %3772 = vmatpush1.bf16.msra.mxu0 %v5431_v44  ;;  %v5503_v44 = vld [vmem:[%s6132_s24 + $0xda0] ss:$16 sps:$4 sm:$0xff]  }
  0xfb   : > { %3813 = vmatpush1.bf16.msra.mxu1 %v5434_v45  ;;  %3773 = vmatprep.subr.bf16.mxu0 %v5439_v46  ;;  %v5506_v45 = vld [vmem:[%s6132_s24 + $0xfa0] ss:$16 sps:$4 sm:$0xff]   ;;  %v5511_v46 = vld [vmem:[%s6132_s24 + $0xdc4] ss:$16 sps:$4 sm:$0xff]  }
  0xfc   : > { %3814 = vmatprep.subr.bf16.mxu1 %v5442_v48  ;;  %v5514_v48 = vld [vmem:[%s6132_s24 + $0xfc4] ss:$16 sps:$4 sm:$0xff]  }
  0xfe   : > { %3774 = vmatpush1.bf16.msra.mxu0 %v5437_v49  ;;  %v5509_v49 = vld [vmem:[%s6132_s24 + $0xdc0] ss:$16 sps:$4 sm:$0xff]  }
  0xff   : > { %3815 = vmatpush1.bf16.msra.mxu1 %v5440_v50  ;;  %3775 = vmatprep.subr.bf16.mxu0 %v5445_v52  ;;  %v5512_v50 = vld [vmem:[%s6132_s24 + $0xfc0] ss:$16 sps:$4 sm:$0xff]   ;;  %v5517_v52 = vld [vmem:[%s6132_s24 + $0xde4] ss:$16 sps:$4 sm:$0xff]  }
 0x100   : > { %3816 = vmatprep.subr.bf16.mxu1 %v5448_v53  ;;  %v5520_v53 = vld [vmem:[%s6132_s24 + $0xfe4] ss:$16 sps:$4 sm:$0xff]  }
 0x102   : > { %3776 = vmatpush1.bf16.msra.mxu0 %v5443_v54  ;;  %v5515_v54 = vld [vmem:[%s6132_s24 + $0xde0] ss:$16 sps:$4 sm:$0xff]  }
 0x103   : > { %3817 = vmatpush1.bf16.msra.mxu1 %v5446_v55  ;;  %3777 = vmatprep.subr.bf16.mxu0 %v5451_v56  ;;  %v5518_v55 = vld [vmem:[%s6132_s24 + $0xfe0] ss:$16 sps:$4 sm:$0xff]   ;;  %v5527_v56 = vld [vmem:[%s6132_s24 + $0xc] ss:$16 sps:$4 sm:$0xff]  }
 0x104   : > { %3818 = vmatprep.subr.bf16.mxu1 %v5454_v57  ;;  %v5530_v57 = vld [vmem:[%s6132_s24 + $0x20c] ss:$16 sps:$4 sm:$0xff]  }
 0x106   : > { %3778 = vmatpush1.bf16.msra.mxu0 %v5449_v58  ;;  %v6496_v58 = vcombine.low %v6413_v40, %v6413_v40  ;;  %v5531_v40 = vld [vmem:[%s6132_s24 + $0x28] ss:$16 sps:$4 sm:$0xff]  }
 0x107   : > { %3819 = vmatpush1.bf16.msra.mxu1 %v5452_v59  ;;  %3779 = vmatprep.subr.bf16.mxu0 %v5457_v60  ;;  %v6500_v59 = vcombine.low %v6418_v41, %v6418_v41  ;;  %v5525_v60 = vld [vmem:[%s6132_s24 + $0x8] ss:$16 sps:$4 sm:$0xff]   ;;  %v5539_v41 = vld [vmem:[%s6132_s24 + $0x4c] ss:$16 sps:$4 sm:$0xff]  }
 0x108   : > { %3820 = vmatprep.subr.bf16.mxu1 %v5460_v61  ;;  %v5528_v61 = vld [vmem:[%s6132_s24 + $0x208] ss:$16 sps:$4 sm:$0xff]  }
 0x10a   : > { %3780 = vmatpush1.bf16.msra.mxu0 %v5455_v62  ;;  %v5533_v62 = vld [vmem:[%s6132_s24 + $0x2c] ss:$16 sps:$4 sm:$0xff]  }
 0x10b   : > { %3821 = vmatpush1.bf16.msra.mxu1 %v5458_v63  ;;  %3781 = vmatprep.subr.bf16.mxu0 %v5463_v0  ;;  %v5536_v63 = vld [vmem:[%s6132_s24 + $0x22c] ss:$16 sps:$4 sm:$0xff]   ;;  %v5534_v0 = vld [vmem:[%s6132_s24 + $0x228] ss:$16 sps:$4 sm:$0xff]  }
 0x10c   : > { %3822 = vmatprep.subr.bf16.mxu1 %v5466_v1  ;;  %v5542_v1 = vld [vmem:[%s6132_s24 + $0x24c] ss:$16 sps:$4 sm:$0xff]  }
 0x10e   : > { %3782 = vmatpush1.bf16.msra.mxu0 %v5461_v2  ;;  %v5537_v2 = vld [vmem:[%s6132_s24 + $0x48] ss:$16 sps:$4 sm:$0xff]  }
 0x10f   : > { %3823 = vmatpush1.bf16.msra.mxu1 %v5464_v3  ;;  %3783 = vmatprep.subr.bf16.mxu0 %v5469_v4  ;;  %v5540_v3 = vld [vmem:[%s6132_s24 + $0x248] ss:$16 sps:$4 sm:$0xff]   ;;  %v5545_v4 = vld [vmem:[%s6132_s24 + $0x6c] ss:$16 sps:$4 sm:$0xff]  }
 0x110   : > { %3824 = vmatprep.subr.bf16.mxu1 %v5472_v5  ;;  %v5548_v5 = vld [vmem:[%s6132_s24 + $0x26c] ss:$16 sps:$4 sm:$0xff]  }
 0x112   : > { %3784 = vmatpush1.bf16.msra.mxu0 %v5467_v8  ;;  %v5546_v8 = vld [vmem:[%s6132_s24 + $0x268] ss:$16 sps:$4 sm:$0xff]  }
 0x113   : > { %3825 = vmatpush1.bf16.msra.mxu1 %v5470_v9  ;;  %3785 = vmatprep.subr.bf16.mxu0 %v5475_v10  ;;  %v5554_v9 = vld [vmem:[%s6132_s24 + $0x28c] ss:$16 sps:$4 sm:$0xff]   ;;  %v5549_v10 = vld [vmem:[%s6132_s24 + $0x88] ss:$16 sps:$4 sm:$0xff]  }
 0x114   : > { %3826 = vmatprep.subr.bf16.mxu1 %v5478_v11  ;;  %v5552_v11 = vld [vmem:[%s6132_s24 + $0x288] ss:$16 sps:$4 sm:$0xff]  }
 0x116   : > { %3786 = vmatpush1.bf16.msra.mxu0 %v5473_v12  ;;  %v5557_v12 = vld [vmem:[%s6132_s24 + $0xac] ss:$16 sps:$4 sm:$0xff]  }
 0x117   : > { %3827 = vmatpush1.bf16.msra.mxu1 %v5476_v13  ;;  %3787 = vmatprep.subr.bf16.mxu0 %v5481_v14  ;;  %v5560_v13 = vld [vmem:[%s6132_s24 + $0x2ac] ss:$16 sps:$4 sm:$0xff]   ;;  %v5555_v14 = vld [vmem:[%s6132_s24 + $0xa8] ss:$16 sps:$4 sm:$0xff]  }
 0x118   : > { %3828 = vmatprep.subr.bf16.mxu1 %v5484_v15  ;;  %v5558_v15 = vld [vmem:[%s6132_s24 + $0x2a8] ss:$16 sps:$4 sm:$0xff]  }
 0x11a   : > { %3788 = vmatpush1.bf16.msra.mxu0 %v5479_v18  ;;  %v5563_v18 = vld [vmem:[%s6132_s24 + $0xcc] ss:$16 sps:$4 sm:$0xff]  }
 0x11b   : > { %3829 = vmatpush1.bf16.msra.mxu1 %v5482_v19  ;;  %3789 = vmatprep.subr.bf16.mxu0 %v5487_v20  ;;  %v5566_v19 = vld [vmem:[%s6132_s24 + $0x2cc] ss:$16 sps:$4 sm:$0xff]  }
 0x11c   : > { %3830 = vmatprep.subr.bf16.mxu1 %v5490_v21 }
 0x11e   : > { %3790 = vmatpush1.bf16.msra.mxu0 %v5485_v26  ;;  %v5561_v26 = vld [vmem:[%s6132_s24 + $0xc8] ss:$16 sps:$4 sm:$0xff]  }
 0x11f   : > { %3831 = vmatpush1.bf16.msra.mxu1 %v5488_v27  ;;  %3791 = vmatprep.subr.bf16.mxu0 %v5493_v28  ;;  %v5564_v27 = vld [vmem:[%s6132_s24 + $0x2c8] ss:$16 sps:$4 sm:$0xff]  }
 0x120   : > { %3832 = vmatprep.subr.bf16.mxu1 %v5496_v29 }
 0x122   : > { %3792 = vmatpush1.bf16.msra.mxu0 %v5491_v30 }
 0x123   : > { %3833 = vmatpush1.bf16.msra.mxu1 %v5494_v31  ;;  %3793 = vmatprep.subr.bf16.mxu0 %v5499_v32 }
 0x124   : > { %3834 = vmatprep.subr.bf16.mxu1 %v5502_v33 }
 0x126   : > { %3794 = vmatpush1.bf16.msra.mxu0 %v5497_v34 }
 0x127   : > { %3835 = vmatpush1.bf16.msra.mxu1 %v5500_v35  ;;  %3795 = vmatprep.subr.bf16.mxu0 %v5505_v22  ;;  %v5569_v22 = vld [vmem:[%s6132_s24 + $0xec] ss:$16 sps:$4 sm:$0xff]  }
 0x128   : > { %3836 = vmatprep.subr.bf16.mxu1 %v5508_v23  ;;  %v5572_v23 = vld [vmem:[%s6132_s24 + $0x2ec] ss:$16 sps:$4 sm:$0xff]  }
 0x12a   : > { %3796 = vmatpush1.bf16.msra.mxu0 %v5503_v44  ;;  %v5567_v44 = vld [vmem:[%s6132_s24 + $0xe8] ss:$16 sps:$4 sm:$0xff]  }
 0x12b   : > { %3837 = vmatpush1.bf16.msra.mxu1 %v5506_v45  ;;  %3797 = vmatprep.subr.bf16.mxu0 %v5511_v46  ;;  %v5570_v45 = vld [vmem:[%s6132_s24 + $0x2e8] ss:$16 sps:$4 sm:$0xff]   ;;  %v5575_v46 = vld [vmem:[%s6132_s24 + $0x10c] ss:$16 sps:$4 sm:$0xff]  }
 0x12c   : > { %3838 = vmatprep.subr.bf16.mxu1 %v5514_v48  ;;  %v5578_v48 = vld [vmem:[%s6132_s24 + $0x30c] ss:$16 sps:$4 sm:$0xff]  }
 0x12e   : > { %3798 = vmatpush1.bf16.msra.mxu0 %v5509_v49  ;;  %v5573_v49 = vld [vmem:[%s6132_s24 + $0x108] ss:$16 sps:$4 sm:$0xff]  }
 0x12f   : > { %3839 = vmatpush1.bf16.msra.mxu1 %v5512_v50  ;;  %3799 = vmatprep.subr.bf16.mxu0 %v5517_v52  ;;  %v5576_v50 = vld [vmem:[%s6132_s24 + $0x308] ss:$16 sps:$4 sm:$0xff]   ;;  %v5581_v52 = vld [vmem:[%s6132_s24 + $0x12c] ss:$16 sps:$4 sm:$0xff]  }
 0x130   : > { %3840 = vmatprep.subr.bf16.mxu1 %v5520_v53  ;;  %v5584_v53 = vld [vmem:[%s6132_s24 + $0x32c] ss:$16 sps:$4 sm:$0xff]  }
 0x132   : > { %3800 = vmatpush1.bf16.msra.mxu0 %v5515_v54  ;;  %v5579_v54 = vld [vmem:[%s6132_s24 + $0x128] ss:$16 sps:$4 sm:$0xff]  }
 0x133   : > { %3841 = vmatpush1.bf16.msra.mxu1 %v5518_v55  ;;  %3851 = vmatprep.subr.bf16.mxu0 %v5527_v56  ;;  %v5582_v55 = vld [vmem:[%s6132_s24 + $0x328] ss:$16 sps:$4 sm:$0xff]   ;;  %v5587_v56 = vld [vmem:[%s6132_s24 + $0x14c] ss:$16 sps:$4 sm:$0xff]  }
 0x134   : > { %3892 = vmatprep.subr.bf16.mxu1 %v5530_v57  ;;  %v5590_v57 = vld [vmem:[%s6132_s24 + $0x34c] ss:$16 sps:$4 sm:$0xff]  }
 0x135   : > { %3802 = vmatmul.mubr.bf16.vlgmr.msra.gmra.mrb[12].mxu0 %v6496_v58 }
 0x136   : > { %3843 = vmatmul.mubr.bf16.vlgmr.msra.gmra.mrb[12].mxu1 %v6500_v59  ;;  %3852 = vmatpush1.bf16.msra.mxu0 %v5525_v60  ;;  %v5585_v60 = vld [vmem:[%s6132_s24 + $0x148] ss:$16 sps:$4 sm:$0xff]  }
 0x137   : > { %3893 = vmatpush1.bf16.msra.mxu1 %v5528_v61  ;;  %3853 = vmatprep.subr.bf16.mxu0 %v5533_v62  ;;  %v5588_v61 = vld [vmem:[%s6132_s24 + $0x348] ss:$16 sps:$4 sm:$0xff]   ;;  %v5593_v62 = vld [vmem:[%s6132_s24 + $0x16c] ss:$16 sps:$4 sm:$0xff]  }
 0x138   : > { %3894 = vmatprep.subr.bf16.mxu1 %v5536_v63  ;;  %3883 = vmatprep.mubr.bf16.mxu0 %v6187_v47  ;;  %v5543_v47 = vld [vmem:[%s6132_s24 + $0x68] ss:$16 sps:$4 sm:$0xff]   ;;  %v5596_v63 = vld [vmem:[%s6132_s24 + $0x36c] ss:$16 sps:$4 sm:$0xff]  }
 0x139   : > { %3924 = vmatprep.mubr.bf16.mxu1 %v6194_v51  ;;  %v5551_v51 = vld [vmem:[%s6132_s24 + $0x8c] ss:$16 sps:$4 sm:$0xff]  }
 0x13a   : > { %3854 = vmatpush1.bf16.msra.mxu0 %v5531_v40  ;;  %v5591_v40 = vld [vmem:[%s6132_s24 + $0x168] ss:$16 sps:$4 sm:$0xff]  }
 0x13b   : > { %3895 = vmatpush1.bf16.msra.mxu1 %v5534_v0  ;;  %3855 = vmatprep.subr.bf16.mxu0 %v5539_v41  ;;  %v5594_v0 = vld [vmem:[%s6132_s24 + $0x368] ss:$16 sps:$4 sm:$0xff]   ;;  %v5599_v41 = vld [vmem:[%s6132_s24 + $0x18c] ss:$16 sps:$4 sm:$0xff]  }
 0x13c   : > { %3896 = vmatprep.subr.bf16.mxu1 %v5542_v1  ;;  %v5602_v1 = vld [vmem:[%s6132_s24 + $0x38c] ss:$16 sps:$4 sm:$0xff]  }
 0x13e   : > { %3856 = vmatpush1.bf16.msra.mxu0 %v5537_v2  ;;  %v5597_v2 = vld [vmem:[%s6132_s24 + $0x188] ss:$16 sps:$4 sm:$0xff]  }
 0x13f   : > { %3897 = vmatpush1.bf16.msra.mxu1 %v5540_v3  ;;  %3857 = vmatprep.subr.bf16.mxu0 %v5545_v4  ;;  %v5600_v3 = vld [vmem:[%s6132_s24 + $0x388] ss:$16 sps:$4 sm:$0xff]   ;;  %v5605_v4 = vld [vmem:[%s6132_s24 + $0x1ac] ss:$16 sps:$4 sm:$0xff]  }
 0x140   : > { %3898 = vmatprep.subr.bf16.mxu1 %v5548_v5  ;;  %v5608_v5 = vld [vmem:[%s6132_s24 + $0x3ac] ss:$16 sps:$4 sm:$0xff]  }
 0x142   : > { %3858 = vmatpush1.bf16.msra.mxu0 %v5543_v47  ;;  %v5603_v47 = vld [vmem:[%s6132_s24 + $0x1a8] ss:$16 sps:$4 sm:$0xff]  }
 0x143   : > { %3899 = vmatpush1.bf16.msra.mxu1 %v5546_v8  ;;  %3859 = vmatprep.subr.bf16.mxu0 %v5551_v51  ;;  %v5606_v8 = vld [vmem:[%s6132_s24 + $0x3a8] ss:$16 sps:$4 sm:$0xff]   ;;  %v5611_v51 = vld [vmem:[%s6132_s24 + $0x1cc] ss:$16 sps:$4 sm:$0xff]  }
 0x144   : > { %3900 = vmatprep.subr.bf16.mxu1 %v5554_v9  ;;  %v5614_v9 = vld [vmem:[%s6132_s24 + $0x3cc] ss:$16 sps:$4 sm:$0xff]  }
 0x146   : > { %3860 = vmatpush1.bf16.msra.mxu0 %v5549_v10  ;;  %v5609_v10 = vld [vmem:[%s6132_s24 + $0x1c8] ss:$16 sps:$4 sm:$0xff]  }
 0x147   : > { %3901 = vmatpush1.bf16.msra.mxu1 %v5552_v11  ;;  %3861 = vmatprep.subr.bf16.mxu0 %v5557_v12  ;;  %v5612_v11 = vld [vmem:[%s6132_s24 + $0x3c8] ss:$16 sps:$4 sm:$0xff]   ;;  %v5617_v12 = vld [vmem:[%s6132_s24 + $0x1ec] ss:$16 sps:$4 sm:$0xff]  }
 0x148   : > { %3902 = vmatprep.subr.bf16.mxu1 %v5560_v13  ;;  %v3557_v20 = vpop.f32.mrb[0].mxu0  ;;  %v5620_v13 = vld [vmem:[%s6132_s24 + $0x3ec] ss:$16 sps:$4 sm:$0xff]  }
 0x149   : > { %v3598_v21 = vpop.f32.mrb[0].mxu1  ;;  %v3559_v29 = vpop.f32.mrb[1].mxu0 }
 0x14a   : > { %v6532_v28 = vadd.f32 %v3598_v21, %v3557_v20  ;;  %v3600_v30 = vpop.f32.mrb[1].mxu1  ;;  %v3561_v32 = vpop.f32.mrb[2].mxu0  ;;  %3862 = vmatpush1.bf16.msra.mxu0 %v5555_v14  ;;  %v5615_v14 = vld [vmem:[%s6132_s24 + $0x1e8] ss:$16 sps:$4 sm:$0xff]  }
 0x14b   : > { %v6534_v31 = vadd.f32 %v3600_v30, %v3559_v29  ;;  %v3602_v33 = vpop.f32.mrb[2].mxu1  ;;  %3903 = vmatpush1.bf16.msra.mxu1 %v5558_v15  ;;  %v3562_v34 = vpop.f32.mrb[3].mxu0  ;;  %3863 = vmatprep.subr.bf16.mxu0 %v5563_v18  ;;  %v5618_v15 = vld [vmem:[%s6132_s24 + $0x3e8] ss:$16 sps:$4 sm:$0xff]   ;;  %v5623_v18 = vld [vmem:[%s6132_s24 + $0x40c] ss:$16 sps:$4 sm:$0xff]  }
 0x14c   : > { %v3603_v35 = vpop.f32.mrb[3].mxu1  ;;  %3904 = vmatprep.subr.bf16.mxu1 %v5566_v19  ;;  %v5626_v19 = vld [vmem:[%s6132_s24 + $0x60c] ss:$16 sps:$4 sm:$0xff]   ;;  %v5621_v20 = vld [vmem:[%s6132_s24 + $0x408] ss:$16 sps:$4 sm:$0xff]  }
 0x14d   : > { %v5624_v21 = vld [vmem:[%s6132_s24 + $0x608] ss:$16 sps:$4 sm:$0xff]   ;;  %v5635_v32 = vld [vmem:[%s6132_s24 + $0x44c] ss:$16 sps:$4 sm:$0xff]  }
 0x14e   : > { %3864 = vmatpush1.bf16.msra.mxu0 %v5561_v26  ;;  %v5629_v26 = vld [vmem:[%s6132_s24 + $0x42c] ss:$16 sps:$4 sm:$0xff]   ;;  %v5627_v29 = vld [vmem:[%s6132_s24 + $0x428] ss:$16 sps:$4 sm:$0xff]  }
 0x14f   : > { %3905 = vmatpush1.bf16.msra.mxu1 %v5564_v27  ;;  %3865 = vmatprep.subr.bf16.mxu0 %v5569_v22  ;;  %v5632_v27 = vld [vmem:[%s6132_s24 + $0x62c] ss:$16 sps:$4 sm:$0xff]   ;;  %v5630_v30 = vld [vmem:[%s6132_s24 + $0x628] ss:$16 sps:$4 sm:$0xff]  }
 0x150   : > { %3906 = vmatprep.subr.bf16.mxu1 %v5572_v23  ;;  %v5638_v33 = vld [vmem:[%s6132_s24 + $0x64c] ss:$16 sps:$4 sm:$0xff]   ;;  %v5639_v22 = vld [vmem:[%s6132_s24 + $0x468] ss:$16 sps:$4 sm:$0xff]  }
 0x151   : > { %v5641_v34 = vld [vmem:[%s6132_s24 + $0x46c] ss:$16 sps:$4 sm:$0xff]  }
 0x152   : > { %3866 = vmatpush1.bf16.msra.mxu0 %v5567_v44  ;;  %v5644_v35 = vld [vmem:[%s6132_s24 + $0x66c] ss:$16 sps:$4 sm:$0xff]   ;;  %v5645_v44 = vld [vmem:[%s6132_s24 + $0x488] ss:$16 sps:$4 sm:$0xff]  }
 0x153   : > { %3907 = vmatpush1.bf16.msra.mxu1 %v5570_v45  ;;  %3867 = vmatprep.subr.bf16.mxu0 %v5575_v46  ;;  %v5650_v23 = vld [vmem:[%s6132_s24 + $0x68c] ss:$16 sps:$4 sm:$0xff]   ;;  %v5648_v45 = vld [vmem:[%s6132_s24 + $0x688] ss:$16 sps:$4 sm:$0xff]  }
 0x154   : > { %3908 = vmatprep.subr.bf16.mxu1 %v5578_v48  ;;  %v5653_v46 = vld [vmem:[%s6132_s24 + $0x4ac] ss:$16 sps:$4 sm:$0xff]  }
 0x155   : > { %v5656_v48 = vld [vmem:[%s6132_s24 + $0x6ac] ss:$16 sps:$4 sm:$0xff]  }
 0x156   : > { %3868 = vmatpush1.bf16.msra.mxu0 %v5573_v49  ;;  %v5651_v49 = vld [vmem:[%s6132_s24 + $0x4a8] ss:$16 sps:$4 sm:$0xff]  }
 0x157   : > { %3909 = vmatpush1.bf16.msra.mxu1 %v5576_v50  ;;  %3869 = vmatprep.subr.bf16.mxu0 %v5581_v52  ;;  %v5654_v50 = vld [vmem:[%s6132_s24 + $0x6a8] ss:$16 sps:$4 sm:$0xff]   ;;  %v5659_v52 = vld [vmem:[%s6132_s24 + $0x4cc] ss:$16 sps:$4 sm:$0xff]  }
 0x158   : > { %3910 = vmatprep.subr.bf16.mxu1 %v5584_v53  ;;  %v5662_v53 = vld [vmem:[%s6132_s24 + $0x6cc] ss:$16 sps:$4 sm:$0xff]  }
 0x15a   : > { %3870 = vmatpush1.bf16.msra.mxu0 %v5579_v54 }
 0x15b   : > { %3911 = vmatpush1.bf16.msra.mxu1 %v5582_v55  ;;  %3871 = vmatprep.subr.bf16.mxu0 %v5587_v56 }
 0x15c   : > { %3912 = vmatprep.subr.bf16.mxu1 %v5590_v57 }
 0x15e   : > { %3872 = vmatpush1.bf16.msra.mxu0 %v5585_v60 }
 0x15f   : > { %3913 = vmatpush1.bf16.msra.mxu1 %v5588_v61  ;;  %3873 = vmatprep.subr.bf16.mxu0 %v5593_v62 }
 0x160   : > { %3914 = vmatprep.subr.bf16.mxu1 %v5596_v63 }
 0x162   : > { %3874 = vmatpush1.bf16.msra.mxu0 %v5591_v40  ;;  %v5657_v40 = vld [vmem:[%s6132_s24 + $0x4c8] ss:$16 sps:$4 sm:$0xff]  }
 0x163   : > { %3915 = vmatpush1.bf16.msra.mxu1 %v5594_v0  ;;  %3875 = vmatprep.subr.bf16.mxu0 %v5599_v41  ;;  %v5660_v0 = vld [vmem:[%s6132_s24 + $0x6c8] ss:$16 sps:$4 sm:$0xff]  }
 0x164   : > { %3916 = vmatprep.subr.bf16.mxu1 %v5602_v1 }
 0x166   : > { %3876 = vmatpush1.bf16.msra.mxu0 %v5597_v2 }
 0x167   : > { %3917 = vmatpush1.bf16.msra.mxu1 %v5600_v3  ;;  %3877 = vmatprep.subr.bf16.mxu0 %v5605_v4  ;;  %v5663_v4 = vld [vmem:[%s6132_s24 + $0x4e8] ss:$16 sps:$4 sm:$0xff]  }
 0x168   : > { %3918 = vmatprep.subr.bf16.mxu1 %v5608_v5  ;;  %v5666_v5 = vld [vmem:[%s6132_s24 + $0x6e8] ss:$16 sps:$4 sm:$0xff]  }
 0x16a   : > { %3878 = vmatpush1.bf16.msra.mxu0 %v5603_v47  ;;  %v5671_v47 = vld [vmem:[%s6132_s24 + $0x50c] ss:$16 sps:$4 sm:$0xff]  }
 0x16b   : > { %3919 = vmatpush1.bf16.msra.mxu1 %v5606_v8  ;;  %3879 = vmatprep.subr.bf16.mxu0 %v5611_v51  ;;  %v5674_v8 = vld [vmem:[%s6132_s24 + $0x70c] ss:$16 sps:$4 sm:$0xff]   ;;  %v5669_v51 = vld [vmem:[%s6132_s24 + $0x508] ss:$16 sps:$4 sm:$0xff]  }
 0x16c   : > { %3920 = vmatprep.subr.bf16.mxu1 %v5614_v9  ;;  %v5672_v9 = vld [vmem:[%s6132_s24 + $0x708] ss:$16 sps:$4 sm:$0xff]  }
 0x16e   : > { %3880 = vmatpush1.bf16.msra.mxu0 %v5609_v10  ;;  %v5677_v10 = vld [vmem:[%s6132_s24 + $0x52c] ss:$16 sps:$4 sm:$0xff]  }
 0x16f   : > { %3921 = vmatpush1.bf16.msra.mxu1 %v5612_v11  ;;  %3881 = vmatprep.subr.bf16.mxu0 %v5617_v12  ;;  %v5680_v11 = vld [vmem:[%s6132_s24 + $0x72c] ss:$16 sps:$4 sm:$0xff]   ;;  %v5675_v12 = vld [vmem:[%s6132_s24 + $0x528] ss:$16 sps:$4 sm:$0xff]  }
 0x170   : > { %3922 = vmatprep.subr.bf16.mxu1 %v5620_v13  ;;  %v5678_v13 = vld [vmem:[%s6132_s24 + $0x728] ss:$16 sps:$4 sm:$0xff]  }
 0x172   : > { %3882 = vmatpush1.bf16.msra.mxu0 %v5615_v14  ;;  %v5683_v14 = vld [vmem:[%s6132_s24 + $0x54c] ss:$16 sps:$4 sm:$0xff]  }
 0x173   : > { %3923 = vmatpush1.bf16.msra.mxu1 %v5618_v15  ;;  %3933 = vmatprep.subr.bf16.mxu0 %v5623_v18  ;;  %v5686_v15 = vld [vmem:[%s6132_s24 + $0x74c] ss:$16 sps:$4 sm:$0xff]   ;;  %v5681_v18 = vld [vmem:[%s6132_s24 + $0x548] ss:$16 sps:$4 sm:$0xff]  }
 0x174   : > { %3974 = vmatprep.subr.bf16.mxu1 %v5626_v19  ;;  %v5684_v19 = vld [vmem:[%s6132_s24 + $0x748] ss:$16 sps:$4 sm:$0xff]  }
 0x175   : > { %3884 = vmatmul.mubr.bf16.vlgmr.msra.gmra.mrb[16].mxu0 %v6216_v6  ;;  %v5633_v6 = vld [vmem:[%s6132_s24 + $0x448] ss:$16 sps:$4 sm:$0xff]  }
 0x176   : > { %3925 = vmatmul.mubr.bf16.vlgmr.msra.gmra.mrb[16].mxu1 %v6218_v7  ;;  %3934 = vmatpush1.bf16.msra.mxu0 %v5621_v20  ;;  %v5636_v7 = vld [vmem:[%s6132_s24 + $0x648] ss:$16 sps:$4 sm:$0xff]   ;;  %v5689_v20 = vld [vmem:[%s6132_s24 + $0x56c] ss:$16 sps:$4 sm:$0xff]  }
 0x177   : > { %3975 = vmatpush1.bf16.msra.mxu1 %v5624_v21  ;;  %3935 = vmatprep.subr.bf16.mxu0 %v5629_v26  ;;  %v5692_v21 = vld [vmem:[%s6132_s24 + $0x76c] ss:$16 sps:$4 sm:$0xff]   ;;  %v5687_v26 = vld [vmem:[%s6132_s24 + $0x568] ss:$16 sps:$4 sm:$0xff]  }
 0x178   : > { %3976 = vmatprep.subr.bf16.mxu1 %v5632_v27  ;;  %3965 = vmatprep.mubr.bf16.mxu0 %v6260_v36  ;;  %v5642_v36 = vld [vmem:[%s6132_s24 + $0x668] ss:$16 sps:$4 sm:$0xff]  }
 0x179   : > { %4006 = vmatprep.mubr.bf16.mxu1 %v6264_v37  ;;  %v5647_v37 = vld [vmem:[%s6132_s24 + $0x48c] ss:$16 sps:$4 sm:$0xff]   ;;  %v5690_v27 = vld [vmem:[%s6132_s24 + $0x768] ss:$16 sps:$4 sm:$0xff]  }
 0x17a   : > { %3936 = vmatpush1.bf16.msra.mxu0 %v5627_v29  ;;  %v5695_v29 = vld [vmem:[%s6132_s24 + $0x58c] ss:$16 sps:$4 sm:$0xff]  }
 0x17b   : > { %3977 = vmatpush1.bf16.msra.mxu1 %v5630_v30  ;;  %3937 = vmatprep.subr.bf16.mxu0 %v5635_v32  ;;  %v5698_v30 = vld [vmem:[%s6132_s24 + $0x78c] ss:$16 sps:$4 sm:$0xff]   ;;  %v5693_v32 = vld [vmem:[%s6132_s24 + $0x588] ss:$16 sps:$4 sm:$0xff]  }
 0x17c   : > { %3978 = vmatprep.subr.bf16.mxu1 %v5638_v33  ;;  %v5696_v33 = vld [vmem:[%s6132_s24 + $0x788] ss:$16 sps:$4 sm:$0xff]  }
 0x17e   : > { %3938 = vmatpush1.bf16.msra.mxu0 %v5633_v6  ;;  %v5701_v6 = vld [vmem:[%s6132_s24 + $0x5ac] ss:$16 sps:$4 sm:$0xff]  }
 0x17f   : > { %3979 = vmatpush1.bf16.msra.mxu1 %v5636_v7  ;;  %3939 = vmatprep.subr.bf16.mxu0 %v5641_v34  ;;  %v5704_v7 = vld [vmem:[%s6132_s24 + $0x7ac] ss:$16 sps:$4 sm:$0xff]   ;;  %v5699_v34 = vld [vmem:[%s6132_s24 + $0x5a8] ss:$16 sps:$4 sm:$0xff]  }
 0x180   : > { %3980 = vmatprep.subr.bf16.mxu1 %v5644_v35  ;;  %v5702_v35 = vld [vmem:[%s6132_s24 + $0x7a8] ss:$16 sps:$4 sm:$0xff]  }
 0x182   : > { %3940 = vmatpush1.bf16.msra.mxu0 %v5639_v22  ;;  %v5707_v22 = vld [vmem:[%s6132_s24 + $0x5cc] ss:$16 sps:$4 sm:$0xff]  }
 0x183   : > { %3981 = vmatpush1.bf16.msra.mxu1 %v5642_v36  ;;  %3941 = vmatprep.subr.bf16.mxu0 %v5647_v37  ;;  %v5710_v36 = vld [vmem:[%s6132_s24 + $0x7cc] ss:$16 sps:$4 sm:$0xff]   ;;  %v5705_v37 = vld [vmem:[%s6132_s24 + $0x5c8] ss:$16 sps:$4 sm:$0xff]  }
 0x184   : > { %3982 = vmatprep.subr.bf16.mxu1 %v5650_v23  ;;  %v5708_v23 = vld [vmem:[%s6132_s24 + $0x7c8] ss:$16 sps:$4 sm:$0xff]  }
 0x186   : > { %3942 = vmatpush1.bf16.msra.mxu0 %v5645_v44  ;;  %v5713_v44 = vld [vmem:[%s6132_s24 + $0x5ec] ss:$16 sps:$4 sm:$0xff]  }
 0x187   : > { %3983 = vmatpush1.bf16.msra.mxu1 %v5648_v45  ;;  %3943 = vmatprep.subr.bf16.mxu0 %v5653_v46  ;;  %v5716_v45 = vld [vmem:[%s6132_s24 + $0x7ec] ss:$16 sps:$4 sm:$0xff]   ;;  %v5711_v46 = vld [vmem:[%s6132_s24 + $0x5e8] ss:$16 sps:$4 sm:$0xff]  }
 0x188   : > { %3984 = vmatprep.subr.bf16.mxu1 %v5656_v48  ;;  %v3639_v54 = vpop.f32.mrb[4].mxu0  ;;  %v5714_v48 = vld [vmem:[%s6132_s24 + $0x7e8] ss:$16 sps:$4 sm:$0xff]  }
 0x189   : > { %v3680_v55 = vpop.f32.mrb[4].mxu1  ;;  %v3640_v56 = vadd.f32 %v3639_v54, %v6532_v28  ;;  %v3641_v57 = vpop.f32.mrb[5].mxu0  ;;  %v5665_v28 = vld [vmem:[%s6132_s24 + $0x4ec] ss:$16 sps:$4 sm:$0xff]  }
 0x18a   : > { %v3682_v60 = vpop.f32.mrb[5].mxu1  ;;  %v3642_v61 = vadd.f32 %v3641_v57, %v6534_v31  ;;  %v3643_v62 = vpop.f32.mrb[6].mxu0  ;;  %3944 = vmatpush1.bf16.msra.mxu0 %v5651_v49  ;;  %v5668_v31 = vld [vmem:[%s6132_s24 + $0x6ec] ss:$16 sps:$4 sm:$0xff]   ;;  %v5726_v57 = vld [vmem:[%s6132_s24 + $0xa28] ss:$16 sps:$4 sm:$0xff]  }
 0x18b   : > { %v3684_v63 = vpop.f32.mrb[6].mxu1  ;;  %3985 = vmatpush1.bf16.msra.mxu1 %v5654_v50  ;;  %v6606_v41 = vadd.f32 %v3680_v55, %v3640_v56  ;;  %v3644_v1 = vpop.f32.mrb[7].mxu0  ;;  %3945 = vmatprep.subr.bf16.mxu0 %v5659_v52  ;;  %v5719_v49 = vld [vmem:[%s6132_s24 + $0x80c] ss:$16 sps:$4 sm:$0xff]   ;;  %v5717_v52 = vld [vmem:[%s6132_s24 + $0x808] ss:$16 sps:$4 sm:$0xff]  }
 0x18c   : > { %v3685_v2 = vpop.f32.mrb[7].mxu1  ;;  %3986 = vmatprep.subr.bf16.mxu1 %v5662_v53  ;;  %v6610_v3 = vadd.f32 %v3682_v60, %v3642_v61  ;;  %v5722_v50 = vld [vmem:[%s6132_s24 + $0xa0c] ss:$16 sps:$4 sm:$0xff]   ;;  %v5720_v53 = vld [vmem:[%s6132_s24 + $0xa08] ss:$16 sps:$4 sm:$0xff]  }
 0x18d   : > { %v5725_v54 = vld [vmem:[%s6132_s24 + $0x82c] ss:$16 sps:$4 sm:$0xff]   ;;  %v5723_v56 = vld [vmem:[%s6132_s24 + $0x828] ss:$16 sps:$4 sm:$0xff]  }
 0x18e   : > { %3946 = vmatpush1.bf16.msra.mxu0 %v5657_v40  ;;  %v5728_v55 = vld [vmem:[%s6132_s24 + $0xa2c] ss:$16 sps:$4 sm:$0xff]   ;;  %v5735_v40 = vld [vmem:[%s6132_s24 + $0x868] ss:$16 sps:$4 sm:$0xff]  }
 0x18f   : > { %3987 = vmatpush1.bf16.msra.mxu1 %v5660_v0  ;;  %3947 = vmatprep.subr.bf16.mxu0 %v5665_v28  ;;  %v5731_v60 = vld [vmem:[%s6132_s24 + $0x84c] ss:$16 sps:$4 sm:$0xff]   ;;  %v5741_v1 = vld [vmem:[%s6132_s24 + $0x888] ss:$16 sps:$4 sm:$0xff]  }
 0x190   : > { %3988 = vmatprep.subr.bf16.mxu1 %v5668_v31  ;;  %v5734_v61 = vld [vmem:[%s6132_s24 + $0xa4c] ss:$16 sps:$4 sm:$0xff]   ;;  %v5744_v2 = vld [vmem:[%s6132_s24 + $0xa88] ss:$16 sps:$4 sm:$0xff]  }
 0x191   : > { %v5737_v62 = vld [vmem:[%s6132_s24 + $0x86c] ss:$16 sps:$4 sm:$0xff]  }
 0x192   : > { %3948 = vmatpush1.bf16.msra.mxu0 %v5663_v4  ;;  %v5740_v63 = vld [vmem:[%s6132_s24 + $0xa6c] ss:$16 sps:$4 sm:$0xff]   ;;  %v5747_v4 = vld [vmem:[%s6132_s24 + $0x8a8] ss:$16 sps:$4 sm:$0xff]  }
 0x193   : > { %3989 = vmatpush1.bf16.msra.mxu1 %v5666_v5  ;;  %3949 = vmatprep.subr.bf16.mxu0 %v5671_v47  ;;  %v5746_v0 = vld [vmem:[%s6132_s24 + $0xa8c] ss:$16 sps:$4 sm:$0xff]   ;;  %v5750_v5 = vld [vmem:[%s6132_s24 + $0xaa8] ss:$16 sps:$4 sm:$0xff]  }
 0x194   : > { %3990 = vmatprep.subr.bf16.mxu1 %v5674_v8  ;;  %v5749_v28 = vld [vmem:[%s6132_s24 + $0x8ac] ss:$16 sps:$4 sm:$0xff]  }
 0x195   : > { %v5752_v31 = vld [vmem:[%s6132_s24 + $0xaac] ss:$16 sps:$4 sm:$0xff]  }
 0x196   : > { %3950 = vmatpush1.bf16.msra.mxu0 %v5669_v51  ;;  %v5755_v47 = vld [vmem:[%s6132_s24 + $0x8cc] ss:$16 sps:$4 sm:$0xff]  }
 0x197   : > { %3991 = vmatpush1.bf16.msra.mxu1 %v5672_v9  ;;  %3951 = vmatprep.subr.bf16.mxu0 %v5677_v10  ;;  %v5758_v8 = vld [vmem:[%s6132_s24 + $0xacc] ss:$16 sps:$4 sm:$0xff]  }
 0x198   : > { %3992 = vmatprep.subr.bf16.mxu1 %v5680_v11 }
 0x19a   : > { %3952 = vmatpush1.bf16.msra.mxu0 %v5675_v12 }
 0x19b   : > { %3993 = vmatpush1.bf16.msra.mxu1 %v5678_v13  ;;  %3953 = vmatprep.subr.bf16.mxu0 %v5683_v14 }
 0x19c   : > { %3994 = vmatprep.subr.bf16.mxu1 %v5686_v15 }
 0x19e   : > { %3954 = vmatpush1.bf16.msra.mxu0 %v5681_v18  ;;  %v5753_v18 = vld [vmem:[%s6132_s24 + $0x8c8] ss:$16 sps:$4 sm:$0xff]  }
 0x19f   : > { %3995 = vmatpush1.bf16.msra.mxu1 %v5684_v19  ;;  %3955 = vmatprep.subr.bf16.mxu0 %v5689_v20  ;;  %v5756_v19 = vld [vmem:[%s6132_s24 + $0xac8] ss:$16 sps:$4 sm:$0xff]  }
 0x1a0   : > { %3996 = vmatprep.subr.bf16.mxu1 %v5692_v21 }
 0x1a2   : > { %3956 = vmatpush1.bf16.msra.mxu0 %v5687_v26 }
 0x1a3   : > { %3997 = vmatpush1.bf16.msra.mxu1 %v5690_v27  ;;  %3957 = vmatprep.subr.bf16.mxu0 %v5695_v29  ;;  %v5759_v29 = vld [vmem:[%s6132_s24 + $0x8e8] ss:$16 sps:$4 sm:$0xff]  }
 0x1a4   : > { %3998 = vmatprep.subr.bf16.mxu1 %v5698_v30  ;;  %v5762_v30 = vld [vmem:[%s6132_s24 + $0xae8] ss:$16 sps:$4 sm:$0xff]  }
 0x1a6   : > { %3958 = vmatpush1.bf16.msra.mxu0 %v5693_v32  ;;  %v5767_v32 = vld [vmem:[%s6132_s24 + $0x90c] ss:$16 sps:$4 sm:$0xff]  }
 0x1a7   : > { %3999 = vmatpush1.bf16.msra.mxu1 %v5696_v33  ;;  %3959 = vmatprep.subr.bf16.mxu0 %v5701_v6  ;;  %v5770_v33 = vld [vmem:[%s6132_s24 + $0xb0c] ss:$16 sps:$4 sm:$0xff]   ;;  %v5765_v6 = vld [vmem:[%s6132_s24 + $0x908] ss:$16 sps:$4 sm:$0xff]  }
 0x1a8   : > { %4000 = vmatprep.subr.bf16.mxu1 %v5704_v7  ;;  %v5768_v7 = vld [vmem:[%s6132_s24 + $0xb08] ss:$16 sps:$4 sm:$0xff]  }
 0x1aa   : > { %3960 = vmatpush1.bf16.msra.mxu0 %v5699_v34  ;;  %v5773_v34 = vld [vmem:[%s6132_s24 + $0x92c] ss:$16 sps:$4 sm:$0xff]  }
 0x1ab   : > { %4001 = vmatpush1.bf16.msra.mxu1 %v5702_v35  ;;  %3961 = vmatprep.subr.bf16.mxu0 %v5707_v22  ;;  %v5776_v35 = vld [vmem:[%s6132_s24 + $0xb2c] ss:$16 sps:$4 sm:$0xff]   ;;  %v5771_v22 = vld [vmem:[%s6132_s24 + $0x928] ss:$16 sps:$4 sm:$0xff]  }
 0x1ac   : > { %4002 = vmatprep.subr.bf16.mxu1 %v5710_v36  ;;  %v5774_v36 = vld [vmem:[%s6132_s24 + $0xb28] ss:$16 sps:$4 sm:$0xff]  }
 0x1ae   : > { %3962 = vmatpush1.bf16.msra.mxu0 %v5705_v37  ;;  %v5779_v37 = vld [vmem:[%s6132_s24 + $0x94c] ss:$16 sps:$4 sm:$0xff]  }
 0x1af   : > { %4003 = vmatpush1.bf16.msra.mxu1 %v5708_v23  ;;  %3963 = vmatprep.subr.bf16.mxu0 %v5713_v44  ;;  %v5782_v23 = vld [vmem:[%s6132_s24 + $0xb4c] ss:$16 sps:$4 sm:$0xff]   ;;  %v5777_v44 = vld [vmem:[%s6132_s24 + $0x948] ss:$16 sps:$4 sm:$0xff]  }
 0x1b0   : > { %4004 = vmatprep.subr.bf16.mxu1 %v5716_v45  ;;  %v5780_v45 = vld [vmem:[%s6132_s24 + $0xb48] ss:$16 sps:$4 sm:$0xff]  }
 0x1b2   : > { %3964 = vmatpush1.bf16.msra.mxu0 %v5711_v46  ;;  %v5785_v46 = vld [vmem:[%s6132_s24 + $0x96c] ss:$16 sps:$4 sm:$0xff]  }
 0x1b3   : > { %4005 = vmatpush1.bf16.msra.mxu1 %v5714_v48  ;;  %4015 = vmatprep.subr.bf16.mxu0 %v5719_v49  ;;  %v5788_v48 = vld [vmem:[%s6132_s24 + $0xb6c] ss:$16 sps:$4 sm:$0xff]   ;;  %v5783_v49 = vld [vmem:[%s6132_s24 + $0x968] ss:$16 sps:$4 sm:$0xff]  }
 0x1b4   : > { %4056 = vmatprep.subr.bf16.mxu1 %v5722_v50  ;;  %v5786_v50 = vld [vmem:[%s6132_s24 + $0xb68] ss:$16 sps:$4 sm:$0xff]  }
 0x1b5   : > { %3966 = vmatmul.mubr.bf16.vlgmr.msra.gmra.mrb[20].mxu0 %v6308_v16  ;;  %v5729_v16 = vld [vmem:[%s6132_s24 + $0x848] ss:$16 sps:$4 sm:$0xff]  }
 0x1b6   : > { %4007 = vmatmul.mubr.bf16.vlgmr.msra.gmra.mrb[20].mxu1 %v6312_v17  ;;  %4016 = vmatpush1.bf16.msra.mxu0 %v5717_v52  ;;  %v5732_v17 = vld [vmem:[%s6132_s24 + $0xa48] ss:$16 sps:$4 sm:$0xff]   ;;  %v5791_v52 = vld [vmem:[%s6132_s24 + $0x98c] ss:$16 sps:$4 sm:$0xff]  }
 0x1b7   : > { %4057 = vmatpush1.bf16.msra.mxu1 %v5720_v53  ;;  %4017 = vmatprep.subr.bf16.mxu0 %v5725_v54  ;;  %v5794_v53 = vld [vmem:[%s6132_s24 + $0xb8c] ss:$16 sps:$4 sm:$0xff]   ;;  %v5789_v54 = vld [vmem:[%s6132_s24 + $0x988] ss:$16 sps:$4 sm:$0xff]  }
 0x1b8   : > { %4058 = vmatprep.subr.bf16.mxu1 %v5728_v55  ;;  %4047 = vmatprep.mubr.bf16.mxu0 %v6330_v24  ;;  %v5738_v24 = vld [vmem:[%s6132_s24 + $0xa68] ss:$16 sps:$4 sm:$0xff]  }
 0x1b9   : > { %4088 = vmatprep.mubr.bf16.mxu1 %v6334_v25  ;;  %v5743_v25 = vld [vmem:[%s6132_s24 + $0x88c] ss:$16 sps:$4 sm:$0xff]   ;;  %v5792_v55 = vld [vmem:[%s6132_s24 + $0xb88] ss:$16 sps:$4 sm:$0xff]  }
 0x1ba   : > { %4018 = vmatpush1.bf16.msra.mxu0 %v5723_v56  ;;  %v5797_v56 = vld [vmem:[%s6132_s24 + $0x9ac] ss:$16 sps:$4 sm:$0xff]  }
 0x1bb   : > { %4059 = vmatpush1.bf16.msra.mxu1 %v5726_v57  ;;  %4019 = vmatprep.subr.bf16.mxu0 %v5731_v60  ;;  %v5800_v57 = vld [vmem:[%s6132_s24 + $0xbac] ss:$16 sps:$4 sm:$0xff]   ;;  %v5795_v60 = vld [vmem:[%s6132_s24 + $0x9a8] ss:$16 sps:$4 sm:$0xff]  }
 0x1bc   : > { %4060 = vmatprep.subr.bf16.mxu1 %v5734_v61  ;;  %v5798_v61 = vld [vmem:[%s6132_s24 + $0xba8] ss:$16 sps:$4 sm:$0xff]  }
 0x1be   : > { %4020 = vmatpush1.bf16.msra.mxu0 %v5729_v16  ;;  %v5803_v16 = vld [vmem:[%s6132_s24 + $0x9cc] ss:$16 sps:$4 sm:$0xff]  }
 0x1bf   : > { %4061 = vmatpush1.bf16.msra.mxu1 %v5732_v17  ;;  %4021 = vmatprep.subr.bf16.mxu0 %v5737_v62  ;;  %v5806_v17 = vld [vmem:[%s6132_s24 + $0xbcc] ss:$16 sps:$4 sm:$0xff]   ;;  %v5801_v62 = vld [vmem:[%s6132_s24 + $0x9c8] ss:$16 sps:$4 sm:$0xff]  }
 0x1c0   : > { %4062 = vmatprep.subr.bf16.mxu1 %v5740_v63  ;;  %v5804_v63 = vld [vmem:[%s6132_s24 + $0xbc8] ss:$16 sps:$4 sm:$0xff]  }
 0x1c2   : > { %4022 = vmatpush1.bf16.msra.mxu0 %v5735_v40  ;;  %v5809_v40 = vld [vmem:[%s6132_s24 + $0x9ec] ss:$16 sps:$4 sm:$0xff]  }
 0x1c3   : > { %4063 = vmatpush1.bf16.msra.mxu1 %v5738_v24  ;;  %4023 = vmatprep.subr.bf16.mxu0 %v5743_v25  ;;  %v5812_v24 = vld [vmem:[%s6132_s24 + $0xbec] ss:$16 sps:$4 sm:$0xff]   ;;  %v5807_v25 = vld [vmem:[%s6132_s24 + $0x9e8] ss:$16 sps:$4 sm:$0xff]  }
 0x1c4   : > { %4064 = vmatprep.subr.bf16.mxu1 %v5746_v0  ;;  %v5810_v0 = vld [vmem:[%s6132_s24 + $0xbe8] ss:$16 sps:$4 sm:$0xff]  }
 0x1c6   : > { %4024 = vmatpush1.bf16.msra.mxu0 %v5741_v1  ;;  %v5815_v1 = vld [vmem:[%s6132_s24 + $0xc0c] ss:$16 sps:$4 sm:$0xff]  }
 0x1c7   : > { %4065 = vmatpush1.bf16.msra.mxu1 %v5744_v2  ;;  %4025 = vmatprep.subr.bf16.mxu0 %v5749_v28  ;;  %v5818_v2 = vld [vmem:[%s6132_s24 + $0xe0c] ss:$16 sps:$4 sm:$0xff]   ;;  %v5813_v28 = vld [vmem:[%s6132_s24 + $0xc08] ss:$16 sps:$4 sm:$0xff]  }
 0x1c8   : > { %4066 = vmatprep.subr.bf16.mxu1 %v5752_v31  ;;  %v3721_v51 = vpop.f32.mrb[8].mxu0  ;;  %v5816_v31 = vld [vmem:[%s6132_s24 + $0xe08] ss:$16 sps:$4 sm:$0xff]  }
 0x1c9   : > { %v3762_v9 = vpop.f32.mrb[8].mxu1  ;;  %v3722_v10 = vadd.f32 %v3721_v51, %v6606_v41  ;;  %v3723_v11 = vpop.f32.mrb[9].mxu0  ;;  %v5761_v41 = vld [vmem:[%s6132_s24 + $0x8ec] ss:$16 sps:$4 sm:$0xff]  }
 0x1ca   : > { %v3764_v12 = vpop.f32.mrb[9].mxu1  ;;  %v3724_v13 = vadd.f32 %v3723_v11, %v6610_v3  ;;  %v3725_v14 = vpop.f32.mrb[10].mxu0  ;;  %4026 = vmatpush1.bf16.msra.mxu0 %v5747_v4  ;;  %v5764_v3 = vld [vmem:[%s6132_s24 + $0xaec] ss:$16 sps:$4 sm:$0xff]  }
 0x1cb   : > { %v3766_v15 = vpop.f32.mrb[10].mxu1  ;;  %4067 = vmatpush1.bf16.msra.mxu1 %v5750_v5  ;;  %v6680_v20 = vadd.f32 %v3762_v9, %v3722_v10  ;;  %v3726_v21 = vpop.f32.mrb[11].mxu0  ;;  %4027 = vmatprep.subr.bf16.mxu0 %v5755_v47  ;;  %v5821_v4 = vld [vmem:[%s6132_s24 + $0xc2c] ss:$16 sps:$4 sm:$0xff]   ;;  %v5819_v47 = vld [vmem:[%s6132_s24 + $0xc28] ss:$16 sps:$4 sm:$0xff]  }
 0x1cc   : > { %v3767_v26 = vpop.f32.mrb[11].mxu1  ;;  %4068 = vmatprep.subr.bf16.mxu1 %v5758_v8  ;;  %v6684_v27 = vadd.f32 %v3764_v12, %v3724_v13  ;;  %v5824_v5 = vld [vmem:[%s6132_s24 + $0xe2c] ss:$16 sps:$4 sm:$0xff]   ;;  %v5822_v8 = vld [vmem:[%s6132_s24 + $0xe28] ss:$16 sps:$4 sm:$0xff]   ;;  %v4196_v12 = vlaneseq }
 0x1cd   : > { %v5827_v51 = vld [vmem:[%s6132_s24 + $0xc4c] ss:$16 sps:$4 sm:$0xff]  }
 0x1ce   : > { %4028 = vmatpush1.bf16.msra.mxu0 %v5753_v18  ;;  %v5830_v9 = vld [vmem:[%s6132_s24 + $0xe4c] ss:$16 sps:$4 sm:$0xff]   ;;  %v6745_v15 = vshrl.u32 %v4196_v12, 7  ;;  %v5837_v18 = vld [vmem:[%s6132_s24 + $0xc88] ss:$16 sps:$4 sm:$0xff]  }
 0x1cf   : > { %4069 = vmatpush1.bf16.msra.mxu1 %v5756_v19  ;;  %4029 = vmatprep.subr.bf16.mxu0 %v5761_v41  ;;  %v5833_v10 = vld [vmem:[%s6132_s24 + $0xc6c] ss:$16 sps:$4 sm:$0xff]   ;;  %v5840_v19 = vld [vmem:[%s6132_s24 + $0xe88] ss:$16 sps:$4 sm:$0xff]  }
 0x1d0   : > { %4070 = vmatprep.subr.bf16.mxu1 %v5764_v3  ;;  %v5836_v11 = vld [vmem:[%s6132_s24 + $0xe6c] ss:$16 sps:$4 sm:$0xff]   ;;  %v6756_v41 = vsub.s32 0, %v6745_v15  ;;  %v5843_v3 = vld [vmem:[%s6132_s24 + $0xca8] ss:$16 sps:$4 sm:$0xff]  }
 0x1d1   : > { %v5839_v13 = vld [vmem:[%s6132_s24 + $0xc8c] ss:$16 sps:$4 sm:$0xff]   ;;  %v5876_v12 = vld [vmem:[%s6132_s24 + $0xf48] ss:$16 sps:$4 sm:$0xff]  }
 0x1d2   : > { %4030 = vmatpush1.bf16.msra.mxu0 %v5759_v29  ;;  %v5842_v14 = vld [vmem:[%s6132_s24 + $0xe8c] ss:$16 sps:$4 sm:$0xff]   ;;  %v6759_v29 = vld [vmem:[%s353_s11] sm:$0xf] }
 0x1d3   : > { %4071 = vmatpush1.bf16.msra.mxu1 %v5762_v30  ;;  %4031 = vmatprep.subr.bf16.mxu0 %v5767_v32  ;;  %v5845_v21 = vld [vmem:[%s6132_s24 + $0xcac] ss:$16 sps:$4 sm:$0xff]   ;;  %v6762_v30 = vsub.s32 1, %v6745_v15  ;;  %v5846_v32 = vld [vmem:[%s6132_s24 + $0xea8] ss:$16 sps:$4 sm:$0xff]  }
 0x1d4   : > { %4072 = vmatprep.subr.bf16.mxu1 %v5770_v33  ;;  %v5848_v26 = vld [vmem:[%s6132_s24 + $0xeac] ss:$16 sps:$4 sm:$0xff]  }
 0x1d5   : > { %v5851_v33 = vld [vmem:[%s6132_s24 + $0xccc] ss:$16 sps:$4 sm:$0xff]  }
 0x1d6   : > { %4032 = vmatpush1.bf16.msra.mxu0 %v5765_v6  ;;  %v5854_v6 = vld [vmem:[%s6132_s24 + $0xecc] ss:$16 sps:$4 sm:$0xff]  }
 0x1d7   : > { %4073 = vmatpush1.bf16.msra.mxu1 %v5768_v7  ;;  %4033 = vmatprep.subr.bf16.mxu0 %v5773_v34 }
 0x1d8   : > { %4074 = vmatprep.subr.bf16.mxu1 %v5776_v35 }
 0x1da   : > { %4034 = vmatpush1.bf16.msra.mxu0 %v5771_v22  ;;  %v4199_v22 = vrot.slane %v6759_v29, %v6756_v41 }
 0x1db   : > { %4075 = vmatpush1.bf16.msra.mxu1 %v5774_v36  ;;  %4035 = vmatprep.subr.bf16.mxu0 %v5779_v37 }
 0x1dc   : > { %4076 = vmatprep.subr.bf16.mxu1 %v5782_v23 }
 0x1de   : > { %4036 = vmatpush1.bf16.msra.mxu0 %v5777_v44  ;;  %v4203_v44 = vrot.slane %v6759_v29, %v6762_v30 }
 0x1df   : > { %4077 = vmatpush1.bf16.msra.mxu1 %v5780_v45  ;;  %4037 = vmatprep.subr.bf16.mxu0 %v5785_v46 }
 0x1e0   : > { %4078 = vmatprep.subr.bf16.mxu1 %v5788_v48  ;;  %v5849_v48 = vld [vmem:[%s6132_s24 + $0xcc8] ss:$16 sps:$4 sm:$0xff]  }
 0x1e2   : > { %4038 = vmatpush1.bf16.msra.mxu0 %v5783_v49 }
 0x1e3   : > { %4079 = vmatpush1.bf16.msra.mxu1 %v5786_v50  ;;  %4039 = vmatprep.subr.bf16.mxu0 %v5791_v52 }
 0x1e4   : > { %4080 = vmatprep.subr.bf16.mxu1 %v5794_v53  ;;  %v5857_v53 = vld [vmem:[%s6132_s24 + $0xcec] ss:$16 sps:$4 sm:$0xff]  }
 0x1e6   : > { %4040 = vmatpush1.bf16.msra.mxu0 %v5789_v54 }
 0x1e7   : > { %4081 = vmatpush1.bf16.msra.mxu1 %v5792_v55  ;;  %4041 = vmatprep.subr.bf16.mxu0 %v5797_v56 }
 0x1e8   : > { %4082 = vmatprep.subr.bf16.mxu1 %v5800_v57  ;;  %v5855_v57 = vld [vmem:[%s6132_s24 + $0xce8] ss:$16 sps:$4 sm:$0xff]  }
 0x1ea   : > { %4042 = vmatpush1.bf16.msra.mxu0 %v5795_v60  ;;  %v5858_v60 = vld [vmem:[%s6132_s24 + $0xee8] ss:$16 sps:$4 sm:$0xff]  }
 0x1eb   : > { %4083 = vmatpush1.bf16.msra.mxu1 %v5798_v61  ;;  %4043 = vmatprep.subr.bf16.mxu0 %v5803_v16  ;;  %v5863_v16 = vld [vmem:[%s6132_s24 + $0xd0c] ss:$16 sps:$4 sm:$0xff]  }
 0x1ec   : > { %4084 = vmatprep.subr.bf16.mxu1 %v5806_v17  ;;  %v5866_v17 = vld [vmem:[%s6132_s24 + $0xf0c] ss:$16 sps:$4 sm:$0xff]  }
 0x1ee   : > { %4044 = vmatpush1.bf16.msra.mxu0 %v5801_v62 }
 0x1ef   : > { %4085 = vmatpush1.bf16.msra.mxu1 %v5804_v63  ;;  %4045 = vmatprep.subr.bf16.mxu0 %v5809_v40 }
 0x1f0   : > { %4086 = vmatprep.subr.bf16.mxu1 %v5812_v24  ;;  %v5861_v24 = vld [vmem:[%s6132_s24 + $0xd08] ss:$16 sps:$4 sm:$0xff]  }
 0x1f2   : > { %4046 = vmatpush1.bf16.msra.mxu0 %v5807_v25  ;;  %v5864_v25 = vld [vmem:[%s6132_s24 + $0xf08] ss:$16 sps:$4 sm:$0xff]  }
 0x1f3   : > { %4087 = vmatpush1.bf16.msra.mxu1 %v5810_v0  ;;  %4097 = vmatprep.subr.bf16.mxu0 %v5815_v1  ;;  %v5869_v1 = vld [vmem:[%s6132_s24 + $0xd2c] ss:$16 sps:$4 sm:$0xff]  }
 0x1f4   : > { %4138 = vmatprep.subr.bf16.mxu1 %v5818_v2  ;;  %v5872_v2 = vld [vmem:[%s6132_s24 + $0xf2c] ss:$16 sps:$4 sm:$0xff]  }
 0x1f5   : > { %4048 = vmatmul.mubr.bf16.vlgmr.msra.gmra.mrb[24].mxu0 %v6404_v38  ;;  %v5825_v38 = vld [vmem:[%s6132_s24 + $0xc48] ss:$16 sps:$4 sm:$0xff]  }
 0x1f6   : > { %4089 = vmatmul.mubr.bf16.vlgmr.msra.gmra.mrb[24].mxu1 %v6408_v39  ;;  %4098 = vmatpush1.bf16.msra.mxu0 %v5813_v28  ;;  %v5828_v39 = vld [vmem:[%s6132_s24 + $0xe48] ss:$16 sps:$4 sm:$0xff]  }
 0x1f7   : > { %4139 = vmatpush1.bf16.msra.mxu1 %v5816_v31  ;;  %4099 = vmatprep.subr.bf16.mxu0 %v5821_v4 }
 0x1f8   : > { %4140 = vmatprep.subr.bf16.mxu1 %v5824_v5  ;;  %4129 = vmatprep.mubr.bf16.mxu0 %v6424_v42  ;;  %v5831_v42 = vld [vmem:[%s6132_s24 + $0xc68] ss:$16 sps:$4 sm:$0xff]  }
 0x1f9   : > { %4170 = vmatprep.mubr.bf16.mxu1 %v6428_v43  ;;  %v5834_v43 = vld [vmem:[%s6132_s24 + $0xe68] ss:$16 sps:$4 sm:$0xff]  }
 0x1fa   : > { %4100 = vmatpush1.bf16.msra.mxu0 %v5819_v47  ;;  %v5867_v5 = vld [vmem:[%s6132_s24 + $0xd28] ss:$16 sps:$4 sm:$0xff]  }
 0x1fb   : > { %4141 = vmatpush1.bf16.msra.mxu1 %v5822_v8  ;;  %4101 = vmatprep.subr.bf16.mxu0 %v5827_v51  ;;  %v5870_v47 = vld [vmem:[%s6132_s24 + $0xf28] ss:$16 sps:$4 sm:$0xff]   ;;  %v5875_v51 = vld [vmem:[%s6132_s24 + $0xd4c] ss:$16 sps:$4 sm:$0xff]  }
 0x1fc   : > { %4142 = vmatprep.subr.bf16.mxu1 %v5830_v9  ;;  %v5878_v9 = vld [vmem:[%s6132_s24 + $0xf4c] ss:$16 sps:$4 sm:$0xff]  }
 0x1fe   : > { %4102 = vmatpush1.bf16.msra.mxu0 %v5825_v38 }
 0x1ff   : > { %4143 = vmatpush1.bf16.msra.mxu1 %v5828_v39  ;;  %4103 = vmatprep.subr.bf16.mxu0 %v5833_v10 }
 0x200   : > { %4144 = vmatprep.subr.bf16.mxu1 %v5836_v11  ;;  %v5873_v11 = vld [vmem:[%s6132_s24 + $0xd48] ss:$16 sps:$4 sm:$0xff]  }
 0x202   : > { %4104 = vmatpush1.bf16.msra.mxu0 %v5831_v42 }
 0x203   : > { %4145 = vmatpush1.bf16.msra.mxu1 %v5834_v43  ;;  %4105 = vmatprep.subr.bf16.mxu0 %v5839_v13  ;;  %v5881_v43 = vld [vmem:[%s6132_s24 + $0xd6c] ss:$16 sps:$4 sm:$0xff]  }
 0x204   : > { %4146 = vmatprep.subr.bf16.mxu1 %v5842_v14  ;;  %v5884_v13 = vld [vmem:[%s6132_s24 + $0xf6c] ss:$16 sps:$4 sm:$0xff]  }
 0x206   : > { %4106 = vmatpush1.bf16.msra.mxu0 %v5837_v18 }
 0x207   : > { %4147 = vmatpush1.bf16.msra.mxu1 %v5840_v19  ;;  %4107 = vmatprep.subr.bf16.mxu0 %v5845_v21  ;;  %v5879_v21 = vld [vmem:[%s6132_s24 + $0xd68] ss:$16 sps:$4 sm:$0xff]  }
 0x208   : > { %4148 = vmatprep.subr.bf16.mxu1 %v5848_v26  ;;  %v3803_v7 = vpop.f32.mrb[12].mxu0  ;;  %v5882_v26 = vld [vmem:[%s6132_s24 + $0xf68] ss:$16 sps:$4 sm:$0xff]  }
 0x209   : > { %v3844_v34 = vpop.f32.mrb[12].mxu1  ;;  %v3804_v35 = vadd.f32 %v3803_v7, %v6680_v20  ;;  %v3805_v36 = vpop.f32.mrb[13].mxu0  ;;  %v5852_v20 = vld [vmem:[%s6132_s24 + $0xec8] ss:$16 sps:$4 sm:$0xff]  }
 0x20a   : > { %v3846_v37 = vpop.f32.mrb[13].mxu1  ;;  %v3806_v23 = vadd.f32 %v3805_v36, %v6684_v27  ;;  %v3807_v45 = vpop.f32.mrb[14].mxu0  ;;  %4108 = vmatpush1.bf16.msra.mxu0 %v5843_v3  ;;  %v5860_v27 = vld [vmem:[%s6132_s24 + $0xeec] ss:$16 sps:$4 sm:$0xff]  }
 0x20b   : > { %v3848_v46 = vpop.f32.mrb[14].mxu1  ;;  %4149 = vmatpush1.bf16.msra.mxu1 %v5846_v32  ;;  %v3845_v49 = vadd.f32 %v3844_v34, %v3804_v35  ;;  %v3808_v50 = vpop.f32.mrb[15].mxu0  ;;  %4109 = vmatprep.subr.bf16.mxu0 %v5851_v33  ;;  %v5887_v32 = vld [vmem:[%s6132_s24 + $0xd8c] ss:$16 sps:$4 sm:$0xff]   ;;  %v5885_v35 = vld [vmem:[%s6132_s24 + $0xd88] ss:$16 sps:$4 sm:$0xff]  }
 0x20c   : > { %v3849_v52 = vpop.f32.mrb[15].mxu1  ;;  %4150 = vmatprep.subr.bf16.mxu1 %v5854_v6  ;;  %v3847_v54 = vadd.f32 %v3846_v37, %v3806_v23  ;;  %v5890_v33 = vld [vmem:[%s6132_s24 + $0xf8c] ss:$16 sps:$4 sm:$0xff]  }
 0x20d   : > { %v4216_v55 = vadd.f32 %v4199_v22, %v3845_v49  ;;  %v5888_v22 = vld [vmem:[%s6132_s24 + $0xf88] ss:$16 sps:$4 sm:$0xff]   ;;  %v5893_v37 = vld [vmem:[%s6132_s24 + $0xdac] ss:$16 sps:$4 sm:$0xff]  }
 0x20e   : > { %v4217_v56 = vadd.f32 %v4203_v44, %v3847_v54  ;;  %4110 = vmatpush1.bf16.msra.mxu0 %v5849_v48  ;;  %v5896_v23 = vld [vmem:[%s6132_s24 + $0xfac] ss:$16 sps:$4 sm:$0xff]   ;;  %v5891_v48 = vld [vmem:[%s6132_s24 + $0xda8] ss:$16 sps:$4 sm:$0xff]  }
 0x20f   : > { %4151 = vmatpush1.bf16.msra.mxu1 %v5852_v20  ;;  %v4220_v61 = vrot.slane %v4216_v55, 4  ;;  %4111 = vmatprep.subr.bf16.mxu0 %v5857_v53  ;;  %v5894_v20 = vld [vmem:[%s6132_s24 + $0xfa8] ss:$16 sps:$4 sm:$0xff]   ;;  %v5899_v50 = vld [vmem:[%s6132_s24 + $0xdcc] ss:$16 sps:$4 sm:$0xff]  }
 0x210   : > { %4152 = vmatprep.subr.bf16.mxu1 %v5860_v27  ;;  %v4226_v62 = vrot.slane %v4217_v56, 4  ;;  %v5902_v52 = vld [vmem:[%s6132_s24 + $0xfcc] ss:$16 sps:$4 sm:$0xff]  }
 0x211   : > { %v4221_v63 = vadd.f32 %v4220_v61, %v4216_v55  ;;  %v5908_v61 = vld [vmem:[%s6132_s24 + $0xfec] ss:$16 sps:$4 sm:$0xff]  }
 0x212   : > { %v4227_v40 = vadd.f32 %v4226_v62, %v4217_v56  ;;  %4112 = vmatpush1.bf16.msra.mxu0 %v5855_v57 }
 0x213   : > { %4153 = vmatpush1.bf16.msra.mxu1 %v5858_v60  ;;  %v4222_v0 = vrot.slane %v4221_v63, 2  ;;  %4113 = vmatprep.subr.bf16.mxu0 %v5863_v16  ;;  %v5905_v60 = vld [vmem:[%s6132_s24 + $0xdec] ss:$16 sps:$4 sm:$0xff]  }
 0x214   : > { %4154 = vmatprep.subr.bf16.mxu1 %v5866_v17  ;;  %v4228_v28 = vrot.slane %v4227_v40, 2 }
 0x215   : > { %v4223_v31 = vadd.f32 %v4222_v0, %v4221_v63  ;;  %v5903_v63 = vld [vmem:[%s6132_s24 + $0xde8] ss:$16 sps:$4 sm:$0xff]   ;;  %v6829_v0 = vld [vmem:[%s358_s15] sm:$0xf] }
 0x216   : > { %v4229_v4 = vadd.f32 %v4228_v28, %v4227_v40  ;;  %4114 = vmatpush1.bf16.msra.mxu0 %v5861_v24  ;;  %v5906_v40 = vld [vmem:[%s6132_s24 + $0xfe8] ss:$16 sps:$4 sm:$0xff]  }
 0x217   : > { %4155 = vmatpush1.bf16.msra.mxu1 %v5864_v25  ;;  %v4224_v8 = vrot.slane %v4223_v31, 1  ;;  %4115 = vmatprep.subr.bf16.mxu0 %v5869_v1 }
 0x218   : > { %4156 = vmatprep.subr.bf16.mxu1 %v5872_v2  ;;  %v4230_v38 = vrot.slane %v4229_v4, 1  ;;  %v4302_v2 = vrot.slane %v6829_v0, %v6756_v41 }
 0x219   : > { %v4225_v39 = vadd.f32 %v4224_v8, %v4223_v31  ;;  %v4306_v31 = vrot.slane %v6829_v0, %v6762_v30 }
 0x21a   : > { %v4231_v10 = vadd.f32 %v4230_v38, %v4229_v4  ;;  %4116 = vmatpush1.bf16.msra.mxu0 %v5867_v5 }
 0x21b   : > { %4157 = vmatpush1.bf16.msra.mxu1 %v5870_v47  ;;  %v4245_v42 = vmul.f32 0.125, %v4225_v39  ;;  %4117 = vmatprep.subr.bf16.mxu0 %v5875_v51 }
 0x21c   : > { %4158 = vmatprep.subr.bf16.mxu1 %v5878_v9  ;;  %v4246_v14 = vmul.f32 0.125, %v4231_v10 }
 0x21d   : > { %v6793_v18 = vsub.f32 %v4216_v55, %v4245_v42  ;;  %v5897_v55 = vld [vmem:[%s6132_s24 + $0xdc8] ss:$16 sps:$4 sm:$0xff]  }
 0x21e   : > { %v6795_v19 = vsub.f32 %v4217_v56, %v4246_v14  ;;  %4118 = vmatpush1.bf16.msra.mxu0 %v5873_v11  ;;  %v5900_v56 = vld [vmem:[%s6132_s24 + $0xfc8] ss:$16 sps:$4 sm:$0xff]   ;;  %s363_s24 = scalar_lea.vmem %s6891_s4, %s6905_s18 }
 0x21f   : > { %4159 = vmatpush1.bf16.msra.mxu1 %v5876_v12  ;;  %v4253_v3 = vmul.f32 %v6793_v18, %v6793_v18  ;;  %4119 = vmatprep.subr.bf16.mxu0 %v5881_v43  ;;  %v6831_v1 = vld [vmem:[%s363_s24] sm:$0xf] }
 0x220   : > { %4160 = vmatprep.subr.bf16.mxu1 %v5884_v13  ;;  %v4254_v6 = vmul.f32 %v6795_v19, %v6795_v19  ;;  %v4332_v47 = vrot.slane %v6831_v1, %v6762_v30 }
 0x221   : > { %v4257_v7 = vrot.slane %v4253_v3, 4 }
 0x222   : > { %v4263_v34 = vrot.slane %v4254_v6, 4  ;;  %4120 = vmatpush1.bf16.msra.mxu0 %v5879_v21 }
 0x223   : > { %4161 = vmatpush1.bf16.msra.mxu1 %v5882_v26  ;;  %v4258_v36 = vadd.f32 %v4257_v7, %v4253_v3  ;;  %4121 = vmatprep.subr.bf16.mxu0 %v5887_v32 }
 0x224   : > { %4162 = vmatprep.subr.bf16.mxu1 %v5890_v33  ;;  %v4264_v44 = vadd.f32 %v4263_v34, %v4254_v6 }
 0x225   : > { %v4259_v45 = vrot.slane %v4258_v36, 2 }
 0x226   : > { %v4265_v46 = vrot.slane %v4264_v44, 2  ;;  %4122 = vmatpush1.bf16.msra.mxu0 %v5885_v35 }
 0x227   : > { %4163 = vmatpush1.bf16.msra.mxu1 %v5888_v22  ;;  %v4260_v49 = vadd.f32 %v4259_v45, %v4258_v36  ;;  %4123 = vmatprep.subr.bf16.mxu0 %v5893_v37 }
 0x228   : > { %4164 = vmatprep.subr.bf16.mxu1 %v5896_v23  ;;  %v4266_v53 = vadd.f32 %v4265_v46, %v4264_v44 }
 0x229   : > { %v4261_v27 = vrot.slane %v4260_v49, 1 }
 0x22a   : > { %v4267_v54 = vrot.slane %v4266_v53, 1  ;;  %4124 = vmatpush1.bf16.msra.mxu0 %v5891_v48 }
 0x22b   : > { %4165 = vmatpush1.bf16.msra.mxu1 %v5894_v20  ;;  %v4262_v57 = vadd.f32 %v4261_v27, %v4260_v49  ;;  %4125 = vmatprep.subr.bf16.mxu0 %v5899_v50 }
 0x22c   : > { %4166 = vmatprep.subr.bf16.mxu1 %v5902_v52  ;;  %v4268_v16 = vadd.f32 %v4267_v54, %v4266_v53 }
 0x22d   : > { %v4281_v17 = vmul.f32 0.125, %v4262_v57  ;;  %v6854_v57 = vsub.s32 3, %v6745_v15 }
 0x22e   : > { %v4282_v62 = vmul.f32 0.125, %v4268_v16  ;;  %4126 = vmatpush1.bf16.msra.mxu0 %v5897_v55 }
 0x22f   : > { %4167 = vmatpush1.bf16.msra.mxu1 %v5900_v56  ;;  %v4285_v24 = vadd.f32 1e-05, %v4281_v17  ;;  %4127 = vmatprep.subr.bf16.mxu0 %v5905_v60  ;;  %v6851_v56 = vsub.s32 2, %v6745_v15 }
 0x230   : > { %4168 = vmatprep.subr.bf16.mxu1 %v5908_v61  ;;  %v4286_v25 = vadd.f32 1e-05, %v4282_v62 }
 0x231   : > { %5909 = vrsqrt.f32 %v4285_v24  ;;  %v4207_v17 = vrot.slane %v6759_v29, %v6851_v56  ;;  %v4211_v24 = vrot.slane %v6759_v29, %v6854_v57 }
 0x232   : > { %5911 = vrsqrt.f32 %v4286_v25  ;;  %4128 = vmatpush1.bf16.msra.mxu0 %v5903_v63 }
 0x233   : > { %4169 = vmatpush1.bf16.msra.mxu1 %v5906_v40 }
 0x235   : > { %4130 = vmatmul.mubr.bf16.vlgmr.msra.gmra.mrb[28].mxu0 %v6496_v58 }
 0x236   : > { %4171 = vmatmul.mubr.bf16.vlgmr.msra.gmra.mrb[28].mxu1 %v6500_v59  ;;  %v4328_v59 = vrot.slane %v6831_v1, %v6756_v41 }
 0x23b   : > { %v5910_v28 = vpop.eup %5909 }
 0x23c   : > { %v5912_v4 = vpop.eup %5911  ;;  %v4293_v58 = vmul.f32 %v5910_v28, %v6793_v18 }
 0x23d   : > { %v4294_v5 = vmul.f32 %v5912_v4, %v6795_v19 }
 0x23e   : > { %v4319_v8 = vmul.f32 %v4302_v2, %v4293_v58 }
 0x23f   : > { %v4320_v51 = vmul.f32 %v4306_v31, %v4294_v5 }
 0x240   : > { %v4345_v9 = vadd.f32 %v4328_v59, %v4319_v8 }
 0x241   : > { %v4346_v38 = vadd.f32 %v4332_v47, %v4320_v51 }
 0x242   : > { %v4349_v39 = vmax.f32 %v4345_v9, 0.0 }
 0x243   : > { %v4350_v10 = vmax.f32 %v4346_v38, 0.0 }
 0x245   : > { %v5065_v11 = vpack.c.bf16 %v4350_v10, %v4349_v39 }
 0x247   : > { %4369 = vst [vmem:[%s6847_s8] sm:$0xff] %v5065_v11 }
 0x248   : > { %v3885_v41 = vpop.f32.mrb[16].mxu0 }
 0x249   : > { %v3926_v12 = vpop.f32.mrb[16].mxu1  ;;  %v3887_v43 = vpop.f32.mrb[17].mxu0 }
 0x24a   : > { %v3927_v42 = vadd.f32 %v3926_v12, %v3885_v41  ;;  %v3928_v30 = vpop.f32.mrb[17].mxu1  ;;  %v3889_v14 = vpop.f32.mrb[18].mxu0 }
 0x24b   : > { %v3929_v13 = vadd.f32 %v3928_v30, %v3887_v43  ;;  %v3930_v18 = vpop.f32.mrb[18].mxu1  ;;  %v3890_v19 = vpop.f32.mrb[19].mxu0 }
 0x24c   : > { %v3931_v21 = vpop.f32.mrb[19].mxu1 }
 0x288   : > { %v3967_v26 = vpop.f32.mrb[20].mxu0 }
 0x289   : > { %v4008_v3 = vpop.f32.mrb[20].mxu1  ;;  %v3968_v32 = vadd.f32 %v3967_v26, %v3927_v42  ;;  %v3969_v33 = vpop.f32.mrb[21].mxu0 }
 0x28a   : > { %v4010_v6 = vpop.f32.mrb[21].mxu1  ;;  %v3970_v7 = vadd.f32 %v3969_v33, %v3929_v13  ;;  %v3971_v34 = vpop.f32.mrb[22].mxu0 }
 0x28b   : > { %v4012_v35 = vpop.f32.mrb[22].mxu1  ;;  %v4009_v22 = vadd.f32 %v4008_v3, %v3968_v32  ;;  %v3972_v36 = vpop.f32.mrb[23].mxu0 }
 0x28c   : > { %v4013_v37 = vpop.f32.mrb[23].mxu1  ;;  %v4011_v23 = vadd.f32 %v4010_v6, %v3970_v7 }
 0x2c8   : > { %v4049_v44 = vpop.f32.mrb[24].mxu0 }
 0x2c9   : > { %v4090_v45 = vpop.f32.mrb[24].mxu1  ;;  %v4050_v46 = vadd.f32 %v4049_v44, %v4009_v22  ;;  %v4051_v48 = vpop.f32.mrb[25].mxu0 }
 0x2ca   : > { %v4092_v20 = vpop.f32.mrb[25].mxu1  ;;  %v4052_v49 = vadd.f32 %v4051_v48, %v4011_v23  ;;  %v4053_v50 = vpop.f32.mrb[26].mxu0 }
 0x2cb   : > { %v4094_v52 = vpop.f32.mrb[26].mxu1  ;;  %v4091_v53 = vadd.f32 %v4090_v45, %v4050_v46  ;;  %v4054_v27 = vpop.f32.mrb[27].mxu0  ;;  %v4310_v46 = vrot.slane %v6829_v0, %v6851_v56 }
 0x2cc   : > { %v4095_v54 = vpop.f32.mrb[27].mxu1  ;;  %v4093_v55 = vadd.f32 %v4092_v20, %v4052_v49  ;;  %v4314_v20 = vrot.slane %v6829_v0, %v6854_v57  ;;  %v4336_v52 = vrot.slane %v6831_v1, %v6851_v56  ;;  %v4340_v27 = vrot.slane %v6831_v1, %v6854_v57 }
 0x308   : > { %v4131_v60 = vpop.f32.mrb[28].mxu0 }
 0x309   : > { %v4172_v61 = vpop.f32.mrb[28].mxu1  ;;  %v4132_v16 = vadd.f32 %v4131_v60, %v4091_v53  ;;  %v4133_v62 = vpop.f32.mrb[29].mxu0 }
 0x30a   : > { %v4174_v63 = vpop.f32.mrb[29].mxu1  ;;  %v4134_v40 = vadd.f32 %v4133_v62, %v4093_v55  ;;  %v4135_v25 = vpop.f32.mrb[30].mxu0 }
 0x30b   : > { %v4176_v2 = vpop.f32.mrb[30].mxu1  ;;  %v4173_v28 = vadd.f32 %v4172_v61, %v4132_v16  ;;  %v4136_v31 = vpop.f32.mrb[31].mxu0 }
 0x30c   : > { %v4177_v4 = vpop.f32.mrb[31].mxu1  ;;  %v4175_v58 = vadd.f32 %v4174_v63, %v4134_v40 }
 0x30d   : > { %v4218_v15 = vadd.f32 %v4207_v17, %v4173_v28 }
 0x30e   : > { %v4219_v59 = vadd.f32 %v4211_v24, %v4175_v58 }
 0x30f   : > { %v4232_v5 = vrot.slane %v4218_v15, 4 }
 0x310   : > { %v4238_v47 = vrot.slane %v4219_v59, 4 }
 0x311   : > { %v4233_v8 = vadd.f32 %v4232_v5, %v4218_v15 }
 0x312   : > { %v4239_v51 = vadd.f32 %v4238_v47, %v4219_v59 }
 0x313   : > { %v4234_v9 = vrot.slane %v4233_v8, 2 }
 0x314   : > { %v4240_v38 = vrot.slane %v4239_v51, 2 }
 0x315   : > { %v4235_v39 = vadd.f32 %v4234_v9, %v4233_v8 }
 0x316   : > { %v4241_v10 = vadd.f32 %v4240_v38, %v4239_v51 }
 0x317   : > { %v4236_v11 = vrot.slane %v4235_v39, 1 }
 0x318   : > { %v4242_v41 = vrot.slane %v4241_v10, 1 }
 0x319   : > { %v4237_v12 = vadd.f32 %v4236_v11, %v4235_v39 }
 0x31a   : > { %v4243_v29 = vadd.f32 %v4242_v41, %v4241_v10 }
 0x31b   : > { %v4247_v42 = vmul.f32 0.125, %v4237_v12 }
 0x31c   : > { %v4248_v43 = vmul.f32 0.125, %v4243_v29 }
 0x31d   : > { %v4251_v30 = vsub.f32 %v4218_v15, %v4247_v42 }
 0x31e   : > { %v4252_v13 = vsub.f32 %v4219_v59, %v4248_v43 }
 0x31f   : > { %v4255_v14 = vmul.f32 %v4251_v30, %v4251_v30 }
 0x320   : > { %v4256_v18 = vmul.f32 %v4252_v13, %v4252_v13 }
 0x321   : > { %v4269_v19 = vrot.slane %v4255_v14, 4 }
 0x322   : > { %v4275_v21 = vrot.slane %v4256_v18, 4 }
 0x323   : > { %v4270_v26 = vadd.f32 %v4269_v19, %v4255_v14 }
 0x324   : > { %v4276_v3 = vadd.f32 %v4275_v21, %v4256_v18 }
 0x325   : > { %v4271_v32 = vrot.slane %v4270_v26, 2 }
 0x326   : > { %v4277_v33 = vrot.slane %v4276_v3, 2 }
 0x327   : > { %v4272_v6 = vadd.f32 %v4271_v32, %v4270_v26 }
 0x328   : > { %v4278_v7 = vadd.f32 %v4277_v33, %v4276_v3 }
 0x329   : > { %v4273_v34 = vrot.slane %v4272_v6, 1 }
 0x32a   : > { %v4279_v35 = vrot.slane %v4278_v7, 1 }
 0x32b   : > { %v4274_v22 = vadd.f32 %v4273_v34, %v4272_v6 }
 0x32c   : > { %v4280_v36 = vadd.f32 %v4279_v35, %v4278_v7 }
 0x32d   : > { %v4283_v37 = vmul.f32 0.125, %v4274_v22 }
 0x32e   : > { %v4284_v23 = vmul.f32 0.125, %v4280_v36 }
 0x32f   : > { %v4287_v44 = vadd.f32 1e-05, %v4283_v37 }
 0x330   : > { %v4288_v45 = vadd.f32 1e-05, %v4284_v23 }
 0x331   : > { %5913 = vrsqrt.f32 %v4287_v44 }
 0x332   : > { %5915 = vrsqrt.f32 %v4288_v45 }
 0x33b   : > { %v5914_v48 = vpop.eup %5913 }
 0x33c   : > { %v5916_v49 = vpop.eup %5915  ;;  %v4295_v50 = vmul.f32 %v5914_v48, %v4251_v30 }
 0x33d   : > { %v4296_v53 = vmul.f32 %v5916_v49, %v4252_v13 }
 0x33e   : > { %v4321_v54 = vmul.f32 %v4310_v46, %v4295_v50 }
 0x33f   : > { %v4322_v55 = vmul.f32 %v4314_v20, %v4296_v53 }
 0x340   : > { %v4347_v60 = vadd.f32 %v4336_v52, %v4321_v54 }
 0x341   : > { %v4348_v61 = vadd.f32 %v4340_v27, %v4322_v55 }
 0x342   : > { %v4351_v16 = vmax.f32 %v4347_v60, 0.0 }
 0x343   : > { %v4352_v17 = vmax.f32 %v4348_v61, 0.0 }
 0x345   : > { %v5066_v62 = vpack.c.bf16 %v4352_v17, %v4351_v16 }
 0x347   : > { %4370 = vst [vmem:[%s6847_s8 + $0x8] sm:$0xff] %v5066_v62 }
 0x348 PF: > { %s18_s23 = sadd.s32 1, %s5997_s23   ;;  %s6897_s18 = smov %s5981_s19 }
 0x349   : > { %p15_p9 = scmp.ge.s32.totalorder %s18_s23, 10   ;;  %s6898_s19 = smov %s5985_s20 }
 0x34a   : > { %s6899_s20 = smov %s6082_s30  ;;  %s6900_s21 = smov %s5993_s22 }
 0x34b   : > { %s6901_s22 = smov %s6903_s25  ;;  %17 = sbr.rel (!%p15_p9) target bundleno = 4 (0x4), region = 100 }
 0x352   :  { %4401 = vsyncpa [#allocation4], 1 }
 0x353   :  { %4403 = vsyncpa [#allocation4 + $0x1], 1 }

// kernel: apnet_forward.12
= control target key start
LH: loop header
LB: loop body
LE: loop exit
PB: predicated region body
PF: predicated region fallthrough
CT: control target
= control target key end

     0   :  { %s4416_s0 = inlined_call_operand.vmem [shape: bf16[8,4096], index: 0, kind: input, shape index: {}]   ;;  %s4417_s1 = inlined_call_operand.vmem [shape: bf16[4096,256], index: 1, kind: input, shape index: {}]   ;;  %s4418_s2 = inlined_call_operand.vmem [shape: f32[1,256], index: 2, kind: input, shape index: {}]   ;;  %s4419_s3 = inlined_call_operand.vmem [shape: f32[1,256], index: 3, kind: input, shape index: {}]   ;;  %s4420_s4 = inlined_call_operand.vmem [shape: f32[1,256], index: 4, kind: input, shape index: {}]   ;;  %s4421_s5 = inlined_call_operand.vmem [shape: bf16[8,256], index: 5, kind: output, shape index: {}]  }
   0x1   :  { %4423 = sst [smem:[#allocation5_spill]] %s4417_s1 }
   0x2   :  { %s3632_s18 = smov 0   ;;  %s3634_s19 = smov 0  }
   0x3   :  { %s3636_s20 = smov 0   ;;  %s3638_s21 = smov 0  }
   0x4   :  { %s3640_s22 = smov 0   ;;  %s3642_s23 = smov 0  }
   0x5   :  { %s3644_s24 = smov 0  }
   0x6 LB: > { %s27_s25 = sadd.s32 1, %s3591_s22  ;;  %s30_s26 = sadd.s32 1, %s3595_s23  ;;  %s3599_s24 = sphi %s3644_s24, %s15_s24   ;;  %s3595_s23 = sphi %s3642_s23, %s4432_s23   ;;  %s3591_s22 = sphi %s3640_s22, %s4431_s22   ;;  %s3587_s21 = sphi %s3638_s21, %s4430_s21   ;;  %s3583_s20 = sphi %s3636_s20, %s4429_s20   ;;  %s3579_s19 = sphi %s3634_s19, %s4428_s19   ;;  %s3575_s18 = sphi %s3632_s18, %s4427_s18  }
   0x7   : > { %p28_p0 = scmp.ge.s32.totalorder %s27_s25, 2  ;;  %p78_p1 = scmp.ne.s32.totalorder %s3579_s19, %s3575_s18 }
   0x8   : > { %p79_p2 = scmp.eq.s32.totalorder %s3599_s24, 0  ;;  %s71_s30 = sadd.s32 1, %s3579_s19 }
   0x9   : > { %s4434_s25 = smov (%p28_p0, %s27_s25), 0  ;;  %s4436_s26 = smov (!%p28_p0, %s30_s26), %s3595_s23 }
   0xa   : > { %p80_p3 = por %p79_p2, %p78_p1  ;;  %p32_p4 = scmp.ge.s32.totalorder %s4436_s26, 2 }
   0xb   : > { %s66_s27 = ssub.s32 %s3591_s22, %s4434_s25  ;;  %p3004_p6 = scmp.ge.s32.totalorder %s3599_s24, 4 }
   0xc   : > { %s4438_s26 = smov (%p32_p4, %s4436_s26), 0 }
   0xd   : > { %4424 = sst [smem:[#allocation4_spill]] %s4438_s26  ;;  %s67_s28 = ssub.s32 %s3595_s23, %s4438_s26 }
   0xe   : > { %s68_s29 = sor.u32 %s67_s28, %s66_s27  ;;  %210 = sbr.rel (%p3004_p6) target bundleno = 201 (0xc9), region = 16 }
   0xf   : > { %p69_p5 = scmp.eq.s32.totalorder %s68_s29, 0 }
  0x11   : > { %s3683_s6 = scalar_select %p69_p5, %s3579_s19, %s71_s30  }
  0x15   : > { %226 = sbr.rel (!%p80_p3) target bundleno = 201 (0xc9), region = 24  ;;  %s228_s7 = sand.u32 (%p80_p3), 1, %s3579_s19  }
  0x16   : > { %s3165_s8 = sshll.u32 (%p80_p3), %s3591_s22, 9  ;;  %s3005_s9 = sshll.u32 (%p80_p3), %s228_s7, 10 }
  0x17   : > { %s233_s10 = sadd.s32 (%p80_p3), %s3595_s23, %s3165_s8  ;;  %s4425_s1 = sld [smem:[#allocation5_spill]] (%p80_p3) }
  0x18   : > { %s3008_s11 = sshll.u32 (%p80_p3), %s233_s10, 2  ;;  %s3697_s15 = scalar_lea.vmem (%p80_p3), [#allocation3], %s3005_s9 }
  0x1d   : > { %s3692_s14 = scalar_lea.vmem %s4425_s1, %s3008_s11 }
  0x1e   : > { %v251_v0 = vld [vmem:[%s3692_s14] sm:$0xf]  ;;  %v253_v1 = vld [vmem:[%s3692_s14 + $0x8] sm:$0xf]  ;;  %v255_v2 = vld [vmem:[%s3692_s14 + $0x10] sm:$0xf] }
  0x1f   : > { %252 = vst [vmem:[%s3697_s15] sm:$0xf] %v251_v0  ;;  %254 = vst [vmem:[%s3697_s15 + $0x4] sm:$0xf] %v253_v1  ;;  %v257_v3 = vld [vmem:[%s3692_s14 + $0x18] sm:$0xf] }
  0x20   : > { %256 = vst [vmem:[%s3697_s15 + $0x8] sm:$0xf] %v255_v2  ;;  %v259_v4 = vld [vmem:[%s3692_s14 + $0x20] sm:$0xf]  ;;  %v261_v5 = vld [vmem:[%s3692_s14 + $0x28] sm:$0xf] }
  0x21   : > { %258 = vst [vmem:[%s3697_s15 + $0xc] sm:$0xf] %v257_v3  ;;  %260 = vst [vmem:[%s3697_s15 + $0x10] sm:$0xf] %v259_v4  ;;  %v263_v6 = vld [vmem:[%s3692_s14 + $0x30] sm:$0xf] }
  0x22   : > { %262 = vst [vmem:[%s3697_s15 + $0x14] sm:$0xf] %v261_v5  ;;  %v265_v7 = vld [vmem:[%s3692_s14 + $0x38] sm:$0xf]  ;;  %v267_v8 = vld [vmem:[%s3692_s14 + $0x40] sm:$0xf] }
  0x23   : > { %264 = vst [vmem:[%s3697_s15 + $0x18] sm:$0xf] %v263_v6  ;;  %266 = vst [vmem:[%s3697_s15 + $0x1c] sm:$0xf] %v265_v7  ;;  %v269_v9 = vld [vmem:[%s3692_s14 + $0x48] sm:$0xf] }
  0x24   : > { %268 = vst [vmem:[%s3697_s15 + $0x20] sm:$0xf] %v267_v8  ;;  %v271_v10 = vld [vmem:[%s3692_s14 + $0x50] sm:$0xf]  ;;  %v273_v11 = vld [vmem:[%s3692_s14 + $0x58] sm:$0xf] }
  0x25   : > { %270 = vst [vmem:[%s3697_s15 + $0x24] sm:$0xf] %v269_v9  ;;  %272 = vst [vmem:[%s3697_s15 + $0x28] sm:$0xf] %v271_v10  ;;  %v275_v12 = vld [vmem:[%s3692_s14 + $0x60] sm:$0xf] }
  0x26   : > { %274 = vst [vmem:[%s3697_s15 + $0x2c] sm:$0xf] %v273_v11  ;;  %v277_v13 = vld [vmem:[%s3692_s14 + $0x68] sm:$0xf]  ;;  %v279_v14 = vld [vmem:[%s3692_s14 + $0x70] sm:$0xf] }
  0x27   : > { %276 = vst [vmem:[%s3697_s15 + $0x30] sm:$0xf] %v275_v12  ;;  %278 = vst [vmem:[%s3697_s15 + $0x34] sm:$0xf] %v277_v13  ;;  %v281_v15 = vld [vmem:[%s3692_s14 + $0x78] sm:$0xf] }
  0x28   : > { %280 = vst [vmem:[%s3697_s15 + $0x38] sm:$0xf] %v279_v14  ;;  %v283_v16 = vld [vmem:[%s3692_s14 + $0x80] sm:$0xf]  ;;  %v285_v17 = vld [vmem:[%s3692_s14 + $0x88] sm:$0xf] }
  0x29   : > { %282 = vst [vmem:[%s3697_s15 + $0x3c] sm:$0xf] %v281_v15  ;;  %284 = vst [vmem:[%s3697_s15 + $0x40] sm:$0xf] %v283_v16  ;;  %v287_v18 = vld [vmem:[%s3692_s14 + $0x90] sm:$0xf] }
  0x2a   : > { %286 = vst [vmem:[%s3697_s15 + $0x44] sm:$0xf] %v285_v17  ;;  %v289_v19 = vld [vmem:[%s3692_s14 + $0x98] sm:$0xf]  ;;  %v291_v20 = vld [vmem:[%s3692_s14 + $0xa0] sm:$0xf] }
  0x2b   : > { %288 = vst [vmem:[%s3697_s15 + $0x48] sm:$0xf] %v287_v18  ;;  %290 = vst [vmem:[%s3697_s15 + $0x4c] sm:$0xf] %v289_v19  ;;  %v293_v21 = vld [vmem:[%s3692_s14 + $0xa8] sm:$0xf] }
  0x2c   : > { %292 = vst [vmem:[%s3697_s15 + $0x50] sm:$0xf] %v291_v20  ;;  %v295_v22 = vld [vmem:[%s3692_s14 + $0xb0] sm:$0xf]  ;;  %v297_v23 = vld [vmem:[%s3692_s14 + $0xb8] sm:$0xf] }
  0x2d   : > { %294 = vst [vmem:[%s3697_s15 + $0x54] sm:$0xf] %v293_v21  ;;  %296 = vst [vmem:[%s3697_s15 + $0x58] sm:$0xf] %v295_v22  ;;  %v299_v24 = vld [vmem:[%s3692_s14 + $0xc0] sm:$0xf] }
  0x2e   : > { %298 = vst [vmem:[%s3697_s15 + $0x5c] sm:$0xf] %v297_v23  ;;  %v301_v25 = vld [vmem:[%s3692_s14 + $0xc8] sm:$0xf]  ;;  %v303_v26 = vld [vmem:[%s3692_s14 + $0xd0] sm:$0xf] }
  0x2f   : > { %300 = vst [vmem:[%s3697_s15 + $0x60] sm:$0xf] %v299_v24  ;;  %302 = vst [vmem:[%s3697_s15 + $0x64] sm:$0xf] %v301_v25  ;;  %v305_v27 = vld [vmem:[%s3692_s14 + $0xd8] sm:$0xf] }
  0x30   : > { %304 = vst [vmem:[%s3697_s15 + $0x68] sm:$0xf] %v303_v26  ;;  %v307_v28 = vld [vmem:[%s3692_s14 + $0xe0] sm:$0xf]  ;;  %v309_v29 = vld [vmem:[%s3692_s14 + $0xe8] sm:$0xf] }
  0x31   : > { %306 = vst [vmem:[%s3697_s15 + $0x6c] sm:$0xf] %v305_v27  ;;  %308 = vst [vmem:[%s3697_s15 + $0x70] sm:$0xf] %v307_v28  ;;  %v311_v30 = vld [vmem:[%s3692_s14 + $0xf0] sm:$0xf] }
  0x32   : > { %310 = vst [vmem:[%s3697_s15 + $0x74] sm:$0xf] %v309_v29  ;;  %v313_v31 = vld [vmem:[%s3692_s14 + $0xf8] sm:$0xf]  ;;  %v315_v32 = vld [vmem:[%s3692_s14 + $0x100] sm:$0xf] }
  0x33   : > { %312 = vst [vmem:[%s3697_s15 + $0x78] sm:$0xf] %v311_v30  ;;  %314 = vst [vmem:[%s3697_s15 + $0x7c] sm:$0xf] %v313_v31  ;;  %v317_v33 = vld [vmem:[%s3692_s14 + $0x108] sm:$0xf] }
  0x34   : > { %316 = vst [vmem:[%s3697_s15 + $0x80] sm:$0xf] %v315_v32  ;;  %v319_v34 = vld [vmem:[%s3692_s14 + $0x110] sm:$0xf]  ;;  %v321_v35 = vld [vmem:[%s3692_s14 + $0x118] sm:$0xf] }
  0x35   : > { %318 = vst [vmem:[%s3697_s15 + $0x84] sm:$0xf] %v317_v33  ;;  %320 = vst [vmem:[%s3697_s15 + $0x88] sm:$0xf] %v319_v34  ;;  %v323_v36 = vld [vmem:[%s3692_s14 + $0x120] sm:$0xf] }
  0x36   : > { %322 = vst [vmem:[%s3697_s15 + $0x8c] sm:$0xf] %v321_v35  ;;  %v325_v37 = vld [vmem:[%s3692_s14 + $0x128] sm:$0xf]  ;;  %v327_v38 = vld [vmem:[%s3692_s14 + $0x130] sm:$0xf] }
  0x37   : > { %324 = vst [vmem:[%s3697_s15 + $0x90] sm:$0xf] %v323_v36  ;;  %326 = vst [vmem:[%s3697_s15 + $0x94] sm:$0xf] %v325_v37  ;;  %v329_v39 = vld [vmem:[%s3692_s14 + $0x138] sm:$0xf] }
  0x38   : > { %328 = vst [vmem:[%s3697_s15 + $0x98] sm:$0xf] %v327_v38  ;;  %v331_v40 = vld [vmem:[%s3692_s14 + $0x140] sm:$0xf]  ;;  %v333_v41 = vld [vmem:[%s3692_s14 + $0x148] sm:$0xf] }
  0x39   : > { %330 = vst [vmem:[%s3697_s15 + $0x9c] sm:$0xf] %v329_v39  ;;  %332 = vst [vmem:[%s3697_s15 + $0xa0] sm:$0xf] %v331_v40  ;;  %v335_v42 = vld [vmem:[%s3692_s14 + $0x150] sm:$0xf] }
  0x3a   : > { %334 = vst [vmem:[%s3697_s15 + $0xa4] sm:$0xf] %v333_v41  ;;  %v337_v43 = vld [vmem:[%s3692_s14 + $0x158] sm:$0xf]  ;;  %v339_v44 = vld [vmem:[%s3692_s14 + $0x160] sm:$0xf] }
  0x3b   : > { %336 = vst [vmem:[%s3697_s15 + $0xa8] sm:$0xf] %v335_v42  ;;  %338 = vst [vmem:[%s3697_s15 + $0xac] sm:$0xf] %v337_v43  ;;  %v341_v45 = vld [vmem:[%s3692_s14 + $0x168] sm:$0xf] }
  0x3c   : > { %340 = vst [vmem:[%s3697_s15 + $0xb0] sm:$0xf] %v339_v44  ;;  %v343_v46 = vld [vmem:[%s3692_s14 + $0x170] sm:$0xf]  ;;  %v345_v47 = vld [vmem:[%s3692_s14 + $0x178] sm:$0xf] }
  0x3d   : > { %342 = vst [vmem:[%s3697_s15 + $0xb4] sm:$0xf] %v341_v45  ;;  %344 = vst [vmem:[%s3697_s15 + $0xb8] sm:$0xf] %v343_v46  ;;  %v347_v48 = vld [vmem:[%s3692_s14 + $0x180] sm:$0xf] }
  0x3e   : > { %346 = vst [vmem:[%s3697_s15 + $0xbc] sm:$0xf] %v345_v47  ;;  %v349_v49 = vld [vmem:[%s3692_s14 + $0x188] sm:$0xf]  ;;  %v351_v50 = vld [vmem:[%s3692_s14 + $0x190] sm:$0xf] }
  0x3f   : > { %348 = vst [vmem:[%s3697_s15 + $0xc0] sm:$0xf] %v347_v48  ;;  %350 = vst [vmem:[%s3697_s15 + $0xc4] sm:$0xf] %v349_v49  ;;  %v353_v51 = vld [vmem:[%s3692_s14 + $0x198] sm:$0xf] }
  0x40   : > { %352 = vst [vmem:[%s3697_s15 + $0xc8] sm:$0xf] %v351_v50  ;;  %v355_v52 = vld [vmem:[%s3692_s14 + $0x1a0] sm:$0xf]  ;;  %v357_v53 = vld [vmem:[%s3692_s14 + $0x1a8] sm:$0xf] }
  0x41   : > { %354 = vst [vmem:[%s3697_s15 + $0xcc] sm:$0xf] %v353_v51  ;;  %356 = vst [vmem:[%s3697_s15 + $0xd0] sm:$0xf] %v355_v52  ;;  %v359_v54 = vld [vmem:[%s3692_s14 + $0x1b0] sm:$0xf] }
  0x42   : > { %358 = vst [vmem:[%s3697_s15 + $0xd4] sm:$0xf] %v357_v53  ;;  %v361_v55 = vld [vmem:[%s3692_s14 + $0x1b8] sm:$0xf]  ;;  %v363_v56 = vld [vmem:[%s3692_s14 + $0x1c0] sm:$0xf] }
  0x43   : > { %360 = vst [vmem:[%s3697_s15 + $0xd8] sm:$0xf] %v359_v54  ;;  %362 = vst [vmem:[%s3697_s15 + $0xdc] sm:$0xf] %v361_v55  ;;  %v365_v57 = vld [vmem:[%s3692_s14 + $0x1c8] sm:$0xf] }
  0x44   : > { %364 = vst [vmem:[%s3697_s15 + $0xe0] sm:$0xf] %v363_v56  ;;  %v367_v58 = vld [vmem:[%s3692_s14 + $0x1d0] sm:$0xf]  ;;  %v369_v59 = vld [vmem:[%s3692_s14 + $0x1d8] sm:$0xf] }
  0x45   : > { %366 = vst [vmem:[%s3697_s15 + $0xe4] sm:$0xf] %v365_v57  ;;  %368 = vst [vmem:[%s3697_s15 + $0xe8] sm:$0xf] %v367_v58  ;;  %v371_v60 = vld [vmem:[%s3692_s14 + $0x1e0] sm:$0xf] }
  0x46   : > { %370 = vst [vmem:[%s3697_s15 + $0xec] sm:$0xf] %v369_v59  ;;  %v373_v61 = vld [vmem:[%s3692_s14 + $0x1e8] sm:$0xf]  ;;  %v375_v62 = vld [vmem:[%s3692_s14 + $0x1f0] sm:$0xf] }
  0x47   : > { %372 = vst [vmem:[%s3697_s15 + $0xf0] sm:$0xf] %v371_v60  ;;  %374 = vst [vmem:[%s3697_s15 + $0xf4] sm:$0xf] %v373_v61  ;;  %v377_v63 = vld [vmem:[%s3692_s14 + $0x1f8] sm:$0xf] }
  0x48   : > { %376 = vst [vmem:[%s3697_s15 + $0xf8] sm:$0xf] %v375_v62  ;;  %v379_v0 = vld [vmem:[%s3692_s14 + $0x200] sm:$0xf]  ;;  %v381_v1 = vld [vmem:[%s3692_s14 + $0x208] sm:$0xf] }
  0x49   : > { %378 = vst [vmem:[%s3697_s15 + $0xfc] sm:$0xf] %v377_v63  ;;  %380 = vst [vmem:[%s3697_s15 + $0x100] sm:$0xf] %v379_v0  ;;  %v383_v2 = vld [vmem:[%s3692_s14 + $0x210] sm:$0xf] }
  0x4a   : > { %382 = vst [vmem:[%s3697_s15 + $0x104] sm:$0xf] %v381_v1  ;;  %v385_v3 = vld [vmem:[%s3692_s14 + $0x218] sm:$0xf]  ;;  %v387_v4 = vld [vmem:[%s3692_s14 + $0x220] sm:$0xf] }
  0x4b   : > { %384 = vst [vmem:[%s3697_s15 + $0x108] sm:$0xf] %v383_v2  ;;  %386 = vst [vmem:[%s3697_s15 + $0x10c] sm:$0xf] %v385_v3  ;;  %v389_v5 = vld [vmem:[%s3692_s14 + $0x228] sm:$0xf] }
  0x4c   : > { %388 = vst [vmem:[%s3697_s15 + $0x110] sm:$0xf] %v387_v4  ;;  %v391_v6 = vld [vmem:[%s3692_s14 + $0x230] sm:$0xf]  ;;  %v393_v7 = vld [vmem:[%s3692_s14 + $0x238] sm:$0xf] }
  0x4d   : > { %390 = vst [vmem:[%s3697_s15 + $0x114] sm:$0xf] %v389_v5  ;;  %392 = vst [vmem:[%s3697_s15 + $0x118] sm:$0xf] %v391_v6  ;;  %v395_v8 = vld [vmem:[%s3692_s14 + $0x240] sm:$0xf] }
  0x4e   : > { %394 = vst [vmem:[%s3697_s15 + $0x11c] sm:$0xf] %v393_v7  ;;  %v397_v9 = vld [vmem:[%s3692_s14 + $0x248] sm:$0xf]  ;;  %v399_v10 = vld [vmem:[%s3692_s14 + $0x250] sm:$0xf] }
  0x4f   : > { %396 = vst [vmem:[%s3697_s15 + $0x120] sm:$0xf] %v395_v8  ;;  %398 = vst [vmem:[%s3697_s15 + $0x124] sm:$0xf] %v397_v9  ;;  %v401_v11 = vld [vmem:[%s3692_s14 + $0x258] sm:$0xf] }
  0x50   : > { %400 = vst [vmem:[%s3697_s15 + $0x128] sm:$0xf] %v399_v10  ;;  %v403_v12 = vld [vmem:[%s3692_s14 + $0x260] sm:$0xf]  ;;  %v405_v13 = vld [vmem:[%s3692_s14 + $0x268] sm:$0xf] }
  0x51   : > { %402 = vst [vmem:[%s3697_s15 + $0x12c] sm:$0xf] %v401_v11  ;;  %404 = vst [vmem:[%s3697_s15 + $0x130] sm:$0xf] %v403_v12  ;;  %v407_v14 = vld [vmem:[%s3692_s14 + $0x270] sm:$0xf] }
  0x52   : > { %406 = vst [vmem:[%s3697_s15 + $0x134] sm:$0xf] %v405_v13  ;;  %v409_v15 = vld [vmem:[%s3692_s14 + $0x278] sm:$0xf]  ;;  %v411_v16 = vld [vmem:[%s3692_s14 + $0x280] sm:$0xf] }
  0x53   : > { %408 = vst [vmem:[%s3697_s15 + $0x138] sm:$0xf] %v407_v14  ;;  %410 = vst [vmem:[%s3697_s15 + $0x13c] sm:$0xf] %v409_v15  ;;  %v413_v17 = vld [vmem:[%s3692_s14 + $0x288] sm:$0xf] }
  0x54   : > { %412 = vst [vmem:[%s3697_s15 + $0x140] sm:$0xf] %v411_v16  ;;  %v415_v18 = vld [vmem:[%s3692_s14 + $0x290] sm:$0xf]  ;;  %v417_v19 = vld [vmem:[%s3692_s14 + $0x298] sm:$0xf] }
  0x55   : > { %414 = vst [vmem:[%s3697_s15 + $0x144] sm:$0xf] %v413_v17  ;;  %416 = vst [vmem:[%s3697_s15 + $0x148] sm:$0xf] %v415_v18  ;;  %v419_v20 = vld [vmem:[%s3692_s14 + $0x2a0] sm:$0xf] }
  0x56   : > { %418 = vst [vmem:[%s3697_s15 + $0x14c] sm:$0xf] %v417_v19  ;;  %v421_v21 = vld [vmem:[%s3692_s14 + $0x2a8] sm:$0xf]  ;;  %v423_v22 = vld [vmem:[%s3692_s14 + $0x2b0] sm:$0xf] }
  0x57   : > { %420 = vst [vmem:[%s3697_s15 + $0x150] sm:$0xf] %v419_v20  ;;  %422 = vst [vmem:[%s3697_s15 + $0x154] sm:$0xf] %v421_v21  ;;  %v425_v23 = vld [vmem:[%s3692_s14 + $0x2b8] sm:$0xf] }
  0x58   : > { %424 = vst [vmem:[%s3697_s15 + $0x158] sm:$0xf] %v423_v22  ;;  %v427_v24 = vld [vmem:[%s3692_s14 + $0x2c0] sm:$0xf]  ;;  %v429_v25 = vld [vmem:[%s3692_s14 + $0x2c8] sm:$0xf] }
  0x59   : > { %426 = vst [vmem:[%s3697_s15 + $0x15c] sm:$0xf] %v425_v23  ;;  %428 = vst [vmem:[%s3697_s15 + $0x160] sm:$0xf] %v427_v24  ;;  %v431_v26 = vld [vmem:[%s3692_s14 + $0x2d0] sm:$0xf] }
  0x5a   : > { %430 = vst [vmem:[%s3697_s15 + $0x164] sm:$0xf] %v429_v25  ;;  %v433_v27 = vld [vmem:[%s3692_s14 + $0x2d8] sm:$0xf]  ;;  %v435_v28 = vld [vmem:[%s3692_s14 + $0x2e0] sm:$0xf] }
  0x5b   : > { %432 = vst [vmem:[%s3697_s15 + $0x168] sm:$0xf] %v431_v26  ;;  %434 = vst [vmem:[%s3697_s15 + $0x16c] sm:$0xf] %v433_v27  ;;  %v437_v29 = vld [vmem:[%s3692_s14 + $0x2e8] sm:$0xf] }
  0x5c   : > { %436 = vst [vmem:[%s3697_s15 + $0x170] sm:$0xf] %v435_v28  ;;  %v439_v30 = vld [vmem:[%s3692_s14 + $0x2f0] sm:$0xf]  ;;  %v441_v31 = vld [vmem:[%s3692_s14 + $0x2f8] sm:$0xf] }
  0x5d   : > { %438 = vst [vmem:[%s3697_s15 + $0x174] sm:$0xf] %v437_v29  ;;  %440 = vst [vmem:[%s3697_s15 + $0x178] sm:$0xf] %v439_v30  ;;  %v443_v32 = vld [vmem:[%s3692_s14 + $0x300] sm:$0xf] }
  0x5e   : > { %442 = vst [vmem:[%s3697_s15 + $0x17c] sm:$0xf] %v441_v31  ;;  %v445_v33 = vld [vmem:[%s3692_s14 + $0x308] sm:$0xf]  ;;  %v447_v34 = vld [vmem:[%s3692_s14 + $0x310] sm:$0xf] }
  0x5f   : > { %444 = vst [vmem:[%s3697_s15 + $0x180] sm:$0xf] %v443_v32  ;;  %446 = vst [vmem:[%s3697_s15 + $0x184] sm:$0xf] %v445_v33  ;;  %v449_v35 = vld [vmem:[%s3692_s14 + $0x318] sm:$0xf] }
  0x60   : > { %448 = vst [vmem:[%s3697_s15 + $0x188] sm:$0xf] %v447_v34  ;;  %v451_v36 = vld [vmem:[%s3692_s14 + $0x320] sm:$0xf]  ;;  %v453_v37 = vld [vmem:[%s3692_s14 + $0x328] sm:$0xf] }
  0x61   : > { %450 = vst [vmem:[%s3697_s15 + $0x18c] sm:$0xf] %v449_v35  ;;  %452 = vst [vmem:[%s3697_s15 + $0x190] sm:$0xf] %v451_v36  ;;  %v455_v38 = vld [vmem:[%s3692_s14 + $0x330] sm:$0xf] }
  0x62   : > { %454 = vst [vmem:[%s3697_s15 + $0x194] sm:$0xf] %v453_v37  ;;  %v457_v39 = vld [vmem:[%s3692_s14 + $0x338] sm:$0xf]  ;;  %v459_v40 = vld [vmem:[%s3692_s14 + $0x340] sm:$0xf] }
  0x63   : > { %456 = vst [vmem:[%s3697_s15 + $0x198] sm:$0xf] %v455_v38  ;;  %458 = vst [vmem:[%s3697_s15 + $0x19c] sm:$0xf] %v457_v39  ;;  %v461_v41 = vld [vmem:[%s3692_s14 + $0x348] sm:$0xf] }
  0x64   : > { %460 = vst [vmem:[%s3697_s15 + $0x1a0] sm:$0xf] %v459_v40  ;;  %v463_v42 = vld [vmem:[%s3692_s14 + $0x350] sm:$0xf]  ;;  %v465_v43 = vld [vmem:[%s3692_s14 + $0x358] sm:$0xf] }
  0x65   : > { %462 = vst [vmem:[%s3697_s15 + $0x1a4] sm:$0xf] %v461_v41  ;;  %464 = vst [vmem:[%s3697_s15 + $0x1a8] sm:$0xf] %v463_v42  ;;  %v467_v44 = vld [vmem:[%s3692_s14 + $0x360] sm:$0xf] }
  0x66   : > { %466 = vst [vmem:[%s3697_s15 + $0x1ac] sm:$0xf] %v465_v43  ;;  %v469_v45 = vld [vmem:[%s3692_s14 + $0x368] sm:$0xf]  ;;  %v471_v46 = vld [vmem:[%s3692_s14 + $0x370] sm:$0xf] }
  0x67   : > { %468 = vst [vmem:[%s3697_s15 + $0x1b0] sm:$0xf] %v467_v44  ;;  %470 = vst [vmem:[%s3697_s15 + $0x1b4] sm:$0xf] %v469_v45  ;;  %v473_v47 = vld [vmem:[%s3692_s14 + $0x378] sm:$0xf] }
  0x68   : > { %472 = vst [vmem:[%s3697_s15 + $0x1b8] sm:$0xf] %v471_v46  ;;  %v475_v48 = vld [vmem:[%s3692_s14 + $0x380] sm:$0xf]  ;;  %v477_v49 = vld [vmem:[%s3692_s14 + $0x388] sm:$0xf] }
  0x69   : > { %474 = vst [vmem:[%s3697_s15 + $0x1bc] sm:$0xf] %v473_v47  ;;  %476 = vst [vmem:[%s3697_s15 + $0x1c0] sm:$0xf] %v475_v48  ;;  %v479_v50 = vld [vmem:[%s3692_s14 + $0x390] sm:$0xf] }
  0x6a   : > { %478 = vst [vmem:[%s3697_s15 + $0x1c4] sm:$0xf] %v477_v49  ;;  %v481_v51 = vld [vmem:[%s3692_s14 + $0x398] sm:$0xf]  ;;  %v483_v52 = vld [vmem:[%s3692_s14 + $0x3a0] sm:$0xf] }
  0x6b   : > { %480 = vst [vmem:[%s3697_s15 + $0x1c8] sm:$0xf] %v479_v50  ;;  %482 = vst [vmem:[%s3697_s15 + $0x1cc] sm:$0xf] %v481_v51  ;;  %v485_v53 = vld [vmem:[%s3692_s14 + $0x3a8] sm:$0xf] }
  0x6c   : > { %484 = vst [vmem:[%s3697_s15 + $0x1d0] sm:$0xf] %v483_v52  ;;  %v487_v54 = vld [vmem:[%s3692_s14 + $0x3b0] sm:$0xf]  ;;  %v489_v55 = vld [vmem:[%s3692_s14 + $0x3b8] sm:$0xf] }
  0x6d   : > { %486 = vst [vmem:[%s3697_s15 + $0x1d4] sm:$0xf] %v485_v53  ;;  %488 = vst [vmem:[%s3697_s15 + $0x1d8] sm:$0xf] %v487_v54  ;;  %v491_v56 = vld [vmem:[%s3692_s14 + $0x3c0] sm:$0xf] }
  0x6e   : > { %490 = vst [vmem:[%s3697_s15 + $0x1dc] sm:$0xf] %v489_v55  ;;  %v493_v57 = vld [vmem:[%s3692_s14 + $0x3c8] sm:$0xf]  ;;  %v495_v58 = vld [vmem:[%s3692_s14 + $0x3d0] sm:$0xf] }
  0x6f   : > { %492 = vst [vmem:[%s3697_s15 + $0x1e0] sm:$0xf] %v491_v56  ;;  %494 = vst [vmem:[%s3697_s15 + $0x1e4] sm:$0xf] %v493_v57  ;;  %v497_v59 = vld [vmem:[%s3692_s14 + $0x3d8] sm:$0xf] }
  0x70   : > { %496 = vst [vmem:[%s3697_s15 + $0x1e8] sm:$0xf] %v495_v58  ;;  %v499_v60 = vld [vmem:[%s3692_s14 + $0x3e0] sm:$0xf]  ;;  %v501_v61 = vld [vmem:[%s3692_s14 + $0x3e8] sm:$0xf] }
  0x71   : > { %498 = vst [vmem:[%s3697_s15 + $0x1ec] sm:$0xf] %v497_v59  ;;  %500 = vst [vmem:[%s3697_s15 + $0x1f0] sm:$0xf] %v499_v60  ;;  %v503_v62 = vld [vmem:[%s3692_s14 + $0x3f0] sm:$0xf] }
  0x72   : > { %502 = vst [vmem:[%s3697_s15 + $0x1f4] sm:$0xf] %v501_v61  ;;  %v505_v63 = vld [vmem:[%s3692_s14 + $0x3f8] sm:$0xf]  ;;  %v507_v0 = vld [vmem:[%s3692_s14 + $0x400] sm:$0xf] }
  0x73   : > { %504 = vst [vmem:[%s3697_s15 + $0x1f8] sm:$0xf] %v503_v62  ;;  %506 = vst [vmem:[%s3697_s15 + $0x1fc] sm:$0xf] %v505_v63  ;;  %v509_v1 = vld [vmem:[%s3692_s14 + $0x408] sm:$0xf] }
  0x74   : > { %508 = vst [vmem:[%s3697_s15 + $0x200] sm:$0xf] %v507_v0  ;;  %v511_v2 = vld [vmem:[%s3692_s14 + $0x410] sm:$0xf]  ;;  %v513_v3 = vld [vmem:[%s3692_s14 + $0x418] sm:$0xf] }
  0x75   : > { %510 = vst [vmem:[%s3697_s15 + $0x204] sm:$0xf] %v509_v1  ;;  %512 = vst [vmem:[%s3697_s15 + $0x208] sm:$0xf] %v511_v2  ;;  %v515_v4 = vld [vmem:[%s3692_s14 + $0x420] sm:$0xf] }
  0x76   : > { %514 = vst [vmem:[%s3697_s15 + $0x20c] sm:$0xf] %v513_v3  ;;  %v517_v5 = vld [vmem:[%s3692_s14 + $0x428] sm:$0xf]  ;;  %v519_v6 = vld [vmem:[%s3692_s14 + $0x430] sm:$0xf] }
  0x77   : > { %516 = vst [vmem:[%s3697_s15 + $0x210] sm:$0xf] %v515_v4  ;;  %518 = vst [vmem:[%s3697_s15 + $0x214] sm:$0xf] %v517_v5  ;;  %v521_v7 = vld [vmem:[%s3692_s14 + $0x438] sm:$0xf] }
  0x78   : > { %520 = vst [vmem:[%s3697_s15 + $0x218] sm:$0xf] %v519_v6  ;;  %v523_v8 = vld [vmem:[%s3692_s14 + $0x440] sm:$0xf]  ;;  %v525_v9 = vld [vmem:[%s3692_s14 + $0x448] sm:$0xf] }
  0x79   : > { %522 = vst [vmem:[%s3697_s15 + $0x21c] sm:$0xf] %v521_v7  ;;  %524 = vst [vmem:[%s3697_s15 + $0x220] sm:$0xf] %v523_v8  ;;  %v527_v10 = vld [vmem:[%s3692_s14 + $0x450] sm:$0xf] }
  0x7a   : > { %526 = vst [vmem:[%s3697_s15 + $0x224] sm:$0xf] %v525_v9  ;;  %v529_v11 = vld [vmem:[%s3692_s14 + $0x458] sm:$0xf]  ;;  %v531_v12 = vld [vmem:[%s3692_s14 + $0x460] sm:$0xf] }
  0x7b   : > { %528 = vst [vmem:[%s3697_s15 + $0x228] sm:$0xf] %v527_v10  ;;  %530 = vst [vmem:[%s3697_s15 + $0x22c] sm:$0xf] %v529_v11  ;;  %v533_v13 = vld [vmem:[%s3692_s14 + $0x468] sm:$0xf] }
  0x7c   : > { %532 = vst [vmem:[%s3697_s15 + $0x230] sm:$0xf] %v531_v12  ;;  %v535_v14 = vld [vmem:[%s3692_s14 + $0x470] sm:$0xf]  ;;  %v537_v15 = vld [vmem:[%s3692_s14 + $0x478] sm:$0xf] }
  0x7d   : > { %534 = vst [vmem:[%s3697_s15 + $0x234] sm:$0xf] %v533_v13  ;;  %536 = vst [vmem:[%s3697_s15 + $0x238] sm:$0xf] %v535_v14  ;;  %v539_v16 = vld [vmem:[%s3692_s14 + $0x480] sm:$0xf] }
  0x7e   : > { %538 = vst [vmem:[%s3697_s15 + $0x23c] sm:$0xf] %v537_v15  ;;  %v541_v17 = vld [vmem:[%s3692_s14 + $0x488] sm:$0xf]  ;;  %v543_v18 = vld [vmem:[%s3692_s14 + $0x490] sm:$0xf] }
  0x7f   : > { %540 = vst [vmem:[%s3697_s15 + $0x240] sm:$0xf] %v539_v16  ;;  %542 = vst [vmem:[%s3697_s15 + $0x244] sm:$0xf] %v541_v17  ;;  %v545_v19 = vld [vmem:[%s3692_s14 + $0x498] sm:$0xf] }
  0x80   : > { %544 = vst [vmem:[%s3697_s15 + $0x248] sm:$0xf] %v543_v18  ;;  %v547_v20 = vld [vmem:[%s3692_s14 + $0x4a0] sm:$0xf]  ;;  %v549_v21 = vld [vmem:[%s3692_s14 + $0x4a8] sm:$0xf] }
  0x81   : > { %546 = vst [vmem:[%s3697_s15 + $0x24c] sm:$0xf] %v545_v19  ;;  %548 = vst [vmem:[%s3697_s15 + $0x250] sm:$0xf] %v547_v20  ;;  %v551_v22 = vld [vmem:[%s3692_s14 + $0x4b0] sm:$0xf] }
  0x82   : > { %550 = vst [vmem:[%s3697_s15 + $0x254] sm:$0xf] %v549_v21  ;;  %v553_v23 = vld [vmem:[%s3692_s14 + $0x4b8] sm:$0xf]  ;;  %v555_v24 = vld [vmem:[%s3692_s14 + $0x4c0] sm:$0xf] }
  0x83   : > { %552 = vst [vmem:[%s3697_s15 + $0x258] sm:$0xf] %v551_v22  ;;  %554 = vst [vmem:[%s3697_s15 + $0x25c] sm:$0xf] %v553_v23  ;;  %v557_v25 = vld [vmem:[%s3692_s14 + $0x4c8] sm:$0xf] }
  0x84   : > { %556 = vst [vmem:[%s3697_s15 + $0x260] sm:$0xf] %v555_v24  ;;  %v559_v26 = vld [vmem:[%s3692_s14 + $0x4d0] sm:$0xf]  ;;  %v561_v27 = vld [vmem:[%s3692_s14 + $0x4d8] sm:$0xf] }
  0x85   : > { %558 = vst [vmem:[%s3697_s15 + $0x264] sm:$0xf] %v557_v25  ;;  %560 = vst [vmem:[%s3697_s15 + $0x268] sm:$0xf] %v559_v26  ;;  %v563_v28 = vld [vmem:[%s3692_s14 + $0x4e0] sm:$0xf] }
  0x86   : > { %562 = vst [vmem:[%s3697_s15 + $0x26c] sm:$0xf] %v561_v27  ;;  %v565_v29 = vld [vmem:[%s3692_s14 + $0x4e8] sm:$0xf]  ;;  %v567_v30 = vld [vmem:[%s3692_s14 + $0x4f0] sm:$0xf] }
  0x87   : > { %564 = vst [vmem:[%s3697_s15 + $0x270] sm:$0xf] %v563_v28  ;;  %566 = vst [vmem:[%s3697_s15 + $0x274] sm:$0xf] %v565_v29  ;;  %v569_v31 = vld [vmem:[%s3692_s14 + $0x4f8] sm:$0xf] }
  0x88   : > { %568 = vst [vmem:[%s3697_s15 + $0x278] sm:$0xf] %v567_v30  ;;  %v571_v32 = vld [vmem:[%s3692_s14 + $0x500] sm:$0xf]  ;;  %v573_v33 = vld [vmem:[%s3692_s14 + $0x508] sm:$0xf] }
  0x89   : > { %570 = vst [vmem:[%s3697_s15 + $0x27c] sm:$0xf] %v569_v31  ;;  %572 = vst [vmem:[%s3697_s15 + $0x280] sm:$0xf] %v571_v32  ;;  %v575_v34 = vld [vmem:[%s3692_s14 + $0x510] sm:$0xf] }
  0x8a   : > { %574 = vst [vmem:[%s3697_s15 + $0x284] sm:$0xf] %v573_v33  ;;  %v577_v35 = vld [vmem:[%s3692_s14 + $0x518] sm:$0xf]  ;;  %v579_v36 = vld [vmem:[%s3692_s14 + $0x520] sm:$0xf] }
  0x8b   : > { %576 = vst [vmem:[%s3697_s15 + $0x288] sm:$0xf] %v575_v34  ;;  %578 = vst [vmem:[%s3697_s15 + $0x28c] sm:$0xf] %v577_v35  ;;  %v581_v37 = vld [vmem:[%s3692_s14 + $0x528] sm:$0xf] }
  0x8c   : > { %580 = vst [vmem:[%s3697_s15 + $0x290] sm:$0xf] %v579_v36  ;;  %v583_v38 = vld [vmem:[%s3692_s14 + $0x530] sm:$0xf]  ;;  %v585_v39 = vld [vmem:[%s3692_s14 + $0x538] sm:$0xf] }
  0x8d   : > { %582 = vst [vmem:[%s3697_s15 + $0x294] sm:$0xf] %v581_v37  ;;  %584 = vst [vmem:[%s3697_s15 + $0x298] sm:$0xf] %v583_v38  ;;  %v587_v40 = vld [vmem:[%s3692_s14 + $0x540] sm:$0xf] }
  0x8e   : > { %586 = vst [vmem:[%s3697_s15 + $0x29c] sm:$0xf] %v585_v39  ;;  %v589_v41 = vld [vmem:[%s3692_s14 + $0x548] sm:$0xf]  ;;  %v591_v42 = vld [vmem:[%s3692_s14 + $0x550] sm:$0xf] }
  0x8f   : > { %588 = vst [vmem:[%s3697_s15 + $0x2a0] sm:$0xf] %v587_v40  ;;  %590 = vst [vmem:[%s3697_s15 + $0x2a4] sm:$0xf] %v589_v41  ;;  %v593_v43 = vld [vmem:[%s3692_s14 + $0x558] sm:$0xf] }
  0x90   : > { %592 = vst [vmem:[%s3697_s15 + $0x2a8] sm:$0xf] %v591_v42  ;;  %v595_v44 = vld [vmem:[%s3692_s14 + $0x560] sm:$0xf]  ;;  %v597_v45 = vld [vmem:[%s3692_s14 + $0x568] sm:$0xf] }
  0x91   : > { %594 = vst [vmem:[%s3697_s15 + $0x2ac] sm:$0xf] %v593_v43  ;;  %596 = vst [vmem:[%s3697_s15 + $0x2b0] sm:$0xf] %v595_v44  ;;  %v599_v46 = vld [vmem:[%s3692_s14 + $0x570] sm:$0xf] }
  0x92   : > { %598 = vst [vmem:[%s3697_s15 + $0x2b4] sm:$0xf] %v597_v45  ;;  %v601_v47 = vld [vmem:[%s3692_s14 + $0x578] sm:$0xf]  ;;  %v603_v48 = vld [vmem:[%s3692_s14 + $0x580] sm:$0xf] }
  0x93   : > { %600 = vst [vmem:[%s3697_s15 + $0x2b8] sm:$0xf] %v599_v46  ;;  %602 = vst [vmem:[%s3697_s15 + $0x2bc] sm:$0xf] %v601_v47  ;;  %v605_v49 = vld [vmem:[%s3692_s14 + $0x588] sm:$0xf] }
  0x94   : > { %604 = vst [vmem:[%s3697_s15 + $0x2c0] sm:$0xf] %v603_v48  ;;  %v607_v50 = vld [vmem:[%s3692_s14 + $0x590] sm:$0xf]  ;;  %v609_v51 = vld [vmem:[%s3692_s14 + $0x598] sm:$0xf] }
  0x95   : > { %606 = vst [vmem:[%s3697_s15 + $0x2c4] sm:$0xf] %v605_v49  ;;  %608 = vst [vmem:[%s3697_s15 + $0x2c8] sm:$0xf] %v607_v50  ;;  %v611_v52 = vld [vmem:[%s3692_s14 + $0x5a0] sm:$0xf] }
  0x96   : > { %610 = vst [vmem:[%s3697_s15 + $0x2cc] sm:$0xf] %v609_v51  ;;  %v613_v53 = vld [vmem:[%s3692_s14 + $0x5a8] sm:$0xf]  ;;  %v615_v54 = vld [vmem:[%s3692_s14 + $0x5b0] sm:$0xf] }
  0x97   : > { %612 = vst [vmem:[%s3697_s15 + $0x2d0] sm:$0xf] %v611_v52  ;;  %614 = vst [vmem:[%s3697_s15 + $0x2d4] sm:$0xf] %v613_v53  ;;  %v617_v55 = vld [vmem:[%s3692_s14 + $0x5b8] sm:$0xf] }
  0x98   : > { %616 = vst [vmem:[%s3697_s15 + $0x2d8] sm:$0xf] %v615_v54  ;;  %v619_v56 = vld [vmem:[%s3692_s14 + $0x5c0] sm:$0xf]  ;;  %v621_v57 = vld [vmem:[%s3692_s14 + $0x5c8] sm:$0xf] }
  0x99   : > { %618 = vst [vmem:[%s3697_s15 + $0x2dc] sm:$0xf] %v617_v55  ;;  %620 = vst [vmem:[%s3697_s15 + $0x2e0] sm:$0xf] %v619_v56  ;;  %v623_v58 = vld [vmem:[%s3692_s14 + $0x5d0] sm:$0xf] }
  0x9a   : > { %622 = vst [vmem:[%s3697_s15 + $0x2e4] sm:$0xf] %v621_v57  ;;  %v625_v59 = vld [vmem:[%s3692_s14 + $0x5d8] sm:$0xf]  ;;  %v627_v60 = vld [vmem:[%s3692_s14 + $0x5e0] sm:$0xf] }
  0x9b   : > { %624 = vst [vmem:[%s3697_s15 + $0x2e8] sm:$0xf] %v623_v58  ;;  %626 = vst [vmem:[%s3697_s15 + $0x2ec] sm:$0xf] %v625_v59  ;;  %v629_v61 = vld [vmem:[%s3692_s14 + $0x5e8] sm:$0xf] }
  0x9c   : > { %628 = vst [vmem:[%s3697_s15 + $0x2f0] sm:$0xf] %v627_v60  ;;  %v631_v62 = vld [vmem:[%s3692_s14 + $0x5f0] sm:$0xf]  ;;  %v633_v63 = vld [vmem:[%s3692_s14 + $0x5f8] sm:$0xf] }
  0x9d   : > { %630 = vst [vmem:[%s3697_s15 + $0x2f4] sm:$0xf] %v629_v61  ;;  %632 = vst [vmem:[%s3697_s15 + $0x2f8] sm:$0xf] %v631_v62  ;;  %v635_v0 = vld [vmem:[%s3692_s14 + $0x600] sm:$0xf] }
  0x9e   : > { %634 = vst [vmem:[%s3697_s15 + $0x2fc] sm:$0xf] %v633_v63  ;;  %v637_v1 = vld [vmem:[%s3692_s14 + $0x608] sm:$0xf]  ;;  %v639_v2 = vld [vmem:[%s3692_s14 + $0x610] sm:$0xf] }
  0x9f   : > { %636 = vst [vmem:[%s3697_s15 + $0x300] sm:$0xf] %v635_v0  ;;  %638 = vst [vmem:[%s3697_s15 + $0x304] sm:$0xf] %v637_v1  ;;  %v641_v3 = vld [vmem:[%s3692_s14 + $0x618] sm:$0xf] }
  0xa0   : > { %640 = vst [vmem:[%s3697_s15 + $0x308] sm:$0xf] %v639_v2  ;;  %v643_v4 = vld [vmem:[%s3692_s14 + $0x620] sm:$0xf]  ;;  %v645_v5 = vld [vmem:[%s3692_s14 + $0x628] sm:$0xf] }
  0xa1   : > { %642 = vst [vmem:[%s3697_s15 + $0x30c] sm:$0xf] %v641_v3  ;;  %644 = vst [vmem:[%s3697_s15 + $0x310] sm:$0xf] %v643_v4  ;;  %v647_v6 = vld [vmem:[%s3692_s14 + $0x630] sm:$0xf] }
  0xa2   : > { %646 = vst [vmem:[%s3697_s15 + $0x314] sm:$0xf] %v645_v5  ;;  %v649_v7 = vld [vmem:[%s3692_s14 + $0x638] sm:$0xf]  ;;  %v651_v8 = vld [vmem:[%s3692_s14 + $0x640] sm:$0xf] }
  0xa3   : > { %648 = vst [vmem:[%s3697_s15 + $0x318] sm:$0xf] %v647_v6  ;;  %650 = vst [vmem:[%s3697_s15 + $0x31c] sm:$0xf] %v649_v7  ;;  %v653_v9 = vld [vmem:[%s3692_s14 + $0x648] sm:$0xf] }
  0xa4   : > { %652 = vst [vmem:[%s3697_s15 + $0x320] sm:$0xf] %v651_v8  ;;  %v655_v10 = vld [vmem:[%s3692_s14 + $0x650] sm:$0xf]  ;;  %v657_v11 = vld [vmem:[%s3692_s14 + $0x658] sm:$0xf] }
  0xa5   : > { %654 = vst [vmem:[%s3697_s15 + $0x324] sm:$0xf] %v653_v9  ;;  %656 = vst [vmem:[%s3697_s15 + $0x328] sm:$0xf] %v655_v10  ;;  %v659_v12 = vld [vmem:[%s3692_s14 + $0x660] sm:$0xf] }
  0xa6   : > { %658 = vst [vmem:[%s3697_s15 + $0x32c] sm:$0xf] %v657_v11  ;;  %v661_v13 = vld [vmem:[%s3692_s14 + $0x668] sm:$0xf]  ;;  %v663_v14 = vld [vmem:[%s3692_s14 + $0x670] sm:$0xf] }
  0xa7   : > { %660 = vst [vmem:[%s3697_s15 + $0x330] sm:$0xf] %v659_v12  ;;  %662 = vst [vmem:[%s3697_s15 + $0x334] sm:$0xf] %v661_v13  ;;  %v665_v15 = vld [vmem:[%s3692_s14 + $0x678] sm:$0xf] }
  0xa8   : > { %664 = vst [vmem:[%s3697_s15 + $0x338] sm:$0xf] %v663_v14  ;;  %v667_v16 = vld [vmem:[%s3692_s14 + $0x680] sm:$0xf]  ;;  %v669_v17 = vld [vmem:[%s3692_s14 + $0x688] sm:$0xf] }
  0xa9   : > { %666 = vst [vmem:[%s3697_s15 + $0x33c] sm:$0xf] %v665_v15  ;;  %668 = vst [vmem:[%s3697_s15 + $0x340] sm:$0xf] %v667_v16  ;;  %v671_v18 = vld [vmem:[%s3692_s14 + $0x690] sm:$0xf] }
  0xaa   : > { %670 = vst [vmem:[%s3697_s15 + $0x344] sm:$0xf] %v669_v17  ;;  %v673_v19 = vld [vmem:[%s3692_s14 + $0x698] sm:$0xf]  ;;  %v675_v20 = vld [vmem:[%s3692_s14 + $0x6a0] sm:$0xf] }
  0xab   : > { %672 = vst [vmem:[%s3697_s15 + $0x348] sm:$0xf] %v671_v18  ;;  %674 = vst [vmem:[%s3697_s15 + $0x34c] sm:$0xf] %v673_v19  ;;  %v677_v21 = vld [vmem:[%s3692_s14 + $0x6a8] sm:$0xf] }
  0xac   : > { %676 = vst [vmem:[%s3697_s15 + $0x350] sm:$0xf] %v675_v20  ;;  %v679_v22 = vld [vmem:[%s3692_s14 + $0x6b0] sm:$0xf]  ;;  %v681_v23 = vld [vmem:[%s3692_s14 + $0x6b8] sm:$0xf] }
  0xad   : > { %678 = vst [vmem:[%s3697_s15 + $0x354] sm:$0xf] %v677_v21  ;;  %680 = vst [vmem:[%s3697_s15 + $0x358] sm:$0xf] %v679_v22  ;;  %v683_v24 = vld [vmem:[%s3692_s14 + $0x6c0] sm:$0xf] }
  0xae   : > { %682 = vst [vmem:[%s3697_s15 + $0x35c] sm:$0xf] %v681_v23  ;;  %v685_v25 = vld [vmem:[%s3692_s14 + $0x6c8] sm:$0xf]  ;;  %v687_v26 = vld [vmem:[%s3692_s14 + $0x6d0] sm:$0xf] }
  0xaf   : > { %684 = vst [vmem:[%s3697_s15 + $0x360] sm:$0xf] %v683_v24  ;;  %686 = vst [vmem:[%s3697_s15 + $0x364] sm:$0xf] %v685_v25  ;;  %v689_v27 = vld [vmem:[%s3692_s14 + $0x6d8] sm:$0xf] }
  0xb0   : > { %688 = vst [vmem:[%s3697_s15 + $0x368] sm:$0xf] %v687_v26  ;;  %v691_v28 = vld [vmem:[%s3692_s14 + $0x6e0] sm:$0xf]  ;;  %v693_v29 = vld [vmem:[%s3692_s14 + $0x6e8] sm:$0xf] }
  0xb1   : > { %690 = vst [vmem:[%s3697_s15 + $0x36c] sm:$0xf] %v689_v27  ;;  %692 = vst [vmem:[%s3697_s15 + $0x370] sm:$0xf] %v691_v28  ;;  %v695_v30 = vld [vmem:[%s3692_s14 + $0x6f0] sm:$0xf] }
  0xb2   : > { %694 = vst [vmem:[%s3697_s15 + $0x374] sm:$0xf] %v693_v29  ;;  %v697_v31 = vld [vmem:[%s3692_s14 + $0x6f8] sm:$0xf]  ;;  %v699_v32 = vld [vmem:[%s3692_s14 + $0x700] sm:$0xf] }
  0xb3   : > { %696 = vst [vmem:[%s3697_s15 + $0x378] sm:$0xf] %v695_v30  ;;  %698 = vst [vmem:[%s3697_s15 + $0x37c] sm:$0xf] %v697_v31  ;;  %v701_v33 = vld [vmem:[%s3692_s14 + $0x708] sm:$0xf] }
  0xb4   : > { %700 = vst [vmem:[%s3697_s15 + $0x380] sm:$0xf] %v699_v32  ;;  %v703_v34 = vld [vmem:[%s3692_s14 + $0x710] sm:$0xf]  ;;  %v705_v35 = vld [vmem:[%s3692_s14 + $0x718] sm:$0xf] }
  0xb5   : > { %702 = vst [vmem:[%s3697_s15 + $0x384] sm:$0xf] %v701_v33  ;;  %704 = vst [vmem:[%s3697_s15 + $0x388] sm:$0xf] %v703_v34  ;;  %v707_v36 = vld [vmem:[%s3692_s14 + $0x720] sm:$0xf] }
  0xb6   : > { %706 = vst [vmem:[%s3697_s15 + $0x38c] sm:$0xf] %v705_v35  ;;  %v709_v37 = vld [vmem:[%s3692_s14 + $0x728] sm:$0xf]  ;;  %v711_v38 = vld [vmem:[%s3692_s14 + $0x730] sm:$0xf] }
  0xb7   : > { %708 = vst [vmem:[%s3697_s15 + $0x390] sm:$0xf] %v707_v36  ;;  %710 = vst [vmem:[%s3697_s15 + $0x394] sm:$0xf] %v709_v37  ;;  %v713_v39 = vld [vmem:[%s3692_s14 + $0x738] sm:$0xf] }
  0xb8   : > { %712 = vst [vmem:[%s3697_s15 + $0x398] sm:$0xf] %v711_v38  ;;  %v715_v40 = vld [vmem:[%s3692_s14 + $0x740] sm:$0xf]  ;;  %v717_v41 = vld [vmem:[%s3692_s14 + $0x748] sm:$0xf] }
  0xb9   : > { %714 = vst [vmem:[%s3697_s15 + $0x39c] sm:$0xf] %v713_v39  ;;  %716 = vst [vmem:[%s3697_s15 + $0x3a0] sm:$0xf] %v715_v40  ;;  %v719_v42 = vld [vmem:[%s3692_s14 + $0x750] sm:$0xf] }
  0xba   : > { %718 = vst [vmem:[%s3697_s15 + $0x3a4] sm:$0xf] %v717_v41  ;;  %v721_v43 = vld [vmem:[%s3692_s14 + $0x758] sm:$0xf]  ;;  %v723_v44 = vld [vmem:[%s3692_s14 + $0x760] sm:$0xf] }
  0xbb   : > { %720 = vst [vmem:[%s3697_s15 + $0x3a8] sm:$0xf] %v719_v42  ;;  %722 = vst [vmem:[%s3697_s15 + $0x3ac] sm:$0xf] %v721_v43  ;;  %v725_v45 = vld [vmem:[%s3692_s14 + $0x768] sm:$0xf] }
  0xbc   : > { %724 = vst [vmem:[%s3697_s15 + $0x3b0] sm:$0xf] %v723_v44  ;;  %v727_v46 = vld [vmem:[%s3692_s14 + $0x770] sm:$0xf]  ;;  %v729_v47 = vld [vmem:[%s3692_s14 + $0x778] sm:$0xf] }
  0xbd   : > { %726 = vst [vmem:[%s3697_s15 + $0x3b4] sm:$0xf] %v725_v45  ;;  %728 = vst [vmem:[%s3697_s15 + $0x3b8] sm:$0xf] %v727_v46  ;;  %v731_v48 = vld [vmem:[%s3692_s14 + $0x780] sm:$0xf] }
  0xbe   : > { %730 = vst [vmem:[%s3697_s15 + $0x3bc] sm:$0xf] %v729_v47  ;;  %v733_v49 = vld [vmem:[%s3692_s14 + $0x788] sm:$0xf]  ;;  %v735_v50 = vld [vmem:[%s3692_s14 + $0x790] sm:$0xf] }
  0xbf   : > { %732 = vst [vmem:[%s3697_s15 + $0x3c0] sm:$0xf] %v731_v48  ;;  %734 = vst [vmem:[%s3697_s15 + $0x3c4] sm:$0xf] %v733_v49  ;;  %v737_v51 = vld [vmem:[%s3692_s14 + $0x798] sm:$0xf] }
  0xc0   : > { %736 = vst [vmem:[%s3697_s15 + $0x3c8] sm:$0xf] %v735_v50  ;;  %v739_v52 = vld [vmem:[%s3692_s14 + $0x7a0] sm:$0xf]  ;;  %v741_v53 = vld [vmem:[%s3692_s14 + $0x7a8] sm:$0xf] }
  0xc1   : > { %738 = vst [vmem:[%s3697_s15 + $0x3cc] sm:$0xf] %v737_v51  ;;  %740 = vst [vmem:[%s3697_s15 + $0x3d0] sm:$0xf] %v739_v52  ;;  %v743_v54 = vld [vmem:[%s3692_s14 + $0x7b0] sm:$0xf] }
  0xc2   : > { %742 = vst [vmem:[%s3697_s15 + $0x3d4] sm:$0xf] %v741_v53  ;;  %v745_v55 = vld [vmem:[%s3692_s14 + $0x7b8] sm:$0xf]  ;;  %v747_v56 = vld [vmem:[%s3692_s14 + $0x7c0] sm:$0xf] }
  0xc3   : > { %744 = vst [vmem:[%s3697_s15 + $0x3d8] sm:$0xf] %v743_v54  ;;  %746 = vst [vmem:[%s3697_s15 + $0x3dc] sm:$0xf] %v745_v55  ;;  %v749_v57 = vld [vmem:[%s3692_s14 + $0x7c8] sm:$0xf] }
  0xc4   : > { %748 = vst [vmem:[%s3697_s15 + $0x3e0] sm:$0xf] %v747_v56  ;;  %v751_v58 = vld [vmem:[%s3692_s14 + $0x7d0] sm:$0xf]  ;;  %v753_v59 = vld [vmem:[%s3692_s14 + $0x7d8] sm:$0xf] }
  0xc5   : > { %750 = vst [vmem:[%s3697_s15 + $0x3e4] sm:$0xf] %v749_v57  ;;  %752 = vst [vmem:[%s3697_s15 + $0x3e8] sm:$0xf] %v751_v58  ;;  %v755_v60 = vld [vmem:[%s3692_s14 + $0x7e0] sm:$0xf] }
  0xc6   : > { %754 = vst [vmem:[%s3697_s15 + $0x3ec] sm:$0xf] %v753_v59  ;;  %v757_v61 = vld [vmem:[%s3692_s14 + $0x7e8] sm:$0xf]  ;;  %v759_v62 = vld [vmem:[%s3692_s14 + $0x7f0] sm:$0xf] }
  0xc7   : > { %756 = vst [vmem:[%s3697_s15 + $0x3f0] sm:$0xf] %v755_v60  ;;  %758 = vst [vmem:[%s3697_s15 + $0x3f4] sm:$0xf] %v757_v61  ;;  %v761_v63 = vld [vmem:[%s3692_s14 + $0x7f8] sm:$0xf] }
  0xc8   : > { %760 = vst [vmem:[%s3697_s15 + $0x3f8] sm:$0xf] %v759_v62  ;;  %762 = vst [vmem:[%s3697_s15 + $0x3fc] sm:$0xf] %v761_v63 }
  0xc9 PF: > { %p3009_p7 = scmp.ge.s32.totalorder %s3599_s24, 1  ;;  %p1314_p8 = scmp.lt.s32.totalorder %s3599_s24, 5 }
  0xcb   : > { %p1315_p9 = pnand %p3009_p7, %p1314_p8 }
  0xcc   : > { %s1321_s16 = sand.u32 (!%p1315_p9), 1, %s3575_s18   ;;  %s3011_s17 = sshll.u32 (!%p1315_p9), %s3583_s20, 4 }
  0xcd   : > { %1318 = sbr.rel (%p1315_p9) target bundleno = 639 (0x27f), region = 77  ;;  %s3010_s27 = sshll.u32 (!%p1315_p9), %s1321_s16, 10 }
  0xce   : > { %p1372_p10 = scmp.lt.s32.totalorder (!%p1315_p9), %s3011_s17, 31  ;;  %p1380_p11 = scmp.lt.s32.totalorder (!%p1315_p9), %s3587_s21, 1 }
  0xcf   : > { %p3014_p12 = scmp.ne.s32.totalorder (!%p1315_p9), %s3583_s20, 0 }
  0xd4   : > { %s4440_s17 = smov (!%p1372_p10, %s3011_s17), 31  ;;  %s4442_s21 = smov (!%p1380_p11, %s3587_s21), 1 }
  0xd5   : > { %s3012_s28 = sshll.u32 %s4440_s17, 2  ;;  %s1382_s18 = scalar_lea.vmem %s4418_s2, %s4442_s21  ;;  %v3601_v0 = vmov (!%p3014_p12), 0.0  }
  0xd6   : > { %s4219_s7 = scalar_lea.vmem %s4416_s0, %s3012_s28  ;;  %s1385_s12 = scalar_lea.vmem %s4419_s3, %s4442_s21  ;;  %1402 = vst [vmem:[#allocation2] sm:$0xff] (!%p3014_p12), %v3601_v0 }
  0xd7   : > { %s1388_s15 = scalar_lea.vmem %s4420_s4, %s4442_s21  ;;  %s3013_s16 = sshll.u32 %s4442_s21, 2 }
  0xd8   : > { %s4237_s26 = scalar_lea.vmem %s4421_s5, %s3013_s16  ;;  %s4239_s28 = scalar_lea.vmem [#allocation3], %s3010_s27 }
  0xd9   : > { %1401 = sbr.rel (%p3014_p12) target bundleno = 224 (0xe0), region = 85 }
  0xe0 PF: > { %v3399_v1 = vld [vmem:[%s4239_s28 + $0x40] sm:$0xff]   ;;  %v3403_v5 = vld [vmem:[%s4239_s28 + $0x48] sm:$0xff]   ;;  %v3407_v9 = vld [vmem:[%s4239_s28 + $0x50] sm:$0xff]   ;;  %p3159_p13 = scmp.ne.s32.totalorder %s3583_s20, 1 }
  0xe1   : > { %v3400_v2 = vld [vmem:[%s4239_s28 + $0xc0] sm:$0xff]   ;;  %3166 = vmatprep.subr.bf16.mxu0 %v3399_v1  ;;  %v3404_v6 = vld [vmem:[%s4239_s28 + $0xc8] sm:$0xff]   ;;  %v3408_v10 = vld [vmem:[%s4239_s28 + $0xd0] sm:$0xff]  }
  0xe2   : > { %v3401_v3 = vld [vmem:[%s4239_s28] sm:$0xff]   ;;  %3188 = vmatprep.subr.bf16.mxu1 %v3400_v2  ;;  %v3405_v7 = vld [vmem:[%s4239_s28 + $0x8] sm:$0xff]   ;;  %v3409_v11 = vld [vmem:[%s4239_s28 + $0x10] sm:$0xff]  }
  0xe3   : > { %v3402_v4 = vld [vmem:[%s4239_s28 + $0x80] sm:$0xff]   ;;  %3167 = vmatpush3.bf16.msra.mxu0 %v3401_v3  ;;  %v3406_v8 = vld [vmem:[%s4239_s28 + $0x88] sm:$0xff]   ;;  %v3410_v12 = vld [vmem:[%s4239_s28 + $0x90] sm:$0xff]  }
  0xe4   : > { %3189 = vmatpush3.bf16.msra.mxu1 %v3402_v4  ;;  %3168 = vmatprep.subr.bf16.mxu0 %v3403_v5  ;;  %v3411_v13 = vld [vmem:[%s4239_s28 + $0x58] sm:$0xff]   ;;  %v3415_v17 = vld [vmem:[%s4239_s28 + $0x60] sm:$0xff]   ;;  %v3419_v21 = vld [vmem:[%s4239_s28 + $0x68] sm:$0xff]  }
  0xe5   : > { %3190 = vmatprep.subr.bf16.mxu1 %v3404_v6  ;;  %v3412_v14 = vld [vmem:[%s4239_s28 + $0xd8] sm:$0xff]   ;;  %v3416_v18 = vld [vmem:[%s4239_s28 + $0xe0] sm:$0xff]   ;;  %v3420_v22 = vld [vmem:[%s4239_s28 + $0xe8] sm:$0xff]  }
  0xe6   : > { %v3413_v15 = vld [vmem:[%s4239_s28 + $0x18] sm:$0xff]   ;;  %v3417_v19 = vld [vmem:[%s4239_s28 + $0x20] sm:$0xff]   ;;  %v3421_v23 = vld [vmem:[%s4239_s28 + $0x28] sm:$0xff]  }
  0xe7   : > { %3169 = vmatpush3.bf16.msra.mxu0 %v3405_v7  ;;  %v3414_v16 = vld [vmem:[%s4239_s28 + $0x98] sm:$0xff]   ;;  %v3418_v20 = vld [vmem:[%s4239_s28 + $0xa0] sm:$0xff]   ;;  %v3422_v24 = vld [vmem:[%s4239_s28 + $0xa8] sm:$0xff]  }
  0xe8   : > { %3191 = vmatpush3.bf16.msra.mxu1 %v3406_v8  ;;  %3170 = vmatprep.subr.bf16.mxu0 %v3407_v9  ;;  %v3423_v25 = vld [vmem:[%s4239_s28 + $0x70] sm:$0xff]   ;;  %v3427_v29 = vld [vmem:[%s4239_s28 + $0x78] sm:$0xff]   ;;  %v1404_v34 = vld [vmem:[%s4219_s7 + $0x8] sm:$0xff] }
  0xe9   : > { %3192 = vmatprep.subr.bf16.mxu1 %v3408_v10  ;;  %v3424_v26 = vld [vmem:[%s4239_s28 + $0xf0] sm:$0xff]   ;;  %v3428_v30 = vld [vmem:[%s4239_s28 + $0xf8] sm:$0xff]   ;;  %v3017_v37 = vcombine.low %v1404_v34, %v1404_v34  ;;  %v3018_v38 = vcombine.high %v1404_v34, %v1404_v34  ;;  %v3435_v39 = vld [vmem:[%s4239_s28 + $0x140] sm:$0xff]  }
  0xea   : > { %v3425_v27 = vld [vmem:[%s4239_s28 + $0x30] sm:$0xff]   ;;  %v3429_v31 = vld [vmem:[%s4239_s28 + $0x38] sm:$0xff]   ;;  %v3436_v40 = vld [vmem:[%s4239_s28 + $0x1c0] sm:$0xff]  }
  0xeb   : > { %3171 = vmatpush3.bf16.msra.mxu0 %v3409_v11  ;;  %v3426_v28 = vld [vmem:[%s4239_s28 + $0xb0] sm:$0xff]   ;;  %v3430_v32 = vld [vmem:[%s4239_s28 + $0xb8] sm:$0xff]   ;;  %2564 = vmatprep.mubr.bf16.mxu1 %v3018_v38  ;;  %v3437_v41 = vld [vmem:[%s4239_s28 + $0x100] sm:$0xff]  }
  0xec   : > { %3193 = vmatpush3.bf16.msra.mxu1 %v3410_v12  ;;  %3172 = vmatprep.subr.bf16.mxu0 %v3411_v13  ;;  %v1403_v33 = vld [vmem:[%s4219_s7] sm:$0xff]  ;;  %v3438_v42 = vld [vmem:[%s4239_s28 + $0x180] sm:$0xff]   ;;  %v3439_v43 = vld [vmem:[%s4239_s28 + $0x148] sm:$0xff]  }
  0xed   : > { %3194 = vmatprep.subr.bf16.mxu1 %v3412_v14  ;;  %v3015_v35 = vcombine.low %v1403_v33, %v1403_v33  ;;  %v3016_v36 = vcombine.high %v1403_v33, %v1403_v33  ;;  %v3440_v44 = vld [vmem:[%s4239_s28 + $0x1c8] sm:$0xff]   ;;  %v3443_v47 = vld [vmem:[%s4239_s28 + $0x150] sm:$0xff]   ;;  %v3447_v51 = vld [vmem:[%s4239_s28 + $0x158] sm:$0xff]  }
  0xee   : > { %v3441_v45 = vld [vmem:[%s4239_s28 + $0x108] sm:$0xff]   ;;  %v3444_v48 = vld [vmem:[%s4239_s28 + $0x1d0] sm:$0xff]   ;;  %v3448_v52 = vld [vmem:[%s4239_s28 + $0x1d8] sm:$0xff]  }
  0xef   : > { %3173 = vmatpush3.bf16.msra.mxu0 %v3413_v15  ;;  %2524 = vmatprep.mubr.bf16.mxu0 %v3016_v36  ;;  %v3442_v46 = vld [vmem:[%s4239_s28 + $0x188] sm:$0xff]   ;;  %v3445_v49 = vld [vmem:[%s4239_s28 + $0x110] sm:$0xff]   ;;  %v3449_v53 = vld [vmem:[%s4239_s28 + $0x118] sm:$0xff]  }
  0xf0   : > { %3195 = vmatpush3.bf16.msra.mxu1 %v3414_v16  ;;  %3174 = vmatprep.subr.bf16.mxu0 %v3415_v17  ;;  %v3446_v50 = vld [vmem:[%s4239_s28 + $0x190] sm:$0xff]   ;;  %v3450_v54 = vld [vmem:[%s4239_s28 + $0x198] sm:$0xff]   ;;  %v3451_v55 = vld [vmem:[%s4239_s28 + $0x160] sm:$0xff]  }
  0xf1   : > { %3196 = vmatprep.subr.bf16.mxu1 %v3416_v18  ;;  %v3452_v56 = vld [vmem:[%s4239_s28 + $0x1e0] sm:$0xff]   ;;  %v3455_v59 = vld [vmem:[%s4239_s28 + $0x168] sm:$0xff]   ;;  %v3459_v63 = vld [vmem:[%s4239_s28 + $0x170] sm:$0xff]  }
  0xf2   : > { %v3453_v57 = vld [vmem:[%s4239_s28 + $0x120] sm:$0xff]   ;;  %v3456_v60 = vld [vmem:[%s4239_s28 + $0x1e8] sm:$0xff]   ;;  %v3460_v0 = vld [vmem:[%s4239_s28 + $0x1f0] sm:$0xff]  }
  0xf3   : > { %3175 = vmatpush3.bf16.msra.mxu0 %v3417_v19  ;;  %v3454_v58 = vld [vmem:[%s4239_s28 + $0x1a0] sm:$0xff]   ;;  %v3457_v61 = vld [vmem:[%s4239_s28 + $0x128] sm:$0xff]   ;;  %v3461_v1 = vld [vmem:[%s4239_s28 + $0x130] sm:$0xff]  }
  0xf4   : > { %3197 = vmatpush3.bf16.msra.mxu1 %v3418_v20  ;;  %3176 = vmatprep.subr.bf16.mxu0 %v3419_v21  ;;  %v3458_v62 = vld [vmem:[%s4239_s28 + $0x1a8] sm:$0xff]   ;;  %v3462_v2 = vld [vmem:[%s4239_s28 + $0x1b0] sm:$0xff]   ;;  %v3463_v3 = vld [vmem:[%s4239_s28 + $0x178] sm:$0xff]  }
  0xf5   : > { %3198 = vmatprep.subr.bf16.mxu1 %v3420_v22  ;;  %v3464_v4 = vld [vmem:[%s4239_s28 + $0x1f8] sm:$0xff]   ;;  %v1405_v7 = vld [vmem:[%s4219_s7 + $0x10] sm:$0xff]  ;;  %v1406_v10 = vld [vmem:[%s4219_s7 + $0x18] sm:$0xff] }
  0xf6   : > { %v3465_v5 = vld [vmem:[%s4239_s28 + $0x138] sm:$0xff]   ;;  %v3019_v8 = vcombine.low %v1405_v7, %v1405_v7  ;;  %v3020_v9 = vcombine.high %v1405_v7, %v1405_v7  ;;  %v3021_v11 = vcombine.low %v1406_v10, %v1406_v10  ;;  %v3022_v12 = vcombine.high %v1406_v10, %v1406_v10  ;;  %v3471_v13 = vld [vmem:[%s4239_s28 + $0x240] sm:$0xff]   ;;  %v3475_v17 = vld [vmem:[%s4239_s28 + $0x248] sm:$0xff]  }
  0xf7   : > { %3177 = vmatpush3.bf16.msra.mxu0 %v3421_v23  ;;  %v3466_v6 = vld [vmem:[%s4239_s28 + $0x1b8] sm:$0xff]   ;;  %v3472_v14 = vld [vmem:[%s4239_s28 + $0x2c0] sm:$0xff]   ;;  %v3476_v18 = vld [vmem:[%s4239_s28 + $0x2c8] sm:$0xff]  }
  0xf8   : > { %3199 = vmatpush3.bf16.msra.mxu1 %v3422_v24  ;;  %3178 = vmatprep.subr.bf16.mxu0 %v3423_v25  ;;  %v3473_v15 = vld [vmem:[%s4239_s28 + $0x200] sm:$0xff]   ;;  %v3477_v19 = vld [vmem:[%s4239_s28 + $0x208] sm:$0xff]   ;;  %v3479_v21 = vld [vmem:[%s4239_s28 + $0x250] sm:$0xff]  }
  0xf9   : > { %3200 = vmatprep.subr.bf16.mxu1 %v3424_v26  ;;  %v3474_v16 = vld [vmem:[%s4239_s28 + $0x280] sm:$0xff]   ;;  %v3478_v20 = vld [vmem:[%s4239_s28 + $0x288] sm:$0xff]   ;;  %v3480_v22 = vld [vmem:[%s4239_s28 + $0x2d0] sm:$0xff]  }
  0xfa   : > { %v3481_v23 = vld [vmem:[%s4239_s28 + $0x210] sm:$0xff]   ;;  %v3483_v25 = vld [vmem:[%s4239_s28 + $0x258] sm:$0xff]   ;;  %v3491_v33 = vld [vmem:[%s4239_s28 + $0x268] sm:$0xff]  }
  0xfb   : > { %3179 = vmatpush3.bf16.msra.mxu0 %v3425_v27  ;;  %v3482_v24 = vld [vmem:[%s4239_s28 + $0x290] sm:$0xff]   ;;  %v3484_v26 = vld [vmem:[%s4239_s28 + $0x2d8] sm:$0xff]   ;;  %v3492_v34 = vld [vmem:[%s4239_s28 + $0x2e8] sm:$0xff]  }
  0xfc   : > { %3201 = vmatpush3.bf16.msra.mxu1 %v3426_v28  ;;  %3180 = vmatprep.subr.bf16.mxu0 %v3427_v29  ;;  %v3485_v27 = vld [vmem:[%s4239_s28 + $0x218] sm:$0xff]   ;;  %v3487_v29 = vld [vmem:[%s4239_s28 + $0x260] sm:$0xff]   ;;  %v3494_v36 = vld [vmem:[%s4239_s28 + $0x2a8] sm:$0xff]  }
  0xfd   : > { %3202 = vmatprep.subr.bf16.mxu1 %v3428_v30  ;;  %v3486_v28 = vld [vmem:[%s4239_s28 + $0x298] sm:$0xff]   ;;  %v3488_v30 = vld [vmem:[%s4239_s28 + $0x2e0] sm:$0xff]   ;;  %v3496_v38 = vld [vmem:[%s4239_s28 + $0x2f0] sm:$0xff]  }
  0xfe   : > { %v3527_v7 = vld [vmem:[%s4239_s28 + $0x368] sm:$0xff]  }
  0xff   : > { %3181 = vmatpush3.bf16.msra.mxu0 %v3429_v31  ;;  %v3489_v31 = vld [vmem:[%s4239_s28 + $0x220] sm:$0xff]   ;;  %v3530_v10 = vld [vmem:[%s4239_s28 + $0x3a8] sm:$0xff]  }
 0x100   : > { %3203 = vmatpush3.bf16.msra.mxu1 %v3430_v32  ;;  %3210 = vmatprep.subr.bf16.mxu0 %v3435_v39  ;;  %v3490_v32 = vld [vmem:[%s4239_s28 + $0x2a0] sm:$0xff]   ;;  %v3497_v39 = vld [vmem:[%s4239_s28 + $0x230] sm:$0xff]  }
 0x101   : > { %3232 = vmatprep.subr.bf16.mxu1 %v3436_v40  ;;  %v3498_v40 = vld [vmem:[%s4239_s28 + $0x2b0] sm:$0xff]  }
 0x102   : > { %2525 = vmatmul.mubr.bf16.vlgmr.msra.gmra.mrb[0].mxu0 %v3015_v35  ;;  %v3493_v35 = vld [vmem:[%s4239_s28 + $0x228] sm:$0xff]  }
 0x103   : > { %2565 = vmatmul.mubr.bf16.vlgmr.msra.gmra.mrb[0].mxu1 %v3017_v37  ;;  %3211 = vmatpush3.bf16.msra.mxu0 %v3437_v41  ;;  %v3495_v37 = vld [vmem:[%s4239_s28 + $0x270] sm:$0xff]   ;;  %v3499_v41 = vld [vmem:[%s4239_s28 + $0x278] sm:$0xff]  }
 0x104   : > { %3233 = vmatpush3.bf16.msra.mxu1 %v3438_v42  ;;  %3212 = vmatprep.subr.bf16.mxu0 %v3439_v43  ;;  %v3500_v42 = vld [vmem:[%s4239_s28 + $0x2f8] sm:$0xff]  }
 0x105   : > { %3234 = vmatprep.subr.bf16.mxu1 %v3440_v44  ;;  %2604 = vmatprep.mubr.bf16.mxu0 %v3020_v9  ;;  %v3501_v43 = vld [vmem:[%s4239_s28 + $0x238] sm:$0xff]   ;;  %v3529_v9 = vld [vmem:[%s4239_s28 + $0x328] sm:$0xff]  }
 0x106   : > { %2644 = vmatprep.mubr.bf16.mxu1 %v3022_v12  ;;  %v3502_v44 = vld [vmem:[%s4239_s28 + $0x2b8] sm:$0xff]   ;;  %v3532_v12 = vld [vmem:[%s4239_s28 + $0x3f0] sm:$0xff]  }
 0x107   : > { %3213 = vmatpush3.bf16.msra.mxu0 %v3441_v45  ;;  %v1407_v45 = vld [vmem:[%s4219_s7 + $0x20] sm:$0xff] }
 0x108   : > { %3235 = vmatpush3.bf16.msra.mxu1 %v3442_v46  ;;  %3214 = vmatprep.subr.bf16.mxu0 %v3443_v47  ;;  %v1408_v46 = vld [vmem:[%s4219_s7 + $0x28] sm:$0xff]  ;;  %v3023_v47 = vcombine.low %v1407_v45, %v1407_v45 }
 0x109   : > { %3236 = vmatprep.subr.bf16.mxu1 %v3444_v48  ;;  %v3024_v48 = vcombine.high %v1407_v45, %v1407_v45 }
 0x10b   : > { %3215 = vmatpush3.bf16.msra.mxu0 %v3445_v49  ;;  %v3025_v49 = vcombine.low %v1408_v46, %v1408_v46 }
 0x10c   : > { %3237 = vmatpush3.bf16.msra.mxu1 %v3446_v50  ;;  %3216 = vmatprep.subr.bf16.mxu0 %v3447_v51  ;;  %v3026_v50 = vcombine.high %v1408_v46, %v1408_v46  ;;  %v3507_v51 = vld [vmem:[%s4239_s28 + $0x340] sm:$0xff]  }
 0x10d   : > { %3238 = vmatprep.subr.bf16.mxu1 %v3448_v52  ;;  %v3508_v52 = vld [vmem:[%s4239_s28 + $0x3c0] sm:$0xff]  }
 0x10f   : > { %3217 = vmatpush3.bf16.msra.mxu0 %v3449_v53  ;;  %v3509_v53 = vld [vmem:[%s4239_s28 + $0x300] sm:$0xff]  }
 0x110   : > { %3239 = vmatpush3.bf16.msra.mxu1 %v3450_v54  ;;  %3218 = vmatprep.subr.bf16.mxu0 %v3451_v55  ;;  %v3510_v54 = vld [vmem:[%s4239_s28 + $0x380] sm:$0xff]   ;;  %v3511_v55 = vld [vmem:[%s4239_s28 + $0x348] sm:$0xff]  }
 0x111   : > { %3240 = vmatprep.subr.bf16.mxu1 %v3452_v56  ;;  %v3512_v56 = vld [vmem:[%s4239_s28 + $0x3c8] sm:$0xff]  }
 0x113   : > { %3219 = vmatpush3.bf16.msra.mxu0 %v3453_v57  ;;  %v3513_v57 = vld [vmem:[%s4239_s28 + $0x308] sm:$0xff]  }
 0x114   : > { %3241 = vmatpush3.bf16.msra.mxu1 %v3454_v58  ;;  %3220 = vmatprep.subr.bf16.mxu0 %v3455_v59  ;;  %v3514_v58 = vld [vmem:[%s4239_s28 + $0x388] sm:$0xff]   ;;  %v3515_v59 = vld [vmem:[%s4239_s28 + $0x350] sm:$0xff]  }
 0x115   : > { %3242 = vmatprep.subr.bf16.mxu1 %v3456_v60  ;;  %v3516_v60 = vld [vmem:[%s4239_s28 + $0x3d0] sm:$0xff]  }
 0x117   : > { %3221 = vmatpush3.bf16.msra.mxu0 %v3457_v61  ;;  %v3517_v61 = vld [vmem:[%s4239_s28 + $0x310] sm:$0xff]  }
 0x118   : > { %3243 = vmatpush3.bf16.msra.mxu1 %v3458_v62  ;;  %3222 = vmatprep.subr.bf16.mxu0 %v3459_v63  ;;  %v3518_v62 = vld [vmem:[%s4239_s28 + $0x390] sm:$0xff]   ;;  %v3519_v63 = vld [vmem:[%s4239_s28 + $0x358] sm:$0xff]  }
 0x119   : > { %3244 = vmatprep.subr.bf16.mxu1 %v3460_v0  ;;  %v3520_v0 = vld [vmem:[%s4239_s28 + $0x3d8] sm:$0xff]  }
 0x11b   : > { %3223 = vmatpush3.bf16.msra.mxu0 %v3461_v1  ;;  %v3521_v1 = vld [vmem:[%s4239_s28 + $0x318] sm:$0xff]  }
 0x11c   : > { %3245 = vmatpush3.bf16.msra.mxu1 %v3462_v2  ;;  %3224 = vmatprep.subr.bf16.mxu0 %v3463_v3  ;;  %v3522_v2 = vld [vmem:[%s4239_s28 + $0x398] sm:$0xff]   ;;  %v3523_v3 = vld [vmem:[%s4239_s28 + $0x360] sm:$0xff]  }
 0x11d   : > { %3246 = vmatprep.subr.bf16.mxu1 %v3464_v4  ;;  %v3524_v4 = vld [vmem:[%s4239_s28 + $0x3e0] sm:$0xff]  }
 0x11f   : > { %3225 = vmatpush3.bf16.msra.mxu0 %v3465_v5  ;;  %v3525_v5 = vld [vmem:[%s4239_s28 + $0x320] sm:$0xff]  }
 0x120   : > { %3247 = vmatpush3.bf16.msra.mxu1 %v3466_v6  ;;  %3254 = vmatprep.subr.bf16.mxu0 %v3471_v13  ;;  %v3526_v6 = vld [vmem:[%s4239_s28 + $0x3a0] sm:$0xff]   ;;  %v3533_v13 = vld [vmem:[%s4239_s28 + $0x330] sm:$0xff]  }
 0x121   : > { %3276 = vmatprep.subr.bf16.mxu1 %v3472_v14  ;;  %v3534_v14 = vld [vmem:[%s4239_s28 + $0x3b0] sm:$0xff]  }
 0x122   : > { %2605 = vmatmul.mubr.bf16.vlgmr.msra.gmra.mrb[4].mxu0 %v3019_v8  ;;  %v3528_v8 = vld [vmem:[%s4239_s28 + $0x3e8] sm:$0xff]  }
 0x123   : > { %2645 = vmatmul.mubr.bf16.vlgmr.msra.gmra.mrb[4].mxu1 %v3021_v11  ;;  %3255 = vmatpush3.bf16.msra.mxu0 %v3473_v15  ;;  %v3531_v11 = vld [vmem:[%s4239_s28 + $0x370] sm:$0xff]   ;;  %v3535_v15 = vld [vmem:[%s4239_s28 + $0x378] sm:$0xff]  }
 0x124   : > { %3277 = vmatpush3.bf16.msra.mxu1 %v3474_v16  ;;  %3256 = vmatprep.subr.bf16.mxu0 %v3475_v17  ;;  %v3536_v16 = vld [vmem:[%s4239_s28 + $0x3f8] sm:$0xff]  }
 0x125   : > { %3278 = vmatprep.subr.bf16.mxu1 %v3476_v18  ;;  %2684 = vmatprep.mubr.bf16.mxu0 %v3024_v48  ;;  %v3537_v17 = vld [vmem:[%s4239_s28 + $0x338] sm:$0xff]  }
 0x126   : > { %2724 = vmatprep.mubr.bf16.mxu1 %v3026_v50  ;;  %v3538_v18 = vld [vmem:[%s4239_s28 + $0x3b8] sm:$0xff]  }
 0x127   : > { %3257 = vmatpush3.bf16.msra.mxu0 %v3477_v19  ;;  %v1409_v19 = vld [vmem:[%s4219_s7 + $0x30] sm:$0xff] }
 0x128   : > { %3279 = vmatpush3.bf16.msra.mxu1 %v3478_v20  ;;  %3258 = vmatprep.subr.bf16.mxu0 %v3479_v21  ;;  %v1410_v20 = vld [vmem:[%s4219_s7 + $0x38] sm:$0xff]  ;;  %v3027_v21 = vcombine.low %v1409_v19, %v1409_v19 }
 0x129   : > { %3280 = vmatprep.subr.bf16.mxu1 %v3480_v22  ;;  %v3028_v22 = vcombine.high %v1409_v19, %v1409_v19 }
 0x12b   : > { %3259 = vmatpush3.bf16.msra.mxu0 %v3481_v23  ;;  %v3029_v23 = vcombine.low %v1410_v20, %v1410_v20 }
 0x12c   : > { %3281 = vmatpush3.bf16.msra.mxu1 %v3482_v24  ;;  %3260 = vmatprep.subr.bf16.mxu0 %v3483_v25  ;;  %v3030_v24 = vcombine.high %v1410_v20, %v1410_v20 }
 0x12d   : > { %3282 = vmatprep.subr.bf16.mxu1 %v3484_v26 }
 0x12f   : > { %3261 = vmatpush3.bf16.msra.mxu0 %v3485_v27 }
 0x130   : > { %3283 = vmatpush3.bf16.msra.mxu1 %v3486_v28  ;;  %3262 = vmatprep.subr.bf16.mxu0 %v3487_v29 }
 0x131   : > { %3284 = vmatprep.subr.bf16.mxu1 %v3488_v30 }
 0x133   : > { %3263 = vmatpush3.bf16.msra.mxu0 %v3489_v31 }
 0x134   : > { %3285 = vmatpush3.bf16.msra.mxu1 %v3490_v32  ;;  %3264 = vmatprep.subr.bf16.mxu0 %v3491_v33 }
 0x135   : > { %3286 = vmatprep.subr.bf16.mxu1 %v3492_v34 }
 0x137   : > { %3265 = vmatpush3.bf16.msra.mxu0 %v3493_v35 }
 0x138   : > { %3287 = vmatpush3.bf16.msra.mxu1 %v3494_v36  ;;  %3266 = vmatprep.subr.bf16.mxu0 %v3495_v37 }
 0x139   : > { %3288 = vmatprep.subr.bf16.mxu1 %v3496_v38 }
 0x13b   : > { %3267 = vmatpush3.bf16.msra.mxu0 %v3497_v39 }
 0x13c   : > { %3289 = vmatpush3.bf16.msra.mxu1 %v3498_v40  ;;  %3268 = vmatprep.subr.bf16.mxu0 %v3499_v41 }
 0x13d   : > { %3290 = vmatprep.subr.bf16.mxu1 %v3500_v42 }
 0x13f   : > { %3269 = vmatpush3.bf16.msra.mxu0 %v3501_v43 }
 0x140   : > { %3291 = vmatpush3.bf16.msra.mxu1 %v3502_v44  ;;  %3298 = vmatprep.subr.bf16.mxu0 %v3507_v51 }
 0x141   : > { %3320 = vmatprep.subr.bf16.mxu1 %v3508_v52 }
 0x142   : > { %2685 = vmatmul.mubr.bf16.vlgmr.msra.gmra.mrb[8].mxu0 %v3023_v47 }
 0x143   : > { %2725 = vmatmul.mubr.bf16.vlgmr.msra.gmra.mrb[8].mxu1 %v3025_v49  ;;  %3299 = vmatpush3.bf16.msra.mxu0 %v3509_v53 }
 0x144   : > { %3321 = vmatpush3.bf16.msra.mxu1 %v3510_v54  ;;  %3300 = vmatprep.subr.bf16.mxu0 %v3511_v55 }
 0x145   : > { %3322 = vmatprep.subr.bf16.mxu1 %v3512_v56  ;;  %2764 = vmatprep.mubr.bf16.mxu0 %v3028_v22 }
 0x146   : > { %2804 = vmatprep.mubr.bf16.mxu1 %v3030_v24 }
 0x147   : > { %3301 = vmatpush3.bf16.msra.mxu0 %v3513_v57 }
 0x148   : > { %3323 = vmatpush3.bf16.msra.mxu1 %v3514_v58  ;;  %3302 = vmatprep.subr.bf16.mxu0 %v3515_v59 }
 0x149   : > { %3324 = vmatprep.subr.bf16.mxu1 %v3516_v60 }
 0x14b   : > { %3303 = vmatpush3.bf16.msra.mxu0 %v3517_v61 }
 0x14c   : > { %3325 = vmatpush3.bf16.msra.mxu1 %v3518_v62  ;;  %3304 = vmatprep.subr.bf16.mxu0 %v3519_v63 }
 0x14d   : > { %3326 = vmatprep.subr.bf16.mxu1 %v3520_v0 }
 0x14f   : > { %3305 = vmatpush3.bf16.msra.mxu0 %v3521_v1 }
 0x150   : > { %3327 = vmatpush3.bf16.msra.mxu1 %v3522_v2  ;;  %3306 = vmatprep.subr.bf16.mxu0 %v3523_v3 }
 0x151   : > { %3328 = vmatprep.subr.bf16.mxu1 %v3524_v4 }
 0x153   : > { %3307 = vmatpush3.bf16.msra.mxu0 %v3525_v5 }
 0x154   : > { %3329 = vmatpush3.bf16.msra.mxu1 %v3526_v6  ;;  %3308 = vmatprep.subr.bf16.mxu0 %v3527_v7  ;;  %v1667_v7 = vld [vmem:[#allocation2] sm:$0xff] }
 0x155   : > { %3330 = vmatprep.subr.bf16.mxu1 %v3528_v8 }
 0x157   : > { %3309 = vmatpush3.bf16.msra.mxu0 %v3529_v9 }
 0x158   : > { %3331 = vmatpush3.bf16.msra.mxu1 %v3530_v10  ;;  %3310 = vmatprep.subr.bf16.mxu0 %v3531_v11  ;;  %v3160_v11 = vld [vmem:[%s1382_s18] ss:$0 sm:$0xff] (!%p3159_p13) }
 0x159   : > { %3332 = vmatprep.subr.bf16.mxu1 %v3532_v12 }
 0x15b   : > { %3311 = vmatpush3.bf16.msra.mxu0 %v3533_v13 }
 0x15c   : > { %3333 = vmatpush3.bf16.msra.mxu1 %v3534_v14  ;;  %3312 = vmatprep.subr.bf16.mxu0 %v3535_v15 }
 0x15d   : > { %3334 = vmatprep.subr.bf16.mxu1 %v3536_v16 }
 0x15f   : > { %3313 = vmatpush3.bf16.msra.mxu0 %v3537_v17 }
 0x160   : > { %3335 = vmatpush3.bf16.msra.mxu1 %v3538_v18 }
 0x162   : > { %2765 = vmatmul.mubr.bf16.vlgmr.msra.gmra.mrb[12].mxu0 %v3027_v21 }
 0x163   : > { %2805 = vmatmul.mubr.bf16.vlgmr.msra.gmra.mrb[12].mxu1 %v3029_v23 }
 0x1d5   : > { %v3182_v25 = vpop.f32.mrb[0].mxu0 }
 0x1d6   : > { %v3204_v26 = vpop.f32.mrb[0].mxu1  ;;  %v3183_v27 = vpop.f32.mrb[1].mxu0 }
 0x1d7   : > { %v3205_v28 = vpop.f32.mrb[1].mxu1  ;;  %v3184_v29 = vadd.f32 %v3183_v27, %v3182_v25  ;;  %v3185_v31 = vpop.f32.mrb[2].mxu0 }
 0x1d8   : > { %v3206_v30 = vadd.f32 %v3205_v28, %v3204_v26  ;;  %v3207_v32 = vpop.f32.mrb[2].mxu1  ;;  %v3186_v33 = vpop.f32.mrb[3].mxu0  ;;  %v3161_v31 = vld [vmem:[%s1385_s12] ss:$0 sm:$0xff] (!%p3159_p13) }
 0x1d9   : > { %v3208_v34 = vpop.f32.mrb[3].mxu1  ;;  %v3162_v33 = vld [vmem:[%s1388_s15] ss:$0 sm:$0xff] (!%p3159_p13) }
 0x1da   : > { %v2567_v35 = vadd.f32 %v3206_v30, %v3184_v29 }
 0x1f5   : > { %v3226_v36 = vpop.f32.mrb[4].mxu0 }
 0x1f6   : > { %v3248_v37 = vpop.f32.mrb[4].mxu1  ;;  %v3227_v38 = vpop.f32.mrb[5].mxu0 }
 0x1f7   : > { %v3249_v39 = vpop.f32.mrb[5].mxu1  ;;  %v3228_v40 = vadd.f32 %v3227_v38, %v3226_v36  ;;  %v3229_v42 = vpop.f32.mrb[6].mxu0 }
 0x1f8   : > { %v3250_v41 = vadd.f32 %v3249_v39, %v3248_v37  ;;  %v3251_v43 = vpop.f32.mrb[6].mxu1  ;;  %v3230_v44 = vpop.f32.mrb[7].mxu0 }
 0x1f9   : > { %v3252_v45 = vpop.f32.mrb[7].mxu1  ;;  %v2607_v46 = vadd.f32 %v3228_v40, %v2567_v35 }
 0x1fb   : > { %v2647_v47 = vadd.f32 %v3250_v41, %v2607_v46 }
 0x215   : > { %v3270_v48 = vpop.f32.mrb[8].mxu0 }
 0x216   : > { %v3292_v49 = vpop.f32.mrb[8].mxu1  ;;  %v3271_v50 = vpop.f32.mrb[9].mxu0 }
 0x217   : > { %v3272_v51 = vadd.f32 %v3271_v50, %v3270_v48  ;;  %v3293_v52 = vpop.f32.mrb[9].mxu1  ;;  %v3273_v53 = vpop.f32.mrb[10].mxu0 }
 0x218   : > { %v3294_v54 = vadd.f32 %v3293_v52, %v3292_v49  ;;  %v3295_v55 = vpop.f32.mrb[10].mxu1  ;;  %v3274_v56 = vpop.f32.mrb[11].mxu0 }
 0x219   : > { %v2687_v57 = vadd.f32 %v3272_v51, %v2647_v47  ;;  %v3296_v58 = vpop.f32.mrb[11].mxu1 }
 0x21b   : > { %v2727_v59 = vadd.f32 %v3294_v54, %v2687_v57 }
 0x235   : > { %v3314_v60 = vpop.f32.mrb[12].mxu0 }
 0x236   : > { %v3336_v61 = vpop.f32.mrb[12].mxu1  ;;  %v3315_v62 = vpop.f32.mrb[13].mxu0 }
 0x237   : > { %v3316_v63 = vadd.f32 %v3315_v62, %v3314_v60  ;;  %v3337_v0 = vpop.f32.mrb[13].mxu1  ;;  %v3317_v1 = vpop.f32.mrb[14].mxu0 }
 0x238   : > { %v3338_v2 = vadd.f32 %v3337_v0, %v3336_v61  ;;  %v3339_v3 = vpop.f32.mrb[14].mxu1  ;;  %v3318_v4 = vpop.f32.mrb[15].mxu0 }
 0x239   : > { %v2767_v5 = vadd.f32 %v3316_v63, %v2727_v59  ;;  %v3340_v6 = vpop.f32.mrb[15].mxu1  ;;  %2817 = sbr.rel (%p3159_p13) target bundleno = 639 (0x27f), region = 89 }
 0x23b   : > { %v2807_v8 = vadd.f32 %v3338_v2, %v2767_v5 }
 0x23d   : > { %v2812_v9 = vadd.f32 %v2807_v8, %v1667_v7 }
 0x23f   : > { %2813 = vst [vmem:[#allocation2] sm:$0xff] %v2812_v9 }
 0x246   : > { %v2818_v10 = vld [vmem:[#allocation2] sm:$0xff] }
 0x247   : > { %v2826_v12 = vadd.f32 %v3160_v11, %v2818_v10 }
 0x249   : > { %v2827_v13 = vrot.slane %v2826_v12, 4 }
 0x24b   : > { %v2828_v14 = vadd.f32 %v2827_v13, %v2826_v12 }
 0x24d   : > { %v2829_v15 = vrot.slane %v2828_v14, 2 }
 0x24f   : > { %v2830_v16 = vadd.f32 %v2829_v15, %v2828_v14 }
 0x251   : > { %v2831_v17 = vrot.slane %v2830_v16, 1 }
 0x253   : > { %v2832_v18 = vadd.f32 %v2831_v17, %v2830_v16 }
 0x255   : > { %v2834_v19 = vmul.f32 0.125, %v2832_v18 }
 0x257   : > { %v2835_v20 = vsub.f32 %v2826_v12, %v2834_v19 }
 0x259   : > { %v2836_v21 = vmul.f32 %v2835_v20, %v2835_v20 }
 0x25b   : > { %v2837_v22 = vrot.slane %v2836_v21, 4 }
 0x25d   : > { %v2838_v23 = vadd.f32 %v2837_v22, %v2836_v21 }
 0x25f   : > { %v2839_v24 = vrot.slane %v2838_v23, 2 }
 0x261   : > { %v2840_v25 = vadd.f32 %v2839_v24, %v2838_v23 }
 0x263   : > { %v2841_v26 = vrot.slane %v2840_v25, 1 }
 0x265   : > { %v2842_v27 = vadd.f32 %v2841_v26, %v2840_v25 }
 0x267   : > { %v2843_v28 = vmul.f32 0.125, %v2842_v27 }
 0x269   : > { %v2844_v29 = vadd.f32 1e-05, %v2843_v28 }
 0x26b   : > { %3543 = vrsqrt.f32 %v2844_v29 }
 0x275   : > { %v3544_v30 = vpop.eup %3543 }
 0x276   : > { %v2846_v32 = vmul.f32 %v3544_v30, %v2835_v20 }
 0x278   : > { %v2854_v34 = vmul.f32 %v3161_v31, %v2846_v32 }
 0x27a   : > { %v2862_v35 = vadd.f32 %v3162_v33, %v2854_v34 }
 0x27c   : > { %v2863_v36 = vpack.c.bf16 %v2862_v35, %v2862_v35 }
 0x27e   : > { %2864 = vst [vmem:[%s4237_s26] sm:$0xf] %v2863_v36 }
 0x27f PF: > { %s15_s24 = sadd.s32 1, %s3599_s24   ;;  %s4426_s8 = sld [smem:[#allocation4_spill]] }
 0x280   : > { %p12_p0 = scmp.ge.s32.totalorder %s15_s24, 6   ;;  %s4427_s18 = smov %s3579_s19 }
 0x281   : > { %s4428_s19 = smov %s3683_s6  ;;  %s4429_s20 = smov %s3591_s22 }
 0x282   : > { %s4430_s21 = smov %s3595_s23  ;;  %s4431_s22 = smov %s4434_s25 }
 0x283   :  { %14 = sbr.rel (!%p12_p0) target bundleno = 6 (0x6), region = 136 }
 0x285   : > { %s4432_s23 = smov %s4426_s8 }

// kernel: apnet_forward.13
= control target key start
LH: loop header
LB: loop body
LE: loop exit
PB: predicated region body
PF: predicated region fallthrough
CT: control target
= control target key end

     0   :  { %s1624_s18 = smov 0   ;;  %s1626_s19 = smov 0   ;;  %s1931_s0 = inlined_call_operand.vmem [shape: bf16[8,256], index: 0, kind: input, shape index: {}]   ;;  %s1932_s1 = inlined_call_operand.vmem [shape: bf16[256,4096], index: 1, kind: input, shape index: {}]   ;;  %s1933_s2 = inlined_call_operand.vmem [shape: f32[1,4096], index: 2, kind: input, shape index: {}]   ;;  %s1934_s3 = inlined_call_operand.vmem [shape: f32[1,4096], index: 3, kind: input, shape index: {}]   ;;  %s1935_s4 = inlined_call_operand.vmem [shape: f32[1,4096], index: 4, kind: input, shape index: {}]   ;;  %s1936_s5 = inlined_call_operand.vmem [shape: bf16[8,4096], index: 5, kind: output, shape index: {}]  }
   0x1   :  { %s1628_s20 = smov 0   ;;  %s1630_s21 = smov 0  }
   0x2   :  { %s1632_s22 = smov 0  }
   0x3 LB: > { %s30_s23 = sadd.s32 1, %s1588_s21  ;;  %p78_p1 = scmp.ne.s32.totalorder %s1580_s19, %s1576_s18  ;;  %s1592_s22 = sphi %s1632_s22, %s15_s22   ;;  %s1588_s21 = sphi %s1630_s21, %s1940_s21   ;;  %s1584_s20 = sphi %s1628_s20, %s1939_s20   ;;  %s1580_s19 = sphi %s1626_s19, %s1938_s19   ;;  %s1576_s18 = sphi %s1624_s18, %s1937_s18  }
   0x4   : > { %p32_p0 = scmp.ge.s32.totalorder %s30_s23, 8  ;;  %p79_p2 = scmp.eq.s32.totalorder %s1592_s22, 0 }
   0x5   : > { %s71_s25 = sadd.s32 1, %s1580_s19  ;;  %p1324_p5 = scmp.ge.s32.totalorder %s1592_s22, 8 }
   0x6   : > { %s1942_s23 = smov (%p32_p0, %s30_s23), 0  ;;  %p80_p3 = por %p79_p2, %p78_p1 }
   0x7   : > { %s67_s24 = ssub.s32 %s1588_s21, %s1942_s23  ;;  %223 = sbr.rel (%p1324_p5) target bundleno = 50 (0x32), region = 20 }
   0x8   : > { %p69_p4 = scmp.eq.s32.totalorder %s67_s24, 0 }
   0xa   : > { %s1659_s26 = scalar_select %p69_p4, %s1580_s19, %s71_s25  }
   0xe   : > { %226 = sbr.rel (!%p80_p3) target bundleno = 50 (0x32), region = 24  ;;  %s228_s27 = sand.u32 (%p80_p3), 1, %s1580_s19  }
   0xf   : > { %s1405_s28 = sshll.u32 (%p80_p3), %s1588_s21, 4  ;;  %s1325_s29 = sshll.u32 (%p80_p3), %s228_s27, 9 }
  0x10   : > { %s1667_s7 = scalar_lea.vmem (%p80_p3), %s1932_s1, %s1405_s28  ;;  %s1672_s8 = scalar_lea.vmem (%p80_p3), [#allocation3], %s1325_s29 }
  0x11   : > { %v249_v0 = vld [vmem:[%s1667_s7] sm:$0xff] (%p80_p3)  ;;  %v251_v1 = vld [vmem:[%s1667_s7 + $0x8] sm:$0xff] (%p80_p3) }
  0x12   : > { %v253_v2 = vld [vmem:[%s1667_s7 + $0x80] sm:$0xff] (%p80_p3)  ;;  %250 = vst [vmem:[%s1672_s8] sm:$0xff] (%p80_p3), %v249_v0  ;;  %252 = vst [vmem:[%s1672_s8 + $0x8] sm:$0xff] (%p80_p3), %v251_v1  ;;  %v255_v3 = vld [vmem:[%s1667_s7 + $0x88] sm:$0xff] (%p80_p3) }
  0x13   : > { %254 = vst [vmem:[%s1672_s8 + $0x10] sm:$0xff] (%p80_p3), %v253_v2  ;;  %v257_v4 = vld [vmem:[%s1667_s7 + $0x100] sm:$0xff] (%p80_p3)  ;;  %v259_v5 = vld [vmem:[%s1667_s7 + $0x108] sm:$0xff] (%p80_p3)  ;;  %256 = vst [vmem:[%s1672_s8 + $0x18] sm:$0xff] (%p80_p3), %v255_v3 }
  0x14   : > { %258 = vst [vmem:[%s1672_s8 + $0x20] sm:$0xff] (%p80_p3), %v257_v4  ;;  %260 = vst [vmem:[%s1672_s8 + $0x28] sm:$0xff] (%p80_p3), %v259_v5  ;;  %v261_v6 = vld [vmem:[%s1667_s7 + $0x180] sm:$0xff] (%p80_p3)  ;;  %v263_v7 = vld [vmem:[%s1667_s7 + $0x188] sm:$0xff] (%p80_p3) }
  0x15   : > { %v265_v8 = vld [vmem:[%s1667_s7 + $0x200] sm:$0xff]  ;;  %262 = vst [vmem:[%s1672_s8 + $0x30] sm:$0xff] %v261_v6  ;;  %264 = vst [vmem:[%s1672_s8 + $0x38] sm:$0xff] %v263_v7  ;;  %v267_v9 = vld [vmem:[%s1667_s7 + $0x208] sm:$0xff] }
  0x16   : > { %266 = vst [vmem:[%s1672_s8 + $0x40] sm:$0xff] %v265_v8  ;;  %v269_v10 = vld [vmem:[%s1667_s7 + $0x280] sm:$0xff]  ;;  %v271_v11 = vld [vmem:[%s1667_s7 + $0x288] sm:$0xff]  ;;  %268 = vst [vmem:[%s1672_s8 + $0x48] sm:$0xff] %v267_v9 }
  0x17   : > { %270 = vst [vmem:[%s1672_s8 + $0x50] sm:$0xff] %v269_v10  ;;  %272 = vst [vmem:[%s1672_s8 + $0x58] sm:$0xff] %v271_v11  ;;  %v273_v12 = vld [vmem:[%s1667_s7 + $0x300] sm:$0xff]  ;;  %v275_v13 = vld [vmem:[%s1667_s7 + $0x308] sm:$0xff] }
  0x18   : > { %v277_v14 = vld [vmem:[%s1667_s7 + $0x380] sm:$0xff]  ;;  %274 = vst [vmem:[%s1672_s8 + $0x60] sm:$0xff] %v273_v12  ;;  %276 = vst [vmem:[%s1672_s8 + $0x68] sm:$0xff] %v275_v13  ;;  %v279_v15 = vld [vmem:[%s1667_s7 + $0x388] sm:$0xff] }
  0x19   : > { %278 = vst [vmem:[%s1672_s8 + $0x70] sm:$0xff] %v277_v14  ;;  %v281_v16 = vld [vmem:[%s1667_s7 + $0x400] sm:$0xff]  ;;  %v283_v17 = vld [vmem:[%s1667_s7 + $0x408] sm:$0xff]  ;;  %280 = vst [vmem:[%s1672_s8 + $0x78] sm:$0xff] %v279_v15 }
  0x1a   : > { %282 = vst [vmem:[%s1672_s8 + $0x80] sm:$0xff] %v281_v16  ;;  %284 = vst [vmem:[%s1672_s8 + $0x88] sm:$0xff] %v283_v17  ;;  %v285_v18 = vld [vmem:[%s1667_s7 + $0x480] sm:$0xff]  ;;  %v287_v19 = vld [vmem:[%s1667_s7 + $0x488] sm:$0xff] }
  0x1b   : > { %v289_v20 = vld [vmem:[%s1667_s7 + $0x500] sm:$0xff]  ;;  %286 = vst [vmem:[%s1672_s8 + $0x90] sm:$0xff] %v285_v18  ;;  %288 = vst [vmem:[%s1672_s8 + $0x98] sm:$0xff] %v287_v19  ;;  %v291_v21 = vld [vmem:[%s1667_s7 + $0x508] sm:$0xff] }
  0x1c   : > { %290 = vst [vmem:[%s1672_s8 + $0xa0] sm:$0xff] %v289_v20  ;;  %v293_v22 = vld [vmem:[%s1667_s7 + $0x580] sm:$0xff]  ;;  %v295_v23 = vld [vmem:[%s1667_s7 + $0x588] sm:$0xff]  ;;  %292 = vst [vmem:[%s1672_s8 + $0xa8] sm:$0xff] %v291_v21 }
  0x1d   : > { %294 = vst [vmem:[%s1672_s8 + $0xb0] sm:$0xff] %v293_v22  ;;  %296 = vst [vmem:[%s1672_s8 + $0xb8] sm:$0xff] %v295_v23  ;;  %v297_v24 = vld [vmem:[%s1667_s7 + $0x600] sm:$0xff]  ;;  %v299_v25 = vld [vmem:[%s1667_s7 + $0x608] sm:$0xff] }
  0x1e   : > { %v301_v26 = vld [vmem:[%s1667_s7 + $0x680] sm:$0xff]  ;;  %298 = vst [vmem:[%s1672_s8 + $0xc0] sm:$0xff] %v297_v24  ;;  %300 = vst [vmem:[%s1672_s8 + $0xc8] sm:$0xff] %v299_v25  ;;  %v303_v27 = vld [vmem:[%s1667_s7 + $0x688] sm:$0xff] }
  0x1f   : > { %302 = vst [vmem:[%s1672_s8 + $0xd0] sm:$0xff] %v301_v26  ;;  %v305_v28 = vld [vmem:[%s1667_s7 + $0x700] sm:$0xff]  ;;  %v307_v29 = vld [vmem:[%s1667_s7 + $0x708] sm:$0xff]  ;;  %304 = vst [vmem:[%s1672_s8 + $0xd8] sm:$0xff] %v303_v27 }
  0x20   : > { %306 = vst [vmem:[%s1672_s8 + $0xe0] sm:$0xff] %v305_v28  ;;  %308 = vst [vmem:[%s1672_s8 + $0xe8] sm:$0xff] %v307_v29  ;;  %v309_v30 = vld [vmem:[%s1667_s7 + $0x780] sm:$0xff]  ;;  %v311_v31 = vld [vmem:[%s1667_s7 + $0x788] sm:$0xff] }
  0x21   : > { %v313_v32 = vld [vmem:[%s1667_s7 + $0x800] sm:$0xff]  ;;  %310 = vst [vmem:[%s1672_s8 + $0xf0] sm:$0xff] %v309_v30  ;;  %312 = vst [vmem:[%s1672_s8 + $0xf8] sm:$0xff] %v311_v31  ;;  %v315_v33 = vld [vmem:[%s1667_s7 + $0x808] sm:$0xff] }
  0x22   : > { %314 = vst [vmem:[%s1672_s8 + $0x100] sm:$0xff] %v313_v32  ;;  %v317_v34 = vld [vmem:[%s1667_s7 + $0x880] sm:$0xff]  ;;  %v319_v35 = vld [vmem:[%s1667_s7 + $0x888] sm:$0xff]  ;;  %316 = vst [vmem:[%s1672_s8 + $0x108] sm:$0xff] %v315_v33 }
  0x23   : > { %318 = vst [vmem:[%s1672_s8 + $0x110] sm:$0xff] %v317_v34  ;;  %320 = vst [vmem:[%s1672_s8 + $0x118] sm:$0xff] %v319_v35  ;;  %v321_v36 = vld [vmem:[%s1667_s7 + $0x900] sm:$0xff]  ;;  %v323_v37 = vld [vmem:[%s1667_s7 + $0x908] sm:$0xff] }
  0x24   : > { %v325_v38 = vld [vmem:[%s1667_s7 + $0x980] sm:$0xff]  ;;  %322 = vst [vmem:[%s1672_s8 + $0x120] sm:$0xff] %v321_v36  ;;  %324 = vst [vmem:[%s1672_s8 + $0x128] sm:$0xff] %v323_v37  ;;  %v327_v39 = vld [vmem:[%s1667_s7 + $0x988] sm:$0xff] }
  0x25   : > { %326 = vst [vmem:[%s1672_s8 + $0x130] sm:$0xff] %v325_v38  ;;  %v329_v40 = vld [vmem:[%s1667_s7 + $0xa00] sm:$0xff]  ;;  %v331_v41 = vld [vmem:[%s1667_s7 + $0xa08] sm:$0xff]  ;;  %328 = vst [vmem:[%s1672_s8 + $0x138] sm:$0xff] %v327_v39 }
  0x26   : > { %330 = vst [vmem:[%s1672_s8 + $0x140] sm:$0xff] %v329_v40  ;;  %332 = vst [vmem:[%s1672_s8 + $0x148] sm:$0xff] %v331_v41  ;;  %v333_v42 = vld [vmem:[%s1667_s7 + $0xa80] sm:$0xff]  ;;  %v335_v43 = vld [vmem:[%s1667_s7 + $0xa88] sm:$0xff] }
  0x27   : > { %v337_v44 = vld [vmem:[%s1667_s7 + $0xb00] sm:$0xff]  ;;  %334 = vst [vmem:[%s1672_s8 + $0x150] sm:$0xff] %v333_v42  ;;  %336 = vst [vmem:[%s1672_s8 + $0x158] sm:$0xff] %v335_v43  ;;  %v339_v45 = vld [vmem:[%s1667_s7 + $0xb08] sm:$0xff] }
  0x28   : > { %338 = vst [vmem:[%s1672_s8 + $0x160] sm:$0xff] %v337_v44  ;;  %v341_v46 = vld [vmem:[%s1667_s7 + $0xb80] sm:$0xff]  ;;  %v343_v47 = vld [vmem:[%s1667_s7 + $0xb88] sm:$0xff]  ;;  %340 = vst [vmem:[%s1672_s8 + $0x168] sm:$0xff] %v339_v45 }
  0x29   : > { %342 = vst [vmem:[%s1672_s8 + $0x170] sm:$0xff] %v341_v46  ;;  %344 = vst [vmem:[%s1672_s8 + $0x178] sm:$0xff] %v343_v47  ;;  %v345_v48 = vld [vmem:[%s1667_s7 + $0xc00] sm:$0xff]  ;;  %v347_v49 = vld [vmem:[%s1667_s7 + $0xc08] sm:$0xff] }
  0x2a   : > { %v349_v50 = vld [vmem:[%s1667_s7 + $0xc80] sm:$0xff]  ;;  %346 = vst [vmem:[%s1672_s8 + $0x180] sm:$0xff] %v345_v48  ;;  %348 = vst [vmem:[%s1672_s8 + $0x188] sm:$0xff] %v347_v49  ;;  %v351_v51 = vld [vmem:[%s1667_s7 + $0xc88] sm:$0xff] }
  0x2b   : > { %350 = vst [vmem:[%s1672_s8 + $0x190] sm:$0xff] %v349_v50  ;;  %v353_v52 = vld [vmem:[%s1667_s7 + $0xd00] sm:$0xff]  ;;  %v355_v53 = vld [vmem:[%s1667_s7 + $0xd08] sm:$0xff]  ;;  %352 = vst [vmem:[%s1672_s8 + $0x198] sm:$0xff] %v351_v51 }
  0x2c   : > { %354 = vst [vmem:[%s1672_s8 + $0x1a0] sm:$0xff] %v353_v52  ;;  %356 = vst [vmem:[%s1672_s8 + $0x1a8] sm:$0xff] %v355_v53  ;;  %v357_v54 = vld [vmem:[%s1667_s7 + $0xd80] sm:$0xff]  ;;  %v359_v55 = vld [vmem:[%s1667_s7 + $0xd88] sm:$0xff] }
  0x2d   : > { %v361_v56 = vld [vmem:[%s1667_s7 + $0xe00] sm:$0xff]  ;;  %358 = vst [vmem:[%s1672_s8 + $0x1b0] sm:$0xff] %v357_v54  ;;  %360 = vst [vmem:[%s1672_s8 + $0x1b8] sm:$0xff] %v359_v55  ;;  %v363_v57 = vld [vmem:[%s1667_s7 + $0xe08] sm:$0xff] }
  0x2e   : > { %362 = vst [vmem:[%s1672_s8 + $0x1c0] sm:$0xff] %v361_v56  ;;  %v365_v58 = vld [vmem:[%s1667_s7 + $0xe80] sm:$0xff]  ;;  %v367_v59 = vld [vmem:[%s1667_s7 + $0xe88] sm:$0xff]  ;;  %364 = vst [vmem:[%s1672_s8 + $0x1c8] sm:$0xff] %v363_v57 }
  0x2f   : > { %366 = vst [vmem:[%s1672_s8 + $0x1d0] sm:$0xff] %v365_v58  ;;  %368 = vst [vmem:[%s1672_s8 + $0x1d8] sm:$0xff] %v367_v59  ;;  %v369_v60 = vld [vmem:[%s1667_s7 + $0xf00] sm:$0xff]  ;;  %v371_v61 = vld [vmem:[%s1667_s7 + $0xf08] sm:$0xff] }
  0x30   : > { %v373_v62 = vld [vmem:[%s1667_s7 + $0xf80] sm:$0xff]  ;;  %370 = vst [vmem:[%s1672_s8 + $0x1e0] sm:$0xff] %v369_v60  ;;  %372 = vst [vmem:[%s1672_s8 + $0x1e8] sm:$0xff] %v371_v61  ;;  %v375_v63 = vld [vmem:[%s1667_s7 + $0xf88] sm:$0xff] }
  0x31   : > { %374 = vst [vmem:[%s1672_s8 + $0x1f0] sm:$0xff] %v373_v62  ;;  %376 = vst [vmem:[%s1672_s8 + $0x1f8] sm:$0xff] %v375_v63 }
  0x32 PF: > { %p1328_p6 = scmp.ge.s32.totalorder %s1592_s22, 1  ;;  %p405_p7 = scmp.lt.s32.totalorder %s1592_s22, 9 }
  0x34   : > { %p406_p8 = pnand %p1328_p6, %p405_p7 }
  0x35   : > { %s412_s9 = sand.u32 (!%p406_p8), 1, %s1576_s18   ;;  %v1805_v0 = vld [vmem:[%s1931_s0] sm:$0xff] (!%p406_p8)  ;;  %s1330_s14 = sshll.u32 (!%p406_p8), %s1584_s20, 2 }
  0x36   : > { %409 = sbr.rel (%p406_p8) target bundleno = 394 (0x18a), region = 59  ;;  %s1329_s12 = sshll.u32 (!%p406_p8), %s412_s9, 9  ;;  %v1336_v1 = vcombine.high (!%p406_p8), %v1805_v0, %v1805_v0 }
  0x37   : > { %s1809_s13 = scalar_lea.vmem (!%p406_p8), [#allocation3], %s1329_s12  ;;  %p477_p9 = scmp.lt.s32.totalorder (!%p406_p8), %s1330_s14, 31 }
  0x38   : > { %v1448_v2 = vld [vmem:[%s1809_s13 + $0x4] ss:$16 sps:$4 sm:$0xff] (!%p406_p8)   ;;  %937 = vmatprep.mubr.bf16.mxu0 (!%p406_p8), %v1336_v1  ;;  %978 = vmatprep.mubr.bf16.mxu1 (!%p406_p8), %v1336_v1  ;;  %v1450_v3 = vld [vmem:[%s1809_s13 + $0xc] ss:$16 sps:$4 sm:$0xff] (!%p406_p8)   ;;  %v1452_v4 = vld [vmem:[%s1809_s13] ss:$16 sps:$4 sm:$0xff] (!%p406_p8)  }
  0x39   : > { %905 = vmatprep.subr.bf16.mxu0 (!%p406_p8), %v1448_v2  ;;  %v1453_v5 = vld [vmem:[%s1809_s13 + $0x8] ss:$16 sps:$4 sm:$0xff] (!%p406_p8)   ;;  %946 = vmatprep.subr.bf16.mxu1 (!%p406_p8), %v1450_v3  ;;  %v1454_v6 = vld [vmem:[%s1809_s13 + $0x24] ss:$16 sps:$4 sm:$0xff] (!%p406_p8)   ;;  %v1456_v7 = vld [vmem:[%s1809_s13 + $0x2c] ss:$16 sps:$4 sm:$0xff] (!%p406_p8)   ;;  %v1335_v3 = vcombine.low (!%p406_p8), %v1805_v0, %v1805_v0 }
  0x3a   : > { %906 = vmatpush1.bf16.msra.mxu0 (!%p406_p8), %v1452_v4  ;;  %947 = vmatpush1.bf16.msra.mxu1 (!%p406_p8), %v1453_v5  ;;  %v1458_v8 = vld [vmem:[%s1809_s13 + $0x20] ss:$16 sps:$4 sm:$0xff] (!%p406_p8)   ;;  %v1459_v9 = vld [vmem:[%s1809_s13 + $0x28] ss:$16 sps:$4 sm:$0xff] (!%p406_p8)   ;;  %v1460_v10 = vld [vmem:[%s1809_s13 + $0x44] ss:$16 sps:$4 sm:$0xff] (!%p406_p8)   ;;  %v1004_v4 = vlaneseq (!%p406_p8) }
  0x3b   : > { %907 = vmatprep.subr.bf16.mxu0 (!%p406_p8), %v1454_v6  ;;  %948 = vmatprep.subr.bf16.mxu1 (!%p406_p8), %v1456_v7  ;;  %v1462_v11 = vld [vmem:[%s1809_s13 + $0x4c] ss:$16 sps:$4 sm:$0xff] (!%p406_p8)   ;;  %v1464_v12 = vld [vmem:[%s1809_s13 + $0x40] ss:$16 sps:$4 sm:$0xff] (!%p406_p8)   ;;  %v1465_v13 = vld [vmem:[%s1809_s13 + $0x48] ss:$16 sps:$4 sm:$0xff] (!%p406_p8)  }
  0x3c   : > { %v1466_v14 = vld [vmem:[%s1809_s13 + $0x64] ss:$16 sps:$4 sm:$0xff] (!%p406_p8)   ;;  %v1468_v15 = vld [vmem:[%s1809_s13 + $0x6c] ss:$16 sps:$4 sm:$0xff] (!%p406_p8)   ;;  %v1470_v16 = vld [vmem:[%s1809_s13 + $0x60] ss:$16 sps:$4 sm:$0xff] (!%p406_p8)  }
  0x3d   : > { %v1471_v17 = vld [vmem:[%s1809_s13 + $0x68] ss:$16 sps:$4 sm:$0xff]   ;;  %v1472_v18 = vld [vmem:[%s1809_s13 + $0x84] ss:$16 sps:$4 sm:$0xff]   ;;  %v1474_v19 = vld [vmem:[%s1809_s13 + $0x8c] ss:$16 sps:$4 sm:$0xff]  }
  0x3e   : > { %908 = vmatpush1.bf16.msra.mxu0 %v1458_v8  ;;  %949 = vmatpush1.bf16.msra.mxu1 %v1459_v9  ;;  %v1476_v20 = vld [vmem:[%s1809_s13 + $0x80] ss:$16 sps:$4 sm:$0xff]   ;;  %v1477_v21 = vld [vmem:[%s1809_s13 + $0x88] ss:$16 sps:$4 sm:$0xff]   ;;  %v1478_v22 = vld [vmem:[%s1809_s13 + $0xa4] ss:$16 sps:$4 sm:$0xff]  }
  0x3f   : > { %909 = vmatprep.subr.bf16.mxu0 %v1460_v10  ;;  %950 = vmatprep.subr.bf16.mxu1 %v1462_v11  ;;  %v1480_v23 = vld [vmem:[%s1809_s13 + $0xac] ss:$16 sps:$4 sm:$0xff]   ;;  %v1482_v24 = vld [vmem:[%s1809_s13 + $0xa0] ss:$16 sps:$4 sm:$0xff]   ;;  %v1483_v25 = vld [vmem:[%s1809_s13 + $0xa8] ss:$16 sps:$4 sm:$0xff]  }
  0x40   : > { %v1484_v26 = vld [vmem:[%s1809_s13 + $0xc4] ss:$16 sps:$4 sm:$0xff]   ;;  %v1486_v27 = vld [vmem:[%s1809_s13 + $0xcc] ss:$16 sps:$4 sm:$0xff]   ;;  %v1488_v28 = vld [vmem:[%s1809_s13 + $0xc0] ss:$16 sps:$4 sm:$0xff]  }
  0x41   : > { %v1489_v29 = vld [vmem:[%s1809_s13 + $0xc8] ss:$16 sps:$4 sm:$0xff]   ;;  %v1490_v30 = vld [vmem:[%s1809_s13 + $0xe4] ss:$16 sps:$4 sm:$0xff]   ;;  %v1492_v31 = vld [vmem:[%s1809_s13 + $0xec] ss:$16 sps:$4 sm:$0xff]  }
  0x42   : > { %910 = vmatpush1.bf16.msra.mxu0 %v1464_v12  ;;  %951 = vmatpush1.bf16.msra.mxu1 %v1465_v13  ;;  %v1494_v32 = vld [vmem:[%s1809_s13 + $0xe0] ss:$16 sps:$4 sm:$0xff]   ;;  %v1495_v33 = vld [vmem:[%s1809_s13 + $0xe8] ss:$16 sps:$4 sm:$0xff]   ;;  %v1496_v34 = vld [vmem:[%s1809_s13 + $0x104] ss:$16 sps:$4 sm:$0xff]  }
  0x43   : > { %911 = vmatprep.subr.bf16.mxu0 %v1466_v14  ;;  %952 = vmatprep.subr.bf16.mxu1 %v1468_v15  ;;  %v1498_v35 = vld [vmem:[%s1809_s13 + $0x10c] ss:$16 sps:$4 sm:$0xff]   ;;  %v1500_v36 = vld [vmem:[%s1809_s13 + $0x100] ss:$16 sps:$4 sm:$0xff]   ;;  %v1501_v37 = vld [vmem:[%s1809_s13 + $0x108] ss:$16 sps:$4 sm:$0xff]  }
  0x44   : > { %v1502_v38 = vld [vmem:[%s1809_s13 + $0x124] ss:$16 sps:$4 sm:$0xff]   ;;  %v1504_v39 = vld [vmem:[%s1809_s13 + $0x12c] ss:$16 sps:$4 sm:$0xff]   ;;  %v1506_v40 = vld [vmem:[%s1809_s13 + $0x120] ss:$16 sps:$4 sm:$0xff]  }
  0x45   : > { %v1507_v41 = vld [vmem:[%s1809_s13 + $0x128] ss:$16 sps:$4 sm:$0xff]   ;;  %v1508_v42 = vld [vmem:[%s1809_s13 + $0x144] ss:$16 sps:$4 sm:$0xff]   ;;  %v1510_v43 = vld [vmem:[%s1809_s13 + $0x14c] ss:$16 sps:$4 sm:$0xff]  }
  0x46   : > { %912 = vmatpush1.bf16.msra.mxu0 %v1470_v16  ;;  %953 = vmatpush1.bf16.msra.mxu1 %v1471_v17  ;;  %v1512_v44 = vld [vmem:[%s1809_s13 + $0x140] ss:$16 sps:$4 sm:$0xff]   ;;  %v1513_v45 = vld [vmem:[%s1809_s13 + $0x148] ss:$16 sps:$4 sm:$0xff]   ;;  %v1514_v46 = vld [vmem:[%s1809_s13 + $0x164] ss:$16 sps:$4 sm:$0xff]  }
  0x47   : > { %913 = vmatprep.subr.bf16.mxu0 %v1472_v18  ;;  %954 = vmatprep.subr.bf16.mxu1 %v1474_v19  ;;  %v1516_v47 = vld [vmem:[%s1809_s13 + $0x16c] ss:$16 sps:$4 sm:$0xff]   ;;  %v1518_v48 = vld [vmem:[%s1809_s13 + $0x160] ss:$16 sps:$4 sm:$0xff]   ;;  %v1519_v49 = vld [vmem:[%s1809_s13 + $0x168] ss:$16 sps:$4 sm:$0xff]  }
  0x48   : > { %v1520_v50 = vld [vmem:[%s1809_s13 + $0x184] ss:$16 sps:$4 sm:$0xff]   ;;  %v1522_v51 = vld [vmem:[%s1809_s13 + $0x18c] ss:$16 sps:$4 sm:$0xff]   ;;  %v1524_v52 = vld [vmem:[%s1809_s13 + $0x180] ss:$16 sps:$4 sm:$0xff]  }
  0x49   : > { %v1525_v53 = vld [vmem:[%s1809_s13 + $0x188] ss:$16 sps:$4 sm:$0xff]   ;;  %v1526_v54 = vld [vmem:[%s1809_s13 + $0x1a4] ss:$16 sps:$4 sm:$0xff]   ;;  %v1528_v55 = vld [vmem:[%s1809_s13 + $0x1ac] ss:$16 sps:$4 sm:$0xff]  }
  0x4a   : > { %914 = vmatpush1.bf16.msra.mxu0 %v1476_v20  ;;  %955 = vmatpush1.bf16.msra.mxu1 %v1477_v21  ;;  %v1530_v56 = vld [vmem:[%s1809_s13 + $0x1a0] ss:$16 sps:$4 sm:$0xff]   ;;  %v1531_v57 = vld [vmem:[%s1809_s13 + $0x1a8] ss:$16 sps:$4 sm:$0xff]   ;;  %v1532_v58 = vld [vmem:[%s1809_s13 + $0x1c4] ss:$16 sps:$4 sm:$0xff]  }
  0x4b   : > { %915 = vmatprep.subr.bf16.mxu0 %v1478_v22  ;;  %956 = vmatprep.subr.bf16.mxu1 %v1480_v23  ;;  %v1534_v59 = vld [vmem:[%s1809_s13 + $0x1cc] ss:$16 sps:$4 sm:$0xff]   ;;  %v1536_v60 = vld [vmem:[%s1809_s13 + $0x1c0] ss:$16 sps:$4 sm:$0xff]   ;;  %v1537_v61 = vld [vmem:[%s1809_s13 + $0x1c8] ss:$16 sps:$4 sm:$0xff]  }
  0x4c   : > { %v1538_v62 = vld [vmem:[%s1809_s13 + $0x1e4] ss:$16 sps:$4 sm:$0xff]   ;;  %v1540_v63 = vld [vmem:[%s1809_s13 + $0x1ec] ss:$16 sps:$4 sm:$0xff]   ;;  %v1542_v1 = vld [vmem:[%s1809_s13 + $0x1e0] ss:$16 sps:$4 sm:$0xff]  }
  0x4d   : > { %v1543_v2 = vld [vmem:[%s1809_s13 + $0x1e8] ss:$16 sps:$4 sm:$0xff]   ;;  %s1944_s14 = smov (!%p477_p9, %s1330_s14), 31  ;;  %v1005_v5 = vshrl.u32 %v1004_v4, 7 }
  0x4e   : > { %916 = vmatpush1.bf16.msra.mxu0 %v1482_v24  ;;  %957 = vmatpush1.bf16.msra.mxu1 %v1483_v25  ;;  %s479_s17 = scalar_lea.vmem %s1933_s2, %s1944_s14  ;;  %s484_s24 = scalar_lea.vmem %s1934_s3, %s1944_s14 }
  0x4f   : > { %917 = vmatprep.subr.bf16.mxu0 %v1484_v26  ;;  %958 = vmatprep.subr.bf16.mxu1 %v1486_v27  ;;  %v1884_v6 = vsub.s32 0, %v1005_v5  ;;  %v1886_v7 = vsub.s32 2, %v1005_v5  ;;  %v1002_v0 = vld [vmem:[%s479_s17] sm:$0xf]  ;;  %v1888_v8 = vsub.s32 1, %v1005_v5  ;;  %v1890_v9 = vsub.s32 3, %v1005_v5  ;;  %s489_s28 = scalar_lea.vmem %s1935_s4, %s1944_s14 }
  0x50   : > { %s1334_s29 = sshll.u32 %s1944_s14, 2 }
  0x51   : > { %v1007_v10 = vrot.slane %v1002_v0, %v1884_v6  ;;  %v1015_v11 = vrot.slane %v1002_v0, %v1886_v7  ;;  %v1011_v12 = vrot.slane %v1002_v0, %v1888_v8  ;;  %v1019_v13 = vrot.slane %v1002_v0, %v1890_v9  ;;  %s499_s7 = scalar_lea.vmem %s1936_s5, %s1334_s29 }
  0x52   : > { %918 = vmatpush1.bf16.msra.mxu0 %v1488_v28  ;;  %959 = vmatpush1.bf16.msra.mxu1 %v1489_v29 }
  0x53   : > { %919 = vmatprep.subr.bf16.mxu0 %v1490_v30  ;;  %960 = vmatprep.subr.bf16.mxu1 %v1492_v31 }
  0x56   : > { %920 = vmatpush1.bf16.msra.mxu0 %v1494_v32  ;;  %961 = vmatpush1.bf16.msra.mxu1 %v1495_v33 }
  0x57   : > { %921 = vmatprep.subr.bf16.mxu0 %v1496_v34  ;;  %962 = vmatprep.subr.bf16.mxu1 %v1498_v35 }
  0x5a   : > { %922 = vmatpush1.bf16.msra.mxu0 %v1500_v36  ;;  %963 = vmatpush1.bf16.msra.mxu1 %v1501_v37 }
  0x5b   : > { %923 = vmatprep.subr.bf16.mxu0 %v1502_v38  ;;  %964 = vmatprep.subr.bf16.mxu1 %v1504_v39 }
  0x5e   : > { %924 = vmatpush1.bf16.msra.mxu0 %v1506_v40  ;;  %965 = vmatpush1.bf16.msra.mxu1 %v1507_v41 }
  0x5f   : > { %925 = vmatprep.subr.bf16.mxu0 %v1508_v42  ;;  %966 = vmatprep.subr.bf16.mxu1 %v1510_v43 }
  0x62   : > { %926 = vmatpush1.bf16.msra.mxu0 %v1512_v44  ;;  %967 = vmatpush1.bf16.msra.mxu1 %v1513_v45 }
  0x63   : > { %927 = vmatprep.subr.bf16.mxu0 %v1514_v46  ;;  %968 = vmatprep.subr.bf16.mxu1 %v1516_v47 }
  0x66   : > { %928 = vmatpush1.bf16.msra.mxu0 %v1518_v48  ;;  %969 = vmatpush1.bf16.msra.mxu1 %v1519_v49 }
  0x67   : > { %929 = vmatprep.subr.bf16.mxu0 %v1520_v50  ;;  %970 = vmatprep.subr.bf16.mxu1 %v1522_v51 }
  0x6a   : > { %930 = vmatpush1.bf16.msra.mxu0 %v1524_v52  ;;  %971 = vmatpush1.bf16.msra.mxu1 %v1525_v53 }
  0x6b   : > { %931 = vmatprep.subr.bf16.mxu0 %v1526_v54  ;;  %972 = vmatprep.subr.bf16.mxu1 %v1528_v55 }
  0x6e   : > { %932 = vmatpush1.bf16.msra.mxu0 %v1530_v56  ;;  %973 = vmatpush1.bf16.msra.mxu1 %v1531_v57 }
  0x6f   : > { %933 = vmatprep.subr.bf16.mxu0 %v1532_v58  ;;  %974 = vmatprep.subr.bf16.mxu1 %v1534_v59 }
  0x72   : > { %934 = vmatpush1.bf16.msra.mxu0 %v1536_v60  ;;  %975 = vmatpush1.bf16.msra.mxu1 %v1537_v61 }
  0x73   : > { %935 = vmatprep.subr.bf16.mxu0 %v1538_v62  ;;  %976 = vmatprep.subr.bf16.mxu1 %v1540_v63 }
  0x76   : > { %936 = vmatpush1.bf16.msra.mxu0 %v1542_v1  ;;  %977 = vmatpush1.bf16.msra.mxu1 %v1543_v2 }
  0x79   : > { %938 = vmatmul.mubr.bf16.vlgmr.msra.gmra.mrb[0].mxu0 %v1335_v3  ;;  %979 = vmatmul.mubr.bf16.vlgmr.msra.gmra.mrb[0].mxu1 %v1335_v3 }
 0x14c   : > { %v939_v14 = vpop.f32.mrb[0].mxu0  ;;  %v980_v15 = vpop.f32.mrb[0].mxu1 }
 0x14d   : > { %v1024_v16 = vadd.f32 %v1007_v10, %v939_v14  ;;  %v1026_v17 = vadd.f32 %v1015_v11, %v980_v15  ;;  %v941_v18 = vpop.f32.mrb[1].mxu0  ;;  %v982_v19 = vpop.f32.mrb[1].mxu1 }
 0x14e   : > { %v1025_v20 = vadd.f32 %v1011_v12, %v941_v18  ;;  %v1027_v21 = vadd.f32 %v1019_v13, %v982_v19  ;;  %v943_v22 = vpop.f32.mrb[2].mxu0  ;;  %v984_v23 = vpop.f32.mrb[2].mxu1 }
 0x14f   : > { %v1028_v24 = vrot.slane %v1024_v16, 4  ;;  %v1040_v25 = vrot.slane %v1026_v17, 4  ;;  %v944_v26 = vpop.f32.mrb[3].mxu0  ;;  %v985_v27 = vpop.f32.mrb[3].mxu1 }
 0x150   : > { %v1034_v28 = vrot.slane %v1025_v20, 4  ;;  %v1046_v29 = vrot.slane %v1027_v21, 4 }
 0x151   : > { %v1029_v30 = vadd.f32 %v1028_v24, %v1024_v16  ;;  %v1041_v31 = vadd.f32 %v1040_v25, %v1026_v17 }
 0x152   : > { %v1035_v32 = vadd.f32 %v1034_v28, %v1025_v20  ;;  %v1047_v33 = vadd.f32 %v1046_v29, %v1027_v21 }
 0x153   : > { %v1030_v34 = vrot.slane %v1029_v30, 2  ;;  %v1042_v35 = vrot.slane %v1041_v31, 2 }
 0x154   : > { %v1036_v36 = vrot.slane %v1035_v32, 2  ;;  %v1048_v37 = vrot.slane %v1047_v33, 2 }
 0x155   : > { %v1031_v38 = vadd.f32 %v1030_v34, %v1029_v30  ;;  %v1043_v39 = vadd.f32 %v1042_v35, %v1041_v31  ;;  %v1105_v34 = vld [vmem:[%s484_s24] sm:$0xf] }
 0x156   : > { %v1037_v40 = vadd.f32 %v1036_v36, %v1035_v32  ;;  %v1049_v41 = vadd.f32 %v1048_v37, %v1047_v33  ;;  %v1131_v35 = vld [vmem:[%s489_s28] sm:$0xf]  ;;  %v1110_v36 = vrot.slane %v1105_v34, %v1884_v6 }
 0x157   : > { %v1032_v42 = vrot.slane %v1031_v38, 1  ;;  %v1044_v43 = vrot.slane %v1043_v39, 1 }
 0x158   : > { %v1038_v44 = vrot.slane %v1037_v40, 1  ;;  %v1050_v45 = vrot.slane %v1049_v41, 1 }
 0x159   : > { %v1033_v46 = vadd.f32 %v1032_v42, %v1031_v38  ;;  %v1045_v47 = vadd.f32 %v1044_v43, %v1043_v39  ;;  %v1118_v38 = vrot.slane %v1105_v34, %v1886_v7  ;;  %v1114_v42 = vrot.slane %v1105_v34, %v1888_v8 }
 0x15a   : > { %v1039_v48 = vadd.f32 %v1038_v44, %v1037_v40  ;;  %v1051_v49 = vadd.f32 %v1050_v45, %v1049_v41  ;;  %v1136_v41 = vrot.slane %v1131_v35, %v1884_v6  ;;  %v1144_v45 = vrot.slane %v1131_v35, %v1886_v7 }
 0x15b   : > { %v1053_v50 = vmul.f32 0.125, %v1033_v46  ;;  %v1055_v51 = vmul.f32 0.125, %v1045_v47  ;;  %v1122_v46 = vrot.slane %v1105_v34, %v1890_v9 }
 0x15c   : > { %v1054_v52 = vmul.f32 0.125, %v1039_v48  ;;  %v1056_v53 = vmul.f32 0.125, %v1051_v49 }
 0x15d   : > { %v1057_v54 = vsub.f32 %v1024_v16, %v1053_v50  ;;  %v1059_v55 = vsub.f32 %v1026_v17, %v1055_v51  ;;  %v1140_v50 = vrot.slane %v1131_v35, %v1888_v8 }
 0x15e   : > { %v1058_v56 = vsub.f32 %v1025_v20, %v1054_v52  ;;  %v1060_v57 = vsub.f32 %v1027_v21, %v1056_v53  ;;  %v1148_v53 = vrot.slane %v1131_v35, %v1890_v9 }
 0x15f   : > { %v1061_v58 = vmul.f32 %v1057_v54, %v1057_v54  ;;  %v1063_v59 = vmul.f32 %v1059_v55, %v1059_v55 }
 0x160   : > { %v1062_v60 = vmul.f32 %v1058_v56, %v1058_v56  ;;  %v1064_v61 = vmul.f32 %v1060_v57, %v1060_v57 }
 0x161   : > { %v1065_v62 = vrot.slane %v1061_v58, 4  ;;  %v1077_v63 = vrot.slane %v1063_v59, 4 }
 0x162   : > { %v1071_v1 = vrot.slane %v1062_v60, 4  ;;  %v1083_v2 = vrot.slane %v1064_v61, 4 }
 0x163   : > { %v1066_v3 = vadd.f32 %v1065_v62, %v1061_v58  ;;  %v1078_v4 = vadd.f32 %v1077_v63, %v1063_v59 }
 0x164   : > { %v1072_v5 = vadd.f32 %v1071_v1, %v1062_v60  ;;  %v1084_v0 = vadd.f32 %v1083_v2, %v1064_v61 }
 0x165   : > { %v1067_v10 = vrot.slane %v1066_v3, 2  ;;  %v1079_v11 = vrot.slane %v1078_v4, 2 }
 0x166   : > { %v1073_v12 = vrot.slane %v1072_v5, 2  ;;  %v1085_v13 = vrot.slane %v1084_v0, 2 }
 0x167   : > { %v1068_v14 = vadd.f32 %v1067_v10, %v1066_v3  ;;  %v1080_v15 = vadd.f32 %v1079_v11, %v1078_v4 }
 0x168   : > { %v1074_v16 = vadd.f32 %v1073_v12, %v1072_v5  ;;  %v1086_v17 = vadd.f32 %v1085_v13, %v1084_v0 }
 0x169   : > { %v1069_v18 = vrot.slane %v1068_v14, 1  ;;  %v1081_v19 = vrot.slane %v1080_v15, 1 }
 0x16a   : > { %v1075_v20 = vrot.slane %v1074_v16, 1  ;;  %v1087_v21 = vrot.slane %v1086_v17, 1 }
 0x16b   : > { %v1070_v22 = vadd.f32 %v1069_v18, %v1068_v14  ;;  %v1082_v23 = vadd.f32 %v1081_v19, %v1080_v15 }
 0x16c   : > { %v1076_v24 = vadd.f32 %v1075_v20, %v1074_v16  ;;  %v1088_v25 = vadd.f32 %v1087_v21, %v1086_v17 }
 0x16d   : > { %v1089_v26 = vmul.f32 0.125, %v1070_v22  ;;  %v1091_v27 = vmul.f32 0.125, %v1082_v23 }
 0x16e   : > { %v1090_v28 = vmul.f32 0.125, %v1076_v24  ;;  %v1092_v29 = vmul.f32 0.125, %v1088_v25 }
 0x16f   : > { %v1093_v30 = vadd.f32 1e-05, %v1089_v26  ;;  %v1095_v31 = vadd.f32 1e-05, %v1091_v27 }
 0x170   : > { %v1094_v32 = vadd.f32 1e-05, %v1090_v28  ;;  %v1096_v33 = vadd.f32 1e-05, %v1092_v29 }
 0x171   : > { %1546 = vrsqrt.f32 %v1093_v30 }
 0x172   : > { %1548 = vrsqrt.f32 %v1095_v31 }
 0x173   : > { %1550 = vrsqrt.f32 %v1094_v32 }
 0x174   : > { %1552 = vrsqrt.f32 %v1096_v33 }
 0x17b   : > { %v1547_v37 = vpop.eup %1546 }
 0x17c   : > { %v1549_v39 = vpop.eup %1548  ;;  %v1101_v40 = vmul.f32 %v1547_v37, %v1057_v54 }
 0x17d   : > { %v1551_v43 = vpop.eup %1550  ;;  %v1103_v44 = vmul.f32 %v1549_v39, %v1059_v55 }
 0x17e   : > { %v1553_v47 = vpop.eup %1552  ;;  %v1127_v48 = vmul.f32 %v1110_v36, %v1101_v40  ;;  %v1102_v49 = vmul.f32 %v1551_v43, %v1058_v56 }
 0x17f   : > { %v1129_v51 = vmul.f32 %v1118_v38, %v1103_v44  ;;  %v1104_v52 = vmul.f32 %v1553_v47, %v1060_v57 }
 0x180   : > { %v1153_v54 = vadd.f32 %v1136_v41, %v1127_v48  ;;  %v1128_v6 = vmul.f32 %v1114_v42, %v1102_v49 }
 0x181   : > { %v1155_v58 = vadd.f32 %v1144_v45, %v1129_v51  ;;  %v1130_v59 = vmul.f32 %v1122_v46, %v1104_v52 }
 0x182   : > { %v1157_v60 = vmax.f32 %v1153_v54, 0.0  ;;  %v1154_v55 = vadd.f32 %v1140_v50, %v1128_v6 }
 0x183   : > { %v1159_v61 = vmax.f32 %v1155_v58, 0.0  ;;  %v1156_v7 = vadd.f32 %v1148_v53, %v1130_v59 }
 0x184   : > { %v1158_v62 = vmax.f32 %v1154_v55, 0.0 }
 0x185   : > { %v1160_v56 = vmax.f32 %v1156_v7, 0.0 }
 0x186   : > { %v1406_v8 = vpack.c.bf16 %v1158_v62, %v1157_v60 }
 0x187   : > { %v1407_v63 = vpack.c.bf16 %v1160_v56, %v1159_v61 }
 0x188   : > { %1177 = vst [vmem:[%s499_s7] sm:$0xff] %v1406_v8 }
 0x189   : > { %1178 = vst [vmem:[%s499_s7 + $0x8] sm:$0xff] %v1407_v63 }
 0x18a PF: > { %s15_s22 = sadd.s32 1, %s1592_s22   ;;  %s1937_s18 = smov %s1580_s19 }
 0x18b   : > { %p12_p10 = scmp.ge.s32.totalorder %s15_s22, 10   ;;  %s1938_s19 = smov %s1659_s26 }
 0x18c   : > { %s1939_s20 = smov %s1588_s21  ;;  %s1940_s21 = smov %s1942_s23 }
 0x18d   :  { %14 = sbr.rel (!%p12_p10) target bundleno = 3 (0x3), region = 118 }

// kernel: apnet_forward.15
= control target key start
LH: loop header
LB: loop body
LE: loop exit
PB: predicated region body
PF: predicated region fallthrough
CT: control target
= control target key end

     0   :  { %s254_s0 = inlined_call_operand.vmem [shape: s32[1,8], index: 0, kind: input, shape index: {}]   ;;  %s255_s1 = inlined_call_operand.vmem [shape: s32[8,1], index: 1, kind: input, shape index: {}]   ;;  %s256_s2 = inlined_call_operand.vmem [shape: f32[8,128], index: 2, kind: input, shape index: {}]   ;;  %s257_s3 = inlined_call_operand.hbm [shape: f32[1], index: 3, kind: output, shape index: {}]  }
   0x1   :  { %v15_v0 = vld [vmem:[%s256_s2] sm:$0xff] }
   0x2   :  { %8 = vsyncpa [#allocation3], 0  ;;  %v16_v1 = vmul.f32 %v15_v0, %v15_v0  ;;  %v205_v2 = vmov 0.0   ;;  %vm206_vm0 = vmmov 0   ;;  %vm93_vm1 = vcmask 64512   ;;  %v105_v22 = vld [vmem:[%s255_s1] sm:$0xff] }
   0x3   :  { %172 = vmatprep.subr.mxu0 %v205_v2  ;;  %174 = vmatprep.mubr.msk.f32.mxu0 %vm206_vm0, %v205_v2  ;;  %v207_v11 = vmov 0   ;;  %v98_v14 = vlaneseq  ;;  %v168_v24 = vld [vmem:[%s254_s0] ss:$0 sm:$0xff]  ;;  %vm137_vm4 = vcmask 7168   ;;  %s193_s20 = scalar_lea.hbm %s257_s3, 16 }
   0x4   :  { %17 = vadd.xlane.f32.xlu0 %v16_v1  ;;  %183 = vset.pattern.permute.xlu1 %v207_v11  ;;  %p194_p0 = scmp.ne.s32.totalorder %s257_s3, %s193_s20  ;;  %p197_p1 = scmp.lt.u32.totalorder %s193_s20, %s257_s3 }
   0x5   :  { %184 = vset.pattern.permute.xlu0 %v207_v11  ;;  %v99_v16 = vshrl.u32 %v98_v14, 7  ;;  %v101_v17 = vand.u32 127, %v98_v14 }
   0x6   :  { %p199_p2 = pnand %p197_p1, %p194_p0 }
   0x7   :  { %vm102_vm2 = vcmp.ne.s32.totalorder %v99_v16, %v101_v17 }
   0x8   :  { %v167_v18 = vsel %vm102_vm2, 1.0, %v205_v2 }
  0x91   :  { %v18_v3 = vpop.xlane.xlu0 %17 }
  0x92   :  { %v19_v4 = vadd.f32 1e-24, %v18_v3 }
  0x94   :  { %185 = vrsqrt.f32 %v19_v4 }
  0x9e   :  { %v186_v5 = vpop.eup %185 }
  0x9f   :  { %v21_v6 = vmul.f32 %v186_v5, %v15_v0 }
  0xa1   :  { %173 = vmatpush3.xpose.msra.mxu0 %v21_v6 }
  0xa4   :  { %175 = vmatmul.mubr.f32.vlgmr.msra.gmra.mrb[0].mxu0 %v21_v6 }
 0x177   :  { %v88_v7 = vpop.f32.mrb[0].mxu0 }
 0x178   :  { %v92_v8 = vmul.f32 14.285714, %v88_v7  ;;  %v176_v9 = vpop.f32.mrb[1].mxu0 }
 0x17a   :  { %v94_v10 = vsel %vm93_vm1, %v92_v8, -inf }
 0x17b   :  { %95 = vmax.xlane.f32.xlu0 %v94_v10 }
 0x208   :  { %v96_v12 = vpop.xlane.xlu0 %95 }
 0x209   :  { %v97_v13 = vsub.f32 %v92_v8, %v96_v12 }
 0x20b   :  { %v118_v15 = vmul.f32 1.442695, %v97_v13 }
 0x20d   :  { %187 = vpow2.f32 %v118_v15 }
 0x217   :  { %v188_v19 = vpop.eup %187 }
 0x218   :  { %v120_v20 = vmul.f32 %v188_v19, %v167_v18 }
 0x21a   :  { %v121_v21 = vsel %vm93_vm1, %v120_v20, 0.0 }
 0x21b   :  { %122 = vadd.xlane.f32.xlu1 %v121_v21 }
 0x22c   :  { %108 = vperm.xlu1 %183, %v105_v22  }
 0x2a8   :  { %v123_v23 = vpop.xlane.xlu1 %122 }
 0x2a9   :  { %189 = vlog2.f32 %v123_v23 }
 0x2ac   :  { %v109_v25 = vpop.permute.xlu1 %108 }
 0x2ad   :  { %vm114_vm3 = vcmp.eq.s32.totalorder %v109_v25, %v168_v24 }
 0x2ae   :  { %v169_v26 = vsel %vm114_vm3, 1.0, %v205_v2 }
 0x2af   :  { %v117_v27 = vmul.f32 %v169_v26, %v167_v18 }
 0x2b1   :  { %v127_v28 = vsel %vm93_vm1, %v117_v27, 0.0 }
 0x2b2   :  { %128 = vadd.xlane.f32.xlu0 %v127_v28 }
 0x2b3   :  { %v190_v29 = vpop.eup %189 }
 0x2b4   :  { %v125_v30 = vmul.f32 0.6931472, %v190_v29 }
 0x2b6   :  { %v126_v31 = vsub.f32 %v97_v13, %v125_v30 }
 0x2b8   :  { %v131_v32 = vmul.f32 %v126_v31, %v117_v27 }
 0x2ba   :  { %v132_v33 = vsel %vm93_vm1, %v131_v32, 0.0 }
 0x2bb   :  { %133 = vadd.xlane.f32.xlu0 %v132_v33 }
 0x33f   :  { %v129_v34 = vpop.xlane.xlu0 %128 }
 0x340   :  { %v130_v35 = vmax.f32 %v129_v34, 1.0 }
 0x342   :  { %191 = vrcp.f32 %v130_v35 }
 0x348   :  { %v134_v37 = vpop.xlane.xlu0 %133 }
 0x34c   :  { %v192_v36 = vpop.eup %191 }
 0x34d   :  { %v136_v38 = vmul.f32 %v192_v36, %v134_v37 }
 0x34f   :  { %v138_v39 = vsel %vm137_vm4, %v136_v38, 0.0 }
 0x350   :  { %139 = vadd.xlane.f32.xlu0 %v138_v39 }
 0x3dd   :  { %v140_v40 = vpop.xlane.xlu0 %139 }
 0x3de   :  { %v141_v41 = vrot.slane %v140_v40, 4 }
 0x3e0   :  { %v142_v42 = vadd.f32 %v141_v41, %v140_v40 }
 0x3e2   :  { %v143_v43 = vrot.slane %v142_v42, 2 }
 0x3e4   :  { %v144_v44 = vadd.f32 %v143_v43, %v142_v42 }
 0x3e6   :  { %v145_v45 = vrot.slane %v144_v44, 1 }
 0x3e8   :  { %v146_v46 = vadd.f32 %v145_v45, %v144_v44 }
 0x3ea   :  { %177 = vpush %v146_v46 }
 0x41b   :  { %s178_s0 = spop %177 }
 0x41c   :  { %s150_s1 = smul.f32 0.125, %s178_s0 }
 0x41e   :  { %s151_s17 = smul.f32 -1.0, %s150_s1 }
 0x420   :  { %153 = sst [smem:[#allocation2]] %s151_s17 }
 0x421   :  { %202 = shalt.err (!%p199_p2)
}
 0x422   :  { %s208_s25 = smov [#allocation2]  }
 0x423   :  { %161 = dma.smem_to_hbm %s208_s25, 16, %s257_s3, [#allocation3]  }
 0x424   :  { %203 = dma.done.wait [#allocation3], 16  }
 0x425   :  { %204 = vsyncadd [#allocation3], 4294967280 }
 0x426   :  { %165 = sfence }
 0x427   :  { %166 = vsyncpa [#allocation3], 1 }

// kernel: apnet_forward.14
= control target key start
LH: loop header
LB: loop body
LE: loop exit
PB: predicated region body
PF: predicated region fallthrough
CT: control target
= control target key end

     0   :  { %s2344_s12 = smov 0   ;;  %s2346_s13 = smov 0   ;;  %s2529_s0 = inlined_call_operand.vmem [shape: bf16[8,4096], index: 0, kind: input, shape index: {}]   ;;  %s2530_s1 = inlined_call_operand.vmem [shape: bf16[4096,128], index: 1, kind: input, shape index: {}]   ;;  %s2531_s2 = inlined_call_operand.vmem [shape: f32[1,128], index: 2, kind: input, shape index: {}]   ;;  %s2532_s3 = inlined_call_operand.vmem [shape: f32[8,128], index: 3, kind: output, shape index: {}]  }
   0x1   :  { %s2348_s14 = smov 0  }
   0x2 LB: > { %s25_s15 = sadd.s32 1, %s2317_s13  ;;  %p1799_p0 = scmp.ge.s32.totalorder %s2321_s14, 1  ;;  %s2321_s14 = sphi %s2348_s14, %s13_s14   ;;  %s2317_s13 = sphi %s2346_s13, %s2534_s13   ;;  %s2313_s12 = sphi %s2344_s12, %s2533_s12  }
   0x3   : > { %p26_p1 = scmp.ge.s32.totalorder %s25_s15, 2  ;;  %p189_p2 = scmp.lt.s32.totalorder %s2321_s14, 3 }
   0x5   : > { %s2536_s15 = smov (%p26_p1, %s25_s15), 0  ;;  %p190_p3 = pnand %p1799_p0, %p189_p2 }
   0x6   : > { %s1800_s16 = sshll.u32 (!%p190_p3), %s2313_s12, 4  ;;  %s1802_s17 = sshll.u32 (!%p190_p3), %s2313_s12, 8 }
   0x7   : > { %193 = sbr.rel (%p190_p3) target bundleno = 386 (0x182), region = 32  ;;  %p233_p4 = scmp.lt.s32.totalorder (!%p190_p3), %s1800_s16, 31 }
   0x8   : > { %p241_p5 = scmp.lt.s32.totalorder (!%p190_p3), %s1802_s17, 511  ;;  %p1804_p6 = scmp.ne.s32.totalorder (!%p190_p3), %s2313_s12, 0 }
   0xe   : > { %s2538_s16 = smov (!%p233_p4, %s1800_s16), 31  ;;  %s2540_s17 = smov (!%p241_p5, %s1802_s17), 511 }
   0xf   : > { %s1801_s18 = sshll.u32 %s2538_s16, 2  ;;  %s1803_s22 = sshll.u32 %s2540_s17, 2  ;;  %v2323_v0 = vmov (!%p1804_p6), 0.0  }
  0x10   : > { %s2369_s21 = scalar_lea.vmem %s2529_s0, %s1801_s18  ;;  %s2374_s25 = scalar_lea.vmem %s2530_s1, %s1803_s22  ;;  %264 = vst [vmem:[#allocation2] sm:$0xff] (!%p1804_p6), %v2323_v0 }
  0x11   : > { %263 = sbr.rel (%p1804_p6) target bundleno = 24 (0x18), region = 36 }
  0x18 PF: > { %v2155_v1 = vld [vmem:[%s2374_s25 + $0x40] sm:$0xff]   ;;  %v2159_v5 = vld [vmem:[%s2374_s25 + $0x48] sm:$0xff]   ;;  %v2163_v9 = vld [vmem:[%s2374_s25 + $0x50] sm:$0xff]   ;;  %p1949_p7 = scmp.ne.s32.totalorder %s2313_s12, 1 }
  0x19   : > { %v2156_v2 = vld [vmem:[%s2374_s25 + $0xc0] sm:$0xff]   ;;  %1954 = vmatprep.subr.bf16.mxu0 %v2155_v1  ;;  %v2160_v6 = vld [vmem:[%s2374_s25 + $0xc8] sm:$0xff]   ;;  %v2164_v10 = vld [vmem:[%s2374_s25 + $0xd0] sm:$0xff]  }
  0x1a   : > { %v2157_v3 = vld [vmem:[%s2374_s25] sm:$0xff]   ;;  %1976 = vmatprep.subr.bf16.mxu1 %v2156_v2  ;;  %v2161_v7 = vld [vmem:[%s2374_s25 + $0x8] sm:$0xff]   ;;  %v2165_v11 = vld [vmem:[%s2374_s25 + $0x10] sm:$0xff]  }
  0x1b   : > { %v2158_v4 = vld [vmem:[%s2374_s25 + $0x80] sm:$0xff]   ;;  %1955 = vmatpush3.bf16.msra.mxu0 %v2157_v3  ;;  %v2162_v8 = vld [vmem:[%s2374_s25 + $0x88] sm:$0xff]   ;;  %v2166_v12 = vld [vmem:[%s2374_s25 + $0x90] sm:$0xff]  }
  0x1c   : > { %1977 = vmatpush3.bf16.msra.mxu1 %v2158_v4  ;;  %1956 = vmatprep.subr.bf16.mxu0 %v2159_v5  ;;  %v2167_v13 = vld [vmem:[%s2374_s25 + $0x58] sm:$0xff]   ;;  %v2171_v17 = vld [vmem:[%s2374_s25 + $0x60] sm:$0xff]   ;;  %v2175_v21 = vld [vmem:[%s2374_s25 + $0x68] sm:$0xff]  }
  0x1d   : > { %1978 = vmatprep.subr.bf16.mxu1 %v2160_v6  ;;  %v2168_v14 = vld [vmem:[%s2374_s25 + $0xd8] sm:$0xff]   ;;  %v2172_v18 = vld [vmem:[%s2374_s25 + $0xe0] sm:$0xff]   ;;  %v2176_v22 = vld [vmem:[%s2374_s25 + $0xe8] sm:$0xff]  }
  0x1e   : > { %v2169_v15 = vld [vmem:[%s2374_s25 + $0x18] sm:$0xff]   ;;  %v2173_v19 = vld [vmem:[%s2374_s25 + $0x20] sm:$0xff]   ;;  %v2177_v23 = vld [vmem:[%s2374_s25 + $0x28] sm:$0xff]  }
  0x1f   : > { %1957 = vmatpush3.bf16.msra.mxu0 %v2161_v7  ;;  %v2170_v16 = vld [vmem:[%s2374_s25 + $0x98] sm:$0xff]   ;;  %v2174_v20 = vld [vmem:[%s2374_s25 + $0xa0] sm:$0xff]   ;;  %v2178_v24 = vld [vmem:[%s2374_s25 + $0xa8] sm:$0xff]  }
  0x20   : > { %1979 = vmatpush3.bf16.msra.mxu1 %v2162_v8  ;;  %1958 = vmatprep.subr.bf16.mxu0 %v2163_v9  ;;  %v2179_v25 = vld [vmem:[%s2374_s25 + $0x70] sm:$0xff]   ;;  %v2183_v29 = vld [vmem:[%s2374_s25 + $0x78] sm:$0xff]   ;;  %v265_v33 = vld [vmem:[%s2369_s21] sm:$0xff] }
  0x21   : > { %1980 = vmatprep.subr.bf16.mxu1 %v2164_v10  ;;  %v2180_v26 = vld [vmem:[%s2374_s25 + $0xf0] sm:$0xff]   ;;  %v2184_v30 = vld [vmem:[%s2374_s25 + $0xf8] sm:$0xff]   ;;  %v266_v34 = vld [vmem:[%s2369_s21 + $0x8] sm:$0xff]  ;;  %v1805_v35 = vcombine.low %v265_v33, %v265_v33  ;;  %v1806_v36 = vcombine.high %v265_v33, %v265_v33 }
  0x22   : > { %v2181_v27 = vld [vmem:[%s2374_s25 + $0x30] sm:$0xff]   ;;  %v2185_v31 = vld [vmem:[%s2374_s25 + $0x38] sm:$0xff]   ;;  %v1807_v37 = vcombine.low %v266_v34, %v266_v34  ;;  %v1808_v38 = vcombine.high %v266_v34, %v266_v34  ;;  %v2191_v39 = vld [vmem:[%s2374_s25 + $0x140] sm:$0xff]  }
  0x23   : > { %1959 = vmatpush3.bf16.msra.mxu0 %v2165_v11  ;;  %v2182_v28 = vld [vmem:[%s2374_s25 + $0xb0] sm:$0xff]   ;;  %v2186_v32 = vld [vmem:[%s2374_s25 + $0xb8] sm:$0xff]   ;;  %v2192_v40 = vld [vmem:[%s2374_s25 + $0x1c0] sm:$0xff]   ;;  %1386 = vmatprep.mubr.bf16.mxu0 %v1806_v36 }
  0x24   : > { %1981 = vmatpush3.bf16.msra.mxu1 %v2166_v12  ;;  %1960 = vmatprep.subr.bf16.mxu0 %v2167_v13  ;;  %v2193_v41 = vld [vmem:[%s2374_s25 + $0x100] sm:$0xff]   ;;  %v2195_v43 = vld [vmem:[%s2374_s25 + $0x148] sm:$0xff]   ;;  %v2199_v47 = vld [vmem:[%s2374_s25 + $0x150] sm:$0xff]  }
  0x25   : > { %1982 = vmatprep.subr.bf16.mxu1 %v2168_v14  ;;  %1426 = vmatprep.mubr.bf16.mxu1 %v1808_v38  ;;  %v2194_v42 = vld [vmem:[%s2374_s25 + $0x180] sm:$0xff]   ;;  %v2196_v44 = vld [vmem:[%s2374_s25 + $0x1c8] sm:$0xff]   ;;  %v2200_v48 = vld [vmem:[%s2374_s25 + $0x1d0] sm:$0xff]  }
  0x26   : > { %v2197_v45 = vld [vmem:[%s2374_s25 + $0x108] sm:$0xff]   ;;  %v2201_v49 = vld [vmem:[%s2374_s25 + $0x110] sm:$0xff]   ;;  %v2203_v51 = vld [vmem:[%s2374_s25 + $0x158] sm:$0xff]  }
  0x27   : > { %1961 = vmatpush3.bf16.msra.mxu0 %v2169_v15  ;;  %v2198_v46 = vld [vmem:[%s2374_s25 + $0x188] sm:$0xff]   ;;  %v2202_v50 = vld [vmem:[%s2374_s25 + $0x190] sm:$0xff]   ;;  %v2204_v52 = vld [vmem:[%s2374_s25 + $0x1d8] sm:$0xff]  }
  0x28   : > { %1983 = vmatpush3.bf16.msra.mxu1 %v2170_v16  ;;  %1962 = vmatprep.subr.bf16.mxu0 %v2171_v17  ;;  %v2205_v53 = vld [vmem:[%s2374_s25 + $0x118] sm:$0xff]   ;;  %v2207_v55 = vld [vmem:[%s2374_s25 + $0x160] sm:$0xff]   ;;  %v2211_v59 = vld [vmem:[%s2374_s25 + $0x168] sm:$0xff]  }
  0x29   : > { %1984 = vmatprep.subr.bf16.mxu1 %v2172_v18  ;;  %v2206_v54 = vld [vmem:[%s2374_s25 + $0x198] sm:$0xff]   ;;  %v2208_v56 = vld [vmem:[%s2374_s25 + $0x1e0] sm:$0xff]   ;;  %v2212_v60 = vld [vmem:[%s2374_s25 + $0x1e8] sm:$0xff]  }
  0x2a   : > { %v2209_v57 = vld [vmem:[%s2374_s25 + $0x120] sm:$0xff]   ;;  %v2213_v61 = vld [vmem:[%s2374_s25 + $0x128] sm:$0xff]   ;;  %v2215_v63 = vld [vmem:[%s2374_s25 + $0x170] sm:$0xff]  }
  0x2b   : > { %1963 = vmatpush3.bf16.msra.mxu0 %v2173_v19  ;;  %v2210_v58 = vld [vmem:[%s2374_s25 + $0x1a0] sm:$0xff]   ;;  %v2214_v62 = vld [vmem:[%s2374_s25 + $0x1a8] sm:$0xff]   ;;  %v2216_v0 = vld [vmem:[%s2374_s25 + $0x1f0] sm:$0xff]  }
  0x2c   : > { %1985 = vmatpush3.bf16.msra.mxu1 %v2174_v20  ;;  %1964 = vmatprep.subr.bf16.mxu0 %v2175_v21  ;;  %v2217_v1 = vld [vmem:[%s2374_s25 + $0x130] sm:$0xff]   ;;  %v2219_v3 = vld [vmem:[%s2374_s25 + $0x178] sm:$0xff]   ;;  %v2227_v13 = vld [vmem:[%s2374_s25 + $0x240] sm:$0xff]  }
  0x2d   : > { %1986 = vmatprep.subr.bf16.mxu1 %v2176_v22  ;;  %v2218_v2 = vld [vmem:[%s2374_s25 + $0x1b0] sm:$0xff]   ;;  %v2220_v4 = vld [vmem:[%s2374_s25 + $0x1f8] sm:$0xff]   ;;  %v2228_v14 = vld [vmem:[%s2374_s25 + $0x2c0] sm:$0xff]  }
  0x2e   : > { %v2221_v5 = vld [vmem:[%s2374_s25 + $0x138] sm:$0xff]   ;;  %v267_v7 = vld [vmem:[%s2369_s21 + $0x10] sm:$0xff]  ;;  %v2229_v15 = vld [vmem:[%s2374_s25 + $0x200] sm:$0xff]  }
  0x2f   : > { %1965 = vmatpush3.bf16.msra.mxu0 %v2177_v23  ;;  %v2222_v6 = vld [vmem:[%s2374_s25 + $0x1b8] sm:$0xff]   ;;  %v1809_v8 = vcombine.low %v267_v7, %v267_v7  ;;  %v1810_v9 = vcombine.high %v267_v7, %v267_v7  ;;  %v2230_v16 = vld [vmem:[%s2374_s25 + $0x280] sm:$0xff]   ;;  %v2231_v17 = vld [vmem:[%s2374_s25 + $0x248] sm:$0xff]  }
  0x30   : > { %1987 = vmatpush3.bf16.msra.mxu1 %v2178_v24  ;;  %1966 = vmatprep.subr.bf16.mxu0 %v2179_v25  ;;  %v268_v10 = vld [vmem:[%s2369_s21 + $0x18] sm:$0xff]  ;;  %v2232_v18 = vld [vmem:[%s2374_s25 + $0x2c8] sm:$0xff]   ;;  %v2235_v21 = vld [vmem:[%s2374_s25 + $0x250] sm:$0xff]  }
  0x31   : > { %1988 = vmatprep.subr.bf16.mxu1 %v2180_v26  ;;  %v1811_v11 = vcombine.low %v268_v10, %v268_v10  ;;  %v1812_v12 = vcombine.high %v268_v10, %v268_v10  ;;  %v2233_v19 = vld [vmem:[%s2374_s25 + $0x208] sm:$0xff]   ;;  %v2236_v22 = vld [vmem:[%s2374_s25 + $0x2d0] sm:$0xff]   ;;  %v2239_v25 = vld [vmem:[%s2374_s25 + $0x258] sm:$0xff]  }
  0x32   : > { %v2234_v20 = vld [vmem:[%s2374_s25 + $0x288] sm:$0xff]   ;;  %v2237_v23 = vld [vmem:[%s2374_s25 + $0x210] sm:$0xff]   ;;  %v2240_v26 = vld [vmem:[%s2374_s25 + $0x2d8] sm:$0xff]  }
  0x33   : > { %1967 = vmatpush3.bf16.msra.mxu0 %v2181_v27  ;;  %v2238_v24 = vld [vmem:[%s2374_s25 + $0x290] sm:$0xff]   ;;  %v2241_v27 = vld [vmem:[%s2374_s25 + $0x218] sm:$0xff]   ;;  %v2247_v33 = vld [vmem:[%s2374_s25 + $0x268] sm:$0xff]  }
  0x34   : > { %1989 = vmatpush3.bf16.msra.mxu1 %v2182_v28  ;;  %1968 = vmatprep.subr.bf16.mxu0 %v2183_v29  ;;  %v2242_v28 = vld [vmem:[%s2374_s25 + $0x298] sm:$0xff]   ;;  %v2243_v29 = vld [vmem:[%s2374_s25 + $0x260] sm:$0xff]   ;;  %v2248_v34 = vld [vmem:[%s2374_s25 + $0x2e8] sm:$0xff]  }
  0x35   : > { %1990 = vmatprep.subr.bf16.mxu1 %v2184_v30  ;;  %v2244_v30 = vld [vmem:[%s2374_s25 + $0x2e0] sm:$0xff]   ;;  %v2250_v36 = vld [vmem:[%s2374_s25 + $0x2a8] sm:$0xff]   ;;  %v2252_v38 = vld [vmem:[%s2374_s25 + $0x2f0] sm:$0xff]  }
  0x36   : > { %v2283_v7 = vld [vmem:[%s2374_s25 + $0x368] sm:$0xff]  }
  0x37   : > { %1969 = vmatpush3.bf16.msra.mxu0 %v2185_v31  ;;  %v2245_v31 = vld [vmem:[%s2374_s25 + $0x220] sm:$0xff]   ;;  %v2286_v10 = vld [vmem:[%s2374_s25 + $0x3a8] sm:$0xff]  }
  0x38   : > { %1991 = vmatpush3.bf16.msra.mxu1 %v2186_v32  ;;  %1998 = vmatprep.subr.bf16.mxu0 %v2191_v39  ;;  %v2246_v32 = vld [vmem:[%s2374_s25 + $0x2a0] sm:$0xff]   ;;  %v2253_v39 = vld [vmem:[%s2374_s25 + $0x230] sm:$0xff]  }
  0x39   : > { %2020 = vmatprep.subr.bf16.mxu1 %v2192_v40  ;;  %v2254_v40 = vld [vmem:[%s2374_s25 + $0x2b0] sm:$0xff]  }
  0x3a   : > { %1387 = vmatmul.mubr.bf16.vlgmr.msra.gmra.mrb[0].mxu0 %v1805_v35  ;;  %v2249_v35 = vld [vmem:[%s2374_s25 + $0x228] sm:$0xff]  }
  0x3b   : > { %1427 = vmatmul.mubr.bf16.vlgmr.msra.gmra.mrb[0].mxu1 %v1807_v37  ;;  %1999 = vmatpush3.bf16.msra.mxu0 %v2193_v41  ;;  %v2251_v37 = vld [vmem:[%s2374_s25 + $0x270] sm:$0xff]   ;;  %v2255_v41 = vld [vmem:[%s2374_s25 + $0x278] sm:$0xff]  }
  0x3c   : > { %2021 = vmatpush3.bf16.msra.mxu1 %v2194_v42  ;;  %2000 = vmatprep.subr.bf16.mxu0 %v2195_v43  ;;  %v2256_v42 = vld [vmem:[%s2374_s25 + $0x2f8] sm:$0xff]  }
  0x3d   : > { %2022 = vmatprep.subr.bf16.mxu1 %v2196_v44  ;;  %1466 = vmatprep.mubr.bf16.mxu0 %v1810_v9  ;;  %v2257_v43 = vld [vmem:[%s2374_s25 + $0x238] sm:$0xff]   ;;  %v2285_v9 = vld [vmem:[%s2374_s25 + $0x328] sm:$0xff]  }
  0x3e   : > { %1506 = vmatprep.mubr.bf16.mxu1 %v1812_v12  ;;  %v2258_v44 = vld [vmem:[%s2374_s25 + $0x2b8] sm:$0xff]   ;;  %v2288_v12 = vld [vmem:[%s2374_s25 + $0x3f0] sm:$0xff]  }
  0x3f   : > { %2001 = vmatpush3.bf16.msra.mxu0 %v2197_v45  ;;  %v269_v45 = vld [vmem:[%s2369_s21 + $0x20] sm:$0xff] }
  0x40   : > { %2023 = vmatpush3.bf16.msra.mxu1 %v2198_v46  ;;  %2002 = vmatprep.subr.bf16.mxu0 %v2199_v47  ;;  %v270_v46 = vld [vmem:[%s2369_s21 + $0x28] sm:$0xff]  ;;  %v1813_v47 = vcombine.low %v269_v45, %v269_v45 }
  0x41   : > { %2024 = vmatprep.subr.bf16.mxu1 %v2200_v48  ;;  %v1814_v48 = vcombine.high %v269_v45, %v269_v45 }
  0x43   : > { %2003 = vmatpush3.bf16.msra.mxu0 %v2201_v49  ;;  %v1815_v49 = vcombine.low %v270_v46, %v270_v46 }
  0x44   : > { %2025 = vmatpush3.bf16.msra.mxu1 %v2202_v50  ;;  %2004 = vmatprep.subr.bf16.mxu0 %v2203_v51  ;;  %v1816_v50 = vcombine.high %v270_v46, %v270_v46  ;;  %v2263_v51 = vld [vmem:[%s2374_s25 + $0x340] sm:$0xff]  }
  0x45   : > { %2026 = vmatprep.subr.bf16.mxu1 %v2204_v52  ;;  %v2264_v52 = vld [vmem:[%s2374_s25 + $0x3c0] sm:$0xff]  }
  0x47   : > { %2005 = vmatpush3.bf16.msra.mxu0 %v2205_v53  ;;  %v2265_v53 = vld [vmem:[%s2374_s25 + $0x300] sm:$0xff]  }
  0x48   : > { %2027 = vmatpush3.bf16.msra.mxu1 %v2206_v54  ;;  %2006 = vmatprep.subr.bf16.mxu0 %v2207_v55  ;;  %v2266_v54 = vld [vmem:[%s2374_s25 + $0x380] sm:$0xff]   ;;  %v2267_v55 = vld [vmem:[%s2374_s25 + $0x348] sm:$0xff]  }
  0x49   : > { %2028 = vmatprep.subr.bf16.mxu1 %v2208_v56  ;;  %v2268_v56 = vld [vmem:[%s2374_s25 + $0x3c8] sm:$0xff]  }
  0x4b   : > { %2007 = vmatpush3.bf16.msra.mxu0 %v2209_v57  ;;  %v2269_v57 = vld [vmem:[%s2374_s25 + $0x308] sm:$0xff]  }
  0x4c   : > { %2029 = vmatpush3.bf16.msra.mxu1 %v2210_v58  ;;  %2008 = vmatprep.subr.bf16.mxu0 %v2211_v59  ;;  %v2270_v58 = vld [vmem:[%s2374_s25 + $0x388] sm:$0xff]   ;;  %v2271_v59 = vld [vmem:[%s2374_s25 + $0x350] sm:$0xff]  }
  0x4d   : > { %2030 = vmatprep.subr.bf16.mxu1 %v2212_v60  ;;  %v2272_v60 = vld [vmem:[%s2374_s25 + $0x3d0] sm:$0xff]  }
  0x4f   : > { %2009 = vmatpush3.bf16.msra.mxu0 %v2213_v61  ;;  %v2273_v61 = vld [vmem:[%s2374_s25 + $0x310] sm:$0xff]  }
  0x50   : > { %2031 = vmatpush3.bf16.msra.mxu1 %v2214_v62  ;;  %2010 = vmatprep.subr.bf16.mxu0 %v2215_v63  ;;  %v2274_v62 = vld [vmem:[%s2374_s25 + $0x390] sm:$0xff]   ;;  %v2275_v63 = vld [vmem:[%s2374_s25 + $0x358] sm:$0xff]  }
  0x51   : > { %2032 = vmatprep.subr.bf16.mxu1 %v2216_v0  ;;  %v2276_v0 = vld [vmem:[%s2374_s25 + $0x3d8] sm:$0xff]  }
  0x53   : > { %2011 = vmatpush3.bf16.msra.mxu0 %v2217_v1  ;;  %v2277_v1 = vld [vmem:[%s2374_s25 + $0x318] sm:$0xff]  }
  0x54   : > { %2033 = vmatpush3.bf16.msra.mxu1 %v2218_v2  ;;  %2012 = vmatprep.subr.bf16.mxu0 %v2219_v3  ;;  %v2278_v2 = vld [vmem:[%s2374_s25 + $0x398] sm:$0xff]   ;;  %v2279_v3 = vld [vmem:[%s2374_s25 + $0x360] sm:$0xff]  }
  0x55   : > { %2034 = vmatprep.subr.bf16.mxu1 %v2220_v4  ;;  %v2280_v4 = vld [vmem:[%s2374_s25 + $0x3e0] sm:$0xff]  }
  0x57   : > { %2013 = vmatpush3.bf16.msra.mxu0 %v2221_v5  ;;  %v2281_v5 = vld [vmem:[%s2374_s25 + $0x320] sm:$0xff]  }
  0x58   : > { %2035 = vmatpush3.bf16.msra.mxu1 %v2222_v6  ;;  %2042 = vmatprep.subr.bf16.mxu0 %v2227_v13  ;;  %v2282_v6 = vld [vmem:[%s2374_s25 + $0x3a0] sm:$0xff]   ;;  %v2289_v13 = vld [vmem:[%s2374_s25 + $0x330] sm:$0xff]  }
  0x59   : > { %2064 = vmatprep.subr.bf16.mxu1 %v2228_v14  ;;  %v2290_v14 = vld [vmem:[%s2374_s25 + $0x3b0] sm:$0xff]  }
  0x5a   : > { %1467 = vmatmul.mubr.bf16.vlgmr.msra.gmra.mrb[4].mxu0 %v1809_v8  ;;  %v2284_v8 = vld [vmem:[%s2374_s25 + $0x3e8] sm:$0xff]  }
  0x5b   : > { %1507 = vmatmul.mubr.bf16.vlgmr.msra.gmra.mrb[4].mxu1 %v1811_v11  ;;  %2043 = vmatpush3.bf16.msra.mxu0 %v2229_v15  ;;  %v2287_v11 = vld [vmem:[%s2374_s25 + $0x370] sm:$0xff]   ;;  %v2291_v15 = vld [vmem:[%s2374_s25 + $0x378] sm:$0xff]  }
  0x5c   : > { %2065 = vmatpush3.bf16.msra.mxu1 %v2230_v16  ;;  %2044 = vmatprep.subr.bf16.mxu0 %v2231_v17  ;;  %v2292_v16 = vld [vmem:[%s2374_s25 + $0x3f8] sm:$0xff]  }
  0x5d   : > { %2066 = vmatprep.subr.bf16.mxu1 %v2232_v18  ;;  %1546 = vmatprep.mubr.bf16.mxu0 %v1814_v48  ;;  %v2293_v17 = vld [vmem:[%s2374_s25 + $0x338] sm:$0xff]  }
  0x5e   : > { %1586 = vmatprep.mubr.bf16.mxu1 %v1816_v50  ;;  %v2294_v18 = vld [vmem:[%s2374_s25 + $0x3b8] sm:$0xff]  }
  0x5f   : > { %2045 = vmatpush3.bf16.msra.mxu0 %v2233_v19  ;;  %v271_v19 = vld [vmem:[%s2369_s21 + $0x30] sm:$0xff] }
  0x60   : > { %2067 = vmatpush3.bf16.msra.mxu1 %v2234_v20  ;;  %2046 = vmatprep.subr.bf16.mxu0 %v2235_v21  ;;  %v272_v20 = vld [vmem:[%s2369_s21 + $0x38] sm:$0xff]  ;;  %v1817_v21 = vcombine.low %v271_v19, %v271_v19 }
  0x61   : > { %2068 = vmatprep.subr.bf16.mxu1 %v2236_v22  ;;  %v1818_v22 = vcombine.high %v271_v19, %v271_v19 }
  0x63   : > { %2047 = vmatpush3.bf16.msra.mxu0 %v2237_v23  ;;  %v1819_v23 = vcombine.low %v272_v20, %v272_v20 }
  0x64   : > { %2069 = vmatpush3.bf16.msra.mxu1 %v2238_v24  ;;  %2048 = vmatprep.subr.bf16.mxu0 %v2239_v25  ;;  %v1820_v24 = vcombine.high %v272_v20, %v272_v20 }
  0x65   : > { %2070 = vmatprep.subr.bf16.mxu1 %v2240_v26 }
  0x67   : > { %2049 = vmatpush3.bf16.msra.mxu0 %v2241_v27 }
  0x68   : > { %2071 = vmatpush3.bf16.msra.mxu1 %v2242_v28  ;;  %2050 = vmatprep.subr.bf16.mxu0 %v2243_v29 }
  0x69   : > { %2072 = vmatprep.subr.bf16.mxu1 %v2244_v30 }
  0x6b   : > { %2051 = vmatpush3.bf16.msra.mxu0 %v2245_v31 }
  0x6c   : > { %2073 = vmatpush3.bf16.msra.mxu1 %v2246_v32  ;;  %2052 = vmatprep.subr.bf16.mxu0 %v2247_v33 }
  0x6d   : > { %2074 = vmatprep.subr.bf16.mxu1 %v2248_v34 }
  0x6f   : > { %2053 = vmatpush3.bf16.msra.mxu0 %v2249_v35 }
  0x70   : > { %2075 = vmatpush3.bf16.msra.mxu1 %v2250_v36  ;;  %2054 = vmatprep.subr.bf16.mxu0 %v2251_v37 }
  0x71   : > { %2076 = vmatprep.subr.bf16.mxu1 %v2252_v38 }
  0x73   : > { %2055 = vmatpush3.bf16.msra.mxu0 %v2253_v39 }
  0x74   : > { %2077 = vmatpush3.bf16.msra.mxu1 %v2254_v40  ;;  %2056 = vmatprep.subr.bf16.mxu0 %v2255_v41 }
  0x75   : > { %2078 = vmatprep.subr.bf16.mxu1 %v2256_v42 }
  0x77   : > { %2057 = vmatpush3.bf16.msra.mxu0 %v2257_v43 }
  0x78   : > { %2079 = vmatpush3.bf16.msra.mxu1 %v2258_v44  ;;  %2086 = vmatprep.subr.bf16.mxu0 %v2263_v51 }
  0x79   : > { %2108 = vmatprep.subr.bf16.mxu1 %v2264_v52 }
  0x7a   : > { %1547 = vmatmul.mubr.bf16.vlgmr.msra.gmra.mrb[8].mxu0 %v1813_v47 }
  0x7b   : > { %1587 = vmatmul.mubr.bf16.vlgmr.msra.gmra.mrb[8].mxu1 %v1815_v49  ;;  %2087 = vmatpush3.bf16.msra.mxu0 %v2265_v53 }
  0x7c   : > { %2109 = vmatpush3.bf16.msra.mxu1 %v2266_v54  ;;  %2088 = vmatprep.subr.bf16.mxu0 %v2267_v55 }
  0x7d   : > { %2110 = vmatprep.subr.bf16.mxu1 %v2268_v56  ;;  %1626 = vmatprep.mubr.bf16.mxu0 %v1818_v22 }
  0x7e   : > { %1666 = vmatprep.mubr.bf16.mxu1 %v1820_v24 }
  0x7f   : > { %2089 = vmatpush3.bf16.msra.mxu0 %v2269_v57 }
  0x80   : > { %2111 = vmatpush3.bf16.msra.mxu1 %v2270_v58  ;;  %2090 = vmatprep.subr.bf16.mxu0 %v2271_v59 }
  0x81   : > { %2112 = vmatprep.subr.bf16.mxu1 %v2272_v60 }
  0x83   : > { %2091 = vmatpush3.bf16.msra.mxu0 %v2273_v61 }
  0x84   : > { %2113 = vmatpush3.bf16.msra.mxu1 %v2274_v62  ;;  %2092 = vmatprep.subr.bf16.mxu0 %v2275_v63 }
  0x85   : > { %2114 = vmatprep.subr.bf16.mxu1 %v2276_v0 }
  0x87   : > { %2093 = vmatpush3.bf16.msra.mxu0 %v2277_v1 }
  0x88   : > { %2115 = vmatpush3.bf16.msra.mxu1 %v2278_v2  ;;  %2094 = vmatprep.subr.bf16.mxu0 %v2279_v3 }
  0x89   : > { %2116 = vmatprep.subr.bf16.mxu1 %v2280_v4 }
  0x8b   : > { %2095 = vmatpush3.bf16.msra.mxu0 %v2281_v5 }
  0x8c   : > { %2117 = vmatpush3.bf16.msra.mxu1 %v2282_v6  ;;  %2096 = vmatprep.subr.bf16.mxu0 %v2283_v7  ;;  %v529_v7 = vld [vmem:[#allocation2] sm:$0xff] }
  0x8d   : > { %2118 = vmatprep.subr.bf16.mxu1 %v2284_v8 }
  0x8f   : > { %2097 = vmatpush3.bf16.msra.mxu0 %v2285_v9 }
  0x90   : > { %2119 = vmatpush3.bf16.msra.mxu1 %v2286_v10  ;;  %2098 = vmatprep.subr.bf16.mxu0 %v2287_v11  ;;  %v1950_v11 = vld [vmem:[%s2531_s2] ss:$0 sm:$0xff] (!%p1949_p7) }
  0x91   : > { %2120 = vmatprep.subr.bf16.mxu1 %v2288_v12 }
  0x93   : > { %2099 = vmatpush3.bf16.msra.mxu0 %v2289_v13 }
  0x94   : > { %2121 = vmatpush3.bf16.msra.mxu1 %v2290_v14  ;;  %2100 = vmatprep.subr.bf16.mxu0 %v2291_v15 }
  0x95   : > { %2122 = vmatprep.subr.bf16.mxu1 %v2292_v16 }
  0x97   : > { %2101 = vmatpush3.bf16.msra.mxu0 %v2293_v17 }
  0x98   : > { %2123 = vmatpush3.bf16.msra.mxu1 %v2294_v18 }
  0x9a   : > { %1627 = vmatmul.mubr.bf16.vlgmr.msra.gmra.mrb[12].mxu0 %v1817_v21 }
  0x9b   : > { %1667 = vmatmul.mubr.bf16.vlgmr.msra.gmra.mrb[12].mxu1 %v1819_v23 }
 0x10d   : > { %v1970_v25 = vpop.f32.mrb[0].mxu0 }
 0x10e   : > { %v1992_v26 = vpop.f32.mrb[0].mxu1  ;;  %v1971_v27 = vpop.f32.mrb[1].mxu0 }
 0x10f   : > { %v1993_v28 = vpop.f32.mrb[1].mxu1  ;;  %v1972_v29 = vadd.f32 %v1971_v27, %v1970_v25  ;;  %v1973_v31 = vpop.f32.mrb[2].mxu0 }
 0x110   : > { %v1994_v30 = vadd.f32 %v1993_v28, %v1992_v26  ;;  %v1995_v32 = vpop.f32.mrb[2].mxu1  ;;  %v1974_v33 = vpop.f32.mrb[3].mxu0 }
 0x111   : > { %v1996_v34 = vpop.f32.mrb[3].mxu1 }
 0x112   : > { %v1429_v35 = vadd.f32 %v1994_v30, %v1972_v29 }
 0x12d   : > { %v2014_v36 = vpop.f32.mrb[4].mxu0 }
 0x12e   : > { %v2036_v37 = vpop.f32.mrb[4].mxu1  ;;  %v2015_v38 = vpop.f32.mrb[5].mxu0 }
 0x12f   : > { %v2037_v39 = vpop.f32.mrb[5].mxu1  ;;  %v2016_v40 = vadd.f32 %v2015_v38, %v2014_v36  ;;  %v2017_v42 = vpop.f32.mrb[6].mxu0 }
 0x130   : > { %v2038_v41 = vadd.f32 %v2037_v39, %v2036_v37  ;;  %v2039_v43 = vpop.f32.mrb[6].mxu1  ;;  %v2018_v44 = vpop.f32.mrb[7].mxu0 }
 0x131   : > { %v2040_v45 = vpop.f32.mrb[7].mxu1  ;;  %v1469_v46 = vadd.f32 %v2016_v40, %v1429_v35 }
 0x133   : > { %v1509_v47 = vadd.f32 %v2038_v41, %v1469_v46 }
 0x14d   : > { %v2058_v48 = vpop.f32.mrb[8].mxu0 }
 0x14e   : > { %v2080_v49 = vpop.f32.mrb[8].mxu1  ;;  %v2059_v50 = vpop.f32.mrb[9].mxu0 }
 0x14f   : > { %v2060_v51 = vadd.f32 %v2059_v50, %v2058_v48  ;;  %v2081_v52 = vpop.f32.mrb[9].mxu1  ;;  %v2061_v53 = vpop.f32.mrb[10].mxu0 }
 0x150   : > { %v2082_v54 = vadd.f32 %v2081_v52, %v2080_v49  ;;  %v2083_v55 = vpop.f32.mrb[10].mxu1  ;;  %v2062_v56 = vpop.f32.mrb[11].mxu0 }
 0x151   : > { %v1549_v57 = vadd.f32 %v2060_v51, %v1509_v47  ;;  %v2084_v58 = vpop.f32.mrb[11].mxu1 }
 0x153   : > { %v1589_v59 = vadd.f32 %v2082_v54, %v1549_v57 }
 0x16d   : > { %v2102_v60 = vpop.f32.mrb[12].mxu0 }
 0x16e   : > { %v2124_v61 = vpop.f32.mrb[12].mxu1  ;;  %v2103_v62 = vpop.f32.mrb[13].mxu0 }
 0x16f   : > { %v2104_v63 = vadd.f32 %v2103_v62, %v2102_v60  ;;  %v2125_v0 = vpop.f32.mrb[13].mxu1  ;;  %v2105_v1 = vpop.f32.mrb[14].mxu0 }
 0x170   : > { %v2126_v2 = vadd.f32 %v2125_v0, %v2124_v61  ;;  %v2127_v3 = vpop.f32.mrb[14].mxu1  ;;  %v2106_v4 = vpop.f32.mrb[15].mxu0 }
 0x171   : > { %v1629_v5 = vadd.f32 %v2104_v63, %v1589_v59  ;;  %v2128_v6 = vpop.f32.mrb[15].mxu1  ;;  %1679 = sbr.rel (%p1949_p7) target bundleno = 386 (0x182), region = 40 }
 0x173   : > { %v1669_v8 = vadd.f32 %v2126_v2, %v1629_v5 }
 0x175   : > { %v1674_v9 = vadd.f32 %v1669_v8, %v529_v7 }
 0x177   : > { %1675 = vst [vmem:[#allocation2] sm:$0xff] %v1674_v9 }
 0x17e   : > { %v1680_v10 = vld [vmem:[#allocation2] sm:$0xff] }
 0x17f   : > { %v1688_v12 = vadd.f32 %v1950_v11, %v1680_v10 }
 0x181   : > { %1689 = vst [vmem:[%s2532_s3] sm:$0xff] %v1688_v12 }
 0x182 PF: > { %s13_s14 = sadd.s32 1, %s2321_s14   ;;  %s2533_s12 = smov %s2317_s13 }
 0x183   : > { %p10_p8 = scmp.ge.s32.totalorder %s13_s14, 4   ;;  %s2534_s13 = smov %s2536_s15 }
 0x185   :  { %12 = sbr.rel (!%p10_p8) target bundleno = 2 (0x2), region = 76 }

// kernel: apnet_forward.17
= control target key start
LH: loop header
LB: loop body
LE: loop exit
PB: predicated region body
PF: predicated region fallthrough
CT: control target
= control target key end

     0   :  { %s110_s0 = inlined_call_operand.vmem [shape: f32[8,128], index: 0, kind: input, shape index: {}]   ;;  %s111_s1 = inlined_call_operand.vmem [shape: f32[8,128], index: 1, kind: input, shape index: {}]   ;;  %s112_s2 = inlined_call_operand.hbm [shape: f32[1], index: 2, kind: output, shape index: {}]  }
   0x1   :  { %v12_v0 = vld [vmem:[%s110_s0] sm:$0xff] }
   0x2   :  { %7 = vsyncpa [#allocation3], 0  ;;  %13 = vmax.xlane.f32.xlu0 %v12_v0  ;;  %v23_v1 = vld [vmem:[%s111_s1] sm:$0xff]  ;;  %vm28_vm0 = vcmask 7168   ;;  %s64_s15 = scalar_lea.hbm %s112_s2, 16 }
   0x3   :  { %v24_v2 = vmul.f32 %v23_v1, %v12_v0  ;;  %p65_p0 = scmp.ne.s32.totalorder %s112_s2, %s64_s15  ;;  %p68_p1 = scmp.lt.u32.totalorder %s64_s15, %s112_s2 }
   0x5   :  { %25 = vadd.xlane.f32.xlu1 %v24_v2  ;;  %p70_p2 = pnand %p68_p1, %p65_p0 }
  0x8f   :  { %v14_v3 = vpop.xlane.xlu0 %13 }
  0x90   :  { %v15_v4 = vsub.f32 %v12_v0, %v14_v3 }
  0x92   :  { %v16_v5 = vmul.f32 1.442695, %v15_v4  ;;  %v26_v10 = vpop.xlane.xlu1 %25 }
  0x94   :  { %60 = vpow2.f32 %v16_v5 }
  0x9e   :  { %v61_v6 = vpop.eup %60 }
  0x9f   :  { %18 = vadd.xlane.f32.xlu0 %v61_v6 }
 0x12c   :  { %v19_v7 = vpop.xlane.xlu0 %18 }
 0x12d   :  { %62 = vlog2.f32 %v19_v7 }
 0x137   :  { %v63_v8 = vpop.eup %62 }
 0x138   :  { %v21_v9 = vmul.f32 0.6931472, %v63_v8 }
 0x13a   :  { %v22_v11 = vadd.f32 %v21_v9, %v14_v3 }
 0x13c   :  { %v27_v12 = vsub.f32 %v22_v11, %v26_v10 }
 0x13e   :  { %v29_v13 = vsel %vm28_vm0, %v27_v12, 0.0 }
 0x13f   :  { %30 = vadd.xlane.f32.xlu1 %v29_v13 }
 0x1cc   :  { %v31_v14 = vpop.xlane.xlu1 %30 }
 0x1cd   :  { %v32_v15 = vrot.slane %v31_v14, 4 }
 0x1cf   :  { %v33_v16 = vadd.f32 %v32_v15, %v31_v14 }
 0x1d1   :  { %v34_v17 = vrot.slane %v33_v16, 2 }
 0x1d3   :  { %v35_v18 = vadd.f32 %v34_v17, %v33_v16 }
 0x1d5   :  { %v36_v19 = vrot.slane %v35_v18, 1 }
 0x1d7   :  { %v37_v20 = vadd.f32 %v36_v19, %v35_v18 }
 0x1d9   :  { %57 = vpush %v37_v20 }
 0x20a   :  { %s58_s0 = spop %57 }
 0x20b   :  { %s41_s1 = smul.f32 0.125, %s58_s0 }
 0x20d   :  { %43 = sst [smem:[#allocation2]] %s41_s1 }
 0x20e   :  { %73 = shalt.err (!%p70_p2)
}
 0x20f   :  { %s76_s20 = smov [#allocation2]  }
 0x210   :  { %51 = dma.smem_to_hbm %s76_s20, 16, %s112_s2, [#allocation3]  }
 0x211   :  { %74 = dma.done.wait [#allocation3], 16  }
 0x212   :  { %75 = vsyncadd [#allocation3], 4294967280 }
 0x213   :  { %55 = sfence }
 0x214   :  { %56 = vsyncpa [#allocation3], 1 }

// kernel: apnet_forward.16
= control target key start
LH: loop header
LB: loop body
LE: loop exit
PB: predicated region body
PF: predicated region fallthrough
CT: control target
= control target key end

     0   :  { %s2347_s1 = inlined_call_operand.vmem [shape: bf16[2048,128], index: 1, kind: input, shape index: {}]   ;;  %s2348_s0 = inlined_call_operand.vmem [shape: bf16[8,2048], index: 0, kind: input, shape index: {}]   ;;  %s2349_s2 = inlined_call_operand.vmem [shape: f32[1,128], index: 2, kind: input, shape index: {}]   ;;  %s2350_s3 = inlined_call_operand.vmem [shape: f32[8,128], index: 3, kind: output, shape index: {}]  }
   0x1   :  { %v1769_v0 = vld [vmem:[%s2347_s1 + $0x40] sm:$0xff]   ;;  %v1773_v4 = vld [vmem:[%s2347_s1 + $0x48] sm:$0xff]   ;;  %v1777_v8 = vld [vmem:[%s2347_s1 + $0x50] sm:$0xff]  }
   0x2   :  { %v1770_v1 = vld [vmem:[%s2347_s1 + $0xc0] sm:$0xff]   ;;  %1593 = vmatprep.subr.bf16.mxu0 %v1769_v0  ;;  %v1774_v5 = vld [vmem:[%s2347_s1 + $0xc8] sm:$0xff]   ;;  %v1778_v9 = vld [vmem:[%s2347_s1 + $0xd0] sm:$0xff]  }
   0x3   :  { %v1771_v2 = vld [vmem:[%s2347_s1] sm:$0xff]   ;;  %1615 = vmatprep.subr.bf16.mxu1 %v1770_v1  ;;  %v1775_v6 = vld [vmem:[%s2347_s1 + $0x8] sm:$0xff]   ;;  %v1779_v10 = vld [vmem:[%s2347_s1 + $0x10] sm:$0xff]  }
   0x4   :  { %v1772_v3 = vld [vmem:[%s2347_s1 + $0x80] sm:$0xff]   ;;  %1594 = vmatpush3.bf16.msra.mxu0 %v1771_v2  ;;  %v1776_v7 = vld [vmem:[%s2347_s1 + $0x88] sm:$0xff]   ;;  %v1780_v11 = vld [vmem:[%s2347_s1 + $0x90] sm:$0xff]  }
   0x5   :  { %1616 = vmatpush3.bf16.msra.mxu1 %v1772_v3  ;;  %1595 = vmatprep.subr.bf16.mxu0 %v1773_v4  ;;  %v1781_v12 = vld [vmem:[%s2347_s1 + $0x58] sm:$0xff]   ;;  %v1785_v16 = vld [vmem:[%s2347_s1 + $0x60] sm:$0xff]   ;;  %v1789_v20 = vld [vmem:[%s2347_s1 + $0x68] sm:$0xff]  }
   0x6   :  { %1617 = vmatprep.subr.bf16.mxu1 %v1774_v5  ;;  %v1782_v13 = vld [vmem:[%s2347_s1 + $0xd8] sm:$0xff]   ;;  %v1786_v17 = vld [vmem:[%s2347_s1 + $0xe0] sm:$0xff]   ;;  %v1790_v21 = vld [vmem:[%s2347_s1 + $0xe8] sm:$0xff]  }
   0x7   :  { %v1783_v14 = vld [vmem:[%s2347_s1 + $0x18] sm:$0xff]   ;;  %v1787_v18 = vld [vmem:[%s2347_s1 + $0x20] sm:$0xff]   ;;  %v1791_v22 = vld [vmem:[%s2347_s1 + $0x28] sm:$0xff]  }
   0x8   :  { %1596 = vmatpush3.bf16.msra.mxu0 %v1775_v6  ;;  %v1784_v15 = vld [vmem:[%s2347_s1 + $0x98] sm:$0xff]   ;;  %v1788_v19 = vld [vmem:[%s2347_s1 + $0xa0] sm:$0xff]   ;;  %v1792_v23 = vld [vmem:[%s2347_s1 + $0xa8] sm:$0xff]  }
   0x9   :  { %1618 = vmatpush3.bf16.msra.mxu1 %v1776_v7  ;;  %1597 = vmatprep.subr.bf16.mxu0 %v1777_v8  ;;  %v1793_v24 = vld [vmem:[%s2347_s1 + $0x70] sm:$0xff]   ;;  %v1797_v28 = vld [vmem:[%s2347_s1 + $0x78] sm:$0xff]   ;;  %v20_v32 = vld [vmem:[%s2348_s0] sm:$0xff] }
   0xa   :  { %1619 = vmatprep.subr.bf16.mxu1 %v1778_v9  ;;  %v1794_v25 = vld [vmem:[%s2347_s1 + $0xf0] sm:$0xff]   ;;  %v1798_v29 = vld [vmem:[%s2347_s1 + $0xf8] sm:$0xff]   ;;  %v21_v33 = vld [vmem:[%s2348_s0 + $0x8] sm:$0xff]  ;;  %v1448_v34 = vcombine.low %v20_v32, %v20_v32  ;;  %v1449_v35 = vcombine.high %v20_v32, %v20_v32 }
   0xb   :  { %v1795_v26 = vld [vmem:[%s2347_s1 + $0x30] sm:$0xff]   ;;  %v1799_v30 = vld [vmem:[%s2347_s1 + $0x38] sm:$0xff]   ;;  %v1450_v36 = vcombine.low %v21_v33, %v21_v33  ;;  %v1451_v37 = vcombine.high %v21_v33, %v21_v33  ;;  %v1805_v38 = vld [vmem:[%s2347_s1 + $0x140] sm:$0xff]  }
   0xc   :  { %1598 = vmatpush3.bf16.msra.mxu0 %v1779_v10  ;;  %v1796_v27 = vld [vmem:[%s2347_s1 + $0xb0] sm:$0xff]   ;;  %v1800_v31 = vld [vmem:[%s2347_s1 + $0xb8] sm:$0xff]   ;;  %v1806_v39 = vld [vmem:[%s2347_s1 + $0x1c0] sm:$0xff]   ;;  %1141 = vmatprep.mubr.bf16.mxu0 %v1449_v35 }
   0xd   :  { %1620 = vmatpush3.bf16.msra.mxu1 %v1780_v11  ;;  %1599 = vmatprep.subr.bf16.mxu0 %v1781_v12  ;;  %v1807_v40 = vld [vmem:[%s2347_s1 + $0x100] sm:$0xff]   ;;  %v1809_v42 = vld [vmem:[%s2347_s1 + $0x148] sm:$0xff]   ;;  %v1813_v46 = vld [vmem:[%s2347_s1 + $0x150] sm:$0xff]  }
   0xe   :  { %1621 = vmatprep.subr.bf16.mxu1 %v1782_v13  ;;  %1181 = vmatprep.mubr.bf16.mxu1 %v1451_v37  ;;  %v1808_v41 = vld [vmem:[%s2347_s1 + $0x180] sm:$0xff]   ;;  %v1810_v43 = vld [vmem:[%s2347_s1 + $0x1c8] sm:$0xff]   ;;  %v1814_v47 = vld [vmem:[%s2347_s1 + $0x1d0] sm:$0xff]  }
   0xf   :  { %v1811_v44 = vld [vmem:[%s2347_s1 + $0x108] sm:$0xff]   ;;  %v1815_v48 = vld [vmem:[%s2347_s1 + $0x110] sm:$0xff]   ;;  %v1817_v50 = vld [vmem:[%s2347_s1 + $0x158] sm:$0xff]  }
  0x10   :  { %1600 = vmatpush3.bf16.msra.mxu0 %v1783_v14  ;;  %v1812_v45 = vld [vmem:[%s2347_s1 + $0x188] sm:$0xff]   ;;  %v1816_v49 = vld [vmem:[%s2347_s1 + $0x190] sm:$0xff]   ;;  %v1818_v51 = vld [vmem:[%s2347_s1 + $0x1d8] sm:$0xff]  }
  0x11   :  { %1622 = vmatpush3.bf16.msra.mxu1 %v1784_v15  ;;  %1601 = vmatprep.subr.bf16.mxu0 %v1785_v16  ;;  %v1819_v52 = vld [vmem:[%s2347_s1 + $0x118] sm:$0xff]   ;;  %v1821_v54 = vld [vmem:[%s2347_s1 + $0x160] sm:$0xff]   ;;  %v1825_v58 = vld [vmem:[%s2347_s1 + $0x168] sm:$0xff]  }
  0x12   :  { %1623 = vmatprep.subr.bf16.mxu1 %v1786_v17  ;;  %v1820_v53 = vld [vmem:[%s2347_s1 + $0x198] sm:$0xff]   ;;  %v1822_v55 = vld [vmem:[%s2347_s1 + $0x1e0] sm:$0xff]   ;;  %v1826_v59 = vld [vmem:[%s2347_s1 + $0x1e8] sm:$0xff]  }
  0x13   :  { %v1823_v56 = vld [vmem:[%s2347_s1 + $0x120] sm:$0xff]   ;;  %v1827_v60 = vld [vmem:[%s2347_s1 + $0x128] sm:$0xff]   ;;  %v1829_v62 = vld [vmem:[%s2347_s1 + $0x170] sm:$0xff]  }
  0x14   :  { %1602 = vmatpush3.bf16.msra.mxu0 %v1787_v18  ;;  %v1824_v57 = vld [vmem:[%s2347_s1 + $0x1a0] sm:$0xff]   ;;  %v1828_v61 = vld [vmem:[%s2347_s1 + $0x1a8] sm:$0xff]   ;;  %v1830_v63 = vld [vmem:[%s2347_s1 + $0x1f0] sm:$0xff]  }
  0x15   :  { %1624 = vmatpush3.bf16.msra.mxu1 %v1788_v19  ;;  %1603 = vmatprep.subr.bf16.mxu0 %v1789_v20  ;;  %v1831_v0 = vld [vmem:[%s2347_s1 + $0x130] sm:$0xff]   ;;  %v1833_v2 = vld [vmem:[%s2347_s1 + $0x178] sm:$0xff]   ;;  %v1841_v12 = vld [vmem:[%s2347_s1 + $0x240] sm:$0xff]  }
  0x16   :  { %1625 = vmatprep.subr.bf16.mxu1 %v1790_v21  ;;  %v1832_v1 = vld [vmem:[%s2347_s1 + $0x1b0] sm:$0xff]   ;;  %v1834_v3 = vld [vmem:[%s2347_s1 + $0x1f8] sm:$0xff]   ;;  %v1842_v13 = vld [vmem:[%s2347_s1 + $0x2c0] sm:$0xff]  }
  0x17   :  { %v1835_v4 = vld [vmem:[%s2347_s1 + $0x138] sm:$0xff]   ;;  %v22_v6 = vld [vmem:[%s2348_s0 + $0x10] sm:$0xff]  ;;  %v1843_v14 = vld [vmem:[%s2347_s1 + $0x200] sm:$0xff]  }
  0x18   :  { %1604 = vmatpush3.bf16.msra.mxu0 %v1791_v22  ;;  %v1836_v5 = vld [vmem:[%s2347_s1 + $0x1b8] sm:$0xff]   ;;  %v1452_v7 = vcombine.low %v22_v6, %v22_v6  ;;  %v1453_v8 = vcombine.high %v22_v6, %v22_v6  ;;  %v1844_v15 = vld [vmem:[%s2347_s1 + $0x280] sm:$0xff]   ;;  %v1845_v16 = vld [vmem:[%s2347_s1 + $0x248] sm:$0xff]  }
  0x19   :  { %1626 = vmatpush3.bf16.msra.mxu1 %v1792_v23  ;;  %1605 = vmatprep.subr.bf16.mxu0 %v1793_v24  ;;  %v23_v9 = vld [vmem:[%s2348_s0 + $0x18] sm:$0xff]  ;;  %v1846_v17 = vld [vmem:[%s2347_s1 + $0x2c8] sm:$0xff]   ;;  %v1849_v20 = vld [vmem:[%s2347_s1 + $0x250] sm:$0xff]  }
  0x1a   :  { %1627 = vmatprep.subr.bf16.mxu1 %v1794_v25  ;;  %v1454_v10 = vcombine.low %v23_v9, %v23_v9  ;;  %v1455_v11 = vcombine.high %v23_v9, %v23_v9  ;;  %v1847_v18 = vld [vmem:[%s2347_s1 + $0x208] sm:$0xff]   ;;  %v1850_v21 = vld [vmem:[%s2347_s1 + $0x2d0] sm:$0xff]   ;;  %v1853_v24 = vld [vmem:[%s2347_s1 + $0x258] sm:$0xff]  }
  0x1b   :  { %v1848_v19 = vld [vmem:[%s2347_s1 + $0x288] sm:$0xff]   ;;  %v1851_v22 = vld [vmem:[%s2347_s1 + $0x210] sm:$0xff]   ;;  %v1854_v25 = vld [vmem:[%s2347_s1 + $0x2d8] sm:$0xff]  }
  0x1c   :  { %1606 = vmatpush3.bf16.msra.mxu0 %v1795_v26  ;;  %v1852_v23 = vld [vmem:[%s2347_s1 + $0x290] sm:$0xff]   ;;  %v1855_v26 = vld [vmem:[%s2347_s1 + $0x218] sm:$0xff]   ;;  %v1861_v32 = vld [vmem:[%s2347_s1 + $0x268] sm:$0xff]  }
  0x1d   :  { %1628 = vmatpush3.bf16.msra.mxu1 %v1796_v27  ;;  %1607 = vmatprep.subr.bf16.mxu0 %v1797_v28  ;;  %v1856_v27 = vld [vmem:[%s2347_s1 + $0x298] sm:$0xff]   ;;  %v1857_v28 = vld [vmem:[%s2347_s1 + $0x260] sm:$0xff]   ;;  %v1862_v33 = vld [vmem:[%s2347_s1 + $0x2e8] sm:$0xff]  }
  0x1e   :  { %1629 = vmatprep.subr.bf16.mxu1 %v1798_v29  ;;  %v1858_v29 = vld [vmem:[%s2347_s1 + $0x2e0] sm:$0xff]   ;;  %v1864_v35 = vld [vmem:[%s2347_s1 + $0x2a8] sm:$0xff]   ;;  %v1866_v37 = vld [vmem:[%s2347_s1 + $0x2f0] sm:$0xff]  }
  0x1f   :  { %v1897_v6 = vld [vmem:[%s2347_s1 + $0x368] sm:$0xff]  }
  0x20   :  { %1608 = vmatpush3.bf16.msra.mxu0 %v1799_v30  ;;  %v1859_v30 = vld [vmem:[%s2347_s1 + $0x220] sm:$0xff]   ;;  %v1900_v9 = vld [vmem:[%s2347_s1 + $0x3a8] sm:$0xff]  }
  0x21   :  { %1630 = vmatpush3.bf16.msra.mxu1 %v1800_v31  ;;  %1637 = vmatprep.subr.bf16.mxu0 %v1805_v38  ;;  %v1860_v31 = vld [vmem:[%s2347_s1 + $0x2a0] sm:$0xff]   ;;  %v1867_v38 = vld [vmem:[%s2347_s1 + $0x230] sm:$0xff]  }
  0x22   :  { %1659 = vmatprep.subr.bf16.mxu1 %v1806_v39  ;;  %v1868_v39 = vld [vmem:[%s2347_s1 + $0x2b0] sm:$0xff]  }
  0x23   :  { %1142 = vmatmul.mubr.bf16.vlgmr.msra.gmra.mrb[0].mxu0 %v1448_v34  ;;  %v1863_v34 = vld [vmem:[%s2347_s1 + $0x228] sm:$0xff]  }
  0x24   :  { %1182 = vmatmul.mubr.bf16.vlgmr.msra.gmra.mrb[0].mxu1 %v1450_v36  ;;  %1638 = vmatpush3.bf16.msra.mxu0 %v1807_v40  ;;  %v1865_v36 = vld [vmem:[%s2347_s1 + $0x270] sm:$0xff]   ;;  %v1869_v40 = vld [vmem:[%s2347_s1 + $0x278] sm:$0xff]  }
  0x25   :  { %1660 = vmatpush3.bf16.msra.mxu1 %v1808_v41  ;;  %1639 = vmatprep.subr.bf16.mxu0 %v1809_v42  ;;  %v1870_v41 = vld [vmem:[%s2347_s1 + $0x2f8] sm:$0xff]  }
  0x26   :  { %1661 = vmatprep.subr.bf16.mxu1 %v1810_v43  ;;  %1221 = vmatprep.mubr.bf16.mxu0 %v1453_v8  ;;  %v1871_v42 = vld [vmem:[%s2347_s1 + $0x238] sm:$0xff]   ;;  %v1899_v8 = vld [vmem:[%s2347_s1 + $0x328] sm:$0xff]  }
  0x27   :  { %1261 = vmatprep.mubr.bf16.mxu1 %v1455_v11  ;;  %v1872_v43 = vld [vmem:[%s2347_s1 + $0x2b8] sm:$0xff]   ;;  %v1902_v11 = vld [vmem:[%s2347_s1 + $0x3f0] sm:$0xff]  }
  0x28   :  { %1640 = vmatpush3.bf16.msra.mxu0 %v1811_v44  ;;  %v24_v44 = vld [vmem:[%s2348_s0 + $0x20] sm:$0xff] }
  0x29   :  { %1662 = vmatpush3.bf16.msra.mxu1 %v1812_v45  ;;  %1641 = vmatprep.subr.bf16.mxu0 %v1813_v46  ;;  %v25_v45 = vld [vmem:[%s2348_s0 + $0x28] sm:$0xff]  ;;  %v1456_v46 = vcombine.low %v24_v44, %v24_v44 }
  0x2a   :  { %1663 = vmatprep.subr.bf16.mxu1 %v1814_v47  ;;  %v1457_v47 = vcombine.high %v24_v44, %v24_v44 }
  0x2c   :  { %1642 = vmatpush3.bf16.msra.mxu0 %v1815_v48  ;;  %v1458_v48 = vcombine.low %v25_v45, %v25_v45 }
  0x2d   :  { %1664 = vmatpush3.bf16.msra.mxu1 %v1816_v49  ;;  %1643 = vmatprep.subr.bf16.mxu0 %v1817_v50  ;;  %v1459_v49 = vcombine.high %v25_v45, %v25_v45  ;;  %v1877_v50 = vld [vmem:[%s2347_s1 + $0x340] sm:$0xff]  }
  0x2e   :  { %1665 = vmatprep.subr.bf16.mxu1 %v1818_v51  ;;  %v1878_v51 = vld [vmem:[%s2347_s1 + $0x3c0] sm:$0xff]  }
  0x30   :  { %1644 = vmatpush3.bf16.msra.mxu0 %v1819_v52  ;;  %v1879_v52 = vld [vmem:[%s2347_s1 + $0x300] sm:$0xff]  }
  0x31   :  { %1666 = vmatpush3.bf16.msra.mxu1 %v1820_v53  ;;  %1645 = vmatprep.subr.bf16.mxu0 %v1821_v54  ;;  %v1880_v53 = vld [vmem:[%s2347_s1 + $0x380] sm:$0xff]   ;;  %v1881_v54 = vld [vmem:[%s2347_s1 + $0x348] sm:$0xff]  }
  0x32   :  { %1667 = vmatprep.subr.bf16.mxu1 %v1822_v55  ;;  %v1882_v55 = vld [vmem:[%s2347_s1 + $0x3c8] sm:$0xff]  }
  0x34   :  { %1646 = vmatpush3.bf16.msra.mxu0 %v1823_v56  ;;  %v1883_v56 = vld [vmem:[%s2347_s1 + $0x308] sm:$0xff]  }
  0x35   :  { %1668 = vmatpush3.bf16.msra.mxu1 %v1824_v57  ;;  %1647 = vmatprep.subr.bf16.mxu0 %v1825_v58  ;;  %v1884_v57 = vld [vmem:[%s2347_s1 + $0x388] sm:$0xff]   ;;  %v1885_v58 = vld [vmem:[%s2347_s1 + $0x350] sm:$0xff]  }
  0x36   :  { %1669 = vmatprep.subr.bf16.mxu1 %v1826_v59  ;;  %v1886_v59 = vld [vmem:[%s2347_s1 + $0x3d0] sm:$0xff]  }
  0x38   :  { %1648 = vmatpush3.bf16.msra.mxu0 %v1827_v60  ;;  %v1887_v60 = vld [vmem:[%s2347_s1 + $0x310] sm:$0xff]  }
  0x39   :  { %1670 = vmatpush3.bf16.msra.mxu1 %v1828_v61  ;;  %1649 = vmatprep.subr.bf16.mxu0 %v1829_v62  ;;  %v1888_v61 = vld [vmem:[%s2347_s1 + $0x390] sm:$0xff]   ;;  %v1889_v62 = vld [vmem:[%s2347_s1 + $0x358] sm:$0xff]  }
  0x3a   :  { %1671 = vmatprep.subr.bf16.mxu1 %v1830_v63  ;;  %v1890_v63 = vld [vmem:[%s2347_s1 + $0x3d8] sm:$0xff]  }
  0x3c   :  { %1650 = vmatpush3.bf16.msra.mxu0 %v1831_v0  ;;  %v1891_v0 = vld [vmem:[%s2347_s1 + $0x318] sm:$0xff]  }
  0x3d   :  { %1672 = vmatpush3.bf16.msra.mxu1 %v1832_v1  ;;  %1651 = vmatprep.subr.bf16.mxu0 %v1833_v2  ;;  %v1892_v1 = vld [vmem:[%s2347_s1 + $0x398] sm:$0xff]   ;;  %v1893_v2 = vld [vmem:[%s2347_s1 + $0x360] sm:$0xff]  }
  0x3e   :  { %1673 = vmatprep.subr.bf16.mxu1 %v1834_v3  ;;  %v1894_v3 = vld [vmem:[%s2347_s1 + $0x3e0] sm:$0xff]  }
  0x40   :  { %1652 = vmatpush3.bf16.msra.mxu0 %v1835_v4  ;;  %v1895_v4 = vld [vmem:[%s2347_s1 + $0x320] sm:$0xff]  }
  0x41   :  { %1674 = vmatpush3.bf16.msra.mxu1 %v1836_v5  ;;  %1681 = vmatprep.subr.bf16.mxu0 %v1841_v12  ;;  %v1896_v5 = vld [vmem:[%s2347_s1 + $0x3a0] sm:$0xff]   ;;  %v1903_v12 = vld [vmem:[%s2347_s1 + $0x330] sm:$0xff]  }
  0x42   :  { %1703 = vmatprep.subr.bf16.mxu1 %v1842_v13  ;;  %v1904_v13 = vld [vmem:[%s2347_s1 + $0x3b0] sm:$0xff]  }
  0x43   :  { %1222 = vmatmul.mubr.bf16.vlgmr.msra.gmra.mrb[4].mxu0 %v1452_v7  ;;  %v1898_v7 = vld [vmem:[%s2347_s1 + $0x3e8] sm:$0xff]  }
  0x44   :  { %1262 = vmatmul.mubr.bf16.vlgmr.msra.gmra.mrb[4].mxu1 %v1454_v10  ;;  %1682 = vmatpush3.bf16.msra.mxu0 %v1843_v14  ;;  %v1901_v10 = vld [vmem:[%s2347_s1 + $0x370] sm:$0xff]   ;;  %v1905_v14 = vld [vmem:[%s2347_s1 + $0x378] sm:$0xff]  }
  0x45   :  { %1704 = vmatpush3.bf16.msra.mxu1 %v1844_v15  ;;  %1683 = vmatprep.subr.bf16.mxu0 %v1845_v16  ;;  %v1906_v15 = vld [vmem:[%s2347_s1 + $0x3f8] sm:$0xff]  }
  0x46   :  { %1705 = vmatprep.subr.bf16.mxu1 %v1846_v17  ;;  %1301 = vmatprep.mubr.bf16.mxu0 %v1457_v47  ;;  %v1907_v16 = vld [vmem:[%s2347_s1 + $0x338] sm:$0xff]  }
  0x47   :  { %1341 = vmatprep.mubr.bf16.mxu1 %v1459_v49  ;;  %v1908_v17 = vld [vmem:[%s2347_s1 + $0x3b8] sm:$0xff]  }
  0x48   :  { %1684 = vmatpush3.bf16.msra.mxu0 %v1847_v18  ;;  %v26_v18 = vld [vmem:[%s2348_s0 + $0x30] sm:$0xff] }
  0x49   :  { %1706 = vmatpush3.bf16.msra.mxu1 %v1848_v19  ;;  %1685 = vmatprep.subr.bf16.mxu0 %v1849_v20  ;;  %v27_v19 = vld [vmem:[%s2348_s0 + $0x38] sm:$0xff]  ;;  %v1460_v20 = vcombine.low %v26_v18, %v26_v18 }
  0x4a   :  { %1707 = vmatprep.subr.bf16.mxu1 %v1850_v21  ;;  %v1461_v21 = vcombine.high %v26_v18, %v26_v18 }
  0x4c   :  { %1686 = vmatpush3.bf16.msra.mxu0 %v1851_v22  ;;  %v1462_v22 = vcombine.low %v27_v19, %v27_v19 }
  0x4d   :  { %1708 = vmatpush3.bf16.msra.mxu1 %v1852_v23  ;;  %1687 = vmatprep.subr.bf16.mxu0 %v1853_v24  ;;  %v1463_v23 = vcombine.high %v27_v19, %v27_v19 }
  0x4e   :  { %1709 = vmatprep.subr.bf16.mxu1 %v1854_v25 }
  0x50   :  { %1688 = vmatpush3.bf16.msra.mxu0 %v1855_v26 }
  0x51   :  { %1710 = vmatpush3.bf16.msra.mxu1 %v1856_v27  ;;  %1689 = vmatprep.subr.bf16.mxu0 %v1857_v28 }
  0x52   :  { %1711 = vmatprep.subr.bf16.mxu1 %v1858_v29 }
  0x54   :  { %1690 = vmatpush3.bf16.msra.mxu0 %v1859_v30 }
  0x55   :  { %1712 = vmatpush3.bf16.msra.mxu1 %v1860_v31  ;;  %1691 = vmatprep.subr.bf16.mxu0 %v1861_v32 }
  0x56   :  { %1713 = vmatprep.subr.bf16.mxu1 %v1862_v33 }
  0x58   :  { %1692 = vmatpush3.bf16.msra.mxu0 %v1863_v34 }
  0x59   :  { %1714 = vmatpush3.bf16.msra.mxu1 %v1864_v35  ;;  %1693 = vmatprep.subr.bf16.mxu0 %v1865_v36 }
  0x5a   :  { %1715 = vmatprep.subr.bf16.mxu1 %v1866_v37 }
  0x5c   :  { %1694 = vmatpush3.bf16.msra.mxu0 %v1867_v38 }
  0x5d   :  { %1716 = vmatpush3.bf16.msra.mxu1 %v1868_v39  ;;  %1695 = vmatprep.subr.bf16.mxu0 %v1869_v40 }
  0x5e   :  { %1717 = vmatprep.subr.bf16.mxu1 %v1870_v41 }
  0x60   :  { %1696 = vmatpush3.bf16.msra.mxu0 %v1871_v42 }
  0x61   :  { %1718 = vmatpush3.bf16.msra.mxu1 %v1872_v43  ;;  %1725 = vmatprep.subr.bf16.mxu0 %v1877_v50 }
  0x62   :  { %1747 = vmatprep.subr.bf16.mxu1 %v1878_v51 }
  0x63   :  { %1302 = vmatmul.mubr.bf16.vlgmr.msra.gmra.mrb[8].mxu0 %v1456_v46 }
  0x64   :  { %1342 = vmatmul.mubr.bf16.vlgmr.msra.gmra.mrb[8].mxu1 %v1458_v48  ;;  %1726 = vmatpush3.bf16.msra.mxu0 %v1879_v52 }
  0x65   :  { %1748 = vmatpush3.bf16.msra.mxu1 %v1880_v53  ;;  %1727 = vmatprep.subr.bf16.mxu0 %v1881_v54 }
  0x66   :  { %1749 = vmatprep.subr.bf16.mxu1 %v1882_v55  ;;  %1381 = vmatprep.mubr.bf16.mxu0 %v1461_v21 }
  0x67   :  { %1421 = vmatprep.mubr.bf16.mxu1 %v1463_v23 }
  0x68   :  { %1728 = vmatpush3.bf16.msra.mxu0 %v1883_v56 }
  0x69   :  { %1750 = vmatpush3.bf16.msra.mxu1 %v1884_v57  ;;  %1729 = vmatprep.subr.bf16.mxu0 %v1885_v58 }
  0x6a   :  { %1751 = vmatprep.subr.bf16.mxu1 %v1886_v59 }
  0x6c   :  { %1730 = vmatpush3.bf16.msra.mxu0 %v1887_v60 }
  0x6d   :  { %1752 = vmatpush3.bf16.msra.mxu1 %v1888_v61  ;;  %1731 = vmatprep.subr.bf16.mxu0 %v1889_v62 }
  0x6e   :  { %1753 = vmatprep.subr.bf16.mxu1 %v1890_v63 }
  0x70   :  { %1732 = vmatpush3.bf16.msra.mxu0 %v1891_v0 }
  0x71   :  { %1754 = vmatpush3.bf16.msra.mxu1 %v1892_v1  ;;  %1733 = vmatprep.subr.bf16.mxu0 %v1893_v2 }
  0x72   :  { %1755 = vmatprep.subr.bf16.mxu1 %v1894_v3 }
  0x74   :  { %1734 = vmatpush3.bf16.msra.mxu0 %v1895_v4 }
  0x75   :  { %1756 = vmatpush3.bf16.msra.mxu1 %v1896_v5  ;;  %1735 = vmatprep.subr.bf16.mxu0 %v1897_v6  ;;  %v1592_v6 = vld [vmem:[%s2349_s2] ss:$0 sm:$0xff] }
  0x76   :  { %1757 = vmatprep.subr.bf16.mxu1 %v1898_v7 }
  0x78   :  { %1736 = vmatpush3.bf16.msra.mxu0 %v1899_v8 }
  0x79   :  { %1758 = vmatpush3.bf16.msra.mxu1 %v1900_v9  ;;  %1737 = vmatprep.subr.bf16.mxu0 %v1901_v10 }
  0x7a   :  { %1759 = vmatprep.subr.bf16.mxu1 %v1902_v11 }
  0x7c   :  { %1738 = vmatpush3.bf16.msra.mxu0 %v1903_v12 }
  0x7d   :  { %1760 = vmatpush3.bf16.msra.mxu1 %v1904_v13  ;;  %1739 = vmatprep.subr.bf16.mxu0 %v1905_v14 }
  0x7e   :  { %1761 = vmatprep.subr.bf16.mxu1 %v1906_v15 }
  0x80   :  { %1740 = vmatpush3.bf16.msra.mxu0 %v1907_v16 }
  0x81   :  { %1762 = vmatpush3.bf16.msra.mxu1 %v1908_v17 }
  0x83   :  { %1382 = vmatmul.mubr.bf16.vlgmr.msra.gmra.mrb[12].mxu0 %v1460_v20 }
  0x84   :  { %1422 = vmatmul.mubr.bf16.vlgmr.msra.gmra.mrb[12].mxu1 %v1462_v22 }
  0xf6   :  { %v1609_v24 = vpop.f32.mrb[0].mxu0 }
  0xf7   :  { %v1631_v25 = vpop.f32.mrb[0].mxu1  ;;  %v1610_v26 = vpop.f32.mrb[1].mxu0 }
  0xf8   :  { %v1632_v27 = vpop.f32.mrb[1].mxu1  ;;  %v1611_v28 = vadd.f32 %v1610_v26, %v1609_v24  ;;  %v1612_v30 = vpop.f32.mrb[2].mxu0 }
  0xf9   :  { %v1633_v29 = vadd.f32 %v1632_v27, %v1631_v25  ;;  %v1634_v31 = vpop.f32.mrb[2].mxu1  ;;  %v1613_v32 = vpop.f32.mrb[3].mxu0 }
  0xfa   :  { %v1635_v33 = vpop.f32.mrb[3].mxu1 }
  0xfb   :  { %v1184_v34 = vadd.f32 %v1633_v29, %v1611_v28 }
 0x116   :  { %v1653_v35 = vpop.f32.mrb[4].mxu0 }
 0x117   :  { %v1675_v36 = vpop.f32.mrb[4].mxu1  ;;  %v1654_v37 = vpop.f32.mrb[5].mxu0 }
 0x118   :  { %v1676_v38 = vpop.f32.mrb[5].mxu1  ;;  %v1655_v39 = vadd.f32 %v1654_v37, %v1653_v35  ;;  %v1656_v41 = vpop.f32.mrb[6].mxu0 }
 0x119   :  { %v1677_v40 = vadd.f32 %v1676_v38, %v1675_v36  ;;  %v1678_v42 = vpop.f32.mrb[6].mxu1  ;;  %v1657_v43 = vpop.f32.mrb[7].mxu0 }
 0x11a   :  { %v1679_v44 = vpop.f32.mrb[7].mxu1  ;;  %v1224_v45 = vadd.f32 %v1655_v39, %v1184_v34 }
 0x11c   :  { %v1264_v46 = vadd.f32 %v1677_v40, %v1224_v45 }
 0x136   :  { %v1697_v47 = vpop.f32.mrb[8].mxu0 }
 0x137   :  { %v1719_v48 = vpop.f32.mrb[8].mxu1  ;;  %v1698_v49 = vpop.f32.mrb[9].mxu0 }
 0x138   :  { %v1699_v50 = vadd.f32 %v1698_v49, %v1697_v47  ;;  %v1720_v51 = vpop.f32.mrb[9].mxu1  ;;  %v1700_v52 = vpop.f32.mrb[10].mxu0 }
 0x139   :  { %v1721_v53 = vadd.f32 %v1720_v51, %v1719_v48  ;;  %v1722_v54 = vpop.f32.mrb[10].mxu1  ;;  %v1701_v55 = vpop.f32.mrb[11].mxu0 }
 0x13a   :  { %v1304_v56 = vadd.f32 %v1699_v50, %v1264_v46  ;;  %v1723_v57 = vpop.f32.mrb[11].mxu1 }
 0x13c   :  { %v1344_v58 = vadd.f32 %v1721_v53, %v1304_v56 }
 0x156   :  { %v1741_v59 = vpop.f32.mrb[12].mxu0 }
 0x157   :  { %v1763_v60 = vpop.f32.mrb[12].mxu1  ;;  %v1742_v61 = vpop.f32.mrb[13].mxu0 }
 0x158   :  { %v1743_v62 = vadd.f32 %v1742_v61, %v1741_v59  ;;  %v1764_v63 = vpop.f32.mrb[13].mxu1  ;;  %v1744_v0 = vpop.f32.mrb[14].mxu0 }
 0x159   :  { %v1765_v1 = vadd.f32 %v1764_v63, %v1763_v60  ;;  %v1766_v2 = vpop.f32.mrb[14].mxu1  ;;  %v1745_v3 = vpop.f32.mrb[15].mxu0 }
 0x15a   :  { %v1384_v4 = vadd.f32 %v1743_v62, %v1344_v58  ;;  %v1767_v5 = vpop.f32.mrb[15].mxu1 }
 0x15c   :  { %v1424_v7 = vadd.f32 %v1765_v1, %v1384_v4 }
 0x15e   :  { %v1442_v8 = vadd.f32 %v1592_v6, %v1424_v7 }
 0x160   :  { %1443 = vst [vmem:[%s2350_s3] sm:$0xff] %v1442_v8 }

</bundles_post_ra>
